<compile_context>
chip_gen: v5e
topology: v5e:2x2
jax: 0.10.0
libtpu: 0.0.40
codegen_flags: <defaults>
</compile_context>

<pallas_src>
import functools
import math

import numpy as np
import jax
import jax.numpy as jnp
from jax.experimental import pallas as pl
from jax.experimental.pallas import tpu as pltpu


# ----------------------------------------------------------------------------
# Helpers mirroring the PyTorch module (pure-python glue)
# ----------------------------------------------------------------------------
def to_list(x, n):
    if isinstance(x, (list, tuple)):
        assert len(x) == n, (x, n)
        return list(x)
    return [x] * n


def to_pair(x):
    return tuple(to_list(x, 2))


def compute_pad_size(kernel_size, dilation, stride, pad_type):
    ks = 1 + dilation * (kernel_size - 1)
    if pad_type is None:
        return (0, 0)
    if pad_type == 'front':
        return (max(ks - stride, 0), min(stride - 1, ks - 1))
    if pad_type == 'both':
        return (max(ks - stride, 0) // 2,
                min(stride - 1, ks - 1) + math.ceil(max(ks - stride, 0) / 2))
    if pad_type == 'end':
        return (0, ks - 1)
    raise ValueError(pad_type)


def _compute_transpose_out_size(in_size, kernel_size, dilation, stride, pad_type):
    stride = kernel_size if stride is None else stride
    out_size = 1 + (in_size - 1) * stride + dilation * (kernel_size - 1)
    front_pad, end_pad = compute_pad_size(kernel_size, dilation, stride, pad_type)
    end_pad = max(end_pad - stride + 1, 0)
    return out_size.astype(np.int64) - front_pad - end_pad


def _trim(x, sizes, side):
    """Plain-JAX equivalent of padertorch Trim (static slicing = glue).

    For the supported non-overlapping unpool (pool_size == stride) the trim
    sizes are always zero, so this never runs on the hot path.
    """
    slc = [slice(None)] * x.ndim
    for i, size in enumerate(sizes):
        size = int(size)
        idx = 2 + i
        if size < 1:
            continue
        if side == 'front':
            slc[idx] = slice(size, x.shape[idx])
        elif side == 'both':
            slc[idx] = slice(size // 2, x.shape[idx] - math.ceil(size / 2))
        elif side == 'end':
            slc[idx] = slice(0, x.shape[idx] - size)
        else:
            raise ValueError(side)
    return x[tuple(slc)]


# ----------------------------------------------------------------------------
# Block / fold selection (VMEM-budgeted, lane-dense, megacore-friendly)
# ----------------------------------------------------------------------------
_TARGET_BLOCK_BYTES = 8 * 1024 * 1024   # per-step block data (in [+ idx] + out)
_VMEM_LIMIT_BYTES = 32 * 1024 * 1024    # safe on v5e/v6e (128 MiB) and v7x (64 MiB)


def _is_pow2(n):
    return n > 0 and (n & (n - 1)) == 0


def _choose_fold(n_rows, out_lanes_per_row):
    """Fold f consecutive input rows into the lane dim so the output lane
    width becomes a multiple of 128 (full-vreg, unmasked stores)."""
    if out_lanes_per_row % 128 == 0 or out_lanes_per_row >= 512:
        return 1
    f, best = 1, 1
    while f < 64:
        f *= 2
        if n_rows % f != 0:
            break
        best = f
        if (f * out_lanes_per_row) % 128 == 0:
            return f
    return best


def _choose_block_rows(n_rows, per_row_bytes):
    """Rows per grid step: multiple of 8, sized from a VMEM budget that keeps
    double-buffered pipelining safe on every generation; ragged tails are
    handled by the cdiv grid. When there is enough work, shrink toward a grid
    of >= 8 steps (v7x megacore balance) but never below ~512-row blocks."""
    max_rows = max(8, (_TARGET_BLOCK_BYTES // max(per_row_bytes, 1)) // 8 * 8)
    R = min(max_rows, -(-n_rows // 8) * 8)
    while R > 512 and -(-n_rows // R) < 8:
        R = max(512, (R // 2) // 8 * 8)
    return max(8, R)


# ----------------------------------------------------------------------------
# In-kernel lane-dimension upsampling (no sublane interleave)
# ----------------------------------------------------------------------------
def _upsample_lanes(x, f, W, sh, sw):
    """(R, f*W) -> (R, f*sh*W*sw).

    Each of the f W-wide lane segments (one input row each) is width-upsampled
    by sw and then tiled sh times contiguously in lanes. All data movement is
    lane-only: one minor-dim broadcast+merge plus static lane slices/concat.
    """
    R = x.shape[0]
    Wo = W * sw
    if sw > 1:
        x = jnp.broadcast_to(x[:, :, None], (R, f * W, sw)).reshape(R, f * Wo)
    if sh == 1:
        return x
    if f == 1:
        return jnp.concatenate([x] * sh, axis=-1)
    segs = []
    for g in range(f):
        seg = x[:, g * Wo:(g + 1) * Wo]
        segs.extend([seg] * sh)
    return jnp.concatenate(segs, axis=-1)


def _decode_window_code(idx, Wo, sh, sw):
    """Within-window argmax offset code a*sw + b from the per-(n, c) flat
    pooling index: idx = (h*sh + a)*Wo + (w*sw + b). Shift/and when possible
    (no hardware integer divide on TPU)."""
    if _is_pow2(Wo) and _is_pow2(sh):
        a = (idx >> (Wo.bit_length() - 1)) & (sh - 1)
    else:
        a = (idx // Wo) % sh
    if _is_pow2(sw):
        b = idx & (sw - 1)
    else:
        b = idx % sw
    return a * sw + b


def _slot_codes(n_lanes, Wo, sh, sw):
    """(1, n_lanes) int32 row holding each output lane's slot code a*sw + b in
    the folded lane layout (pattern repeats every sh*Wo lanes). Built once per
    grid step on a single vreg row and broadcast against the block."""
    j = jax.lax.broadcasted_iota(jnp.int32, (1, n_lanes), 1)
    seg = sh * Wo
    if _is_pow2(seg) and _is_pow2(Wo):
        a = (j & (seg - 1)) >> (Wo.bit_length() - 1)
    else:
        a = (j % seg) // Wo
    if _is_pow2(sw):
        b = j & (sw - 1)
    else:
        b = j % sw
    return a * sw + b


# ----------------------------------------------------------------------------
# Pallas kernels
# ----------------------------------------------------------------------------
def _interp_kernel(x_ref, o_ref, *, f, W, sh, sw):
    # x_ref: (R, f*W)  ->  o_ref: (R, f*sh*W*sw)
    o_ref[...] = _upsample_lanes(x_ref[...], f, W, sh, sw)


def _max_unpool_kernel(x_ref, idx_ref, o_ref, *, f, W, sh, sw):
    # x_ref/idx_ref: (R, f*W)  ->  o_ref: (R, f*sh*W*sw)
    Wo = W * sw
    code = _decode_window_code(idx_ref[...], Wo, sh, sw)   # (R, f*W), in [0, sh*sw)
    xu = _upsample_lanes(x_ref[...], f, W, sh, sw)         # pooled value per slot
    cu = _upsample_lanes(code, f, W, sh, sw)               # argmax code per slot
    slot = _slot_codes(f * sh * Wo, Wo, sh, sw)            # (1, lanes) slot code
    o_ref[...] = jnp.where(cu == slot, xu, jnp.zeros_like(xu))


# ----------------------------------------------------------------------------
# Wrappers
# ----------------------------------------------------------------------------
def _compiler_params():
    return pltpu.CompilerParams(
        dimension_semantics=("parallel",),
        vmem_limit_bytes=_VMEM_LIMIT_BYTES,
    )


def _upsample_nearest(x, stride):
    B, C, H, W = x.shape
    sh, sw = int(stride[0]), int(stride[1])
    if sh == 1 and sw == 1:
        return x
    n_rows = B * C * H
    out_lanes = sh * W * sw
    f = _choose_fold(n_rows, out_lanes)
    rows = n_rows // f
    x2 = x.reshape(rows, f * W)                           # free metadata reshape
    itemsize = x.dtype.itemsize
    per_row = f * W * itemsize + f * out_lanes * itemsize
    R = _choose_block_rows(rows, per_row)
    grid = (pl.cdiv(rows, R),)
    out = pl.pallas_call(
        functools.partial(_interp_kernel, f=f, W=W, sh=sh, sw=sw),
        out_shape=jax.ShapeDtypeStruct((rows, f * out_lanes), x.dtype),
        grid=grid,
        in_specs=[pl.BlockSpec((R, f * W), lambda i: (i, 0))],
        out_specs=pl.BlockSpec((R, f * out_lanes), lambda i: (i, 0)),
        compiler_params=_compiler_params(),
        cost_estimate=pl.CostEstimate(
            flops=int(rows * f * out_lanes),
            transcendentals=0,
            bytes_accessed=int(rows * per_row)),
    )(x2)
    # (rows, f*sh*Wo) -> (B, C, H*sh, W*sw) is a free row-major reshape.
    return out.reshape(B, C, H * sh, W * sw)


def _max_unpool(x, indices, stride):
    B, C, H, W = x.shape
    sh, sw = int(stride[0]), int(stride[1])
    # PyTorch pooling indices are flat per (n, c) over (H*sh, W*sw); the int32
    # cast below is safe only under this per-image-flat convention (guarded by
    # the assert) -- a future global/NHWC index variant must revisit it.
    assert H * sh * W * sw < 2 ** 31, "flat pooling indices must fit in int32"
    n_rows = B * C * H
    out_lanes = sh * W * sw
    f = _choose_fold(n_rows, out_lanes)
    rows = n_rows // f
    x2 = x.reshape(rows, f * W)
    idx2 = indices.astype(jnp.int32).reshape(rows, f * W)
    itemsize = x.dtype.itemsize
    per_row = f * W * (itemsize + 4) + f * out_lanes * itemsize
    R = _choose_block_rows(rows, per_row)
    grid = (pl.cdiv(rows, R),)
    out = pl.pallas_call(
        functools.partial(_max_unpool_kernel, f=f, W=W, sh=sh, sw=sw),
        out_shape=jax.ShapeDtypeStruct((rows, f * out_lanes), x.dtype),
        grid=grid,
        in_specs=[pl.BlockSpec((R, f * W), lambda i: (i, 0)),
                  pl.BlockSpec((R, f * W), lambda i: (i, 0))],
        out_specs=pl.BlockSpec((R, f * out_lanes), lambda i: (i, 0)),
        compiler_params=_compiler_params(),
        cost_estimate=pl.CostEstimate(
            flops=int(6 * rows * f * out_lanes),
            transcendentals=0,
            bytes_accessed=int(rows * per_row)),
    )(x2, idx2)
    return out.reshape(B, C, H * sh, W * sw)


# ----------------------------------------------------------------------------
# Module equivalent
# ----------------------------------------------------------------------------
class Unpool2d:
    """2d MaxUnpooling if indices are provided else nearest upsampling."""

    def __init__(self, pool_size, stride=None, pad_type=None):
        self.pool_size = to_pair(pool_size)
        self.stride = self.pool_size if stride is None else to_pair(stride)
        self.pad_type = to_pair(pad_type)

    def __call__(self, x, sequence_lengths=None, indices=None):
        if all(np.array(self.pool_size) < 2):
            return x, sequence_lengths
        if indices is None:
            x = _upsample_nearest(x, self.stride)
        else:
            # TODO(synk): overlapping MaxUnpool (pool_size > stride) would need
            # a scatter over candidate windows; module default is pool == stride.
            assert tuple(self.pool_size) == tuple(self.stride), (
                "MaxUnpool path implemented for non-overlapping windows only")
            x = _max_unpool(x, indices, self.stride)
            front_pad, end_pad = list(zip(*[
                compute_pad_size(k, 1, s, t)
                for k, s, t in zip(self.pool_size, self.stride, self.pad_type)]))
            end_pad = np.maximum(np.array(end_pad) - np.array(self.stride) + 1, 0)
            # For pool_size == stride both pads are provably zero, so these
            # slices never execute (no extra HBM pass).
            if any(np.array(front_pad) > 0):
                x = _trim(x, front_pad, side='front')
            if any(np.array(end_pad) > 0):
                x = _trim(x, end_pad, side='end')
        if sequence_lengths is not None:
            sequence_lengths = _compute_transpose_out_size(
                np.asarray(sequence_lengths), self.pool_size[-1], 1,
                self.stride[-1], self.pad_type[-1])
        return x, sequence_lengths


# ----------------------------------------------------------------------------
# Demo / self-check
# ----------------------------------------------------------------------------
if __name__ == "__main__":
    key = jax.random.PRNGKey(0)
    k1, k2 = jax.random.split(key)

    B, C, H, W = 2, 4, 16, 16
    pool = 2
    seq_lens = np.array([16, 12])

    module = Unpool2d(pool)   # pool_size = stride = (2, 2), pad_type None

    # ---- path 1: indices=None -> nearest upsampling -------------------------
    x = jax.random.normal(k1, (B, C, H, W), dtype=jnp.float32)
    out1, sl1 = module(x, sequence_lengths=seq_lens)
    out1 = jax.block_until_ready(out1)
    ref1 = jnp.repeat(jnp.repeat(x, 2, axis=2), 2, axis=3)
    assert out1.shape == (B, C, H * 2, W * 2), out1.shape
    assert jnp.allclose(out1, ref1), "nearest upsample mismatch"
    assert np.array_equal(np.asarray(sl1), 2 * seq_lens), sl1

    # ---- path 2: indices given -> MaxUnpool2d --------------------------------
    # Build pooled values + flat indices from a deterministic 2x2 max-pool.
    x_big = jax.random.normal(k2, (B, C, H * 2, W * 2), dtype=jnp.float32)
    ph, pw = 2, 2
    Hb, Wb = H * 2, W * 2
    xr = x_big.reshape(B, C, Hb // ph, ph, Wb // pw, pw)
    xr = xr.transpose(0, 1, 2, 4, 3, 5).reshape(B, C, Hb // ph, Wb // pw, ph * pw)
    pooled = xr.max(axis=-1)
    local = jnp.argmax(xr, axis=-1).astype(jnp.int32)
    a = local // pw
    b2 = local % pw
    h_base = (jnp.arange(Hb // ph) * ph)[None, None, :, None]
    w_base = (jnp.arange(Wb // pw) * pw)[None, None, None, :]
    indices = ((h_base + a) * Wb + (w_base + b2)).astype(jnp.int32)

    out2, sl2 = module(pooled, sequence_lengths=seq_lens, indices=indices)
    out2 = jax.block_until_ready(out2)
    assert out2.shape == (B, C, Hb, Wb), out2.shape

    # reference: scatter pooled values at flat indices (windows don't overlap)
    ref2 = jnp.zeros((B * C, Hb * Wb), dtype=jnp.float32)
    ref2 = ref2.at[jnp.arange(B * C)[:, None],
                   indices.reshape(B * C, -1)].set(pooled.reshape(B * C, -1))
    ref2 = ref2.reshape(B, C, Hb, Wb)
    assert jnp.allclose(out2, ref2), "max-unpool mismatch"
    assert np.array_equal(np.asarray(sl2), 2 * seq_lens), sl2

    print("KERNEL_OK")
</pallas_src>

<mosaic_0001>
module attributes {stable_mosaic.version = 11 : i64} {
  func.func @_interp_kernel(%arg0: i32, %arg1: memref<64x32xf32, #tpu.memory_space<vmem>>, %arg2: memref<64x128xf32, #tpu.memory_space<vmem>>) attributes {dimension_semantics = [#tpu.dimension_semantics<parallel>], iteration_bounds = array<i64: 1>, scalar_prefetch = 0 : i64, scratch_operands = 0 : i64, tpu.core_type = #tpu.core_type<tc>, window_params = [{transform_indices = @transform_0, window_bounds = array<i64: 64, 32>}, {transform_indices = @transform_1, window_bounds = array<i64: 64, 128>}]} {
    %c0 = arith.constant 0 : index
    %c0_0 = arith.constant 0 : index
    %0 = vector.load %arg1[%c0, %c0_0] : memref<64x32xf32, #tpu.memory_space<vmem>>, vector<64x32xf32>
    %1 = vector.shape_cast %0 : vector<64x32xf32> to vector<64x32x1xf32>
    %2 = vector.shape_cast %1 : vector<64x32x1xf32> to vector<64x32x1xf32>
    %3 = vector.broadcast %2 : vector<64x32x1xf32> to vector<64x32x2xf32>
    %4 = vector.shape_cast %3 : vector<64x32x2xf32> to vector<64x64xf32>
    %5 = vector.extract_strided_slice %4 {offsets = [0, 0], sizes = [64, 32], strides = [1, 1]} : vector<64x64xf32> to vector<64x32xf32>
    %6 = vector.extract_strided_slice %4 {offsets = [0, 32], sizes = [64, 32], strides = [1, 1]} : vector<64x64xf32> to vector<64x32xf32>
    %7 = tpu.concatenate %5, %5, %6, %6 in 1 : vector<64x32xf32>, vector<64x32xf32>, vector<64x32xf32>, vector<64x32xf32> -> vector<64x128xf32>
    %c0_1 = arith.constant 0 : index
    %c0_2 = arith.constant 0 : index
    %8 = vector.load %arg2[%c0_1, %c0_2] : memref<64x128xf32, #tpu.memory_space<vmem>>, vector<64x128xf32>
    tpu.vector_store %arg2[%c0_1, %c0_2], %7 {strides = array<i32>} : memref<64x128xf32, #tpu.memory_space<vmem>>, vector<64x128xf32>,
    return
  }
  func.func @transform_0(%arg0: i32) -> (i32, i32) {
    %c0_i32 = arith.constant 0 : i32
    %c0_i32_0 = arith.constant 0 : i32
    return %arg0, %c0_i32 : i32, i32
  }
  func.func @transform_1(%arg0: i32) -> (i32, i32) {
    %c0_i32 = arith.constant 0 : i32
    %c0_i32_0 = arith.constant 0 : i32
    return %arg0, %c0_i32 : i32, i32
  }
}

</mosaic_0001>

<bundles_post_ra>
// kernel: tpu_custom_call.1
= control target key start
LH: loop header
LB: loop body
LE: loop exit
PB: predicated region body
PF: predicated region fallthrough
CT: control target
= control target key end

     0   :  { %v18_v0 = vlaneseq  ;;  %s12079_s0 = inlined_call_operand.vmem [shape: f32[64,32], index: 0, kind: input, shape index: {}]   ;;  %s12080_s1 = inlined_call_operand.hbm [shape: f32[64,128], index: 1, kind: output, shape index: {}]  }
   0x1   :  { %6 = vsyncpa [#allocation3], 0  ;;  %v6916_v3 = vld [vmem:[%s12079_s0] sm:$0xff]  ;;  %v6932_v7 = vld [vmem:[%s12079_s0 + $0x8] sm:$0xff]  ;;  %v6861_v58 = vmov 1983009808  }
   0x2   :  { %v6907_v1 = vshrl.u32 %v18_v0, 7  ;;  %v42_v4 = vperm.slane %v6916_v3, 1  ;;  %v6922_v5 = vperm.slane %v6916_v3, 4  ;;  %v6925_v6 = vperm.slane %v6916_v3, 0  ;;  %v6954_v12 = vld [vmem:[%s12079_s0 + $0x10] sm:$0xff]  ;;  %v6965_v14 = vld [vmem:[%s12079_s0 + $0x18] sm:$0xff] }
   0x3   :  { %v6938_v9 = vperm.slane %v6932_v7, 1  ;;  %v6947_v11 = vperm.slane %v6932_v7, 6  ;;  %v6957_v13 = vperm.slane %v6954_v12, 3  ;;  %v6968_v15 = vperm.slane %v6965_v14, 0  ;;  %v6980_v17 = vld [vmem:[%s12079_s0 + $0x20] sm:$0xff]  ;;  %v7000_v21 = vld [vmem:[%s12079_s0 + $0x28] sm:$0xff] }
   0x4   :  { %6617 = vset.pattern.permute.xlu2 %v6907_v1  ;;  %v6911_v2 = vadd.s32 16, %v6907_v1  ;;  %v6935_v8 = vadd.s32 8, %v6907_v1  ;;  %v6941_v10 = vadd.s32 24, %v6907_v1  ;;  %v6972_v16 = vperm.slane %v6965_v14, 5  ;;  %v7014_v24 = vld [vmem:[%s12079_s0 + $0x30] sm:$0xff]  ;;  %v7031_v27 = vld [vmem:[%s12079_s0 + $0x38] sm:$0xff] }
   0x5   :  { %12379 = vst [vmem:[#allocation5_spill] sm:$0xff] %v6968_v15  ;;  %v6983_v18 = vperm.slane %v6916_v3, 2  ;;  %v6986_v19 = vperm.slane %v6980_v17, 2  ;;  %v6992_v20 = vperm.slane %v6980_v17, 7  ;;  %v7003_v22 = vperm.slane %v6916_v3, 3  ;;  %s6863_s5 = smov 2  }
   0x6   :  { %6631 = vset.pattern.permute.xlu0 %v6911_v2  ;;  %6618 = vset.pattern.permute.xlu1 %v6911_v2  ;;  %12380 = vst [vmem:[#allocation6_spill] sm:$0xff] %v6972_v16  ;;  %v7006_v23 = vperm.slane %v7000_v21, 4  ;;  %v7017_v25 = vperm.slane %v7014_v24, 1  ;;  %v7023_v26 = vperm.slane %v7014_v24, 6  ;;  %v7034_v28 = vperm.slane %v7031_v27, 3  ;;  %s6864_s10 = smov 4  }
   0x7   :  { %12381 = vst [vmem:[#allocation7_spill] sm:$0xff] %v6986_v19  ;;  %v142_v29 = vperm.slane %v6916_v3, 5  ;;  %v7046_v30 = vperm.slane %v6932_v7, 2  ;;  %v7053_v32 = vperm.slane %v6932_v7, 7  ;;  %v7061_v34 = vperm.slane %v6954_v12, 4  ;;  %s6866_s13 = smov 8  }
   0x8   :  { %12382 = vst [vmem:[#allocation8_spill] sm:$0xff] %v6992_v20  ;;  %v7067_v36 = vperm.slane %v6965_v14, 1  ;;  %v167_v38 = vperm.slane %v6916_v3, 6  ;;  %v7080_v41 = vperm.slane %v6965_v14, 6  ;;  %v7088_v44 = vperm.slane %v6980_v17, 3  ;;  %s6867_s14 = smov 10  }
   0x9   :  { %12383 = vst [vmem:[#allocation9_spill] sm:$0xff] %v7006_v23  ;;  %v7100_v48 = vperm.slane %v7000_v21, 0  ;;  %v7110_v52 = vperm.slane %v7000_v21, 5  ;;  %v192_v55 = vperm.slane %v6916_v3, 7  ;;  %v7123_v57 = vperm.slane %v7014_v24, 2  ;;  %s6868_s15 = smov 12  }
   0xa   :  { %12384 = vst [vmem:[#allocation10_spill] sm:$0xff] %v7017_v25  ;;  %v1623_v59 = vunpack.c.l.s4 %v6861_v58  ;;  %vm12378_vm0 = vcmask 1047556   ;;  %s6869_s16 = smov 14   ;;  %s6870_s17 = smov 16   ;;  %vm6194_vm1 = vcmask 15360   ;;  %vm6203_vm2 = vcmask 31744  }
   0xb   :  { %12385 = vst [vmem:[#allocation11_spill] sm:$0xff] %v7023_v26  ;;  %s6871_s18 = smov 18   ;;  %s6872_s19 = smov 20   ;;  %vm6212_vm3 = vcmask 48128   ;;  %vm6221_vm4 = vcmask 64512   ;;  %vm6230_vm5 = vcmask 80896  }
   0xc   :  { %47 = vperm.xlu2 %6617, %v42_v4   ;;  %12386 = vst [vmem:[#allocation12_spill] sm:$0xff] %v7034_v28  ;;  %v7130_v63 = vunpack.c.0.s8 %v1623_v59  ;;  %s6873_s20 = smov 22   ;;  %s6874_s21 = smov 24   ;;  %vm6239_vm6 = vcmask 97280   ;;  %vm6248_vm7 = vcmask 113664   ;;  %vm6257_vm8 = vcmask 130048  }
   0xd   :  { %12387 = vst [vmem:[#allocation13_spill] sm:$0xff] %v7067_v36  ;;  %s6875_s22 = smov 26   ;;  %s6876_s23 = smov 28   ;;  %vm6266_vm9 = vcmask 146432   ;;  %vm6275_vm10 = vcmask 162816   ;;  %vm6284_vm11 = vcmask 179200  }
   0xe   :  { %134 = vperm.xlu0 %6631, %v6922_v5   ;;  %34 = vperm.xlu1 %6618, %v6925_v6   ;;  %12389 = vst [vmem:[#allocation15_spill] sm:$0xff] %v7080_v41  ;;  %s6877_s24 = smov 30   ;;  %s6878_s25 = smov 32   ;;  %vm6293_vm12 = vcmask 195584   ;;  %vm6302_vm13 = vcmask 211968   ;;  %vm6311_vm14 = vcmask 228352  }
   0xf   :  { %12392 = vst [vmem:[#allocation18_spill] sm:$0xff] %v7088_v44  ;;  %s6879_s26 = smov 34   ;;  %s6880_s27 = smov 36   ;;  %vm6320_vm15 = vcmask 244736  }
  0x10   :  { %12394 = vst [vmem:[#allocation20_spill] sm:$0xff] %v7100_v48  ;;  %s6881_s28 = smov 38   ;;  %s6882_s29 = smov 40  }
  0x11   :  { %12396 = vst [vmem:[#allocation22_spill] sm:$0xff] %v7110_v52  ;;  %s6883_s30 = smov 42   ;;  %s6884_s2 = smov 44  }
  0x12   :  { %12399 = vst [vmem:[#allocation25_spill] sm:$0xff] %v7123_v57  ;;  %s6885_s3 = smov 46   ;;  %s6886_s4 = smov 48  }
  0x13   :  { %s6888_s6 = smov 52   ;;  %s6889_s7 = smov 54  }
  0x14   :  { %6620 = vset.pattern.permute.xlu2 %v6935_v8  ;;  %s6890_s8 = smov 56   ;;  %s6891_s9 = smov 58  }
  0x15   :  { %s6893_s11 = smov 62   ;;  %s6894_s12 = smov 64  }
  0x16   :  { %259 = vperm.xlu0 %6631, %v6938_v9   ;;  %6619 = vset.pattern.permute.xlu1 %v6941_v10 }
  0x1c   :  { %53 = vperm.xlu2 %6620, %v42_v4  }
  0x1e   :  { %384 = vperm.xlu0 %6631, %v6947_v11   ;;  %40 = vperm.xlu1 %6619, %v6925_v6  }
  0x24   :  { %6622 = vset.pattern.permute.xlu2 %v6941_v10 }
  0x26   :  { %509 = vperm.xlu0 %6631, %v6957_v13   ;;  %6621 = vset.pattern.permute.xlu1 %v6911_v2 }
  0x2c   :  { %65 = vperm.xlu2 %6622, %v42_v4  }
  0x2e   :  { %634 = vperm.xlu0 %6631, %v6968_v15   ;;  %59 = vperm.xlu1 %6621, %v42_v4  }
  0x34   :  { %6624 = vset.pattern.permute.xlu2 %v6911_v2 }
  0x36   :  { %759 = vperm.xlu0 %6631, %v6972_v16   ;;  %6623 = vset.pattern.permute.xlu1 %v6935_v8 }
  0x3c   :  { %84 = vperm.xlu2 %6624, %v6983_v18  }
  0x3e   :  { %884 = vperm.xlu0 %6631, %v6986_v19   ;;  %78 = vperm.xlu1 %6623, %v6983_v18  }
  0x44   :  { %6626 = vset.pattern.permute.xlu2 %v6907_v1 }
  0x46   :  { %1009 = vperm.xlu0 %6631, %v6992_v20   ;;  %6625 = vset.pattern.permute.xlu1 %v6941_v10 }
  0x4c   :  { %97 = vperm.xlu2 %6626, %v7003_v22  }
  0x4e   :  { %1134 = vperm.xlu0 %6631, %v7006_v23   ;;  %90 = vperm.xlu1 %6625, %v6983_v18  }
  0x54   :  { %6628 = vset.pattern.permute.xlu2 %v6941_v10 }
  0x56   :  { %1259 = vperm.xlu0 %6631, %v7017_v25   ;;  %6627 = vset.pattern.permute.xlu1 %v6911_v2  ;;  %v7225_v25 = vperm.slane %v6954_v12, 6 }
  0x58   :  { %12412 = vst [vmem:[#allocation38_spill] sm:$0xff] %v7225_v25 }
  0x5c   :  { %115 = vperm.xlu2 %6628, %v7003_v22  }
  0x5e   :  { %1384 = vperm.xlu0 %6631, %v7023_v26   ;;  %109 = vperm.xlu1 %6627, %v7003_v22  }
  0x64   :  { %6630 = vset.pattern.permute.xlu2 %v6935_v8 }
  0x66   :  { %1509 = vperm.xlu0 %6631, %v7034_v28   ;;  %6629 = vset.pattern.permute.xlu1 %v6907_v1  ;;  %v7070_v37 = vpop.permute.xlu2 %47 }
  0x6c   :  { %128 = vperm.xlu2 %6630, %v6922_v5  }
  0x6e   :  { %6808 = vset.pattern.permute.xlu0 %v6941_v10  ;;  %122 = vperm.xlu1 %6629, %v6922_v5  }
  0x74   :  { %6633 = vset.pattern.permute.xlu2 %v6907_v1 }
  0x76   :  { %165 = vperm.xlu0 %6808, %v142_v29   ;;  %6632 = vset.pattern.permute.xlu1 %v6941_v10  ;;  %v7082_v42 = vpop.permute.xlu2 %53 }
  0x77   :  { %12390 = vst [vmem:[#allocation16_spill] sm:$0xff] %v7082_v42 }
  0x7c   :  { %147 = vperm.xlu2 %6633, %v142_v29  }
  0x7e   :  { %290 = vperm.xlu0 %6808, %v7046_v30   ;;  %140 = vperm.xlu1 %6632, %v6922_v5  }
  0x80   :  { %v7050_v31 = vpop.permute.xlu0 %134  ;;  %v7077_v40 = vpop.permute.xlu1 %34 }
  0x84   :  { %6635 = vset.pattern.permute.xlu2 %v6911_v2 }
  0x86   :  { %415 = vperm.xlu0 %6808, %v7053_v32   ;;  %6634 = vset.pattern.permute.xlu1 %v6935_v8  ;;  %v7093_v46 = vpop.permute.xlu2 %65 }
  0x87   :  { %v4320_v61 = vrot.slane %v7093_v46, 4 }
  0x88   :  { %v7058_v33 = vpop.permute.xlu0 %259 }
  0x8c   :  { %159 = vperm.xlu2 %6635, %v142_v29  }
  0x8e   :  { %540 = vperm.xlu0 %6808, %v7061_v34   ;;  %153 = vperm.xlu1 %6634, %v142_v29  }
  0x90   :  { %v7064_v35 = vpop.permute.xlu0 %384  ;;  %v7090_v45 = vpop.permute.xlu1 %40 }
  0x91   :  { %v4308_v62 = vrot.slane %v7090_v45, 4 }
  0x94   :  { %6637 = vset.pattern.permute.xlu2 %v6935_v8 }
  0x96   :  { %665 = vperm.xlu0 %6808, %v7067_v36   ;;  %6636 = vset.pattern.permute.xlu1 %v6907_v1  ;;  %v7104_v50 = vpop.permute.xlu2 %84 }
  0x98   :  { %v7075_v39 = vpop.permute.xlu0 %509 }
  0x99   :  { %12388 = vst [vmem:[#allocation14_spill] sm:$0xff] %v7075_v39 }
  0x9c   :  { %178 = vperm.xlu2 %6637, %v167_v38  }
  0x9e   :  { %790 = vperm.xlu0 %6808, %v7080_v41   ;;  %172 = vperm.xlu1 %6636, %v167_v38  }
  0xa0   :  { %v7085_v43 = vpop.permute.xlu0 %634  ;;  %v7102_v49 = vpop.permute.xlu1 %59 }
  0xa1   :  { %12391 = vst [vmem:[#allocation17_spill] sm:$0xff] %v7085_v43  ;;  %v292_v43 = vperm.slane %v6932_v7, 3 }
  0xa4   :  { %6639 = vset.pattern.permute.xlu2 %v6941_v10 }
  0xa6   :  { %915 = vperm.xlu0 %6808, %v7088_v44   ;;  %6638 = vset.pattern.permute.xlu1 %v6911_v2  ;;  %v7113_v53 = vpop.permute.xlu2 %97  ;;  %v7250_v44 = vperm.slane %v6980_v17, 0 }
  0xa8   :  { %v7097_v47 = vpop.permute.xlu0 %759  ;;  %12418 = vst [vmem:[#allocation44_spill] sm:$0xff] %v7250_v44 }
  0xa9   :  { %12393 = vst [vmem:[#allocation19_spill] sm:$0xff] %v7097_v47  ;;  %v3424_v47 = vrot.slane %v7102_v49, 4 }
  0xac   :  { %190 = vperm.xlu2 %6639, %v167_v38  }
  0xae   :  { %1040 = vperm.xlu0 %6808, %v7100_v48   ;;  %184 = vperm.xlu1 %6638, %v167_v38   ;;  %v7144_v38 = vperm.slane %v7014_v24, 7 }
  0xb0   :  { %v7107_v51 = vpop.permute.xlu0 %884  ;;  %v7117_v54 = vpop.permute.xlu1 %78  ;;  %12402 = vst [vmem:[#allocation28_spill] sm:$0xff] %v7144_v38 }
  0xb1   :  { %12395 = vst [vmem:[#allocation21_spill] sm:$0xff] %v7107_v51 }
  0xb2   :  { %12397 = vst [vmem:[#allocation23_spill] sm:$0xff] %v7117_v54 }
  0xb4   :  { %6641 = vset.pattern.permute.xlu2 %v6911_v2 }
  0xb6   :  { %1165 = vperm.xlu0 %6808, %v7110_v52   ;;  %6640 = vset.pattern.permute.xlu1 %v6935_v8  ;;  %v7125_v60 = vpop.permute.xlu2 %115 }
  0xb7   :  { %v4321_v4 = vsel %vm12378_vm0, %v7125_v60, %v4320_v61 }
  0xb8   :  { %v7120_v56 = vpop.permute.xlu0 %1009  ;;  %v7147_v58 = vperm.slane %v4321_v4, %v7130_v63  ;;  %v7162_v4 = vperm.slane %v7031_v27, 4 }
  0xb9   :  { %12398 = vst [vmem:[#allocation24_spill] sm:$0xff] %v7120_v56 }
  0xba   :  { %12403 = vst [vmem:[#allocation29_spill] sm:$0xff] %v7147_v58 }
  0xbb   :  { %12404 = vst [vmem:[#allocation30_spill] sm:$0xff] %v7162_v4 }
  0xbc   :  { %209 = vperm.xlu2 %6641, %v192_v55  }
  0xbe   :  { %1290 = vperm.xlu0 %6808, %v7123_v57   ;;  %203 = vperm.xlu1 %6640, %v192_v55  }
  0xc0   :  { %v7132_v0 = vpop.permute.xlu1 %90  ;;  %v7134_v3 = vpop.permute.xlu0 %1134 }
  0xc1   :  { %12400 = vst [vmem:[#allocation26_spill] sm:$0xff] %v7134_v3  ;;  %v4309_v5 = vsel %vm12378_vm0, %v7132_v0, %v4308_v62  ;;  %v7158_v62 = vperm.slane %v6932_v7, 0 }
  0xc2   :  { %v7141_v29 = vperm.slane %v4309_v5, %v7130_v63  ;;  %v3410_v5 = vrot.slane %v7104_v50, 4 }
  0xc4   :  { %12401 = vst [vmem:[#allocation27_spill] sm:$0xff] %v7141_v29  ;;  %v4368_v59 = vrot.slane %v7141_v29, 4  ;;  %6643 = vset.pattern.permute.xlu2 %v6907_v1  ;;  %v3411_v29 = vsel %vm12378_vm0, %v3410_v5, %v7077_v40 }
  0xc6   :  { %1415 = vperm.xlu0 %6808, %v7144_v38   ;;  %6642 = vset.pattern.permute.xlu1 %v6941_v10  ;;  %v7155_v61 = vsel %vm12378_vm0, %v7147_v58, %v4368_v59  ;;  %v7171_v59 = vperm.slane %v3411_v29, %v7130_v63 }
  0xc8   :  { %v7164_v28 = vpop.permute.xlu0 %1259  ;;  %12406 = vst [vmem:[#allocation32_spill] sm:$0xff] %v7171_v59  ;;  %v3460_v3 = vrot.slane %v7171_v59, 4  ;;  %v7205_v59 = vperm.slane %v6932_v7, 4 }
  0xc9   :  { %12405 = vst [vmem:[#allocation31_spill] sm:$0xff] %v7164_v28 }
  0xcc   :  { %222 = vperm.xlu2 %6643, %v7158_v62  }
  0xce   :  { %1540 = vperm.xlu0 %6808, %v7162_v4   ;;  %215 = vperm.xlu1 %6642, %v192_v55  }
  0xd0   :  { %v110_v58 = vpop.permute.xlu1 %109  ;;  %v7180_v57 = vpop.permute.xlu0 %1384 }
  0xd1   :  { %v3422_v38 = vrot.slane %v110_v58, 4  ;;  %12408 = vst [vmem:[#allocation34_spill] sm:$0xff] %v7180_v57  ;;  %v3425_v19 = vsel %vm12378_vm0, %v110_v58, %v3424_v47  ;;  %v7266_v47 = vperm.slane %v6980_v17, 5 }
  0xd3   :  { %v3423_v26 = vsel %vm12378_vm0, %v3422_v38, %v7102_v49  ;;  %12420 = vst [vmem:[#allocation46_spill] sm:$0xff] %v7266_v47 }
  0xd4   :  { %v7177_v28 = vperm.slane %v3423_v26, %v7130_v63  ;;  %6645 = vset.pattern.permute.xlu2 %v6941_v10 }
  0xd6   :  { %12407 = vst [vmem:[#allocation33_spill] sm:$0xff] %v7177_v28  ;;  %6813 = vset.pattern.permute.xlu0 %v6907_v1  ;;  %6644 = vset.pattern.permute.xlu1 %v6911_v2  ;;  %v7186_v29 = vsel %vm12378_vm0, %v7177_v28, %v3460_v3  ;;  %v7200_v3 = vpop.permute.xlu2 %128 }
  0xd7   :  { %12410 = vst [vmem:[#allocation36_spill] sm:$0xff] %v7200_v3 }
  0xd8   :  { %v7191_v26 = vpop.permute.xlu0 %1509 }
  0xd9   :  { %12409 = vst [vmem:[#allocation35_spill] sm:$0xff] %v7191_v26  ;;  %v7217_v26 = vperm.slane %v6954_v12, 1 }
  0xdc   :  { %240 = vperm.xlu2 %6645, %v7158_v62  }
  0xde   :  { %22 = vperm.xlu0 %6813, %v6925_v6   ;;  %234 = vperm.xlu1 %6644, %v7158_v62  }
  0xe4   :  { %6647 = vset.pattern.permute.xlu2 %v6935_v8 }
  0xe6   :  { %72 = vperm.xlu0 %6813, %v6983_v18   ;;  %6646 = vset.pattern.permute.xlu1 %v6907_v1  ;;  %v7210_v18 = vpop.permute.xlu2 %147 }
  0xe8   :  { %v7196_v38 = vpop.permute.xlu0 %165 }
  0xec   :  { %253 = vperm.xlu2 %6647, %v6938_v9  }
  0xee   :  { %197 = vperm.xlu0 %6813, %v192_v55   ;;  %247 = vperm.xlu1 %6646, %v6938_v9   ;;  %v7214_v55 = vpop.permute.xlu1 %122  ;;  %v160_v4 = vpop.permute.xlu2 %159 }
  0xf0   :  { %v7202_v5 = vpop.permute.xlu0 %290 }
  0xf4   :  { %6649 = vset.pattern.permute.xlu2 %v6907_v1 }
  0xf6   :  { %322 = vperm.xlu0 %6813, %v7205_v59   ;;  %6648 = vset.pattern.permute.xlu1 %v6941_v10  ;;  %v7227_v52 = vpop.permute.xlu1 %140  ;;  %v7232_v23 = vpop.permute.xlu2 %178 }
  0xf7   :  { %12413 = vst [vmem:[#allocation39_spill] sm:$0xff] %v7232_v23 }
  0xf8   :  { %v7212_v28 = vpop.permute.xlu0 %415 }
  0xfc   :  { %272 = vperm.xlu2 %6649, %v7046_v30  }
  0xfe   :  { %447 = vperm.xlu0 %6813, %v7217_v26   ;;  %265 = vperm.xlu1 %6648, %v6938_v9   ;;  %v7237_v9 = vperm.slane %v6965_v14, 3  ;;  %v3412_v14 = vrot.slane %v7077_v40, 4  ;;  %v3448_v40 = vrot.slane %v160_v4, 4 }
 0x100   :  { %v7222_v57 = vpop.permute.xlu0 %540  ;;  %12415 = vst [vmem:[#allocation41_spill] sm:$0xff] %v7237_v9  ;;  %v7240_v48 = vpop.permute.xlu1 %153  ;;  %v3413_v49 = vsel %vm12378_vm0, %v7104_v50, %v3412_v14 }
 0x101   :  { %12411 = vst [vmem:[#allocation37_spill] sm:$0xff] %v7222_v57  ;;  %v3421_v58 = vperm.slane %v3413_v49, %v7130_v63  ;;  %v3436_v57 = vrot.slane %v7050_v31, 4 }
 0x102   :  { %12416 = vst [vmem:[#allocation42_spill] sm:$0xff] %v7240_v48 }
 0x103   :  { %v3472_v14 = vrot.slane %v3421_v58, 4 }
 0x104   :  { %6651 = vset.pattern.permute.xlu2 %v6911_v2 }
 0x106   :  { %572 = vperm.xlu0 %6813, %v7225_v25   ;;  %6650 = vset.pattern.permute.xlu1 %v6935_v8  ;;  %v7244_v20 = vpop.permute.xlu2 %190 }
 0x108   :  { %v7234_v56 = vpop.permute.xlu0 %665 }
 0x109   :  { %12414 = vst [vmem:[#allocation40_spill] sm:$0xff] %v7234_v56 }
 0x10c   :  { %284 = vperm.xlu2 %6651, %v7046_v30  }
 0x10e   :  { %697 = vperm.xlu0 %6813, %v7237_v9   ;;  %278 = vperm.xlu1 %6650, %v7046_v30   ;;  %v3433_v30 = vperm.slane %v3425_v19, %v7130_v63  ;;  %v6862_v19 = vmov 1934713408  }
 0x10f   :  { %v1671_v39 = vunpack.c.l.s4 %v6862_v19 }
 0x110   :  { %v7246_v51 = vpop.permute.xlu0 %790  ;;  %v7258_v56 = vpop.permute.xlu1 %172 }
 0x111   :  { %12417 = vst [vmem:[#allocation43_spill] sm:$0xff] %v7246_v51  ;;  %v7276_v49 = vunpack.c.0.s8 %v1671_v39 }
 0x114   :  { %6653 = vset.pattern.permute.xlu2 %v6935_v8 }
 0x116   :  { %822 = vperm.xlu0 %6813, %v7250_v44   ;;  %6652 = vset.pattern.permute.xlu1 %v6907_v1  ;;  %v210_v51 = vpop.permute.xlu2 %209  ;;  %v3470_v44 = vrot.slane %v3433_v30, 4 }
 0x117   :  { %v3449_v16 = vsel %vm12378_vm0, %v210_v51, %v3448_v40  ;;  %v3473_v40 = vsel %vm12378_vm0, %v3433_v30, %v3472_v14 }
 0x118   :  { %v7263_v41 = vpop.permute.xlu0 %915  ;;  %v3457_v50 = vperm.slane %v3449_v16, %v7130_v63  ;;  %v3471_v17 = vsel %vm12378_vm0, %v3470_v44, %v3421_v58 }
 0x119   :  { %12419 = vst [vmem:[#allocation45_spill] sm:$0xff] %v7263_v41  ;;  %v3446_v41 = vrot.slane %v210_v51, 4  ;;  %v7285_v51 = vperm.slane %v3471_v17, %v7276_v49  ;;  %v3469_v17 = vperm.slane %v7186_v29, %v7276_v49 }
 0x11a   :  { %v3494_v25 = vrot.slane %v3457_v50, 4 }
 0x11b   :  { %12421 = vst [vmem:[#allocation47_spill] sm:$0xff] %v7285_v51  ;;  %v3447_v44 = vsel %vm12378_vm0, %v3446_v41, %v160_v4 }
 0x11c   :  { %303 = vperm.xlu2 %6653, %v292_v43   ;;  %v7302_v41 = vperm.slane %v3447_v44, %v7130_v63  ;;  %v2538_v44 = vrot.slane %v7232_v23, 4 }
 0x11e   :  { %947 = vperm.xlu0 %6813, %v7266_v47   ;;  %297 = vperm.xlu1 %6652, %v292_v43   ;;  %v7282_v47 = vperm.slane %v7000_v21, 2  ;;  %12424 = vst [vmem:[#allocation50_spill] sm:$0xff] %v7302_v41 }
 0x120   :  { %v185_v9 = vpop.permute.xlu1 %184  ;;  %v7274_v36 = vpop.permute.xlu0 %1040 }
 0x121   :  { %v3434_v15 = vrot.slane %v185_v9, 4  ;;  %v3437_v19 = vsel %vm12378_vm0, %v185_v9, %v3436_v57  ;;  %v3481_v9 = vperm.slane %v3473_v40, %v7276_v49 }
 0x122   :  { %v3445_v16 = vperm.slane %v3437_v19, %v7130_v63 }
 0x123   :  { %v3435_v39 = vsel %vm12378_vm0, %v3434_v15, %v7050_v31  ;;  %v3516_v31 = vrot.slane %v7285_v51, 4  ;;  %v3520_v19 = vrot.slane %v3481_v9, 4 }
 0x124   :  { %v7291_v58 = vperm.slane %v3435_v39, %v7130_v63  ;;  %v3495_v30 = vsel %vm12378_vm0, %v3494_v25, %v3445_v16  ;;  %v3496_v57 = vrot.slane %v3445_v16, 4  ;;  %6655 = vset.pattern.permute.xlu2 %v6941_v10  ;;  %v3512_v39 = vrot.slane %v3469_v17, 4 }
 0x125   :  { %v7297_v14 = vperm.slane %v3495_v30, %v7276_v49  ;;  %v7320_v30 = vperm.slane %v7000_v21, 7 }
 0x126   :  { %12422 = vst [vmem:[#allocation48_spill] sm:$0xff] %v7291_v58  ;;  %v3484_v15 = vrot.slane %v7291_v58, 4  ;;  %1072 = vperm.xlu0 %6813, %v7282_v47   ;;  %6654 = vset.pattern.permute.xlu1 %v6911_v2  ;;  %v3497_v25 = vsel %vm12378_vm0, %v3457_v50, %v3496_v57 }
 0x127   :  { %12423 = vst [vmem:[#allocation49_spill] sm:$0xff] %v7297_v14  ;;  %v3505_v29 = vperm.slane %v3497_v25, %v7276_v49  ;;  %v7316_v16 = vsel %vm12378_vm0, %v7297_v14, %v3516_v31 }
 0x128   :  { %v7309_v4 = vpop.permute.xlu0 %1165  ;;  %v3485_v40 = vsel %vm12378_vm0, %v7302_v41, %v3484_v15  ;;  %12426 = vst [vmem:[#allocation52_spill] sm:$0xff] %v7316_v16  ;;  %v2539_v16 = vsel %vm12378_vm0, %v2538_v44, %v7200_v3 }
 0x129   :  { %12425 = vst [vmem:[#allocation51_spill] sm:$0xff] %v7309_v4  ;;  %v3493_v50 = vperm.slane %v3485_v40, %v7276_v49  ;;  %v7324_v57 = vsel %vm12378_vm0, %v3505_v29, %v3520_v19  ;;  %v3518_v51 = vrot.slane %v3505_v29, 4  ;;  %v7339_v40 = vperm.slane %v2539_v16, %v7130_v63 }
 0x12a   :  { %12427 = vst [vmem:[#allocation53_spill] sm:$0xff] %v7324_v57  ;;  %v4306_v19 = vrot.slane %v7132_v0, 4  ;;  %v4318_v16 = vrot.slane %v7125_v60, 4 }
 0x12b   :  { %v7327_v15 = vsel %vm12378_vm0, %v3493_v50, %v3512_v39  ;;  %v3510_v25 = vrot.slane %v3493_v50, 4  ;;  %v7330_v31 = vsel %vm12378_vm0, %v3518_v51, %v3481_v9  ;;  %12431 = vst [vmem:[#allocation57_spill] sm:$0xff] %v7339_v40  ;;  %v7346_v51 = vperm.slane %v7014_v24, 4 }
 0x12c   :  { %315 = vperm.xlu2 %6655, %v292_v43   ;;  %12428 = vst [vmem:[#allocation54_spill] sm:$0xff] %v7327_v15  ;;  %v4307_v0 = vsel %vm12378_vm0, %v4306_v19, %v7090_v45  ;;  %v4332_v50 = vrot.slane %v7227_v52, 4  ;;  %v4319_v45 = vsel %vm12378_vm0, %v4318_v16, %v7093_v46 }
 0x12d   :  { %12429 = vst [vmem:[#allocation55_spill] sm:$0xff] %v7330_v31  ;;  %v7336_v21 = vsel %vm12378_vm0, %v3510_v25, %v3469_v17  ;;  %v2588_v17 = vrot.slane %v7339_v40, 4  ;;  %v7368_v25 = vperm.slane %v4307_v0, %v7130_v63  ;;  %v4344_v0 = vrot.slane %v7196_v38, 4 }
 0x12e   :  { %1197 = vperm.xlu0 %6813, %v7320_v30   ;;  %309 = vperm.xlu1 %6654, %v292_v43   ;;  %12430 = vst [vmem:[#allocation56_spill] sm:$0xff] %v7336_v21  ;;  %v4333_v19 = vsel %vm12378_vm0, %v7244_v20, %v4332_v50  ;;  %v7386_v57 = vperm.slane %v4319_v45, %v7130_v63 }
 0x12f   :  { %12433 = vst [vmem:[#allocation59_spill] sm:$0xff] %v7346_v51  ;;  %v7389_v21 = vperm.slane %v4333_v19, %v7130_v63  ;;  %v7404_v19 = vperm.slane %v7031_v27, 6 }
 0x130   :  { %v7341_v29 = vpop.permute.xlu1 %203  ;;  %v7348_v9 = vpop.permute.xlu0 %1290  ;;  %12436 = vst [vmem:[#allocation62_spill] sm:$0xff] %v7368_v25 }
 0x131   :  { %12432 = vst [vmem:[#allocation58_spill] sm:$0xff] %v7341_v29  ;;  %v2550_v39 = vrot.slane %v7341_v29, 4 }
 0x132   :  { %12434 = vst [vmem:[#allocation60_spill] sm:$0xff] %v7348_v9 }
 0x133   :  { %v2551_v43 = vsel %vm12378_vm0, %v2550_v39, %v7240_v48  ;;  %v4330_v39 = vrot.slane %v7244_v20, 4  ;;  %12439 = vst [vmem:[#allocation65_spill] sm:$0xff] %v7386_v57 }
 0x134   :  { %v7354_v44 = vperm.slane %v2551_v43, %v7130_v63  ;;  %6657 = vset.pattern.permute.xlu2 %v6911_v2  ;;  %v7372_v43 = vperm.slane %v7031_v27, 1  ;;  %12440 = vst [vmem:[#allocation66_spill] sm:$0xff] %v7389_v21 }
 0x135   :  { %v4331_v31 = vsel %vm12378_vm0, %v4330_v39, %v7227_v52  ;;  %v4392_v39 = vrot.slane %v7389_v21, 4  ;;  %12443 = vst [vmem:[#allocation69_spill] sm:$0xff] %v7404_v19 }
 0x136   :  { %12435 = vst [vmem:[#allocation61_spill] sm:$0xff] %v7354_v44  ;;  %1322 = vperm.xlu0 %6813, %v7346_v51   ;;  %6656 = vset.pattern.permute.xlu1 %v6935_v8  ;;  %v7363_v24 = vsel %vm12378_vm0, %v7354_v44, %v2588_v17  ;;  %v4356_v17 = vrot.slane %v7368_v25, 4  ;;  %v7394_v20 = vperm.slane %v4331_v31, %v7130_v63 }
 0x137   :  { %12437 = vst [vmem:[#allocation63_spill] sm:$0xff] %v7372_v43  ;;  %v4377_v25 = vperm.slane %v7155_v61, %v7276_v49 }
 0x138   :  { %v7380_v60 = vpop.permute.xlu0 %1415  ;;  %12441 = vst [vmem:[#allocation67_spill] sm:$0xff] %v7394_v20  ;;  %v4357_v16 = vsel %vm12378_vm0, %v7386_v57, %v4356_v17  ;;  %v4380_v17 = vrot.slane %v7394_v20, 4 }
 0x139   :  { %12438 = vst [vmem:[#allocation64_spill] sm:$0xff] %v7380_v60  ;;  %v7411_v15 = vperm.slane %v4357_v16, %v7276_v49  ;;  %v4416_v16 = vrot.slane %v4377_v25, 4 }
 0x13b   :  { %12444 = vst [vmem:[#allocation70_spill] sm:$0xff] %v7411_v15 }
 0x13c   :  { %334 = vperm.xlu2 %6657, %v7205_v59  }
 0x13e   :  { %1447 = vperm.xlu0 %6813, %v7372_v43   ;;  %328 = vperm.xlu1 %6656, %v7205_v59  }
 0x140   :  { %v216_v46 = vpop.permute.xlu1 %215  ;;  %v7423_v61 = vpop.permute.xlu0 %1540 }
 0x141   :  { %v4342_v50 = vrot.slane %v216_v46, 4  ;;  %v4345_v52 = vsel %vm12378_vm0, %v216_v46, %v4344_v0  ;;  %12446 = vst [vmem:[#allocation72_spill] sm:$0xff] %v7423_v61 }
 0x142   :  { %v7401_v45 = vperm.slane %v4345_v52, %v7130_v63  ;;  %v4408_v52 = vrot.slane %v7411_v15, 4 }
 0x143   :  { %v4343_v31 = vsel %vm12378_vm0, %v4342_v50, %v7196_v38 }
 0x144   :  { %12442 = vst [vmem:[#allocation68_spill] sm:$0xff] %v7401_v45  ;;  %v7415_v0 = vperm.slane %v4343_v31, %v7130_v63  ;;  %v4393_v46 = vsel %vm12378_vm0, %v7401_v45, %v4392_v39  ;;  %6659 = vset.pattern.permute.xlu2 %v6907_v1  ;;  %v7432_v31 = vperm.slane %v6932_v7, 5  ;;  %v1630_v7 = vrot.slane %v7113_v53, 4 }
 0x145   :  { %v4401_v27 = vperm.slane %v4393_v46, %v7276_v49 }
 0x146   :  { %12445 = vst [vmem:[#allocation71_spill] sm:$0xff] %v7415_v0  ;;  %1572 = vperm.xlu0 %6813, %v7404_v19   ;;  %6658 = vset.pattern.permute.xlu1 %v6941_v10  ;;  %v4381_v38 = vsel %vm12378_vm0, %v7415_v0, %v4380_v17 }
 0x147   :  { %v7428_v50 = vperm.slane %v4381_v38, %v7276_v49  ;;  %v4414_v39 = vrot.slane %v4401_v27, 4  ;;  %v7435_v46 = vsel %vm12378_vm0, %v4401_v27, %v4416_v16  ;;  %v1632_v38 = vrot.slane %v7070_v37, 4 }
 0x148   :  { %12448 = vst [vmem:[#allocation74_spill] sm:$0xff] %v7435_v46 }
 0x149   :  { %12447 = vst [vmem:[#allocation73_spill] sm:$0xff] %v7428_v50  ;;  %v7439_v21 = vsel %vm12378_vm0, %v7428_v50, %v4408_v52  ;;  %v7442_v45 = vsel %vm12378_vm0, %v4414_v39, %v4377_v25  ;;  %v1644_v25 = vrot.slane %v7214_v55, 4  ;;  %v1631_v52 = vsel %vm12378_vm0, %v1630_v7, %v7070_v37 }
 0x14a   :  { %12449 = vst [vmem:[#allocation75_spill] sm:$0xff] %v7439_v21  ;;  %v1637_v50 = vperm.slane %v1631_v52, %v7130_v63 }
 0x14b   :  { %12450 = vst [vmem:[#allocation76_spill] sm:$0xff] %v7442_v45  ;;  %v1633_v45 = vsel %vm12378_vm0, %v7113_v53, %v1632_v38 }
 0x14c   :  { %347 = vperm.xlu2 %6659, %v7432_v31   ;;  %v1666_v38 = vrot.slane %v1637_v50, 4 }
 0x14e   :  { %6818 = vset.pattern.permute.xlu0 %v6935_v8  ;;  %340 = vperm.xlu1 %6658, %v7205_v59   ;;  %v1642_v59 = vrot.slane %v7258_v56, 4 }
 0x150   :  { %v23_v17 = vpop.permute.xlu0 %22  ;;  %v1643_v53 = vsel %vm12378_vm0, %v1642_v59, %v7214_v55 }
 0x151   :  { %v1620_v27 = vrot.slane %v23_v17, 4 }
 0x154   :  { %6661 = vset.pattern.permute.xlu2 %v6941_v10 }
 0x156   :  { %28 = vperm.xlu0 %6818, %v6925_v6   ;;  %6660 = vset.pattern.permute.xlu1 %v6911_v2  ;;  %v1645_v6 = vsel %vm12378_vm0, %v7258_v56, %v1644_v25 }
 0x157   :  { %v7475_v56 = vperm.slane %v1645_v6, %v7130_v63 }
 0x158   :  { %v73_v16 = vpop.permute.xlu0 %72 }
 0x159   :  { %v1617_v39 = vrot.slane %v73_v16, 4  ;;  %v1621_v46 = vsel %vm12378_vm0, %v73_v16, %v1620_v27  ;;  %v7470_v27 = vperm.slane %v1633_v45, %v7130_v63  ;;  %12453 = vst [vmem:[#allocation79_spill] sm:$0xff] %v7475_v56  ;;  %v1649_v45 = vperm.slane %v1643_v53, %v7130_v63 }
 0x15a   :  { %v7462_v21 = vperm.slane %v1621_v46, %v7130_v63  ;;  %v1704_v16 = vrot.slane %v7475_v56, 4 }
 0x15b   :  { %v1619_v15 = vsel %vm12378_vm0, %v1617_v39, %v23_v17  ;;  %12452 = vst [vmem:[#allocation78_spill] sm:$0xff] %v7470_v27  ;;  %v1692_v20 = vrot.slane %v1649_v45, 4 }
 0x15c   :  { %12451 = vst [vmem:[#allocation77_spill] sm:$0xff] %v7462_v21  ;;  %v1625_v37 = vperm.slane %v1619_v15, %v7130_v63  ;;  %v1680_v7 = vrot.slane %v7462_v21, 4  ;;  %365 = vperm.xlu2 %6661, %v7432_v31   ;;  %v1656_v15 = vrot.slane %v7210_v18, 4 }
 0x15e   :  { %v1668_v46 = vrot.slane %v1625_v37, 4  ;;  %103 = vperm.xlu0 %6818, %v7003_v22   ;;  %359 = vperm.xlu1 %6660, %v7432_v31   ;;  %v1681_v17 = vsel %vm12378_vm0, %v7470_v27, %v1680_v7  ;;  %v1667_v39 = vsel %vm12378_vm0, %v1666_v38, %v1625_v37  ;;  %v2514_v27 = vrot.slane %v7117_v54, 4 }
 0x15f   :  { %v1689_v6 = vperm.slane %v1681_v17, %v7276_v49 }
 0x160   :  { %v198_v25 = vpop.permute.xlu0 %197  ;;  %v1669_v22 = vsel %vm12378_vm0, %v1637_v50, %v1668_v46  ;;  %v1673_v50 = vperm.slane %v1667_v39, %v7276_v49 }
 0x161   :  { %v1654_v55 = vrot.slane %v198_v25, 4  ;;  %v1657_v52 = vsel %vm12378_vm0, %v198_v25, %v1656_v15  ;;  %v7498_v25 = vperm.slane %v1669_v22, %v7276_v49  ;;  %v1728_v17 = vrot.slane %v1689_v6, 4 }
 0x162   :  { %v7486_v59 = vperm.slane %v1657_v52, %v7130_v63 }
 0x163   :  { %v1655_v7 = vsel %vm12378_vm0, %v1654_v55, %v7210_v18  ;;  %12455 = vst [vmem:[#allocation81_spill] sm:$0xff] %v7498_v25 }
 0x164   :  { %12454 = vst [vmem:[#allocation80_spill] sm:$0xff] %v7486_v59  ;;  %v1661_v53 = vperm.slane %v1655_v7, %v7130_v63  ;;  %6663 = vset.pattern.permute.xlu2 %v6935_v8  ;;  %v1705_v15 = vsel %vm12378_vm0, %v7486_v59, %v1704_v16  ;;  %v1716_v7 = vrot.slane %v1673_v50, 4 }
 0x165   :  { %v1713_v37 = vperm.slane %v1705_v15, %v7276_v49  ;;  %v7516_v15 = vpop.permute.xlu1 %234 }
 0x166   :  { %v1690_v46 = vrot.slane %v1661_v53, 4  ;;  %228 = vperm.xlu0 %6818, %v7158_v62   ;;  %6662 = vset.pattern.permute.xlu1 %v6907_v1  ;;  %v1693_v18 = vsel %vm12378_vm0, %v1661_v53, %v1692_v20  ;;  %v1720_v62 = vrot.slane %v7498_v25, 4  ;;  %v3524_v48 = vrot.slane %v7516_v15, 4 }
 0x167   :  { %v7506_v38 = vperm.slane %v1693_v18, %v7276_v49  ;;  %v7512_v52 = vsel %vm12378_vm0, %v1713_v37, %v1728_v17  ;;  %v1726_v22 = vrot.slane %v1713_v37, 4 }
 0x168   :  { %v7508_v55 = vpop.permute.xlu0 %322  ;;  %v1691_v16 = vsel %vm12378_vm0, %v1690_v46, %v1649_v45  ;;  %12457 = vst [vmem:[#allocation83_spill] sm:$0xff] %v7512_v52 }
 0x169   :  { %12456 = vst [vmem:[#allocation82_spill] sm:$0xff] %v7506_v38  ;;  %v1697_v39 = vperm.slane %v1691_v16, %v7276_v49  ;;  %v7523_v53 = vsel %vm12378_vm0, %v7506_v38, %v1720_v62  ;;  %v7527_v45 = vsel %vm12378_vm0, %v1726_v22, %v1689_v6  ;;  %v7539_v16 = vperm.slane %v6954_v12, 2 }
 0x16a   :  { %12459 = vst [vmem:[#allocation85_spill] sm:$0xff] %v7523_v53 }
 0x16b   :  { %v7519_v20 = vsel %vm12378_vm0, %v1697_v39, %v1716_v7  ;;  %v1714_v18 = vrot.slane %v1697_v39, 4  ;;  %12460 = vst [vmem:[#allocation86_spill] sm:$0xff] %v7527_v45  ;;  %v7541_v39 = vpop.permute.xlu2 %222 }
 0x16c   :  { %12458 = vst [vmem:[#allocation84_spill] sm:$0xff] %v7519_v20  ;;  %378 = vperm.xlu2 %6663, %v6947_v11  }
 0x16d   :  { %v7530_v37 = vsel %vm12378_vm0, %v1714_v18, %v1673_v50  ;;  %v7536_v17 = vpop.permute.xlu1 %247 }
 0x16e   :  { %12461 = vst [vmem:[#allocation87_spill] sm:$0xff] %v7530_v37  ;;  %372 = vperm.xlu1 %6662, %v6947_v11   ;;  %353 = vperm.xlu0 %6818, %v7432_v31  }
 0x170   :  { %v7534_v46 = vpop.permute.xlu0 %447 }
 0x173   :  { %v7548_v50 = vpop.permute.xlu2 %240 }
 0x174   :  { %6665 = vset.pattern.permute.xlu2 %v6907_v1 }
 0x175   :  { %v7551_v31 = vpop.permute.xlu1 %265 }
 0x176   :  { %6664 = vset.pattern.permute.xlu1 %v6941_v10  ;;  %478 = vperm.xlu0 %6818, %v7539_v16  }
 0x178   :  { %v7546_v6 = vpop.permute.xlu0 %572 }
 0x17b   :  { %v7556_v7 = vpop.permute.xlu2 %253 }
 0x17c   :  { %397 = vperm.xlu2 %6665, %v7053_v32  }
 0x17e   :  { %390 = vperm.xlu1 %6664, %v6947_v11  }
 0x180   :  { %v7554_v22 = vpop.permute.xlu0 %697  ;;  %v7560_v62 = vpop.permute.xlu1 %278 }
 0x183   :  { %v7564_v57 = vpop.permute.xlu2 %272 }
 0x184   :  { %6667 = vset.pattern.permute.xlu2 %v6911_v2  ;;  %v1730_v11 = vrot.slane %v7564_v57, 4 }
 0x186   :  { %6666 = vset.pattern.permute.xlu1 %v6935_v8  ;;  %v1731_v58 = vsel %vm12378_vm0, %v1730_v11, %v7541_v39  ;;  %v417_v11 = vperm.slane %v6954_v12, 0 }
 0x188   :  { %v7562_v18 = vpop.permute.xlu0 %822 }
 0x18b   :  { %v7588_v3 = vpop.permute.xlu2 %284 }
 0x18c   :  { %409 = vperm.xlu2 %6667, %v7053_v32  }
 0x18e   :  { %403 = vperm.xlu1 %6666, %v7053_v32   ;;  %v7583_v32 = vperm.slane %v1731_v58, %v7130_v63  ;;  %v3525_v58 = vsel %vm12378_vm0, %v7588_v3, %v3524_v48 }
 0x18f   :  { %v7601_v52 = vperm.slane %v3525_v58, %v7130_v63 }
 0x190   :  { %v7569_v0 = vpop.permute.xlu1 %297  ;;  %v7571_v37 = vpop.permute.xlu0 %947  ;;  %12463 = vst [vmem:[#allocation89_spill] sm:$0xff] %v7583_v32 }
 0x191   :  { %v1742_v14 = vrot.slane %v7569_v0, 4  ;;  %12465 = vst [vmem:[#allocation91_spill] sm:$0xff] %v7601_v52 }
 0x193   :  { %v1743_v41 = vsel %vm12378_vm0, %v1742_v14, %v7536_v17  ;;  %v7618_v58 = vpop.permute.xlu2 %303 }
 0x194   :  { %v7579_v29 = vperm.slane %v1743_v41, %v7130_v63  ;;  %6669 = vset.pattern.permute.xlu2 %v6935_v8  ;;  %v3536_v41 = vrot.slane %v7058_v33, 4 }
 0x196   :  { %12462 = vst [vmem:[#allocation88_spill] sm:$0xff] %v7579_v29  ;;  %v1778_v23 = vrot.slane %v7579_v29, 4  ;;  %6668 = vset.pattern.permute.xlu1 %v6907_v1 }
 0x198   :  { %v7591_v45 = vpop.permute.xlu0 %1072  ;;  %v7595_v14 = vsel %vm12378_vm0, %v1778_v23, %v7583_v32  ;;  %v3584_v23 = vrot.slane %v7601_v52, 4 }
 0x199   :  { %12464 = vst [vmem:[#allocation90_spill] sm:$0xff] %v7595_v14 }
 0x19b   :  { %v7623_v59 = vpop.permute.xlu2 %315 }
 0x19c   :  { %428 = vperm.xlu2 %6669, %v417_v11  }
 0x19e   :  { %422 = vperm.xlu1 %6668, %v417_v11  }
 0x1a0   :  { %v7603_v40 = vpop.permute.xlu1 %309  ;;  %v7605_v44 = vpop.permute.xlu0 %1197 }
 0x1a1   :  { %v3537_v53 = vsel %vm12378_vm0, %v7603_v40, %v3536_v41  ;;  %v3534_v4 = vrot.slane %v7603_v40, 4  ;;  %v3546_v40 = vrot.slane %v7064_v35, 4 }
 0x1a2   :  { %v7611_v61 = vperm.slane %v3537_v53, %v7130_v63 }
 0x1a3   :  { %v7628_v41 = vpop.permute.xlu2 %334 }
 0x1a4   :  { %12466 = vst [vmem:[#allocation92_spill] sm:$0xff] %v7611_v61  ;;  %6671 = vset.pattern.permute.xlu2 %v6941_v10  ;;  %v7616_v48 = vsel %vm12378_vm0, %v7611_v61, %v3584_v23 }
 0x1a6   :  { %6670 = vset.pattern.permute.xlu1 %v6911_v2 }
 0x1a8   :  { %v7621_v56 = vpop.permute.xlu0 %1322 }
 0x1a9   :  { %12467 = vst [vmem:[#allocation93_spill] sm:$0xff] %v7621_v56 }
 0x1ab   :  { %v348_v23 = vpop.permute.xlu2 %347 }
 0x1ac   :  { %440 = vperm.xlu2 %6671, %v417_v11  }
 0x1ae   :  { %434 = vperm.xlu1 %6670, %v417_v11  }
 0x1b0   :  { %v7626_v53 = vpop.permute.xlu0 %1447  ;;  %v7636_v61 = vpop.permute.xlu1 %328 }
 0x1b1   :  { %12468 = vst [vmem:[#allocation94_spill] sm:$0xff] %v7626_v53 }
 0x1b4   :  { %6673 = vset.pattern.permute.xlu2 %v6911_v2 }
 0x1b6   :  { %6672 = vset.pattern.permute.xlu1 %v6935_v8  ;;  %v7638_v11 = vpop.permute.xlu2 %365 }
 0x1b8   :  { %v7633_v52 = vpop.permute.xlu0 %1572 }
 0x1b9   :  { %12469 = vst [vmem:[#allocation95_spill] sm:$0xff] %v7633_v52 }
 0x1bc   :  { %459 = vperm.xlu2 %6673, %v7217_v26  }
 0x1be   :  { %453 = vperm.xlu1 %6672, %v7217_v26  }
 0x1c0   :  { %v7645_v53 = vpop.permute.xlu1 %340 }
 0x1c4   :  { %6675 = vset.pattern.permute.xlu2 %v6907_v1 }
 0x1c6   :  { %6674 = vset.pattern.permute.xlu1 %v6941_v10  ;;  %v7649_v52 = vpop.permute.xlu2 %378 }
 0x1c8   :  { %v7641_v21 = vpop.permute.xlu0 %28 }
 0x1c9   :  { %12470 = vst [vmem:[#allocation96_spill] sm:$0xff] %v7641_v21  ;;  %v2515_v20 = vsel %vm12378_vm0, %v2514_v27, %v7641_v21 }
 0x1ca   :  { %v7653_v14 = vperm.slane %v2515_v20, %v7130_v63 }
 0x1cc   :  { %472 = vperm.xlu2 %6675, %v7539_v16   ;;  %12471 = vst [vmem:[#allocation97_spill] sm:$0xff] %v7653_v14  ;;  %v2564_v60 = vrot.slane %v7653_v14, 4  ;;  %v1744_v14 = vrot.slane %v7536_v17, 4 }
 0x1ce   :  { %465 = vperm.xlu1 %6674, %v7217_v26   ;;  %v2597_v26 = vperm.slane %v7363_v24, %v7276_v49  ;;  %v1745_v9 = vsel %vm12378_vm0, %v7569_v0, %v1744_v14  ;;  %v4418_v0 = vrot.slane %v7202_v5, 4  ;;  %v1768_v14 = vrot.slane %v348_v23, 4 }
 0x1d0   :  { %v7655_v19 = vpop.permute.xlu0 %103  ;;  %v7668_v20 = vpop.permute.xlu1 %359  ;;  %v2614_v32 = vrot.slane %v2597_v26, 4 }
 0x1d1   :  { %12472 = vst [vmem:[#allocation98_spill] sm:$0xff] %v7655_v19  ;;  %v2526_v56 = vrot.slane %v7655_v19, 4 }
 0x1d3   :  { %v2527_v54 = vsel %vm12378_vm0, %v2526_v56, %v7082_v42  ;;  %v1732_v56 = vrot.slane %v7541_v39, 4 }
 0x1d4   :  { %v7662_v29 = vperm.slane %v2527_v54, %v7130_v63  ;;  %6677 = vset.pattern.permute.xlu2 %v6941_v10  ;;  %v3522_v54 = vrot.slane %v7588_v3, 4 }
 0x1d5   :  { %v1733_v42 = vsel %vm12378_vm0, %v7564_v57, %v1732_v56  ;;  %v1756_v57 = vrot.slane %v7508_v55, 4 }
 0x1d6   :  { %12473 = vst [vmem:[#allocation99_spill] sm:$0xff] %v7662_v29  ;;  %v398_v27 = vpop.permute.xlu2 %397  ;;  %6676 = vset.pattern.permute.xlu1 %v6911_v2  ;;  %v2565_v19 = vsel %vm12378_vm0, %v7662_v29, %v2564_v60  ;;  %v3523_v3 = vsel %vm12378_vm0, %v3522_v54, %v7516_v15  ;;  %v7713_v54 = vperm.slane %v6954_v12, 7 }
 0x1d7   :  { %v2573_v21 = vperm.slane %v2565_v19, %v7276_v49  ;;  %v1766_v24 = vrot.slane %v398_v27, 4  ;;  %v7685_v19 = vperm.slane %v1733_v42, %v7130_v63  ;;  %v3548_v42 = vrot.slane %v7628_v41, 4 }
 0x1d8   :  { %v7703_v15 = vperm.slane %v3523_v3, %v7130_v63  ;;  %603 = vperm.xlu0 %6818, %v7713_v54  }
 0x1d9   :  { %v2616_v43 = vrot.slane %v2573_v21, 4  ;;  %v7682_v60 = vsel %vm12378_vm0, %v2614_v32, %v2573_v21  ;;  %12475 = vst [vmem:[#allocation101_spill] sm:$0xff] %v7685_v19  ;;  %v1767_v17 = vsel %vm12378_vm0, %v1766_v24, %v348_v23  ;;  %v7697_v21 = vperm.slane %v1745_v9, %v7130_v63 }
 0x1da   :  { %12474 = vst [vmem:[#allocation100_spill] sm:$0xff] %v7682_v60  ;;  %v3535_v32 = vsel %vm12378_vm0, %v3534_v4, %v7058_v33  ;;  %v7710_v9 = vperm.slane %v1767_v17, %v7130_v63  ;;  %v1769_v24 = vsel %vm12378_vm0, %v398_v27, %v1768_v14  ;;  %v3549_v33 = vsel %vm12378_vm0, %v7064_v35, %v3548_v42 }
 0x1db   :  { %v7693_v39 = vsel %vm12378_vm0, %v2597_v26, %v2616_v43  ;;  %12477 = vst [vmem:[#allocation103_spill] sm:$0xff] %v7697_v21  ;;  %v4420_v43 = vrot.slane %v7548_v50, 4  ;;  %v1792_v26 = vrot.slane %v7685_v19, 4  ;;  %v7721_v4 = vperm.slane %v3535_v32, %v7130_v63 }
 0x1dc   :  { %490 = vperm.xlu2 %6677, %v7539_v16   ;;  %12476 = vst [vmem:[#allocation102_spill] sm:$0xff] %v7693_v39  ;;  %v3572_v17 = vrot.slane %v7703_v15, 4  ;;  %v3547_v27 = vsel %vm12378_vm0, %v3546_v40, %v7628_v41  ;;  %v7736_v42 = vperm.slane %v1769_v24, %v7130_v63  ;;  %v4419_v41 = vsel %vm12378_vm0, %v4418_v0, %v7548_v50 }
 0x1dd   :  { %12478 = vst [vmem:[#allocation104_spill] sm:$0xff] %v7703_v15  ;;  %v1793_v12 = vsel %vm12378_vm0, %v7697_v21, %v1792_v26 }
 0x1de   :  { %484 = vperm.xlu1 %6676, %v7539_v16   ;;  %12479 = vst [vmem:[#allocation105_spill] sm:$0xff] %v7710_v9  ;;  %v4430_v16 = vrot.slane %v7623_v59, 4  ;;  %v7752_v26 = vperm.slane %v1793_v12, %v7276_v49  ;;  %v3573_v0 = vsel %vm12378_vm0, %v7721_v4, %v3572_v17  ;;  %v4425_v17 = vperm.slane %v4419_v41, %v7130_v63 }
 0x1df   :  { %12480 = vst [vmem:[#allocation106_spill] sm:$0xff] %v7721_v4 }
 0x1e0   :  { %v373_v56 = vpop.permute.xlu1 %372  ;;  %12482 = vst [vmem:[#allocation108_spill] sm:$0xff] %v7736_v42  ;;  %v4431_v40 = vsel %vm12378_vm0, %v4430_v16, %v7551_v31  ;;  %v4454_v16 = vrot.slane %v7212_v28, 4 }
 0x1e1   :  { %v1754_v3 = vrot.slane %v373_v56, 4  ;;  %v1757_v60 = vsel %vm12378_vm0, %v373_v56, %v1756_v57  ;;  %v3560_v57 = vrot.slane %v7668_v20, 4  ;;  %12485 = vst [vmem:[#allocation111_spill] sm:$0xff] %v7752_v26  ;;  %v7755_v56 = vperm.slane %v3547_v27, %v7130_v63 }
 0x1e2   :  { %v7724_v23 = vperm.slane %v1757_v60, %v7130_v63  ;;  %v1802_v60 = vrot.slane %v7710_v9, 4  ;;  %v4437_v15 = vperm.slane %v4431_v40, %v7130_v63  ;;  %v1840_v40 = vrot.slane %v7752_v26, 4 }
 0x1e3   :  { %v1755_v35 = vsel %vm12378_vm0, %v1754_v3, %v7508_v55  ;;  %v7749_v55 = vperm.slane %v3549_v33, %v7130_v63  ;;  %12486 = vst [vmem:[#allocation112_spill] sm:$0xff] %v7755_v56  ;;  %v4432_v33 = vrot.slane %v7551_v31, 4 }
 0x1e4   :  { %12481 = vst [vmem:[#allocation107_spill] sm:$0xff] %v7724_v23  ;;  %v7740_v32 = vperm.slane %v1755_v35, %v7130_v63  ;;  %v1816_v14 = vrot.slane %v7724_v23, 4  ;;  %6679 = vset.pattern.permute.xlu2 %v6935_v8  ;;  %v4421_v35 = vsel %vm12378_vm0, %v7202_v5, %v4420_v43  ;;  %v3596_v5 = vrot.slane %v7755_v56, 4 }
 0x1e5   :  { %12484 = vst [vmem:[#allocation110_spill] sm:$0xff] %v7749_v55  ;;  %v3608_v4 = vrot.slane %v7749_v55, 4  ;;  %v7793_v41 = vperm.slane %v4421_v35, %v7130_v63  ;;  %v4455_v35 = vsel %vm12378_vm0, %v4454_v16, %v7638_v11  ;;  %v4444_v16 = vrot.slane %v7645_v53, 4 }
 0x1e6   :  { %12483 = vst [vmem:[#allocation109_spill] sm:$0xff] %v7740_v32  ;;  %v410_v24 = vpop.permute.xlu2 %409  ;;  %6678 = vset.pattern.permute.xlu1 %v6907_v1  ;;  %v7760_v3 = vsel %vm12378_vm0, %v1802_v60, %v7740_v32  ;;  %v1817_v50 = vsel %vm12378_vm0, %v7736_v42, %v1816_v14 }
 0x1e7   :  { %12487 = vst [vmem:[#allocation113_spill] sm:$0xff] %v7760_v3  ;;  %v3558_v12 = vrot.slane %v410_v24, 4  ;;  %v3561_v27 = vsel %vm12378_vm0, %v410_v24, %v3560_v57  ;;  %v7776_v14 = vperm.slane %v1817_v50, %v7276_v49  ;;  %v7783_v57 = vperm.slane %v3573_v0, %v7276_v49 }
 0x1e8   :  { %v7773_v60 = vperm.slane %v3561_v27, %v7130_v63  ;;  %v3593_v24 = vperm.slane %v7616_v48, %v7276_v49  ;;  %12492 = vst [vmem:[#allocation118_spill] sm:$0xff] %v7793_v41  ;;  %v4433_v50 = vsel %vm12378_vm0, %v7623_v59, %v4432_v33  ;;  %v4466_v0 = vrot.slane %v4437_v15, 4 }
 0x1e9   :  { %12489 = vst [vmem:[#allocation115_spill] sm:$0xff] %v7776_v14  ;;  %v3559_v31 = vsel %vm12378_vm0, %v3558_v12, %v7668_v20  ;;  %v229_v12 = vpop.permute.xlu0 %228  ;;  %v7802_v27 = vsel %vm12378_vm0, %v7776_v14, %v1840_v40  ;;  %v4468_v33 = vrot.slane %v4425_v17, 4  ;;  %v7814_v55 = vperm.slane %v4433_v50, %v7130_v63 }
 0x1ea   :  { %12488 = vst [vmem:[#allocation114_spill] sm:$0xff] %v7773_v60  ;;  %v7787_v43 = vperm.slane %v3559_v31, %v7130_v63  ;;  %v3609_v20 = vsel %vm12378_vm0, %v7773_v60, %v3608_v4  ;;  %v4456_v31 = vrot.slane %v7638_v11, 4  ;;  %v3624_v4 = vrot.slane %v7783_v57, 4 }
 0x1eb   :  { %12490 = vst [vmem:[#allocation116_spill] sm:$0xff] %v7783_v57  ;;  %v3617_v40 = vperm.slane %v3609_v20, %v7276_v49  ;;  %v3632_v60 = vrot.slane %v3593_v24, 4  ;;  %v2628_v56 = vrot.slane %v229_v12, 4  ;;  %v4467_v50 = vsel %vm12378_vm0, %v4466_v0, %v4425_v17 }
 0x1ec   :  { %12491 = vst [vmem:[#allocation117_spill] sm:$0xff] %v7787_v43  ;;  %503 = vperm.xlu2 %6679, %v6957_v13   ;;  %v3597_v48 = vsel %vm12378_vm0, %v7787_v43, %v3596_v5  ;;  %v4480_v5 = vrot.slane %v7793_v41, 4  ;;  %v2640_v20 = vrot.slane %v7556_v7, 4  ;;  %v4457_v41 = vsel %vm12378_vm0, %v7212_v28, %v4456_v31 }
 0x1ed   :  { %12493 = vst [vmem:[#allocation119_spill] sm:$0xff] %v7802_v27  ;;  %v7810_v59 = vperm.slane %v3597_v48, %v7276_v49  ;;  %v4461_v48 = vperm.slane %v4455_v35, %v7130_v63  ;;  %v3630_v43 = vrot.slane %v3617_v40, 4  ;;  %v7827_v39 = vsel %vm12378_vm0, %v3617_v40, %v3632_v60 }
 0x1ee   :  { %12495 = vst [vmem:[#allocation121_spill] sm:$0xff] %v7814_v55  ;;  %497 = vperm.xlu1 %6678, %v6957_v13   ;;  %v4469_v17 = vsel %vm12378_vm0, %v4437_v15, %v4468_v33  ;;  %v4481_v60 = vsel %vm12378_vm0, %v7814_v55, %v4480_v5  ;;  %v2626_v0 = vrot.slane %v7560_v62, 4  ;;  %v2629_v40 = vsel %vm12378_vm0, %v7560_v62, %v2628_v56 }
 0x1ef   :  { %12494 = vst [vmem:[#allocation120_spill] sm:$0xff] %v7810_v59  ;;  %v7822_v11 = vsel %vm12378_vm0, %v7810_v59, %v3624_v4  ;;  %v7837_v35 = vsel %vm12378_vm0, %v3630_v43, %v3593_v24  ;;  %v4490_v43 = vrot.slane %v4461_v48, 4  ;;  %v2638_v31 = vrot.slane %v7618_v58, 4 }
 0x1f0   :  { %12496 = vst [vmem:[#allocation122_spill] sm:$0xff] %v7822_v11  ;;  %v391_v57 = vpop.permute.xlu1 %390  ;;  %v2627_v62 = vsel %vm12378_vm0, %v2626_v0, %v229_v12  ;;  %v4477_v56 = vperm.slane %v4469_v17, %v7276_v49  ;;  %v2652_v12 = vrot.slane %v7636_v61, 4 }
 0x1f1   :  { %12497 = vst [vmem:[#allocation123_spill] sm:$0xff] %v7827_v39  ;;  %v4442_v27 = vrot.slane %v391_v57, 4  ;;  %v4445_v29 = vsel %vm12378_vm0, %v391_v57, %v4444_v16  ;;  %v7848_v57 = vperm.slane %v4467_v50, %v7276_v49  ;;  %v2641_v16 = vsel %vm12378_vm0, %v7618_v58, %v2640_v20  ;;  %v8018_v39 = vld [vmem:[%s12079_s0 + $0x18] sm:$0xff] }
 0x1f2   :  { %v7834_v4 = vperm.slane %v4445_v29, %v7130_v63  ;;  %12499 = vst [vmem:[#allocation125_spill] sm:$0xff] %v7837_v35  ;;  %v7851_v29 = vperm.slane %v4457_v41, %v7130_v63  ;;  %v7876_v0 = vperm.slane %v2627_v62, %v7130_v63  ;;  %v4520_v58 = vrot.slane %v4477_v56, 4 }
 0x1f3   :  { %v4443_v28 = vsel %vm12378_vm0, %v4442_v27, %v7645_v53  ;;  %12500 = vst [vmem:[#allocation126_spill] sm:$0xff] %v7848_v57  ;;  %v7860_v53 = vperm.slane %v4481_v60, %v7276_v49  ;;  %v2637_v27 = vperm.slane %v2629_v40, %v7130_v63  ;;  %v4516_v17 = vrot.slane %v7848_v57, 4 }
 0x1f4   :  { %12498 = vst [vmem:[#allocation124_spill] sm:$0xff] %v7834_v4  ;;  %v4449_v15 = vperm.slane %v4443_v28, %v7130_v63  ;;  %v4504_v24 = vrot.slane %v7834_v4, 4  ;;  %6681 = vset.pattern.permute.xlu2 %v6907_v1  ;;  %v2650_v60 = vrot.slane %v7649_v52, 4  ;;  %v2639_v62 = vsel %vm12378_vm0, %v2638_v31, %v7556_v7  ;;  %v354_v4 = vpop.permute.xlu0 %353 }
 0x1f5   :  { %12501 = vst [vmem:[#allocation127_spill] sm:$0xff] %v7851_v29  ;;  %v2664_v7 = vrot.slane %v354_v4, 4  ;;  %v667_v14 = vperm.slane %v8018_v39, 2 }
 0x1f6   :  { %12502 = vst [vmem:[#allocation128_spill] sm:$0xff] %v7860_v53  ;;  %v4492_v41 = vrot.slane %v4449_v15, 4  ;;  %6680 = vset.pattern.permute.xlu1 %v6941_v10  ;;  %v4491_v33 = vsel %vm12378_vm0, %v4490_v43, %v4449_v15  ;;  %v4505_v5 = vsel %vm12378_vm0, %v7851_v29, %v4504_v24  ;;  %v2649_v15 = vperm.slane %v2641_v16, %v7130_v63 }
 0x1f7   :  { %v7871_v50 = vperm.slane %v4491_v33, %v7276_v49  ;;  %12504 = vst [vmem:[#allocation130_spill] sm:$0xff] %v7876_v0  ;;  %v7880_v28 = vperm.slane %v4505_v5, %v7276_v49  ;;  %v2688_v24 = vrot.slane %v2637_v27, 4  ;;  %v4528_v33 = vrot.slane %v7860_v53, 4 }
 0x1f8   :  { %v4493_v40 = vsel %vm12378_vm0, %v4461_v48, %v4492_v41  ;;  %v2653_v48 = vsel %vm12378_vm0, %v7649_v52, %v2652_v12  ;;  %v7908_v52 = vperm.slane %v2639_v62, %v7130_v63 }
 0x1f9   :  { %12503 = vst [vmem:[#allocation129_spill] sm:$0xff] %v7871_v50  ;;  %v4501_v43 = vperm.slane %v4493_v40, %v7276_v49  ;;  %v7885_v20 = vsel %vm12378_vm0, %v7871_v50, %v4516_v17  ;;  %v2651_v40 = vsel %vm12378_vm0, %v2650_v60, %v7636_v61  ;;  %v2676_v17 = vrot.slane %v7876_v0, 4 }
 0x1fa   :  { %12505 = vst [vmem:[#allocation131_spill] sm:$0xff] %v7880_v28  ;;  %v7902_v16 = vsel %vm12378_vm0, %v7880_v28, %v4528_v33  ;;  %v2661_v12 = vperm.slane %v2653_v48, %v7130_v63  ;;  %v2689_v61 = vsel %vm12378_vm0, %v2649_v15, %v2688_v24  ;;  %v2686_v60 = vrot.slane %v2649_v15, 4 }
 0x1fb   :  { %12506 = vst [vmem:[#allocation132_spill] sm:$0xff] %v7885_v20  ;;  %v7894_v41 = vsel %vm12378_vm0, %v4501_v43, %v4520_v58  ;;  %v4518_v5 = vrot.slane %v4501_v43, 4  ;;  %v7914_v43 = vperm.slane %v2651_v40, %v7130_v63  ;;  %v2677_v33 = vsel %vm12378_vm0, %v7908_v52, %v2676_v17 }
 0x1fc   :  { %12507 = vst [vmem:[#allocation133_spill] sm:$0xff] %v7894_v41  ;;  %522 = vperm.xlu2 %6681, %v7061_v34   ;;  %v2687_v62 = vsel %vm12378_vm0, %v2686_v60, %v2637_v27  ;;  %v2712_v48 = vrot.slane %v2661_v12, 4  ;;  %v2685_v40 = vperm.slane %v2677_v33, %v7276_v49 }
 0x1fd   :  { %12508 = vst [vmem:[#allocation134_spill] sm:$0xff] %v7902_v16  ;;  %v7905_v31 = vsel %vm12378_vm0, %v4518_v5, %v4477_v56  ;;  %v2697_v5 = vperm.slane %v2689_v61, %v7276_v49  ;;  %v2700_v24 = vrot.slane %v7914_v43, 4 }
 0x1fe   :  { %12509 = vst [vmem:[#allocation135_spill] sm:$0xff] %v7905_v31  ;;  %515 = vperm.xlu1 %6680, %v6957_v13  }
 0x1ff   :  { %12510 = vst [vmem:[#allocation136_spill] sm:$0xff] %v7908_v52  ;;  %v2736_v60 = vrot.slane %v2697_v5, 4  ;;  %v12527_v52 = vld [vmem:[#allocation13_spill] sm:$0xff] }
 0x200   :  { %12511 = vst [vmem:[#allocation137_spill] sm:$0xff] %v7914_v43  ;;  %v404_v58 = vpop.permute.xlu1 %403 }
 0x201   :  { %v2662_v16 = vrot.slane %v404_v58, 4  ;;  %v2665_v56 = vsel %vm12378_vm0, %v404_v58, %v2664_v7  ;;  %v7930_v7 = vperm.slane %v2687_v62, %v7276_v49 }
 0x202   :  { %v2673_v13 = vperm.slane %v2665_v56, %v7130_v63  ;;  %v2728_v56 = vrot.slane %v2685_v40, 4 }
 0x203   :  { %v2663_v15 = vsel %vm12378_vm0, %v2662_v16, %v354_v4  ;;  %12513 = vst [vmem:[#allocation139_spill] sm:$0xff] %v7930_v7 }
 0x204   :  { %v7926_v53 = vperm.slane %v2663_v15, %v7130_v63  ;;  %v2710_v17 = vrot.slane %v2673_v13, 4  ;;  %6683 = vset.pattern.permute.xlu2 %v6911_v2  ;;  %v2713_v27 = vsel %vm12378_vm0, %v2673_v13, %v2712_v48  ;;  %v2732_v48 = vrot.slane %v7930_v7, 4 }
 0x205   :  { %v2721_v61 = vperm.slane %v2713_v27, %v7276_v49 }
 0x206   :  { %12512 = vst [vmem:[#allocation138_spill] sm:$0xff] %v7926_v53  ;;  %6682 = vset.pattern.permute.xlu1 %v6935_v8  ;;  %v2711_v4 = vsel %vm12378_vm0, %v2710_v17, %v2661_v12  ;;  %v2701_v16 = vsel %vm12378_vm0, %v7926_v53, %v2700_v24 }
 0x207   :  { %v7939_v58 = vperm.slane %v2711_v4, %v7276_v49  ;;  %v2709_v33 = vperm.slane %v2701_v16, %v7276_v49  ;;  %v7943_v62 = vsel %vm12378_vm0, %v2721_v61, %v2736_v60  ;;  %v2734_v13 = vrot.slane %v2721_v61, 4  ;;  %v6826_v61 = vld [vmem:[%s12079_s0 + $0x10] sm:$0xff]  ;;  %v7966_v4 = vpop.permute.xlu2 %428 }
 0x208   :  { %12515 = vst [vmem:[#allocation141_spill] sm:$0xff] %v7943_v62  ;;  %v542_v60 = vperm.slane %v6826_v61, 5 }
 0x209   :  { %12514 = vst [vmem:[#allocation140_spill] sm:$0xff] %v7939_v58  ;;  %v2726_v15 = vrot.slane %v2709_v33, 4  ;;  %v7947_v27 = vsel %vm12378_vm0, %v2709_v33, %v2728_v56  ;;  %v7951_v12 = vsel %vm12378_vm0, %v7939_v58, %v2732_v48  ;;  %v7954_v24 = vsel %vm12378_vm0, %v2734_v13, %v2697_v5  ;;  %v12520_v56 = vld [vmem:[#allocation38_spill] sm:$0xff] }
 0x20a   :  { %12516 = vst [vmem:[#allocation142_spill] sm:$0xff] %v7947_v27  ;;  %v2740_v48 = vrot.slane %v7966_v4, 4 }
 0x20b   :  { %12517 = vst [vmem:[#allocation143_spill] sm:$0xff] %v7951_v12  ;;  %v7957_v17 = vsel %vm12378_vm0, %v2726_v15, %v2685_v40  ;;  %v7987_v15 = vpop.permute.xlu0 %478 }
 0x20c   :  { %12518 = vst [vmem:[#allocation144_spill] sm:$0xff] %v7954_v24  ;;  %534 = vperm.xlu2 %6683, %v7061_v34   ;;  %v2741_v61 = vsel %vm12378_vm0, %v7987_v15, %v2740_v48 }
 0x20d   :  { %12519 = vst [vmem:[#allocation145_spill] sm:$0xff] %v7957_v17  ;;  %v7995_v29 = vperm.slane %v2741_v61, %v7130_v63 }
 0x20e   :  { %528 = vperm.xlu1 %6682, %v7061_v34  }
 0x20f   :  { %v7969_v5 = vpop.permute.xlu2 %440  ;;  %12521 = vst [vmem:[#allocation38_spill] sm:$0xff] %v7995_v29  ;;  %v2800_v20 = vrot.slane %v7995_v29, 4 }
 0x210   :  { %v7974_v40 = vpop.permute.xlu1 %422 }
 0x211   :  { %v1844_v53 = vrot.slane %v7974_v40, 4 }
 0x214   :  { %6685 = vset.pattern.permute.xlu2 %v6935_v8 }
 0x216   :  { %6684 = vset.pattern.permute.xlu1 %v6907_v1 }
 0x217   :  { %v7972_v34 = vpop.permute.xlu2 %459 }
 0x21c   :  { %553 = vperm.xlu2 %6685, %v542_v60  }
 0x21e   :  { %547 = vperm.xlu1 %6684, %v542_v60  }
 0x220   :  { %v7980_v33 = vpop.permute.xlu1 %434 }
 0x224   :  { %6687 = vset.pattern.permute.xlu2 %v6941_v10 }
 0x226   :  { %6686 = vset.pattern.permute.xlu1 %v6911_v2  ;;  %v7977_v16 = vpop.permute.xlu2 %472 }
 0x227   :  { %v1842_v35 = vrot.slane %v7977_v16, 4  ;;  %v1845_v19 = vsel %vm12378_vm0, %v7977_v16, %v1844_v53  ;;  %v2738_v53 = vrot.slane %v7987_v15, 4 }
 0x228   :  { %v1853_v42 = vperm.slane %v1845_v19, %v7130_v63 }
 0x229   :  { %v1843_v57 = vsel %vm12378_vm0, %v1842_v35, %v7974_v40  ;;  %v6829_v35 = vld [vmem:[%s12079_s0 + $0x28] sm:$0xff]  ;;  %v1866_v40 = vrot.slane %v7546_v6, 4 }
 0x22a   :  { %v8046_v11 = vperm.slane %v1843_v57, %v7130_v63  ;;  %v8064_v57 = vperm.slane %v6829_v35, 3 }
 0x22c   :  { %565 = vperm.xlu2 %6687, %v542_v60   ;;  %v1892_v62 = vrot.slane %v8046_v11, 4 }
 0x22e   :  { %559 = vperm.xlu1 %6686, %v542_v60  }
 0x230   :  { %v7991_v60 = vpop.permute.xlu1 %453 }
 0x231   :  { %v2752_v28 = vrot.slane %v7991_v60, 4 }
 0x234   :  { %6689 = vset.pattern.permute.xlu2 %v6911_v2 }
 0x236   :  { %6688 = vset.pattern.permute.xlu1 %v6935_v8  ;;  %v7984_v13 = vpop.permute.xlu2 %490 }
 0x23c   :  { %584 = vperm.xlu2 %6689, %v12520_v56  }
 0x23e   :  { %578 = vperm.xlu1 %6688, %v12520_v56  }
 0x240   :  { %v8012_v61 = vpop.permute.xlu1 %465 }
 0x244   :  { %6691 = vset.pattern.permute.xlu2 %v6907_v1 }
 0x246   :  { %v7998_v55 = vpop.permute.xlu2 %503  ;;  %6690 = vset.pattern.permute.xlu1 %v6941_v10 }
 0x247   :  { %v2753_v31 = vsel %vm12378_vm0, %v7998_v55, %v2752_v28  ;;  %v8021_v28 = vperm.slane %v8018_v39, 4 }
 0x248   :  { %v8005_v48 = vperm.slane %v2753_v31, %v7130_v63  ;;  %v8031_v31 = vld [vmem:[%s12079_s0 + $0x20] sm:$0xff] }
 0x249   :  { %728 = vperm.xlu0 %6818, %v8021_v28   ;;  %v8043_v50 = vperm.slane %v8031_v31, 6 }
 0x24a   :  { %12522 = vst [vmem:[#allocation146_spill] sm:$0xff] %v8005_v48  ;;  %v8009_v41 = vsel %vm12378_vm0, %v8005_v48, %v2800_v20 }
 0x24c   :  { %597 = vperm.xlu2 %6691, %v7713_v54  }
 0x24e   :  { %590 = vperm.xlu1 %6690, %v12520_v56   ;;  %v8034_v56 = vperm.slane %v8031_v31, 1 }
 0x250   :  { %v8026_v20 = vpop.permute.xlu1 %484 }
 0x251   :  { %853 = vperm.xlu0 %6818, %v8034_v56  }
 0x254   :  { %6693 = vset.pattern.permute.xlu2 %v6941_v10 }
 0x256   :  { %6692 = vset.pattern.permute.xlu1 %v6911_v2 }
 0x259   :  { %978 = vperm.xlu0 %6818, %v8043_v50  }
 0x25c   :  { %615 = vperm.xlu2 %6693, %v7713_v54  }
 0x25e   :  { %609 = vperm.xlu1 %6692, %v7713_v54  }
 0x260   :  { %v498_v59 = vpop.permute.xlu1 %497 }
 0x261   :  { %v1854_v24 = vrot.slane %v498_v59, 4  ;;  %1103 = vperm.xlu0 %6818, %v8064_v57  }
 0x263   :  { %v1855_v12 = vsel %vm12378_vm0, %v1854_v24, %v7534_v46  ;;  %v4530_v24 = vrot.slane %v7984_v13, 4 }
 0x264   :  { %v8053_v29 = vperm.slane %v1855_v12, %v7130_v63  ;;  %6695 = vset.pattern.permute.xlu2 %v6935_v8  ;;  %v12523_v12 = vld [vmem:[#allocation5_spill] sm:$0xff] }
 0x265   :  { %v4531_v48 = vsel %vm12378_vm0, %v4530_v24, %v7969_v5 }
 0x266   :  { %6694 = vset.pattern.permute.xlu1 %v6907_v1  ;;  %v8059_v54 = vsel %vm12378_vm0, %v8053_v29, %v1892_v62  ;;  %v6830_v62 = vld [vmem:[%s12079_s0 + $0x30] sm:$0xff]  ;;  %v8078_v35 = vperm.slane %v4531_v48, %v7130_v63 }
 0x267   :  { %v8075_v27 = vperm.slane %v6830_v62, 0  ;;  %v8096_v0 = vperm.slane %v6830_v62, 5 }
 0x268   :  { %12524 = vst [vmem:[#allocation5_spill] sm:$0xff] %v8078_v35  ;;  %v4580_v58 = vrot.slane %v8078_v35, 4 }
 0x269   :  { %1228 = vperm.xlu0 %6818, %v8075_v27   ;;  %12526 = vst [vmem:[#allocation148_spill] sm:$0xff] %v8096_v0 }
 0x26c   :  { %628 = vperm.xlu2 %6695, %v12523_v12  }
 0x26e   :  { %622 = vperm.xlu1 %6694, %v12523_v12  }
 0x270   :  { %v8080_v17 = vpop.permute.xlu1 %515 }
 0x271   :  { %v4542_v7 = vrot.slane %v8080_v17, 4  ;;  %1353 = vperm.xlu0 %6818, %v8096_v0  }
 0x273   :  { %v4543_v24 = vsel %vm12378_vm0, %v4542_v7, %v8012_v61  ;;  %v523_v7 = vpop.permute.xlu2 %522 }
 0x274   :  { %v8088_v43 = vperm.slane %v4543_v24, %v7130_v63  ;;  %6697 = vset.pattern.permute.xlu2 %v6907_v1  ;;  %v6831_v24 = vld [vmem:[%s12079_s0 + $0x38] sm:$0xff]  ;;  %v1868_v21 = vrot.slane %v523_v7, 4 }
 0x275   :  { %v8104_v35 = vperm.slane %v6831_v24, 2  ;;  %v8111_v62 = vperm.slane %v6831_v24, 7  ;;  %v1856_v24 = vrot.slane %v7534_v46, 4  ;;  %v1904_v46 = vrot.slane %v1853_v42, 4 }
 0x276   :  { %12525 = vst [vmem:[#allocation147_spill] sm:$0xff] %v8088_v43  ;;  %6696 = vset.pattern.permute.xlu1 %v6941_v10  ;;  %v8094_v48 = vsel %vm12378_vm0, %v8088_v43, %v4580_v58  ;;  %v1869_v9 = vsel %vm12378_vm0, %v7546_v6, %v1868_v21  ;;  %v2739_v6 = vsel %vm12378_vm0, %v2738_v53, %v7966_v4 }
 0x277   :  { %12528 = vst [vmem:[#allocation13_spill] sm:$0xff] %v8104_v35 }
 0x278   :  { %12529 = vst [vmem:[#allocation149_spill] sm:$0xff] %v8111_v62 }
 0x279   :  { %1478 = vperm.xlu0 %6818, %v8104_v35   ;;  %v2750_v35 = vrot.slane %v7998_v55, 4 }
 0x27b   :  { %v8108_v58 = vpop.permute.xlu2 %534  ;;  %v2751_v4 = vsel %vm12378_vm0, %v2750_v35, %v7991_v60 }
 0x27c   :  { %647 = vperm.xlu2 %6697, %v12527_v52   ;;  %v8174_v35 = vperm.slane %v2751_v4, %v7130_v63 }
 0x27e   :  { %640 = vperm.xlu1 %6696, %v12523_v12   ;;  %12533 = vst [vmem:[#allocation153_spill] sm:$0xff] %v8174_v35 }
 0x280   :  { %v8118_v43 = vpop.permute.xlu1 %528 }
 0x281   :  { %1603 = vperm.xlu0 %6818, %v8111_v62  }
 0x283   :  { %v8115_v12 = vpop.permute.xlu2 %553 }
 0x284   :  { %6699 = vset.pattern.permute.xlu2 %v6911_v2 }
 0x286   :  { %6698 = vset.pattern.permute.xlu1 %v6935_v8 }
 0x289   :  { %6825 = vset.pattern.permute.xlu0 %v6941_v10 }
 0x28b   :  { %v8123_v26 = vpop.permute.xlu2 %565 }
 0x28c   :  { %659 = vperm.xlu2 %6699, %v12527_v52  }
 0x28e   :  { %653 = vperm.xlu1 %6698, %v12527_v52   ;;  %v1857_v52 = vsel %vm12378_vm0, %v498_v59, %v1856_v24  ;;  %v1867_v59 = vsel %vm12378_vm0, %v1866_v40, %v523_v7  ;;  %v1890_v24 = vrot.slane %v8053_v29, 4  ;;  %v1901_v40 = vperm.slane %v8059_v54, %v7276_v49 }
 0x28f   :  { %v1865_v3 = vperm.slane %v1857_v52, %v7130_v63  ;;  %v1877_v52 = vperm.slane %v1869_v9, %v7130_v63  ;;  %v1873_v0 = vperm.slane %v1867_v59, %v7130_v63  ;;  %v8162_v59 = vperm.slane %v2739_v6, %v7130_v63 }
 0x290   :  { %v548_v23 = vpop.permute.xlu1 %547  ;;  %v1891_v9 = vsel %vm12378_vm0, %v1890_v24, %v8046_v11  ;;  %v1944_v6 = vrot.slane %v1901_v40, 4 }
 0x291   :  { %v1902_v16 = vrot.slane %v1865_v3, 4  ;;  %v1905_v19 = vsel %vm12378_vm0, %v1865_v3, %v1904_v46  ;;  %v1880_v32 = vrot.slane %v548_v23, 4  ;;  %v1928_v46 = vrot.slane %v1877_v52, 4  ;;  %12530 = vst [vmem:[#allocation150_spill] sm:$0xff] %v8162_v59 }
 0x292   :  { %v1913_v3 = vperm.slane %v1905_v19, %v7276_v49  ;;  %v8170_v54 = vperm.slane %v1891_v9, %v7276_v49  ;;  %v604_v19 = vpop.permute.xlu0 %603 }
 0x293   :  { %v1903_v29 = vsel %vm12378_vm0, %v1902_v16, %v1853_v42  ;;  %v1916_v42 = vrot.slane %v1873_v0, 4  ;;  %v2774_v51 = vrot.slane %v604_v19, 4 }
 0x294   :  { %6701 = vset.pattern.permute.xlu2 %v6935_v8  ;;  %12532 = vst [vmem:[#allocation152_spill] sm:$0xff] %v8170_v54  ;;  %v1940_v25 = vrot.slane %v8170_v54, 4 }
 0x296   :  { %6700 = vset.pattern.permute.xlu1 %v6907_v1  ;;  %v8134_v62 = vpop.permute.xlu2 %584 }
 0x29c   :  { %678 = vperm.xlu2 %6701, %v667_v14  }
 0x29e   :  { %672 = vperm.xlu1 %6700, %v667_v14  }
 0x2a0   :  { %v8149_v15 = vpop.permute.xlu1 %559 }
 0x2a4   :  { %6703 = vset.pattern.permute.xlu2 %v6941_v10 }
 0x2a6   :  { %v598_v21 = vpop.permute.xlu2 %597  ;;  %6702 = vset.pattern.permute.xlu1 %v6911_v2 }
 0x2a7   :  { %v1878_v7 = vrot.slane %v598_v21, 4  ;;  %v1881_v55 = vsel %vm12378_vm0, %v598_v21, %v1880_v32  ;;  %v8166_v32 = vperm.slane %v1903_v29, %v7276_v49 }
 0x2a8   :  { %v1889_v53 = vperm.slane %v1881_v55, %v7130_v63  ;;  %v1952_v55 = vrot.slane %v1913_v3, 4 }
 0x2a9   :  { %v1879_v16 = vsel %vm12378_vm0, %v1878_v7, %v548_v23  ;;  %12531 = vst [vmem:[#allocation151_spill] sm:$0xff] %v8166_v32  ;;  %v2776_v23 = vrot.slane %v8115_v12, 4  ;;  %v1948_v38 = vrot.slane %v8166_v32, 4 }
 0x2aa   :  { %v1885_v11 = vperm.slane %v1879_v16, %v7130_v63  ;;  %v1926_v24 = vrot.slane %v1889_v53, 4  ;;  %v1929_v60 = vsel %vm12378_vm0, %v1889_v53, %v1928_v46 }
 0x2ab   :  { %v1937_v21 = vperm.slane %v1929_v60, %v7276_v49 }
 0x2ac   :  { %v1914_v29 = vrot.slane %v1885_v11, 4  ;;  %690 = vperm.xlu2 %6703, %v667_v14   ;;  %v1927_v7 = vsel %vm12378_vm0, %v1926_v24, %v1877_v52  ;;  %v1917_v16 = vsel %vm12378_vm0, %v1885_v11, %v1916_v42  ;;  %v2764_v52 = vrot.slane %v8118_v43, 4 }
 0x2ad   :  { %v8181_v9 = vperm.slane %v1927_v7, %v7276_v49  ;;  %v1925_v46 = vperm.slane %v1917_v16, %v7276_v49  ;;  %v8185_v4 = vsel %vm12378_vm0, %v1937_v21, %v1952_v55  ;;  %v1950_v53 = vrot.slane %v1937_v21, 4 }
 0x2ae   :  { %12534 = vst [vmem:[#allocation154_spill] sm:$0xff] %v8185_v4  ;;  %684 = vperm.xlu1 %6702, %v667_v14   ;;  %v1915_v60 = vsel %vm12378_vm0, %v1914_v29, %v1873_v0  ;;  %v2788_v55 = vrot.slane %v8162_v59, 4  ;;  %v2777_v29 = vsel %vm12378_vm0, %v604_v19, %v2776_v23  ;;  %v2775_v19 = vsel %vm12378_vm0, %v2774_v51, %v8115_v12  ;;  %v12587_v4 = vld [vmem:[#allocation18_spill] sm:$0xff] }
 0x2af   :  { %v8192_v42 = vperm.slane %v1915_v60, %v7276_v49  ;;  %v8195_v11 = vsel %vm12378_vm0, %v1925_v46, %v1944_v6  ;;  %v1942_v24 = vrot.slane %v1925_v46, 4  ;;  %v8199_v14 = vsel %vm12378_vm0, %v1950_v53, %v1913_v3 }
 0x2b0   :  { %12536 = vst [vmem:[#allocation156_spill] sm:$0xff] %v8195_v11  ;;  %v579_v21 = vpop.permute.xlu1 %578  ;;  %v8203_v0 = vsel %vm12378_vm0, %v8181_v9, %v1948_v38  ;;  %v4544_v46 = vrot.slane %v8012_v61, 4  ;;  %v2789_v38 = vsel %vm12378_vm0, %v8174_v35, %v2788_v55  ;;  %v8226_v23 = vperm.slane %v2777_v29, %v7130_v63 }
 0x2b1   :  { %12535 = vst [vmem:[#allocation155_spill] sm:$0xff] %v8192_v42  ;;  %v2762_v7 = vrot.slane %v579_v21, 4  ;;  %v2765_v16 = vsel %vm12378_vm0, %v579_v21, %v2764_v52  ;;  %v1941_v6 = vsel %vm12378_vm0, %v8192_v42, %v1940_v25  ;;  %v8215_v3 = vsel %vm12378_vm0, %v1942_v24, %v1901_v40 }
 0x2b2   :  { %12537 = vst [vmem:[#allocation157_spill] sm:$0xff] %v8199_v14  ;;  %v8211_v60 = vperm.slane %v2765_v16, %v7130_v63  ;;  %5214 = vrot.lane.b32.xlu0 %v1941_v6, %s6863_s5  ;;  %v4545_v61 = vsel %vm12378_vm0, %v8080_v17, %v4544_v46  ;;  %v4532_v52 = vrot.slane %v7969_v5, 4  ;;  %v8235_v51 = vperm.slane %v2789_v38, %v7276_v49 }
 0x2b3   :  { %12538 = vst [vmem:[#allocation158_spill] sm:$0xff] %v8203_v0  ;;  %v2763_v25 = vsel %vm12378_vm0, %v2762_v7, %v8118_v43  ;;  %v2809_v43 = vperm.slane %v8009_v41, %v7276_v49  ;;  %v8240_v17 = vperm.slane %v2775_v19, %v7130_v63  ;;  %v4553_v5 = vperm.slane %v4545_v61, %v7130_v63 }
 0x2b4   :  { %12539 = vst [vmem:[#allocation159_spill] sm:$0xff] %v8211_v60  ;;  %v8229_v53 = vperm.slane %v2763_v25, %v7130_v63  ;;  %v2824_v40 = vrot.slane %v8211_v60, 4  ;;  %6705 = vset.pattern.permute.xlu2 %v6911_v2  ;;  %v4533_v55 = vsel %vm12378_vm0, %v7984_v13, %v4532_v52  ;;  %v4568_v7 = vrot.slane %v8123_v26, 4  ;;  %v12548_v52 = vld [vmem:[#allocation41_spill] sm:$0xff]  ;;  %v12552_v60 = vld [vmem:[#allocation14_spill] sm:$0xff] }
 0x2b5   :  { %12540 = vst [vmem:[#allocation160_spill] sm:$0xff] %v8215_v3  ;;  %v2840_v6 = vrot.slane %v8235_v51, 4  ;;  %v2848_v46 = vrot.slane %v2809_v43, 4  ;;  %v4541_v38 = vperm.slane %v4533_v55, %v7130_v63  ;;  %v4590_v13 = vrot.slane %v4553_v5, 4 }
 0x2b6   :  { %12541 = vst [vmem:[#allocation161_spill] sm:$0xff] %v8226_v23  ;;  %v2812_v12 = vrot.slane %v8229_v53, 4  ;;  %6704 = vset.pattern.permute.xlu1 %v6935_v8  ;;  %v2825_v24 = vsel %vm12378_vm0, %v8226_v23, %v2824_v40  ;;  %v616_v21 = vpop.permute.xlu2 %615 }
 0x2b7   :  { %12542 = vst [vmem:[#allocation162_spill] sm:$0xff] %v8229_v53  ;;  %v2833_v41 = vperm.slane %v2825_v24, %v7276_v49  ;;  %v4569_v25 = vsel %vm12378_vm0, %v616_v21, %v4568_v7  ;;  %v12550_v24 = vld [vmem:[#allocation37_spill] sm:$0xff]  ;;  %v4592_v54 = vrot.slane %v4541_v38, 4  ;;  %v4566_v7 = vrot.slane %v616_v21, 4 }
 0x2b8   :  { %12543 = vst [vmem:[#allocation163_spill] sm:$0xff] %v8235_v51  ;;  %v2813_v29 = vsel %vm12378_vm0, %v8240_v17, %v2812_v12  ;;  %v4577_v55 = vperm.slane %v4569_v25, %v7130_v63  ;;  %v4591_v42 = vsel %vm12378_vm0, %v4590_v13, %v4541_v38  ;;  %v3646_v21 = vrot.slane %v12552_v60, 4 }
 0x2b9   :  { %12544 = vst [vmem:[#allocation164_spill] sm:$0xff] %v8240_v17  ;;  %v8254_v16 = vperm.slane %v2813_v29, %v7276_v49  ;;  %v2846_v19 = vrot.slane %v2833_v41, 4  ;;  %v8264_v40 = vsel %vm12378_vm0, %v2833_v41, %v2848_v46  ;;  %v4556_v29 = vrot.slane %v12550_v24, 4 }
 0x2ba   :  { %12547 = vst [vmem:[#allocation167_spill] sm:$0xff] %v8264_v40  ;;  %v3634_v41 = vrot.slane %v8026_v20, 4  ;;  %v4593_v46 = vsel %vm12378_vm0, %v4553_v5, %v4592_v54  ;;  %v8280_v25 = vperm.slane %v4591_v42, %v7276_v49  ;;  %v4567_v13 = vsel %vm12378_vm0, %v4566_v7, %v8123_v26 }
 0x2bb   :  { %12545 = vst [vmem:[#allocation165_spill] sm:$0xff] %v8254_v16  ;;  %v8261_v61 = vsel %vm12378_vm0, %v8254_v16, %v2840_v6  ;;  %v8268_v12 = vsel %vm12378_vm0, %v2846_v19, %v2809_v43  ;;  %v3636_v6 = vrot.slane %v7980_v33, 4  ;;  %v4614_v19 = vrot.slane %v4577_v55, 4 }
 0x2bc   :  { %12546 = vst [vmem:[#allocation166_spill] sm:$0xff] %v8261_v61  ;;  %709 = vperm.xlu2 %6705, %v12548_v52   ;;  %v4601_v42 = vperm.slane %v4593_v46, %v7276_v49 }
 0x2bd   :  { %12549 = vst [vmem:[#allocation41_spill] sm:$0xff] %v8268_v12  ;;  %v3637_v38 = vsel %vm12378_vm0, %v8026_v20, %v3636_v6  ;;  %v3635_v20 = vsel %vm12378_vm0, %v3634_v41, %v7980_v33  ;;  %v4636_v6 = vrot.slane %v8280_v25, 4  ;;  %v3647_v33 = vsel %vm12378_vm0, %v3646_v21, %v7972_v34 }
 0x2be   :  { %703 = vperm.xlu1 %6704, %v12548_v52   ;;  %12551 = vst [vmem:[#allocation37_spill] sm:$0xff] %v8280_v25  ;;  %v8313_v41 = vperm.slane %v3637_v38, %v7130_v63  ;;  %v3653_v25 = vperm.slane %v3647_v33, %v7130_v63  ;;  %v3672_v33 = vrot.slane %v8149_v15, 4 }
 0x2c0   :  { %v591_v61 = vpop.permute.xlu1 %590  ;;  %12556 = vst [vmem:[#allocation170_spill] sm:$0xff] %v8313_v41 }
 0x2c1   :  { %v4554_v40 = vrot.slane %v591_v61, 4  ;;  %v4557_v43 = vsel %vm12378_vm0, %v591_v61, %v4556_v29 }
 0x2c2   :  { %v4565_v12 = vperm.slane %v4557_v43, %v7130_v63  ;;  %v3648_v43 = vrot.slane %v7972_v34, 4 }
 0x2c3   :  { %v4555_v54 = vsel %vm12378_vm0, %v4554_v40, %v12550_v24  ;;  %v4589_v40 = vperm.slane %v8094_v48, %v7276_v49  ;;  %v8304_v24 = vperm.slane %v4567_v13, %v7130_v63  ;;  %v3641_v48 = vperm.slane %v3635_v20, %v7130_v63 }
 0x2c4   :  { %v8290_v5 = vperm.slane %v4555_v54, %v7130_v63  ;;  %v4615_v61 = vsel %vm12378_vm0, %v4614_v19, %v4565_v12  ;;  %v4616_v29 = vrot.slane %v4565_v12, 4  ;;  %6707 = vset.pattern.permute.xlu2 %v6907_v1  ;;  %v4640_v13 = vrot.slane %v4601_v42, 4 }
 0x2c5   :  { %v8299_v26 = vperm.slane %v4615_v61, %v7276_v49  ;;  %12555 = vst [vmem:[#allocation169_spill] sm:$0xff] %v8304_v24  ;;  %v3658_v61 = vrot.slane %v8134_v62, 4  ;;  %v4632_v21 = vrot.slane %v4589_v40, 4  ;;  %v3649_v38 = vsel %vm12378_vm0, %v12552_v60, %v3648_v43 }
 0x2c6   :  { %12553 = vst [vmem:[#allocation14_spill] sm:$0xff] %v8290_v5  ;;  %v4604_v12 = vrot.slane %v8290_v5, 4  ;;  %6706 = vset.pattern.permute.xlu1 %v6941_v10  ;;  %v4617_v7 = vsel %vm12378_vm0, %v4577_v55, %v4616_v29  ;;  %v3660_v55 = vrot.slane %v8108_v58, 4  ;;  %v8343_v43 = vperm.slane %v3649_v38, %v7130_v63 }
 0x2c7   :  { %12554 = vst [vmem:[#allocation168_spill] sm:$0xff] %v8299_v26  ;;  %v4625_v46 = vperm.slane %v4617_v7, %v7276_v49  ;;  %v8321_v54 = vsel %vm12378_vm0, %v8299_v26, %v4636_v6 }
 0x2c8   :  { %v4605_v19 = vsel %vm12378_vm0, %v8304_v24, %v4604_v12  ;;  %12557 = vst [vmem:[#allocation171_spill] sm:$0xff] %v8321_v54  ;;  %v3696_v12 = vrot.slane %v8313_v41, 4  ;;  %v3661_v7 = vsel %vm12378_vm0, %v8134_v62, %v3660_v55  ;;  %v3682_v55 = vrot.slane %v3653_v25, 4 }
 0x2c9   :  { %v4613_v34 = vperm.slane %v4605_v19, %v7276_v49  ;;  %v8329_v29 = vsel %vm12378_vm0, %v4625_v46, %v4640_v13  ;;  %v4638_v20 = vrot.slane %v4625_v46, 4  ;;  %v3684_v19 = vrot.slane %v3641_v48, 4  ;;  %12561 = vst [vmem:[#allocation175_spill] sm:$0xff] %v8343_v43 }
 0x2ca   :  { %12558 = vst [vmem:[#allocation172_spill] sm:$0xff] %v8329_v29  ;;  %v3659_v46 = vsel %vm12378_vm0, %v3658_v61, %v8108_v58  ;;  %v8351_v13 = vperm.slane %v3661_v7, %v7130_v63 }
 0x2cb   :  { %v4630_v6 = vrot.slane %v4613_v34, 4  ;;  %v8335_v54 = vsel %vm12378_vm0, %v4613_v34, %v4632_v21  ;;  %v8340_v60 = vsel %vm12378_vm0, %v4638_v20, %v4601_v42  ;;  %v3697_v42 = vsel %vm12378_vm0, %v8343_v43, %v3696_v12 }
 0x2cc   :  { %12559 = vst [vmem:[#allocation173_spill] sm:$0xff] %v8335_v54  ;;  %722 = vperm.xlu2 %6707, %v8021_v28   ;;  %v3665_v34 = vperm.slane %v3659_v46, %v7130_v63  ;;  %v3685_v38 = vsel %vm12378_vm0, %v3653_v25, %v3684_v19  ;;  %v3720_v61 = vrot.slane %v8351_v13, 4  ;;  %v8366_v7 = vperm.slane %v3697_v42, %v7276_v49 }
 0x2cd   :  { %12560 = vst [vmem:[#allocation174_spill] sm:$0xff] %v8340_v60  ;;  %v8348_v62 = vsel %vm12378_vm0, %v4630_v6, %v4589_v40  ;;  %v3693_v6 = vperm.slane %v3685_v38, %v7276_v49 }
 0x2ce   :  { %12562 = vst [vmem:[#allocation176_spill] sm:$0xff] %v8348_v62  ;;  %715 = vperm.xlu1 %6706, %v12548_v52   ;;  %v3683_v52 = vsel %vm12378_vm0, %v3682_v55, %v3641_v48  ;;  %v3708_v46 = vrot.slane %v3665_v34, 4  ;;  %v3744_v55 = vrot.slane %v8366_v7, 4 }
 0x2cf   :  { %12563 = vst [vmem:[#allocation177_spill] sm:$0xff] %v8351_v13  ;;  %v3736_v38 = vrot.slane %v3693_v6, 4 }
 0x2d0   :  { %v610_v21 = vpop.permute.xlu1 %609  ;;  %12565 = vst [vmem:[#allocation179_spill] sm:$0xff] %v8366_v7 }
 0x2d1   :  { %v3670_v58 = vrot.slane %v610_v21, 4  ;;  %v3673_v40 = vsel %vm12378_vm0, %v610_v21, %v3672_v33  ;;  %v8376_v33 = vperm.slane %v3683_v52, %v7276_v49 }
 0x2d2   :  { %v8362_v20 = vperm.slane %v3673_v40, %v7130_v63 }
 0x2d3   :  { %v3671_v12 = vsel %vm12378_vm0, %v3670_v58, %v8149_v15  ;;  %12566 = vst [vmem:[#allocation180_spill] sm:$0xff] %v8376_v33 }
 0x2d4   :  { %12564 = vst [vmem:[#allocation178_spill] sm:$0xff] %v8362_v20  ;;  %v3677_v25 = vperm.slane %v3671_v12, %v7130_v63  ;;  %v3721_v19 = vsel %vm12378_vm0, %v8362_v20, %v3720_v61  ;;  %6709 = vset.pattern.permute.xlu2 %v6941_v10  ;;  %v12581_v20 = vld [vmem:[#allocation40_spill] sm:$0xff] }
 0x2d5   :  { %v8379_v48 = vperm.slane %v3721_v19, %v7276_v49  ;;  %v4656_v41 = vrot.slane %v12581_v20, 4 }
 0x2d6   :  { %v3706_v42 = vrot.slane %v3677_v25, 4  ;;  %6708 = vset.pattern.permute.xlu1 %v6911_v2  ;;  %v3709_v15 = vsel %vm12378_vm0, %v3677_v25, %v3708_v46  ;;  %v3732_v46 = vrot.slane %v8376_v33, 4 }
 0x2d7   :  { %12567 = vst [vmem:[#allocation181_spill] sm:$0xff] %v8379_v48  ;;  %v3717_v21 = vperm.slane %v3709_v15, %v7276_v49  ;;  %v8388_v40 = vsel %vm12378_vm0, %v8379_v48, %v3744_v55  ;;  %v8410_v15 = vpop.permute.xlu2 %628  ;;  %v12574_v55 = vld [vmem:[#allocation15_spill] sm:$0xff] }
 0x2d8   :  { %v3707_v58 = vsel %vm12378_vm0, %v3706_v42, %v3665_v34  ;;  %12568 = vst [vmem:[#allocation182_spill] sm:$0xff] %v8388_v40  ;;  %v12573_v34 = vld [vmem:[#allocation6_spill] sm:$0xff] }
 0x2d9   :  { %v8391_v61 = vperm.slane %v3707_v58, %v7276_v49  ;;  %v8394_v52 = vsel %vm12378_vm0, %v3717_v21, %v3736_v38  ;;  %v3734_v12 = vrot.slane %v3717_v21, 4  ;;  %v1966_v58 = vrot.slane %v7554_v22, 4 }
 0x2da   :  { %12570 = vst [vmem:[#allocation184_spill] sm:$0xff] %v8394_v52 }
 0x2db   :  { %12569 = vst [vmem:[#allocation183_spill] sm:$0xff] %v8391_v61  ;;  %v8398_v25 = vsel %vm12378_vm0, %v3734_v12, %v3693_v6  ;;  %v8402_v19 = vsel %vm12378_vm0, %v8391_v61, %v3732_v46 }
 0x2dc   :  { %12571 = vst [vmem:[#allocation185_spill] sm:$0xff] %v8398_v25  ;;  %740 = vperm.xlu2 %6709, %v8021_v28  }
 0x2dd   :  { %12572 = vst [vmem:[#allocation186_spill] sm:$0xff] %v8402_v19 }
 0x2de   :  { %734 = vperm.xlu1 %6708, %v8021_v28  }
 0x2df   :  { %v648_v6 = vpop.permute.xlu2 %647 }
 0x2e0   :  { %v623_v42 = vpop.permute.xlu1 %622  ;;  %v1967_v46 = vsel %vm12378_vm0, %v1966_v58, %v648_v6  ;;  %v1968_v60 = vrot.slane %v648_v6, 4 }
 0x2e1   :  { %v8431_v29 = vperm.slane %v1967_v46, %v7130_v63 }
 0x2e2   :  { %v1969_v62 = vsel %vm12378_vm0, %v7554_v22, %v1968_v60  ;;  %v792_v60 = vperm.slane %v8018_v39, 7 }
 0x2e3   :  { %v8441_v6 = vperm.slane %v1969_v62, %v7130_v63 }
 0x2e4   :  { %6711 = vset.pattern.permute.xlu2 %v6935_v8 }
 0x2e5   :  { %12576 = vst [vmem:[#allocation15_spill] sm:$0xff] %v8441_v6 }
 0x2e6   :  { %6710 = vset.pattern.permute.xlu1 %v6907_v1 }
 0x2e7   :  { %v8418_v28 = vpop.permute.xlu2 %659 }
 0x2ec   :  { %753 = vperm.xlu2 %6711, %v12573_v34  }
 0x2ee   :  { %747 = vperm.xlu1 %6710, %v12573_v34  }
 0x2f0   :  { %v8415_v21 = vpop.permute.xlu1 %640 }
 0x2f4   :  { %6713 = vset.pattern.permute.xlu2 %v6907_v1 }
 0x2f6   :  { %6712 = vset.pattern.permute.xlu1 %v6941_v10  ;;  %v8425_v12 = vpop.permute.xlu2 %678 }
 0x2fc   :  { %772 = vperm.xlu2 %6713, %v12574_v55  }
 0x2fe   :  { %765 = vperm.xlu1 %6712, %v12573_v34   ;;  %v1956_v34 = vrot.slane %v623_v42, 4 }
 0x300   :  { %v8422_v38 = vpop.permute.xlu1 %653 }
 0x301   :  { %v2864_v61 = vrot.slane %v8422_v38, 4 }
 0x304   :  { %6715 = vset.pattern.permute.xlu2 %v6911_v2 }
 0x306   :  { %6714 = vset.pattern.permute.xlu1 %v6935_v8  ;;  %v8444_v58 = vpop.permute.xlu2 %690 }
 0x30c   :  { %784 = vperm.xlu2 %6715, %v12574_v55  }
 0x30e   :  { %778 = vperm.xlu1 %6714, %v12574_v55   ;;  %v2002_v55 = vrot.slane %v8431_v29, 4 }
 0x310   :  { %v673_v54 = vpop.permute.xlu1 %672 }
 0x311   :  { %v1954_v26 = vrot.slane %v673_v54, 4  ;;  %v1957_v40 = vsel %vm12378_vm0, %v673_v54, %v1956_v34 }
 0x312   :  { %v8437_v5 = vperm.slane %v1957_v40, %v7130_v63 }
 0x313   :  { %v1955_v24 = vsel %vm12378_vm0, %v1954_v26, %v623_v42 }
 0x314   :  { %12575 = vst [vmem:[#allocation6_spill] sm:$0xff] %v8437_v5  ;;  %v8447_v46 = vperm.slane %v1955_v24, %v7130_v63  ;;  %v2016_v22 = vrot.slane %v8437_v5, 4  ;;  %6717 = vset.pattern.permute.xlu2 %v6935_v8 }
 0x316   :  { %6716 = vset.pattern.permute.xlu1 %v6907_v1  ;;  %v8454_v54 = vsel %vm12378_vm0, %v2002_v55, %v8447_v46  ;;  %v8458_v26 = vsel %vm12378_vm0, %v8441_v6, %v2016_v22  ;;  %v8461_v62 = vpop.permute.xlu2 %709  ;;  %v12577_v55 = vld [vmem:[#allocation17_spill] sm:$0xff] }
 0x317   :  { %v3758_v24 = vrot.slane %v8461_v62, 4 }
 0x319   :  { %v3759_v34 = vsel %vm12378_vm0, %v3758_v24, %v8418_v28 }
 0x31a   :  { %v8476_v39 = vperm.slane %v3759_v34, %v7130_v63  ;;  %v12580_v34 = vld [vmem:[#allocation44_spill] sm:$0xff] }
 0x31c   :  { %803 = vperm.xlu2 %6717, %v792_v60   ;;  %12579 = vst [vmem:[#allocation187_spill] sm:$0xff] %v8476_v39 }
 0x31e   :  { %797 = vperm.xlu1 %6716, %v792_v60  }
 0x320   :  { %v8464_v40 = vpop.permute.xlu1 %684 }
 0x321   :  { %v3746_v42 = vrot.slane %v8464_v40, 4 }
 0x323   :  { %v3747_v7 = vsel %vm12378_vm0, %v3746_v42, %v12577_v55 }
 0x324   :  { %v8472_v22 = vperm.slane %v3747_v7, %v7130_v63  ;;  %6719 = vset.pattern.permute.xlu2 %v6941_v10  ;;  %v4644_v7 = vrot.slane %v8415_v21, 4 }
 0x326   :  { %12578 = vst [vmem:[#allocation17_spill] sm:$0xff] %v8472_v22  ;;  %v3796_v13 = vrot.slane %v8472_v22, 4  ;;  %6718 = vset.pattern.permute.xlu1 %v6911_v2  ;;  %v4645_v42 = vsel %vm12378_vm0, %v8444_v58, %v4644_v7  ;;  %v2850_v22 = vrot.slane %v8425_v12, 4 }
 0x327   :  { %v8492_v43 = vperm.slane %v4645_v42, %v7130_v63  ;;  %v8507_v42 = vpop.permute.xlu2 %722 }
 0x328   :  { %v8482_v48 = vsel %vm12378_vm0, %v8476_v39, %v3796_v13  ;;  %v2851_v23 = vsel %vm12378_vm0, %v2850_v22, %v8410_v15 }
 0x329   :  { %12582 = vst [vmem:[#allocation44_spill] sm:$0xff] %v8492_v43  ;;  %v4704_v19 = vrot.slane %v8492_v43, 4 }
 0x32c   :  { %815 = vperm.xlu2 %6719, %v792_v60  }
 0x32e   :  { %809 = vperm.xlu1 %6718, %v792_v60  }
 0x330   :  { %v704_v24 = vpop.permute.xlu1 %703 }
 0x331   :  { %v2862_v39 = vrot.slane %v704_v24, 4  ;;  %v2865_v16 = vsel %vm12378_vm0, %v704_v24, %v2864_v61  ;;  %v729_v24 = vpop.permute.xlu0 %728 }
 0x333   :  { %v2863_v51 = vsel %vm12378_vm0, %v2862_v39, %v8422_v38 }
 0x334   :  { %6721 = vset.pattern.permute.xlu2 %v6911_v2  ;;  %v2869_v35 = vperm.slane %v2863_v51, %v7130_v63 }
 0x336   :  { %6720 = vset.pattern.permute.xlu1 %v6935_v8 }
 0x33c   :  { %834 = vperm.xlu2 %6721, %v12580_v34  }
 0x33e   :  { %828 = vperm.xlu1 %6720, %v12580_v34  }
 0x340   :  { %v716_v13 = vpop.permute.xlu1 %715 }
 0x341   :  { %v4657_v60 = vsel %vm12378_vm0, %v716_v13, %v4656_v41  ;;  %v741_v41 = vpop.permute.xlu2 %740  ;;  %v4654_v39 = vrot.slane %v716_v13, 4 }
 0x342   :  { %v8498_v25 = vperm.slane %v4657_v60, %v7130_v63  ;;  %v4668_v14 = vrot.slane %v741_v41, 4 }
 0x343   :  { %v4655_v13 = vsel %vm12378_vm0, %v4654_v39, %v12581_v20 }
 0x344   :  { %12583 = vst [vmem:[#allocation40_spill] sm:$0xff] %v8498_v25  ;;  %6723 = vset.pattern.permute.xlu2 %v6907_v1  ;;  %v8503_v7 = vsel %vm12378_vm0, %v8498_v25, %v4704_v19  ;;  %v12584_v25 = vld [vmem:[#allocation7_spill] sm:$0xff] }
 0x346   :  { %6722 = vset.pattern.permute.xlu1 %v6941_v10 }
 0x349   :  { %v754_v60 = vpop.permute.xlu2 %753 }
 0x34c   :  { %847 = vperm.xlu2 %6723, %v8034_v56  }
 0x34e   :  { %840 = vperm.xlu1 %6722, %v12580_v34  }
 0x350   :  { %v8515_v19 = vpop.permute.xlu1 %734 }
 0x354   :  { %6725 = vset.pattern.permute.xlu2 %v6941_v10 }
 0x356   :  { %6724 = vset.pattern.permute.xlu1 %v6911_v2  ;;  %v8517_v43 = vpop.permute.xlu2 %772 }
 0x35c   :  { %865 = vperm.xlu2 %6725, %v8034_v56  }
 0x35e   :  { %859 = vperm.xlu1 %6724, %v8034_v56   ;;  %v2852_v56 = vrot.slane %v8410_v15, 4  ;;  %v8547_v15 = vperm.slane %v2865_v16, %v7130_v63  ;;  %v12588_v16 = vld [vmem:[#allocation43_spill] sm:$0xff] }
 0x35f   :  { %v4666_v5 = vrot.slane %v12588_v16, 4  ;;  %v4669_v6 = vsel %vm12378_vm0, %v12588_v16, %v4668_v14  ;;  %v8577_v14 = vperm.slane %v4655_v13, %v7130_v63 }
 0x360   :  { %v8521_v34 = vpop.permute.xlu1 %747  ;;  %v2853_v33 = vsel %vm12378_vm0, %v8425_v12, %v2852_v56  ;;  %v4642_v12 = vrot.slane %v8444_v58, 4  ;;  %v2857_v56 = vperm.slane %v2851_v23, %v7130_v63  ;;  %12586 = vst [vmem:[#allocation188_spill] sm:$0xff] %v8547_v15  ;;  %v2876_v58 = vrot.slane %v729_v24, 4 }
 0x361   :  { %v8541_v17 = vperm.slane %v2853_v33, %v7130_v63  ;;  %v2898_v33 = vrot.slane %v2869_v35, 4  ;;  %12591 = vst [vmem:[#allocation189_spill] sm:$0xff] %v8577_v14 }
 0x362   :  { %v4643_v22 = vsel %vm12378_vm0, %v4642_v12, %v8415_v21  ;;  %v2900_v0 = vrot.slane %v2857_v56, 4  ;;  %v2888_v12 = vrot.slane %v754_v60, 4 }
 0x363   :  { %12585 = vst [vmem:[#allocation7_spill] sm:$0xff] %v8541_v17  ;;  %v2912_v61 = vrot.slane %v8541_v17, 4  ;;  %v8558_v17 = vperm.slane %v4643_v22, %v7130_v63 }
 0x364   :  { %6727 = vset.pattern.permute.xlu2 %v6935_v8  ;;  %v2901_v21 = vsel %vm12378_vm0, %v2869_v35, %v2900_v0 }
 0x365   :  { %v2913_v51 = vsel %vm12378_vm0, %v8547_v15, %v2912_v61  ;;  %12589 = vst [vmem:[#allocation18_spill] sm:$0xff] %v8558_v17  ;;  %v2899_v61 = vsel %vm12378_vm0, %v2898_v33, %v2857_v56  ;;  %v2909_v0 = vperm.slane %v2901_v21, %v7276_v49  ;;  %v4692_v20 = vrot.slane %v8558_v17, 4 }
 0x366   :  { %6726 = vset.pattern.permute.xlu1 %v6907_v1  ;;  %v8523_v52 = vpop.permute.xlu2 %784  ;;  %v8569_v15 = vperm.slane %v2913_v51, %v7276_v49  ;;  %v8583_v56 = vperm.slane %v4669_v6, %v7130_v63  ;;  %v1980_v6 = vrot.slane %v8507_v42, 4 }
 0x367   :  { %v2952_v16 = vrot.slane %v2909_v0, 4 }
 0x368   :  { %12590 = vst [vmem:[#allocation43_spill] sm:$0xff] %v8569_v15  ;;  %v4728_v17 = vrot.slane %v8583_v56, 4 }
 0x369   :  { %12593 = vst [vmem:[#allocation191_spill] sm:$0xff] %v8583_v56 }
 0x36c   :  { %878 = vperm.xlu2 %6727, %v12584_v25  }
 0x36e   :  { %872 = vperm.xlu1 %6726, %v12584_v25  }
 0x370   :  { %v8538_v53 = vpop.permute.xlu1 %765 }
 0x374   :  { %6729 = vset.pattern.permute.xlu2 %v6907_v1 }
 0x376   :  { %v804_v59 = vpop.permute.xlu2 %803  ;;  %6728 = vset.pattern.permute.xlu1 %v6941_v10 }
 0x377   :  { %v2886_v38 = vrot.slane %v804_v59, 4  ;;  %v2889_v22 = vsel %vm12378_vm0, %v804_v59, %v2888_v12  ;;  %v4680_v59 = vrot.slane %v8538_v53, 4 }
 0x379   :  { %v2887_v23 = vsel %vm12378_vm0, %v2886_v38, %v754_v60  ;;  %v4667_v60 = vsel %vm12378_vm0, %v4666_v5, %v741_v41 }
 0x37a   :  { %v2893_v38 = vperm.slane %v2887_v23, %v7130_v63  ;;  %v8598_v51 = vperm.slane %v4667_v60, %v7130_v63 }
 0x37c   :  { %897 = vperm.xlu2 %6729, %v12587_v4   ;;  %v2922_v5 = vrot.slane %v2893_v38, 4  ;;  %12596 = vst [vmem:[#allocation194_spill] sm:$0xff] %v8598_v51 }
 0x37e   :  { %890 = vperm.xlu1 %6728, %v12584_v25  }
 0x380   :  { %v779_v3 = vpop.permute.xlu1 %778 }
 0x381   :  { %v2874_v25 = vrot.slane %v779_v3, 4  ;;  %v2877_v35 = vsel %vm12378_vm0, %v779_v3, %v2876_v58  ;;  %v8588_v3 = vperm.slane %v2899_v61, %v7276_v49  ;;  %v8591_v58 = vperm.slane %v2889_v22, %v7130_v63 }
 0x382   :  { %v8580_v39 = vperm.slane %v2877_v35, %v7130_v63  ;;  %v4693_v22 = vsel %vm12378_vm0, %v8577_v14, %v4692_v20 }
 0x383   :  { %v2875_v33 = vsel %vm12378_vm0, %v2874_v25, %v729_v24  ;;  %12594 = vst [vmem:[#allocation192_spill] sm:$0xff] %v8588_v3  ;;  %v2960_v24 = vrot.slane %v8569_v15, 4 }
 0x384   :  { %12592 = vst [vmem:[#allocation190_spill] sm:$0xff] %v8580_v39  ;;  %v2881_v41 = vperm.slane %v2875_v33, %v7130_v63  ;;  %v2936_v23 = vrot.slane %v8580_v39, 4  ;;  %6731 = vset.pattern.permute.xlu2 %v6911_v2  ;;  %v2948_v33 = vrot.slane %v8588_v3, 4 }
 0x385   :  { %12595 = vst [vmem:[#allocation193_spill] sm:$0xff] %v8591_v58 }
 0x386   :  { %v2924_v21 = vrot.slane %v2881_v41, 4  ;;  %v816_v13 = vpop.permute.xlu2 %815  ;;  %6730 = vset.pattern.permute.xlu1 %v6935_v8  ;;  %v2923_v12 = vsel %vm12378_vm0, %v2922_v5, %v2881_v41  ;;  %v2937_v61 = vsel %vm12378_vm0, %v8591_v58, %v2936_v23 }
 0x387   :  { %v4678_v25 = vrot.slane %v816_v13, 4  ;;  %v4681_v35 = vsel %vm12378_vm0, %v816_v13, %v4680_v59  ;;  %v8609_v60 = vperm.slane %v2923_v12, %v7276_v49  ;;  %v8618_v41 = vperm.slane %v2937_v61, %v7276_v49 }
 0x388   :  { %v8614_v15 = vperm.slane %v4681_v35, %v7130_v63  ;;  %v2925_v5 = vsel %vm12378_vm0, %v2893_v38, %v2924_v21  ;;  %v8628_v13 = vperm.slane %v4693_v22, %v7276_v49  ;;  %v4716_v12 = vrot.slane %v8598_v51, 4 }
 0x389   :  { %12597 = vst [vmem:[#allocation195_spill] sm:$0xff] %v8609_v60  ;;  %v4679_v20 = vsel %vm12378_vm0, %v4678_v25, %v8538_v53  ;;  %v2933_v59 = vperm.slane %v2925_v5, %v7276_v49  ;;  %v8625_v23 = vsel %vm12378_vm0, %v8609_v60, %v2948_v33  ;;  %v4713_v53 = vperm.slane %v8503_v7, %v7276_v49 }
 0x38a   :  { %12598 = vst [vmem:[#allocation196_spill] sm:$0xff] %v8614_v15  ;;  %v8632_v35 = vperm.slane %v4679_v20, %v7130_v63  ;;  %v4729_v38 = vsel %vm12378_vm0, %v8614_v15, %v4728_v17  ;;  %v1981_v21 = vsel %vm12378_vm0, %v8517_v43, %v1980_v6  ;;  %v8646_v22 = vsel %vm12378_vm0, %v8618_v41, %v2960_v24 }
 0x38b   :  { %12599 = vst [vmem:[#allocation197_spill] sm:$0xff] %v8618_v41  ;;  %v8641_v61 = vsel %vm12378_vm0, %v2933_v59, %v2952_v16  ;;  %v2950_v25 = vrot.slane %v2933_v59, 4  ;;  %v4744_v6 = vrot.slane %v8628_v13, 4  ;;  %v4737_v16 = vperm.slane %v4729_v38, %v7276_v49 }
 0x38c   :  { %12600 = vst [vmem:[#allocation198_spill] sm:$0xff] %v8625_v23  ;;  %909 = vperm.xlu2 %6731, %v12587_v4   ;;  %v4717_v33 = vsel %vm12378_vm0, %v8632_v35, %v4716_v12  ;;  %v3748_v5 = vrot.slane %v12577_v55, 4  ;;  %v8660_v20 = vperm.slane %v1981_v21, %v7130_v63  ;;  %v4752_v24 = vrot.slane %v4713_v53, 4 }
 0x38d   :  { %12601 = vst [vmem:[#allocation199_spill] sm:$0xff] %v8628_v13  ;;  %v8651_v17 = vsel %vm12378_vm0, %v2950_v25, %v2909_v0  ;;  %v8654_v7 = vperm.slane %v4717_v33, %v7276_v49  ;;  %v1978_v59 = vrot.slane %v8517_v43, 4  ;;  %v1992_v0 = vrot.slane %v8521_v34, 4 }
 0x38e   :  { %12602 = vst [vmem:[#allocation200_spill] sm:$0xff] %v8632_v35  ;;  %903 = vperm.xlu1 %6730, %v12587_v4   ;;  %v4750_v25 = vrot.slane %v4737_v16, 4  ;;  %v8670_v38 = vsel %vm12378_vm0, %v4737_v16, %v4752_v24  ;;  %v2040_v56 = vrot.slane %v8660_v20, 4  ;;  %v2025_v43 = vperm.slane %v8458_v26, %v7276_v49 }
 0x38f   :  { %12603 = vst [vmem:[#allocation201_spill] sm:$0xff] %v8641_v61  ;;  %v8667_v12 = vsel %vm12378_vm0, %v8654_v7, %v4744_v6  ;;  %v3749_v6 = vsel %vm12378_vm0, %v8464_v40, %v3748_v5  ;;  %v1979_v16 = vsel %vm12378_vm0, %v1978_v59, %v8507_v42 }
 0x390   :  { %12604 = vst [vmem:[#allocation202_spill] sm:$0xff] %v8646_v22  ;;  %v798_v33 = vpop.permute.xlu1 %797  ;;  %v8680_v15 = vsel %vm12378_vm0, %v4750_v25, %v4713_v53  ;;  %v3760_v53 = vrot.slane %v8418_v28, 4  ;;  %v3757_v40 = vperm.slane %v3749_v6, %v7130_v63  ;;  %v8698_v5 = vperm.slane %v1979_v16, %v7130_v63 }
 0x391   :  { %12605 = vst [vmem:[#allocation203_spill] sm:$0xff] %v8651_v17  ;;  %v1990_v55 = vrot.slane %v798_v33, 4  ;;  %v1993_v21 = vsel %vm12378_vm0, %v798_v33, %v1992_v0  ;;  %v3772_v33 = vrot.slane %v8515_v19, 4  ;;  %v3770_v6 = vrot.slane %v8523_v52, 4 }
 0x392   :  { %12606 = vst [vmem:[#allocation204_spill] sm:$0xff] %v8654_v7  ;;  %v8675_v4 = vperm.slane %v1993_v21, %v7130_v63  ;;  %v3761_v59 = vsel %vm12378_vm0, %v8461_v62, %v3760_v53  ;;  %v12625_v7 = vld [vmem:[#allocation21_spill] sm:$0xff] }
 0x393   :  { %12607 = vst [vmem:[#allocation205_spill] sm:$0xff] %v8660_v20  ;;  %v1991_v24 = vsel %vm12378_vm0, %v1990_v55, %v8521_v34  ;;  %v2064_v34 = vrot.slane %v2025_v43, 4  ;;  %v3769_v16 = vperm.slane %v3761_v59, %v7130_v63  ;;  %v3773_v62 = vsel %vm12378_vm0, %v8523_v52, %v3772_v33 }
 0x394   :  { %12608 = vst [vmem:[#allocation206_spill] sm:$0xff] %v8667_v12  ;;  %v8689_v0 = vperm.slane %v1991_v24, %v7130_v63  ;;  %6733 = vset.pattern.permute.xlu2 %v6935_v8  ;;  %v2041_v26 = vsel %vm12378_vm0, %v8675_v4, %v2040_v56  ;;  %v917_v56 = vperm.slane %v8031_v31, 4  ;;  %v3808_v24 = vrot.slane %v3757_v40, 4  ;;  %v12614_v31 = vld [vmem:[#allocation19_spill] sm:$0xff] }
 0x395   :  { %12609 = vst [vmem:[#allocation207_spill] sm:$0xff] %v8670_v38  ;;  %v2049_v25 = vperm.slane %v2041_v26, %v7276_v49  ;;  %v3784_v53 = vrot.slane %v12614_v31, 4 }
 0x396   :  { %12610 = vst [vmem:[#allocation208_spill] sm:$0xff] %v8675_v4  ;;  %v2026_v42 = vrot.slane %v8689_v0, 4  ;;  %6732 = vset.pattern.permute.xlu1 %v6907_v1  ;;  %v3809_v38 = vsel %vm12378_vm0, %v3769_v16, %v3808_v24 }
 0x397   :  { %12611 = vst [vmem:[#allocation209_spill] sm:$0xff] %v8680_v15  ;;  %v8711_v55 = vsel %vm12378_vm0, %v2049_v25, %v2064_v34  ;;  %v2062_v21 = vrot.slane %v2049_v25, 4  ;;  %v3806_v34 = vrot.slane %v3769_v16, 4  ;;  %v3781_v25 = vperm.slane %v3773_v62, %v7130_v63 }
 0x398   :  { %v8708_v28 = vsel %vm12378_vm0, %v2026_v42, %v8698_v5  ;;  %12612 = vst [vmem:[#allocation210_spill] sm:$0xff] %v8711_v55  ;;  %v3771_v42 = vsel %vm12378_vm0, %v3770_v6, %v8515_v19  ;;  %v3805_v16 = vperm.slane %v8482_v48, %v7276_v49 }
 0x399   :  { %v8718_v26 = vsel %vm12378_vm0, %v2062_v21, %v2025_v43  ;;  %v8726_v59 = vperm.slane %v3771_v42, %v7130_v63  ;;  %v3807_v52 = vsel %vm12378_vm0, %v3806_v34, %v3757_v40  ;;  %v3817_v21 = vperm.slane %v3809_v38, %v7276_v49 }
 0x39a   :  { %12613 = vst [vmem:[#allocation211_spill] sm:$0xff] %v8718_v26  ;;  %v3832_v12 = vrot.slane %v3781_v25, 4  ;;  %v8735_v62 = vperm.slane %v3807_v52, %v7276_v49 }
 0x39b   :  { %12615 = vst [vmem:[#allocation19_spill] sm:$0xff] %v8726_v59  ;;  %v3820_v24 = vrot.slane %v8726_v59, 4  ;;  %v3856_v42 = vrot.slane %v3817_v21, 4 }
 0x39c   :  { %928 = vperm.xlu2 %6733, %v917_v56   ;;  %12616 = vst [vmem:[#allocation212_spill] sm:$0xff] %v8735_v62 }
 0x39e   :  { %922 = vperm.xlu1 %6732, %v917_v56  }
 0x3a0   :  { %v810_v15 = vpop.permute.xlu1 %809 }
 0x3a1   :  { %v3782_v43 = vrot.slane %v810_v15, 4  ;;  %v3785_v33 = vsel %vm12378_vm0, %v810_v15, %v3784_v53 }
 0x3a2   :  { %v3793_v19 = vperm.slane %v3785_v33, %v7130_v63 }
 0x3a3   :  { %v3783_v6 = vsel %vm12378_vm0, %v3782_v43, %v12614_v31  ;;  %v3848_v43 = vrot.slane %v3805_v16, 4 }
 0x3a4   :  { %v8741_v40 = vperm.slane %v3783_v6, %v7130_v63  ;;  %v3830_v15 = vrot.slane %v3793_v19, 4  ;;  %6735 = vset.pattern.permute.xlu2 %v6941_v10  ;;  %v3833_v38 = vsel %vm12378_vm0, %v3793_v19, %v3832_v12  ;;  %v3852_v12 = vrot.slane %v8735_v62, 4 }
 0x3a5   :  { %v3841_v53 = vperm.slane %v3833_v38, %v7276_v49 }
 0x3a6   :  { %12617 = vst [vmem:[#allocation213_spill] sm:$0xff] %v8741_v40  ;;  %6734 = vset.pattern.permute.xlu1 %v6911_v2  ;;  %v3831_v31 = vsel %vm12378_vm0, %v3830_v15, %v3781_v25  ;;  %v3821_v48 = vsel %vm12378_vm0, %v8741_v40, %v3820_v24 }
 0x3a7   :  { %v8751_v34 = vperm.slane %v3831_v31, %v7276_v49  ;;  %v3829_v52 = vperm.slane %v3821_v48, %v7276_v49  ;;  %v8755_v33 = vsel %vm12378_vm0, %v3841_v53, %v3856_v42  ;;  %v3854_v19 = vrot.slane %v3841_v53, 4  ;;  %v8772_v42 = vpop.permute.xlu2 %834  ;;  %v12624_v53 = vld [vmem:[#allocation46_spill] sm:$0xff] }
 0x3a8   :  { %12619 = vst [vmem:[#allocation215_spill] sm:$0xff] %v8755_v33 }
 0x3a9   :  { %12618 = vst [vmem:[#allocation214_spill] sm:$0xff] %v8751_v34  ;;  %v3846_v6 = vrot.slane %v3829_v52, 4  ;;  %v8759_v38 = vsel %vm12378_vm0, %v3829_v52, %v3848_v43  ;;  %v8763_v25 = vsel %vm12378_vm0, %v8751_v34, %v3852_v12  ;;  %v8766_v24 = vsel %vm12378_vm0, %v3854_v19, %v3817_v21  ;;  %v854_v34 = vpop.permute.xlu0 %853 }
 0x3aa   :  { %12620 = vst [vmem:[#allocation216_spill] sm:$0xff] %v8759_v38  ;;  %v3860_v19 = vrot.slane %v8772_v42, 4  ;;  %v12628_v38 = vld [vmem:[#allocation8_spill] sm:$0xff]  ;;  %v2976_v58 = vrot.slane %v854_v34, 4 }
 0x3ab   :  { %12621 = vst [vmem:[#allocation217_spill] sm:$0xff] %v8763_v25  ;;  %v8769_v15 = vsel %vm12378_vm0, %v3846_v6, %v3805_v16 }
 0x3ac   :  { %12622 = vst [vmem:[#allocation218_spill] sm:$0xff] %v8766_v24  ;;  %940 = vperm.xlu2 %6735, %v917_v56   ;;  %v3861_v51 = vsel %vm12378_vm0, %v12625_v7, %v3860_v19 }
 0x3ad   :  { %12623 = vst [vmem:[#allocation219_spill] sm:$0xff] %v8769_v15  ;;  %v8815_v25 = vperm.slane %v3861_v51, %v7130_v63  ;;  %v12629_v15 = vld [vmem:[#allocation20_spill] sm:$0xff] }
 0x3ae   :  { %934 = vperm.xlu1 %6734, %v917_v56  }
 0x3af   :  { %v8776_v31 = vpop.permute.xlu2 %847  ;;  %12626 = vst [vmem:[#allocation46_spill] sm:$0xff] %v8815_v25  ;;  %v3920_v51 = vrot.slane %v8815_v25, 4 }
 0x3b0   :  { %v8780_v21 = vpop.permute.xlu1 %828 }
 0x3b1   :  { %v2964_v39 = vrot.slane %v8780_v21, 4 }
 0x3b4   :  { %6737 = vset.pattern.permute.xlu2 %v6911_v2 }
 0x3b6   :  { %6736 = vset.pattern.permute.xlu1 %v6935_v8 }
 0x3b7   :  { %v8782_v16 = vpop.permute.xlu2 %865 }
 0x3bc   :  { %959 = vperm.xlu2 %6737, %v12624_v53  }
 0x3be   :  { %953 = vperm.xlu1 %6736, %v12624_v53  }
 0x3c0   :  { %v8786_v56 = vpop.permute.xlu1 %840 }
 0x3c4   :  { %6739 = vset.pattern.permute.xlu2 %v6907_v1 }
 0x3c6   :  { %6738 = vset.pattern.permute.xlu1 %v6941_v10  ;;  %v8788_v48 = vpop.permute.xlu2 %878 }
 0x3c7   :  { %v2965_v17 = vsel %vm12378_vm0, %v8788_v48, %v2964_v39 }
 0x3c8   :  { %v2973_v26 = vperm.slane %v2965_v17, %v7130_v63 }
 0x3ca   :  { %v3024_v3 = vrot.slane %v2973_v26, 4 }
 0x3cc   :  { %972 = vperm.xlu2 %6739, %v8043_v50  }
 0x3ce   :  { %965 = vperm.xlu1 %6738, %v12624_v53  }
 0x3d0   :  { %v8795_v43 = vpop.permute.xlu1 %859 }
 0x3d1   :  { %v3872_v35 = vrot.slane %v8795_v43, 4 }
 0x3d4   :  { %6741 = vset.pattern.permute.xlu2 %v6941_v10 }
 0x3d6   :  { %v8792_v52 = vpop.permute.xlu2 %897  ;;  %6740 = vset.pattern.permute.xlu1 %v6911_v2 }
 0x3d7   :  { %v2078_v12 = vrot.slane %v8792_v52, 4 }
 0x3d9   :  { %v2079_v6 = vsel %vm12378_vm0, %v2078_v12, %v8776_v31 }
 0x3da   :  { %v8804_v53 = vperm.slane %v2079_v6, %v7130_v63 }
 0x3dc   :  { %990 = vperm.xlu2 %6741, %v8043_v50  }
 0x3de   :  { %984 = vperm.xlu1 %6740, %v8043_v50   ;;  %v2114_v50 = vrot.slane %v8804_v53, 4 }
 0x3e0   :  { %v8806_v13 = vpop.permute.xlu1 %872 }
 0x3e1   :  { %v2066_v14 = vrot.slane %v8806_v13, 4 }
 0x3e3   :  { %v2067_v24 = vsel %vm12378_vm0, %v2066_v14, %v7562_v18 }
 0x3e4   :  { %v8819_v12 = vperm.slane %v2067_v24, %v7130_v63  ;;  %6743 = vset.pattern.permute.xlu2 %v6935_v8 }
 0x3e6   :  { %v8822_v6 = vpop.permute.xlu2 %909  ;;  %6742 = vset.pattern.permute.xlu1 %v6907_v1  ;;  %v8827_v19 = vsel %vm12378_vm0, %v2114_v50, %v8819_v12 }
 0x3e7   :  { %v3873_v14 = vsel %vm12378_vm0, %v8822_v6, %v3872_v35  ;;  %v2962_v35 = vrot.slane %v8788_v48, 4  ;;  %v3858_v48 = vrot.slane %v12625_v7, 4 }
 0x3e8   :  { %v8833_v33 = vperm.slane %v3873_v14, %v7130_v63 }
 0x3e9   :  { %v2963_v14 = vsel %vm12378_vm0, %v2962_v35, %v8780_v21 }
 0x3ea   :  { %12627 = vst [vmem:[#allocation21_spill] sm:$0xff] %v8833_v33  ;;  %v8837_v24 = vsel %vm12378_vm0, %v8833_v33, %v3920_v51  ;;  %v8851_v51 = vperm.slane %v2963_v14, %v7130_v63 }
 0x3ec   :  { %1003 = vperm.xlu2 %6743, %v12628_v38   ;;  %12630 = vst [vmem:[#allocation8_spill] sm:$0xff] %v8851_v51  ;;  %v3012_v22 = vrot.slane %v8851_v51, 4 }
 0x3ee   :  { %997 = vperm.xlu1 %6742, %v12628_v38  }
 0x3f0   :  { %v8843_v50 = vpop.permute.xlu1 %890 }
 0x3f4   :  { %6745 = vset.pattern.permute.xlu2 %v6907_v1 }
 0x3f6   :  { %6744 = vset.pattern.permute.xlu1 %v6941_v10  ;;  %v929_v35 = vpop.permute.xlu2 %928 }
 0x3f7   :  { %v2988_v51 = vrot.slane %v929_v35, 4 }
 0x3fc   :  { %1022 = vperm.xlu2 %6745, %v12629_v15  }
 0x3fe   :  { %1015 = vperm.xlu1 %6744, %v12628_v38  }
 0x400   :  { %v904_v25 = vpop.permute.xlu1 %903 }
 0x401   :  { %v2974_v62 = vrot.slane %v904_v25, 4  ;;  %v2977_v23 = vsel %vm12378_vm0, %v904_v25, %v2976_v58 }
 0x402   :  { %v2985_v21 = vperm.slane %v2977_v23, %v7130_v63  ;;  %v3870_v23 = vrot.slane %v8822_v6, 4 }
 0x403   :  { %v2975_v33 = vsel %vm12378_vm0, %v2974_v62, %v854_v34  ;;  %v8869_v62 = vld [vmem:[%s12079_s0 + $0x28] sm:$0xff] }
 0x404   :  { %v8856_v59 = vperm.slane %v2975_v33, %v7130_v63  ;;  %6747 = vset.pattern.permute.xlu2 %v6911_v2  ;;  %v1042_v33 = vperm.slane %v8869_v62, 1  ;;  %v3022_v58 = vrot.slane %v2985_v21, 4  ;;  %v3025_v20 = vsel %vm12378_vm0, %v2985_v21, %v3024_v3 }
 0x405   :  { %v3859_v3 = vsel %vm12378_vm0, %v3858_v48, %v8772_v42 }
 0x406   :  { %12631 = vst [vmem:[#allocation20_spill] sm:$0xff] %v8856_v59  ;;  %6746 = vset.pattern.permute.xlu1 %v6935_v8  ;;  %v3013_v38 = vsel %vm12378_vm0, %v8856_v59, %v3012_v22  ;;  %v8873_v22 = vpop.permute.xlu2 %940  ;;  %v3023_v7 = vsel %vm12378_vm0, %v3022_v58, %v2973_v26  ;;  %v8926_v42 = vperm.slane %v3859_v3, %v7130_v63 }
 0x407   :  { %v3021_v6 = vperm.slane %v3013_v38, %v7276_v49  ;;  %v8922_v26 = vperm.slane %v3023_v7, %v7276_v49  ;;  %v3871_v58 = vsel %vm12378_vm0, %v3870_v23, %v8795_v43 }
 0x408   :  { %12635 = vst [vmem:[#allocation223_spill] sm:$0xff] %v8926_v42  ;;  %v8944_v3 = vperm.slane %v3871_v58, %v7130_v63 }
 0x409   :  { %12634 = vst [vmem:[#allocation222_spill] sm:$0xff] %v8922_v26 }
 0x40a   :  { %12638 = vst [vmem:[#allocation226_spill] sm:$0xff] %v8944_v3 }
 0x40c   :  { %1034 = vperm.xlu2 %6747, %v12629_v15  }
 0x40e   :  { %1028 = vperm.xlu1 %6746, %v12629_v15  }
 0x410   :  { %v8876_v15 = vpop.permute.xlu1 %922 }
 0x414   :  { %6749 = vset.pattern.permute.xlu2 %v6935_v8 }
 0x416   :  { %6748 = vset.pattern.permute.xlu1 %v6907_v1  ;;  %v8878_v14 = vpop.permute.xlu2 %959 }
 0x41c   :  { %1053 = vperm.xlu2 %6749, %v1042_v33  }
 0x41e   :  { %1047 = vperm.xlu1 %6748, %v1042_v33  }
 0x420   :  { %v8880_v40 = vpop.permute.xlu1 %934 }
 0x424   :  { %6751 = vset.pattern.permute.xlu2 %v6941_v10 }
 0x426   :  { %6750 = vset.pattern.permute.xlu1 %v6911_v2  ;;  %v8883_v41 = vpop.permute.xlu2 %972 }
 0x42c   :  { %1065 = vperm.xlu2 %6751, %v1042_v33  }
 0x42e   :  { %1059 = vperm.xlu1 %6750, %v1042_v33   ;;  %v979_v33 = vpop.permute.xlu0 %978 }
 0x42f   :  { %v2986_v59 = vrot.slane %v979_v33, 4  ;;  %v2989_v34 = vsel %vm12378_vm0, %v979_v33, %v2988_v51  ;;  %v3033_v33 = vperm.slane %v3025_v20, %v7276_v49 }
 0x430   :  { %v954_v61 = vpop.permute.xlu1 %953  ;;  %v2997_v60 = vperm.slane %v2989_v34, %v7130_v63 }
 0x431   :  { %v2987_v39 = vsel %vm12378_vm0, %v2986_v59, %v929_v35  ;;  %v3000_v25 = vrot.slane %v954_v61, 4 }
 0x432   :  { %v8903_v17 = vperm.slane %v2987_v39, %v7130_v63  ;;  %v3048_v21 = vrot.slane %v2997_v60, 4 }
 0x434   :  { %6753 = vset.pattern.permute.xlu2 %v6911_v2  ;;  %12632 = vst [vmem:[#allocation220_spill] sm:$0xff] %v8903_v17  ;;  %v3036_v39 = vrot.slane %v8903_v17, 4 }
 0x436   :  { %6752 = vset.pattern.permute.xlu1 %v6935_v8  ;;  %v8892_v55 = vpop.permute.xlu2 %990 }
 0x43c   :  { %1084 = vperm.xlu2 %6753, %v7282_v47  }
 0x43e   :  { %1078 = vperm.xlu1 %6752, %v7282_v47  }
 0x440   :  { %v8907_v51 = vpop.permute.xlu1 %965 }
 0x444   :  { %6755 = vset.pattern.permute.xlu2 %v6907_v1 }
 0x446   :  { %v1004_v4 = vpop.permute.xlu2 %1003  ;;  %6754 = vset.pattern.permute.xlu1 %v6941_v10 }
 0x447   :  { %v2998_v59 = vrot.slane %v1004_v4, 4  ;;  %v3001_v35 = vsel %vm12378_vm0, %v1004_v4, %v3000_v25  ;;  %v3072_v25 = vrot.slane %v3033_v33, 4 }
 0x448   :  { %v3009_v34 = vperm.slane %v3001_v35, %v7130_v63 }
 0x449   :  { %v2999_v11 = vsel %vm12378_vm0, %v2998_v59, %v954_v61  ;;  %v3896_v61 = vrot.slane %v8878_v14, 4  ;;  %v3064_v59 = vrot.slane %v3021_v6, 4 }
 0x44a   :  { %v8919_v32 = vperm.slane %v2999_v11, %v7130_v63  ;;  %v3046_v4 = vrot.slane %v3009_v34, 4  ;;  %v3049_v20 = vsel %vm12378_vm0, %v3009_v34, %v3048_v21  ;;  %v12639_v21 = vld [vmem:[#allocation24_spill] sm:$0xff] }
 0x44b   :  { %v3057_v38 = vperm.slane %v3049_v20, %v7276_v49  ;;  %v3894_v34 = vrot.slane %v12639_v21, 4 }
 0x44c   :  { %12633 = vst [vmem:[#allocation221_spill] sm:$0xff] %v8919_v32  ;;  %1097 = vperm.xlu2 %6755, %v8064_v57   ;;  %v3047_v11 = vsel %vm12378_vm0, %v3046_v4, %v2997_v60  ;;  %v3037_v48 = vsel %vm12378_vm0, %v8919_v32, %v3036_v39  ;;  %v3068_v60 = vrot.slane %v8922_v26, 4  ;;  %v3884_v39 = vrot.slane %v8880_v40, 4 }
 0x44d   :  { %v8937_v35 = vperm.slane %v3047_v11, %v7276_v49  ;;  %v3045_v7 = vperm.slane %v3037_v48, %v7276_v49  ;;  %v8941_v43 = vsel %vm12378_vm0, %v3057_v38, %v3072_v25  ;;  %v3070_v23 = vrot.slane %v3057_v38, 4 }
 0x44e   :  { %12637 = vst [vmem:[#allocation225_spill] sm:$0xff] %v8941_v43  ;;  %1090 = vperm.xlu1 %6754, %v7282_v47   ;;  %v2068_v11 = vrot.slane %v7562_v18, 4  ;;  %v3908_v25 = vrot.slane %v8926_v42, 4  ;;  %v3897_v48 = vsel %vm12378_vm0, %v12639_v21, %v3896_v61 }
 0x44f   :  { %12636 = vst [vmem:[#allocation224_spill] sm:$0xff] %v8937_v35  ;;  %v3062_v4 = vrot.slane %v3045_v7, 4  ;;  %v8951_v20 = vsel %vm12378_vm0, %v3045_v7, %v3064_v59  ;;  %v8957_v58 = vsel %vm12378_vm0, %v8937_v35, %v3068_v60  ;;  %v8960_v47 = vsel %vm12378_vm0, %v3070_v23, %v3033_v33 }
 0x450   :  { %12640 = vst [vmem:[#allocation24_spill] sm:$0xff] %v8951_v20  ;;  %v985_v38 = vpop.permute.xlu1 %984  ;;  %v3909_v7 = vsel %vm12378_vm0, %v8944_v3, %v3908_v25  ;;  %v3895_v60 = vsel %vm12378_vm0, %v3894_v34, %v8878_v14  ;;  %v2069_v61 = vsel %vm12378_vm0, %v8806_v13, %v2068_v11  ;;  %v8980_v23 = vperm.slane %v3897_v48, %v7130_v63 }
 0x451   :  { %12641 = vst [vmem:[#allocation227_spill] sm:$0xff] %v8957_v58  ;;  %v3882_v43 = vrot.slane %v985_v38, 4  ;;  %v3885_v26 = vsel %vm12378_vm0, %v985_v38, %v3884_v39  ;;  %v8969_v18 = vsel %vm12378_vm0, %v3062_v4, %v3021_v6  ;;  %v8988_v21 = vperm.slane %v3909_v7, %v7276_v49 }
 0x452   :  { %12642 = vst [vmem:[#allocation228_spill] sm:$0xff] %v8960_v47  ;;  %v8966_v59 = vperm.slane %v3885_v26, %v7130_v63  ;;  %v3929_v14 = vperm.slane %v8837_v24, %v7276_v49  ;;  %v9000_v34 = vperm.slane %v2069_v61, %v7130_v63  ;;  %v2092_v39 = vrot.slane %v8876_v15, 4 }
 0x453   :  { %12644 = vst [vmem:[#allocation230_spill] sm:$0xff] %v8969_v18  ;;  %v3883_v33 = vsel %vm12378_vm0, %v3882_v43, %v8880_v40  ;;  %v8993_v40 = vperm.slane %v3895_v60, %v7130_v63  ;;  %v2080_v4 = vrot.slane %v8776_v31, 4  ;;  %v3960_v38 = vrot.slane %v8988_v21, 4 }
 0x454   :  { %12643 = vst [vmem:[#allocation229_spill] sm:$0xff] %v8966_v59  ;;  %v8983_v26 = vperm.slane %v3883_v33, %v7130_v63  ;;  %v3944_v6 = vrot.slane %v8966_v59, 4  ;;  %6757 = vset.pattern.permute.xlu2 %v6941_v10  ;;  %v3968_v48 = vrot.slane %v3929_v14, 4  ;;  %v2128_v33 = vrot.slane %v9000_v34, 4 }
 0x455   :  { %12645 = vst [vmem:[#allocation231_spill] sm:$0xff] %v8980_v23  ;;  %v2081_v7 = vsel %vm12378_vm0, %v8792_v52, %v2080_v4  ;;  %v2093_v31 = vsel %vm12378_vm0, %v8883_v41, %v2092_v39  ;;  %v2104_v52 = vrot.slane %v7571_v37, 4  ;;  %v2090_v39 = vrot.slane %v8883_v41, 4 }
 0x456   :  { %12646 = vst [vmem:[#allocation232_spill] sm:$0xff] %v8983_v26  ;;  %v3932_v13 = vrot.slane %v8983_v26, 4  ;;  %6756 = vset.pattern.permute.xlu1 %v6911_v2  ;;  %v3945_v43 = vsel %vm12378_vm0, %v8980_v23, %v3944_v6  ;;  %v9032_v4 = vperm.slane %v2093_v31, %v7130_v63  ;;  %v2178_v58 = vrot.slane %v7591_v45, 4 }
 0x457   :  { %12647 = vst [vmem:[#allocation233_spill] sm:$0xff] %v8988_v21  ;;  %v3953_v11 = vperm.slane %v3945_v43, %v7276_v49  ;;  %v9029_v43 = vperm.slane %v2081_v7, %v7130_v63  ;;  %v2091_v41 = vsel %vm12378_vm0, %v2090_v39, %v8876_v15 }
 0x458   :  { %12648 = vst [vmem:[#allocation234_spill] sm:$0xff] %v8993_v40  ;;  %v3933_v24 = vsel %vm12378_vm0, %v8993_v40, %v3932_v13  ;;  %v2152_v7 = vrot.slane %v9032_v4, 4 }
 0x459   :  { %12649 = vst [vmem:[#allocation235_spill] sm:$0xff] %v9000_v34  ;;  %v9008_v25 = vperm.slane %v3933_v24, %v7276_v49  ;;  %v3966_v60 = vrot.slane %v3953_v11, 4  ;;  %v9021_v6 = vsel %vm12378_vm0, %v3953_v11, %v3968_v48  ;;  %v2129_v24 = vsel %vm12378_vm0, %v9029_v43, %v2128_v33 }
 0x45a   :  { %12652 = vst [vmem:[#allocation238_spill] sm:$0xff] %v9021_v6 }
 0x45b   :  { %12650 = vst [vmem:[#allocation236_spill] sm:$0xff] %v9008_v25  ;;  %v9018_v61 = vsel %vm12378_vm0, %v9008_v25, %v3960_v38  ;;  %v9025_v13 = vsel %vm12378_vm0, %v3966_v60, %v3929_v14  ;;  %v4754_v38 = vrot.slane %v8843_v50, 4  ;;  %v4756_v60 = vrot.slane %v8786_v56, 4 }
 0x45c   :  { %12651 = vst [vmem:[#allocation237_spill] sm:$0xff] %v9018_v61  ;;  %1115 = vperm.xlu2 %6757, %v8064_v57  }
 0x45d   :  { %12653 = vst [vmem:[#allocation239_spill] sm:$0xff] %v9025_v13  ;;  %v4757_v6 = vsel %vm12378_vm0, %v8843_v50, %v4756_v60  ;;  %v4755_v13 = vsel %vm12378_vm0, %v4754_v38, %v8786_v56  ;;  %v9068_v50 = vperm.slane %v2091_v41, %v7130_v63 }
 0x45e   :  { %12654 = vst [vmem:[#allocation240_spill] sm:$0xff] %v9029_v43  ;;  %1109 = vperm.xlu1 %6756, %v8064_v57   ;;  %v9046_v57 = vperm.slane %v2129_v24, %v7276_v49  ;;  %v9074_v60 = vperm.slane %v4757_v6, %v7130_v63 }
 0x45f   :  { %12655 = vst [vmem:[#allocation241_spill] sm:$0xff] %v9032_v4 }
 0x460   :  { %v998_v11 = vpop.permute.xlu1 %997  ;;  %12657 = vst [vmem:[#allocation243_spill] sm:$0xff] %v9046_v57 }
 0x461   :  { %v2102_v14 = vrot.slane %v998_v11, 4  ;;  %v2105_v48 = vsel %vm12378_vm0, %v998_v11, %v2104_v52  ;;  %12660 = vst [vmem:[#allocation244_spill] sm:$0xff] %v9074_v60 }
 0x462   :  { %v9043_v31 = vperm.slane %v2105_v48, %v7130_v63  ;;  %v12658_v48 = vld [vmem:[#allocation45_spill] sm:$0xff] }
 0x463   :  { %v2103_v33 = vsel %vm12378_vm0, %v2102_v14, %v7571_v37  ;;  %v4766_v24 = vrot.slane %v12658_v48, 4  ;;  %v4768_v37 = vrot.slane %v8782_v16, 4  ;;  %v2176_v14 = vrot.slane %v9046_v57, 4 }
 0x464   :  { %12656 = vst [vmem:[#allocation242_spill] sm:$0xff] %v9043_v31  ;;  %v9055_v52 = vperm.slane %v2103_v33, %v7130_v63  ;;  %v2153_v11 = vsel %vm12378_vm0, %v9043_v31, %v2152_v7  ;;  %6759 = vset.pattern.permute.xlu2 %v6935_v8  ;;  %v4761_v7 = vperm.slane %v4755_v13, %v7130_v63  ;;  %v4780_v33 = vrot.slane %v8873_v22, 4 }
 0x465   :  { %v9064_v15 = vperm.slane %v2153_v11, %v7276_v49  ;;  %v4767_v41 = vsel %vm12378_vm0, %v4766_v24, %v8782_v16  ;;  %v4778_v11 = vrot.slane %v8892_v55, 4  ;;  %v4769_v6 = vsel %vm12378_vm0, %v12658_v48, %v4768_v37 }
 0x466   :  { %v2138_v39 = vrot.slane %v9055_v52, 4  ;;  %6758 = vset.pattern.permute.xlu1 %v6907_v1  ;;  %v4816_v13 = vrot.slane %v9074_v60, 4  ;;  %v4773_v61 = vperm.slane %v4767_v41, %v7130_v63  ;;  %v4804_v59 = vrot.slane %v4761_v7, 4 }
 0x467   :  { %12659 = vst [vmem:[#allocation45_spill] sm:$0xff] %v9064_v15  ;;  %v9083_v38 = vsel %vm12378_vm0, %v9064_v15, %v2176_v14  ;;  %v12662_v14 = vld [vmem:[#allocation9_spill] sm:$0xff]  ;;  %v9097_v23 = vperm.slane %v4769_v6, %v7130_v63  ;;  %v4779_v16 = vsel %vm12378_vm0, %v4778_v11, %v8873_v22  ;;  %v4792_v48 = vrot.slane %v8907_v51, 4 }
 0x468   :  { %v9079_v56 = vsel %vm12378_vm0, %v2138_v39, %v9068_v50  ;;  %12661 = vst [vmem:[#allocation245_spill] sm:$0xff] %v9083_v38  ;;  %v4781_v39 = vsel %vm12378_vm0, %v8892_v55, %v4780_v33  ;;  %v4802_v37 = vrot.slane %v4773_v61, 4  ;;  %v4785_v41 = vperm.slane %v4779_v16, %v7130_v63 }
 0x469   :  { %12663 = vst [vmem:[#allocation9_spill] sm:$0xff] %v9097_v23  ;;  %v9102_v24 = vperm.slane %v4781_v39, %v7130_v63  ;;  %v4817_v55 = vsel %vm12378_vm0, %v9097_v23, %v4816_v13  ;;  %v4805_v6 = vsel %vm12378_vm0, %v4773_v61, %v4804_v59 }
 0x46a   :  { %v4803_v39 = vsel %vm12378_vm0, %v4802_v37, %v4761_v7  ;;  %v9117_v25 = vperm.slane %v4817_v55, %v7276_v49  ;;  %v4813_v16 = vperm.slane %v4805_v6, %v7276_v49  ;;  %v4828_v23 = vrot.slane %v4785_v41, 4 }
 0x46b   :  { %12664 = vst [vmem:[#allocation246_spill] sm:$0xff] %v9102_v24  ;;  %v4840_v22 = vrot.slane %v9102_v24, 4 }
 0x46c   :  { %1128 = vperm.xlu2 %6759, %v12662_v14   ;;  %12666 = vst [vmem:[#allocation248_spill] sm:$0xff] %v9117_v25  ;;  %v4856_v37 = vrot.slane %v4813_v16, 4 }
 0x46e   :  { %1122 = vperm.xlu1 %6758, %v12662_v14  }
 0x470   :  { %v1016_v33 = vpop.permute.xlu1 %1015 }
 0x471   :  { %v4790_v60 = vrot.slane %v1016_v33, 4  ;;  %v4793_v21 = vsel %vm12378_vm0, %v1016_v33, %v4792_v48 }
 0x472   :  { %v9113_v11 = vperm.slane %v4793_v21, %v7130_v63  ;;  %v9127_v21 = vperm.slane %v4803_v39, %v7276_v49 }
 0x473   :  { %v4791_v13 = vsel %vm12378_vm0, %v4790_v60, %v8907_v51  ;;  %v4864_v60 = vrot.slane %v9117_v25, 4 }
 0x474   :  { %12665 = vst [vmem:[#allocation247_spill] sm:$0xff] %v9113_v11  ;;  %v4797_v59 = vperm.slane %v4791_v13, %v7130_v63  ;;  %v4841_v61 = vsel %vm12378_vm0, %v9113_v11, %v4840_v22  ;;  %6761 = vset.pattern.permute.xlu2 %v6907_v1  ;;  %v4852_v13 = vrot.slane %v9127_v21, 4 }
 0x475   :  { %12667 = vst [vmem:[#allocation249_spill] sm:$0xff] %v9127_v21  ;;  %v9130_v7 = vperm.slane %v4841_v61, %v7276_v49 }
 0x476   :  { %v4826_v48 = vrot.slane %v4797_v59, 4  ;;  %6760 = vset.pattern.permute.xlu1 %v6941_v10  ;;  %v4829_v51 = vsel %vm12378_vm0, %v4797_v59, %v4828_v23 }
 0x477   :  { %12668 = vst [vmem:[#allocation250_spill] sm:$0xff] %v9130_v7  ;;  %v4837_v55 = vperm.slane %v4829_v51, %v7276_v49  ;;  %v9139_v6 = vsel %vm12378_vm0, %v9130_v7, %v4864_v60 }
 0x478   :  { %v4827_v33 = vsel %vm12378_vm0, %v4826_v48, %v4785_v41  ;;  %12669 = vst [vmem:[#allocation251_spill] sm:$0xff] %v9139_v6  ;;  %v12674_v41 = vld [vmem:[#allocation22_spill] sm:$0xff]  ;;  %v9159_v48 = vpop.permute.xlu2 %1022 }
 0x479   :  { %v9142_v22 = vperm.slane %v4827_v33, %v7276_v49  ;;  %v9145_v39 = vsel %vm12378_vm0, %v4837_v55, %v4856_v37  ;;  %v4854_v23 = vrot.slane %v4837_v55, 4  ;;  %v2180_v3 = vrot.slane %v9159_v48, 4 }
 0x47a   :  { %12671 = vst [vmem:[#allocation253_spill] sm:$0xff] %v9145_v39  ;;  %v2179_v38 = vsel %vm12378_vm0, %v2178_v58, %v9159_v48 }
 0x47b   :  { %12670 = vst [vmem:[#allocation252_spill] sm:$0xff] %v9142_v22  ;;  %v9150_v59 = vsel %vm12378_vm0, %v9142_v22, %v4852_v13  ;;  %v9153_v61 = vsel %vm12378_vm0, %v4854_v23, %v4813_v16  ;;  %v2185_v32 = vperm.slane %v2179_v38, %v7130_v63 }
 0x47c   :  { %12672 = vst [vmem:[#allocation254_spill] sm:$0xff] %v9150_v59  ;;  %1147 = vperm.xlu2 %6761, %v12674_v41  }
 0x47d   :  { %12673 = vst [vmem:[#allocation255_spill] sm:$0xff] %v9153_v61 }
 0x47e   :  { %1140 = vperm.xlu1 %6760, %v12662_v14   ;;  %v1167_v14 = vperm.slane %v8869_v62, 6 }
 0x480   :  { %v9163_v51 = vpop.permute.xlu1 %1028  ;;  %v9165_v60 = vpop.permute.xlu2 %1034 }
 0x481   :  { %v3076_v62 = vrot.slane %v9163_v51, 4  ;;  %v3972_v58 = vrot.slane %v9165_v60, 4 }
 0x484   :  { %6763 = vset.pattern.permute.xlu2 %v6911_v2 }
 0x486   :  { %6762 = vset.pattern.permute.xlu1 %v6935_v8 }
 0x488   :  { %v9170_v16 = vpop.permute.xlu2 %1053 }
 0x489   :  { %v3088_v23 = vrot.slane %v9170_v16, 4 }
 0x48c   :  { %1159 = vperm.xlu2 %6763, %v12674_v41  }
 0x48e   :  { %1153 = vperm.xlu1 %6762, %v12674_v41   ;;  %v9184_v41 = vpop.permute.xlu0 %1103 }
 0x48f   :  { %v3089_v25 = vsel %vm12378_vm0, %v9184_v41, %v3088_v23 }
 0x490   :  { %v9172_v55 = vpop.permute.xlu1 %1047  ;;  %v9174_v37 = vpop.permute.xlu2 %1065  ;;  %v9196_v11 = vperm.slane %v3089_v25, %v7130_v63 }
 0x492   :  { %12676 = vst [vmem:[#allocation256_spill] sm:$0xff] %v9196_v11 }
 0x494   :  { %6765 = vset.pattern.permute.xlu2 %v6935_v8 }
 0x496   :  { %6764 = vset.pattern.permute.xlu1 %v6907_v1 }
 0x498   :  { %v9180_v13 = vpop.permute.xlu2 %1084 }
 0x49c   :  { %1178 = vperm.xlu2 %6765, %v1167_v14  }
 0x49e   :  { %1172 = vperm.xlu1 %6764, %v1167_v14  }
 0x4a0   :  { %v9178_v33 = vpop.permute.xlu1 %1059 }
 0x4a4   :  { %6767 = vset.pattern.permute.xlu2 %v6941_v10 }
 0x4a6   :  { %6766 = vset.pattern.permute.xlu1 %v6911_v2  ;;  %v1098_v61 = vpop.permute.xlu2 %1097 }
 0x4a7   :  { %v2190_v40 = vrot.slane %v1098_v61, 4 }
 0x4ac   :  { %1190 = vperm.xlu2 %6767, %v1167_v14  }
 0x4ae   :  { %1184 = vperm.xlu1 %6766, %v1167_v14  }
 0x4b0   :  { %v9186_v6 = vpop.permute.xlu1 %1078 }
 0x4b1   :  { %v3077_v7 = vsel %vm12378_vm0, %v9186_v6, %v3076_v62 }
 0x4b2   :  { %v9193_v24 = vperm.slane %v3077_v7, %v7130_v63 }
 0x4b4   :  { %12675 = vst [vmem:[#allocation22_spill] sm:$0xff] %v9193_v24  ;;  %v3136_v14 = vrot.slane %v9193_v24, 4  ;;  %6769 = vset.pattern.permute.xlu2 %v6911_v2  ;;  %v2191_v24 = vsel %vm12378_vm0, %v2190_v40, %v9172_v55 }
 0x4b6   :  { %6768 = vset.pattern.permute.xlu1 %v6935_v8  ;;  %v9203_v59 = vsel %vm12378_vm0, %v9196_v11, %v3136_v14  ;;  %v9205_v23 = vpop.permute.xlu2 %1115 }
 0x4b7   :  { %v4878_v25 = vrot.slane %v9205_v23, 4 }
 0x4b9   :  { %v4879_v39 = vsel %vm12378_vm0, %v4878_v25, %v9174_v37 }
 0x4ba   :  { %v9222_v22 = vperm.slane %v4879_v39, %v7130_v63 }
 0x4bc   :  { %1209 = vperm.xlu2 %6769, %v7320_v30   ;;  %12678 = vst [vmem:[#allocation258_spill] sm:$0xff] %v9222_v22 }
 0x4be   :  { %1203 = vperm.xlu1 %6768, %v7320_v30  }
 0x4c0   :  { %v9210_v7 = vpop.permute.xlu1 %1090 }
 0x4c1   :  { %v4866_v62 = vrot.slane %v9210_v7, 4 }
 0x4c3   :  { %v4867_v21 = vsel %vm12378_vm0, %v4866_v62, %v7274_v36  ;;  %v12680_v62 = vld [vmem:[#allocation25_spill] sm:$0xff] }
 0x4c4   :  { %v9218_v14 = vperm.slane %v4867_v21, %v7130_v63  ;;  %6771 = vset.pattern.permute.xlu2 %v6907_v1 }
 0x4c6   :  { %12677 = vst [vmem:[#allocation257_spill] sm:$0xff] %v9218_v14  ;;  %v4916_v42 = vrot.slane %v9218_v14, 4  ;;  %6770 = vset.pattern.permute.xlu1 %v6941_v10  ;;  %v9241_v39 = vpop.permute.xlu2 %1128 }
 0x4c8   :  { %v9228_v26 = vsel %vm12378_vm0, %v9222_v22, %v4916_v42  ;;  %v12679_v42 = vld [vmem:[#allocation10_spill] sm:$0xff]  ;;  %v2192_v22 = vrot.slane %v9172_v55, 4 }
 0x4ca   :  { %v2193_v47 = vsel %vm12378_vm0, %v1098_v61, %v2192_v22  ;;  %v2197_v22 = vperm.slane %v2191_v24, %v7130_v63  ;;  %v2214_v61 = vrot.slane %v7605_v44, 4 }
 0x4cb   :  { %v2201_v18 = vperm.slane %v2193_v47, %v7130_v63 }
 0x4cc   :  { %1222 = vperm.xlu2 %6771, %v8075_v27   ;;  %v2226_v57 = vrot.slane %v2197_v22, 4 }
 0x4cd   :  { %v2238_v55 = vrot.slane %v2201_v18, 4 }
 0x4ce   :  { %1215 = vperm.xlu1 %6770, %v7320_v30  }
 0x4d0   :  { %v9238_v21 = vpop.permute.xlu1 %1109 }
 0x4d1   :  { %v3982_v48 = vrot.slane %v9238_v21, 4 }
 0x4d4   :  { %6773 = vset.pattern.permute.xlu2 %v6941_v10 }
 0x4d6   :  { %6772 = vset.pattern.permute.xlu1 %v6911_v2  ;;  %v1148_v25 = vpop.permute.xlu2 %1147 }
 0x4d7   :  { %v2216_v35 = vrot.slane %v1148_v25, 4 }
 0x4d9   :  { %v2217_v17 = vsel %vm12378_vm0, %v7605_v44, %v2216_v35  ;;  %v2228_v35 = vrot.slane %v2185_v32, 4 }
 0x4da   :  { %v2225_v47 = vperm.slane %v2217_v17, %v7130_v63  ;;  %v3970_v17 = vrot.slane %v9180_v13, 4 }
 0x4dc   :  { %1240 = vperm.xlu2 %6773, %v8075_v27   ;;  %v2262_v43 = vrot.slane %v2225_v47, 4 }
 0x4de   :  { %1234 = vperm.xlu1 %6772, %v8075_v27  }
 0x4e0   :  { %v1123_v30 = vpop.permute.xlu1 %1122 }
 0x4e4   :  { %6775 = vset.pattern.permute.xlu2 %v6935_v8 }
 0x4e6   :  { %6774 = vset.pattern.permute.xlu1 %v6907_v1  ;;  %v9249_v14 = vpop.permute.xlu2 %1159 }
 0x4ec   :  { %1253 = vperm.xlu2 %6775, %v12679_v42  }
 0x4ee   :  { %1247 = vperm.xlu1 %6774, %v12679_v42  }
 0x4f0   :  { %v9247_v27 = vpop.permute.xlu1 %1140 }
 0x4f4   :  { %6777 = vset.pattern.permute.xlu2 %v6907_v1 }
 0x4f6   :  { %6776 = vset.pattern.permute.xlu1 %v6941_v10  ;;  %v9259_v11 = vpop.permute.xlu2 %1178 }
 0x4fc   :  { %1272 = vperm.xlu2 %6777, %v12680_v62  }
 0x4fe   :  { %1265 = vperm.xlu1 %6776, %v12679_v42   ;;  %v2181_v42 = vsel %vm12378_vm0, %v7591_v45, %v2180_v3  ;;  %v2215_v45 = vsel %vm12378_vm0, %v2214_v61, %v1148_v25  ;;  %v2227_v61 = vsel %vm12378_vm0, %v2226_v57, %v2185_v32 }
 0x4ff   :  { %v2189_v40 = vperm.slane %v2181_v42, %v7130_v63  ;;  %v2204_v42 = vrot.slane %v1123_v30, 4  ;;  %v2221_v15 = vperm.slane %v2215_v45, %v7130_v63  ;;  %v9300_v57 = vperm.slane %v2227_v61, %v7276_v49  ;;  %v6833_v61 = vld [vmem:[%s12079_s0 + $0x30] sm:$0xff] }
 0x500   :  { %v9262_v20 = vpop.permute.xlu1 %1153 }
 0x501   :  { %v2240_v3 = vrot.slane %v2189_v40, 4  ;;  %v2239_v44 = vsel %vm12378_vm0, %v2238_v55, %v2189_v40  ;;  %v3983_v55 = vsel %vm12378_vm0, %v3982_v48, %v9178_v33  ;;  %12681 = vst [vmem:[#allocation10_spill] sm:$0xff] %v9300_v57  ;;  %v2250_v45 = vrot.slane %v2221_v15, 4 }
 0x502   :  { %v9293_v40 = vperm.slane %v2239_v44, %v7276_v49  ;;  %v3984_v48 = vrot.slane %v9178_v33, 4  ;;  %v2276_v33 = vrot.slane %v9300_v57, 4 }
 0x503   :  { %v2241_v38 = vsel %vm12378_vm0, %v2201_v18, %v2240_v3  ;;  %v2229_v18 = vsel %vm12378_vm0, %v2197_v22, %v2228_v35  ;;  %v3971_v22 = vsel %vm12378_vm0, %v3970_v17, %v9165_v60  ;;  %v9325_v17 = vperm.slane %v6833_v61, 3 }
 0x504   :  { %6779 = vset.pattern.permute.xlu2 %v6911_v2 }
 0x506   :  { %6778 = vset.pattern.permute.xlu1 %v6935_v8  ;;  %v9278_v24 = vpop.permute.xlu2 %1190 }
 0x50c   :  { %1284 = vperm.xlu2 %6779, %v12680_v62  }
 0x50e   :  { %1278 = vperm.xlu1 %6778, %v12680_v62   ;;  %v3973_v62 = vsel %vm12378_vm0, %v9180_v13, %v3972_v58  ;;  %v2249_v13 = vperm.slane %v2241_v38, %v7276_v49  ;;  %v3989_v38 = vperm.slane %v3983_v55, %v7130_v63  ;;  %v2028_v55 = vrot.slane %v8698_v5, 4 }
 0x50f   :  { %v3977_v5 = vperm.slane %v3971_v22, %v7130_v63 }
 0x510   :  { %v1173_v25 = vpop.permute.xlu1 %1172 }
 0x511   :  { %v2202_v34 = vrot.slane %v1173_v25, 4  ;;  %v2205_v4 = vsel %vm12378_vm0, %v1173_v25, %v2204_v42  ;;  %v2288_v25 = vrot.slane %v2249_v13, 4 }
 0x512   :  { %v2213_v31 = vperm.slane %v2205_v4, %v7130_v63 }
 0x513   :  { %v2203_v32 = vsel %vm12378_vm0, %v2202_v34, %v1123_v30  ;;  %v2237_v30 = vperm.slane %v2229_v18, %v7276_v49 }
 0x514   :  { %v2209_v3 = vperm.slane %v2203_v32, %v7130_v63  ;;  %v2263_v4 = vsel %vm12378_vm0, %v2262_v43, %v2213_v31  ;;  %v2264_v58 = vrot.slane %v2213_v31, 4  ;;  %6781 = vset.pattern.permute.xlu2 %v6935_v8  ;;  %v2284_v31 = vrot.slane %v9293_v40, 4 }
 0x515   :  { %v9310_v34 = vperm.slane %v2263_v4, %v7276_v49 }
 0x516   :  { %v2252_v42 = vrot.slane %v2209_v3, 4  ;;  %v1210_v44 = vpop.permute.xlu2 %1209  ;;  %6780 = vset.pattern.permute.xlu1 %v6907_v1  ;;  %v2251_v35 = vsel %vm12378_vm0, %v2250_v45, %v2209_v3  ;;  %v2265_v43 = vsel %vm12378_vm0, %v2225_v47, %v2264_v58  ;;  %v3985_v45 = vsel %vm12378_vm0, %v9238_v21, %v3984_v48 }
 0x517   :  { %v9319_v60 = vperm.slane %v2251_v35, %v7276_v49  ;;  %v2273_v47 = vperm.slane %v2265_v43, %v7276_v49  ;;  %v9331_v32 = vsel %vm12378_vm0, %v9310_v34, %v2284_v31  ;;  %v4006_v3 = vrot.slane %v1210_v44, 4  ;;  %v12686_v43 = vld [vmem:[#allocation82_spill] sm:$0xff] }
 0x518   :  { %v2253_v18 = vsel %vm12378_vm0, %v2221_v15, %v2252_v42  ;;  %12683 = vst [vmem:[#allocation259_spill] sm:$0xff] %v9331_v32  ;;  %v9339_v58 = vperm.slane %v3973_v62, %v7130_v63  ;;  %v2280_v42 = vrot.slane %v2237_v30, 4  ;;  %v1718_v31 = vrot.slane %v12686_v43, 4 }
 0x519   :  { %12682 = vst [vmem:[#allocation25_spill] sm:$0xff] %v9319_v60  ;;  %v2277_v4 = vsel %vm12378_vm0, %v9319_v60, %v2276_v33  ;;  %v2261_v15 = vperm.slane %v2253_v18, %v7276_v49  ;;  %v9344_v35 = vsel %vm12378_vm0, %v2273_v47, %v2288_v25  ;;  %v2029_v21 = vsel %vm12378_vm0, %v8689_v0, %v2028_v55  ;;  %v12688_v25 = vld [vmem:[#allocation26_spill] sm:$0xff] }
 0x51a   :  { %12684 = vst [vmem:[#allocation260_spill] sm:$0xff] %v9339_v58  ;;  %5220 = vrot.lane.b32.xlu0 %v2277_v4, %s6863_s5  ;;  %v2286_v48 = vrot.slane %v2273_v47, 4  ;;  %v9351_v33 = vperm.slane %v3985_v45, %v7130_v63  ;;  %v4018_v62 = vrot.slane %v3989_v38, 4  ;;  %v3996_v4 = vrot.slane %v12688_v25, 4 }
 0x51b   :  { %12685 = vst [vmem:[#allocation261_spill] sm:$0xff] %v9344_v35  ;;  %v9355_v61 = vsel %vm12378_vm0, %v2261_v15, %v2280_v42  ;;  %v2278_v18 = vrot.slane %v2261_v15, 4  ;;  %v4007_v22 = vsel %vm12378_vm0, %v4006_v3, %v9249_v14  ;;  %v2004_v0 = vrot.slane %v8447_v46, 4  ;;  %v12690_v15 = vld [vmem:[#allocation81_spill] sm:$0xff] }
 0x51c   :  { %12687 = vst [vmem:[#allocation82_spill] sm:$0xff] %v9351_v33  ;;  %1303 = vperm.xlu2 %6781, %v9325_v17   ;;  %v9361_v43 = vsel %vm12378_vm0, %v2286_v48, %v2249_v13  ;;  %v4032_v47 = vrot.slane %v9339_v58, 4  ;;  %v4008_v45 = vrot.slane %v9249_v14, 4  ;;  %v1719_v42 = vsel %vm12378_vm0, %v1718_v31, %v12690_v15 }
 0x51d   :  { %12689 = vst [vmem:[#allocation26_spill] sm:$0xff] %v9361_v43  ;;  %v9367_v55 = vsel %vm12378_vm0, %v2278_v18, %v2237_v30  ;;  %v9373_v57 = vperm.slane %v2029_v21, %v7276_v49  ;;  %v4020_v3 = vrot.slane %v3977_v5, 4  ;;  %v4013_v13 = vperm.slane %v4007_v22, %v7130_v63  ;;  %v12739_v43 = vld [vmem:[#allocation105_spill] sm:$0xff] }
 0x51e   :  { %1297 = vperm.xlu1 %6780, %v9325_v17   ;;  %v4019_v46 = vsel %vm12378_vm0, %v4018_v62, %v3977_v5  ;;  %v4033_v58 = vsel %vm12378_vm0, %v9351_v33, %v4032_v47  ;;  %v3074_v30 = vrot.slane %v9186_v6, 4  ;;  %v4009_v18 = vsel %vm12378_vm0, %v1210_v44, %v4008_v45 }
 0x51f   :  { %12691 = vst [vmem:[#allocation81_spill] sm:$0xff] %v9373_v57  ;;  %v2005_v21 = vsel %vm12378_vm0, %v8431_v29, %v2004_v0  ;;  %v4021_v5 = vsel %vm12378_vm0, %v3989_v38, %v4020_v3  ;;  %v2054_v6 = vrot.slane %v9373_v57, 4  ;;  %v9393_v44 = vperm.slane %v4019_v46, %v7276_v49 }
 0x520   :  { %v1185_v48 = vpop.permute.xlu1 %1184  ;;  %v4042_v22 = vrot.slane %v4013_v13, 4  ;;  %v3075_v38 = vsel %vm12378_vm0, %v3074_v30, %v9163_v51  ;;  %v4029_v0 = vperm.slane %v4021_v5, %v7276_v49  ;;  %v3100_v30 = vrot.slane %v9241_v39, 4 }
 0x521   :  { %v3994_v14 = vrot.slane %v1185_v48, 4  ;;  %v3997_v60 = vsel %vm12378_vm0, %v1185_v48, %v3996_v4  ;;  %12693 = vst [vmem:[#allocation263_spill] sm:$0xff] %v9393_v44  ;;  %v9396_v4 = vperm.slane %v4033_v58, %v7276_v49  ;;  %v3086_v58 = vrot.slane %v9184_v41, 4 }
 0x522   :  { %v9383_v31 = vperm.slane %v3997_v60, %v7130_v63  ;;  %5242 = vrot.lane.b32.xlu0 %v1719_v42, %s6864_s10  ;;  %v9399_v60 = vperm.slane %v4009_v18, %v7130_v63  ;;  %v4068_v48 = vrot.slane %v9393_v44, 4  ;;  %v9425_v41 = vperm.slane %v3075_v38, %v7130_v63 }
 0x523   :  { %v3995_v62 = vsel %vm12378_vm0, %v3994_v14, %v12688_v25  ;;  %12694 = vst [vmem:[#allocation264_spill] sm:$0xff] %v9396_v4  ;;  %v9407_v25 = vperm.slane %v2005_v21, %v7276_v49  ;;  %v4080_v14 = vrot.slane %v9396_v4, 4  ;;  %v3098_v21 = vrot.slane %v9259_v11, 4 }
 0x524   :  { %12692 = vst [vmem:[#allocation262_spill] sm:$0xff] %v9383_v31  ;;  %v4001_v47 = vperm.slane %v3995_v62, %v7130_v63  ;;  %v4056_v29 = vrot.slane %v9383_v31, 4  ;;  %6783 = vset.pattern.permute.xlu2 %v6941_v10  ;;  %v4072_v62 = vrot.slane %v4029_v0, 4  ;;  %v3087_v38 = vsel %vm12378_vm0, %v3086_v58, %v9170_v16 }
 0x525   :  { %12695 = vst [vmem:[#allocation265_spill] sm:$0xff] %v9399_v60  ;;  %v2055_v3 = vsel %vm12378_vm0, %v2054_v6, %v9407_v25  ;;  %v3112_v16 = vrot.slane %v9262_v20, 4 }
 0x526   :  { %v4044_v45 = vrot.slane %v4001_v47, 4  ;;  %6782 = vset.pattern.permute.xlu1 %v6911_v2  ;;  %v4043_v15 = vsel %vm12378_vm0, %v4042_v22, %v4001_v47  ;;  %v4057_v42 = vsel %vm12378_vm0, %v9399_v60, %v4056_v29  ;;  %12698 = vst [vmem:[#allocation268_spill] sm:$0xff] %v9425_v41 }
 0x527   :  { %v9418_v51 = vperm.slane %v4043_v15, %v7276_v49  ;;  %v9422_v46 = vperm.slane %v4057_v42, %v7276_v49  ;;  %v3099_v15 = vsel %vm12378_vm0, %v3098_v21, %v9241_v39 }
 0x528   :  { %v4045_v18 = vsel %vm12378_vm0, %v4013_v13, %v4044_v45  ;;  %v3101_v13 = vsel %vm12378_vm0, %v9259_v11, %v3100_v30  ;;  %v3124_v45 = vrot.slane %v9425_v41, 4  ;;  %v4868_v11 = vrot.slane %v7274_v36, 4 }
 0x529   :  { %12696 = vst [vmem:[#allocation266_spill] sm:$0xff] %v9418_v51  ;;  %v4053_v5 = vperm.slane %v4045_v18, %v7276_v49  ;;  %v9434_v6 = vsel %vm12378_vm0, %v9418_v51, %v4068_v48  ;;  %v9439_v22 = vsel %vm12378_vm0, %v9422_v46, %v4080_v14  ;;  %v9461_v48 = vperm.slane %v3087_v38, %v7130_v63 }
 0x52a   :  { %12697 = vst [vmem:[#allocation267_spill] sm:$0xff] %v9422_v46  ;;  %5248 = vrot.lane.b32.xlu0 %v2055_v3, %s6864_s10  ;;  %v9456_v3 = vperm.slane %v3101_v13, %v7130_v63  ;;  %v9465_v58 = vperm.slane %v3099_v15, %v7130_v63  ;;  %v3145_v36 = vperm.slane %v9203_v59, %v7276_v49  ;;  %v4880_v59 = vrot.slane %v9174_v37, 4 }
 0x52b   :  { %12699 = vst [vmem:[#allocation269_spill] sm:$0xff] %v9434_v6  ;;  %v9444_v47 = vsel %vm12378_vm0, %v4053_v5, %v4072_v62  ;;  %v4070_v29 = vrot.slane %v4053_v5, 4  ;;  %v3125_v18 = vsel %vm12378_vm0, %v9461_v48, %v3124_v45  ;;  %v4869_v21 = vsel %vm12378_vm0, %v9210_v7, %v4868_v11 }
 0x52c   :  { %12700 = vst [vmem:[#allocation270_spill] sm:$0xff] %v9439_v22  ;;  %1315 = vperm.xlu2 %6783, %v9325_v17   ;;  %v3160_v14 = vrot.slane %v9456_v3, 4  ;;  %v3148_v62 = vrot.slane %v9465_v58, 4  ;;  %v9488_v38 = vperm.slane %v3125_v18, %v7276_v49  ;;  %v4877_v45 = vperm.slane %v4869_v21, %v7130_v63 }
 0x52d   :  { %12701 = vst [vmem:[#allocation271_spill] sm:$0xff] %v9444_v47  ;;  %v9453_v42 = vsel %vm12378_vm0, %v4070_v29, %v4029_v0  ;;  %v3184_v15 = vrot.slane %v3145_v36, 4  ;;  %v4881_v11 = vsel %vm12378_vm0, %v9205_v23, %v4880_v59  ;;  %v4890_v18 = vrot.slane %v9278_v24, 4  ;;  %v12714_v59 = vld [vmem:[#allocation51_spill] sm:$0xff] }
 0x52e   :  { %12702 = vst [vmem:[#allocation272_spill] sm:$0xff] %v9453_v42  ;;  %1309 = vperm.xlu1 %6782, %v9325_v17   ;;  %v3176_v37 = vrot.slane %v9488_v38, 4  ;;  %v4928_v21 = vrot.slane %v4877_v45, 4 }
 0x52f   :  { %12703 = vst [vmem:[#allocation273_spill] sm:$0xff] %v9456_v3  ;;  %v12737_v3 = vld [vmem:[#allocation109_spill] sm:$0xff] }
 0x530   :  { %12704 = vst [vmem:[#allocation274_spill] sm:$0xff] %v9461_v48  ;;  %v1204_v30 = vpop.permute.xlu1 %1203 }
 0x531   :  { %12705 = vst [vmem:[#allocation275_spill] sm:$0xff] %v9465_v58  ;;  %v3110_v39 = vrot.slane %v1204_v30, 4  ;;  %v3113_v0 = vsel %vm12378_vm0, %v1204_v30, %v3112_v16  ;;  %v4892_v16 = vrot.slane %v9247_v27, 4 }
 0x532   :  { %v9472_v17 = vperm.slane %v3113_v0, %v7130_v63  ;;  %12708 = vst [vmem:[#allocation278_spill] sm:$0xff] %v9488_v38 }
 0x533   :  { %v3111_v5 = vsel %vm12378_vm0, %v3110_v39, %v9262_v20  ;;  %v4893_v23 = vsel %vm12378_vm0, %v9278_v24, %v4892_v16 }
 0x534   :  { %12706 = vst [vmem:[#allocation276_spill] sm:$0xff] %v9472_v17  ;;  %v9482_v13 = vperm.slane %v3111_v5, %v7130_v63  ;;  %v3161_v29 = vsel %vm12378_vm0, %v9472_v17, %v3160_v14  ;;  %6785 = vset.pattern.permute.xlu2 %v6911_v2  ;;  %v4889_v14 = vperm.slane %v4881_v11, %v7130_v63  ;;  %v1804_v17 = vrot.slane %v12737_v3, 4 }
 0x535   :  { %v3169_v7 = vperm.slane %v3161_v29, %v7276_v49  ;;  %v12713_v29 = vld [vmem:[#allocation59_spill] sm:$0xff]  ;;  %v4901_v11 = vperm.slane %v4893_v23, %v7130_v63 }
 0x536   :  { %12707 = vst [vmem:[#allocation277_spill] sm:$0xff] %v9482_v13  ;;  %6784 = vset.pattern.permute.xlu1 %v6935_v8  ;;  %v3149_v20 = vsel %vm12378_vm0, %v9482_v13, %v3148_v62  ;;  %v1805_v3 = vsel %vm12378_vm0, %v12739_v43, %v1804_v17 }
 0x537   :  { %v9500_v30 = vperm.slane %v3149_v20, %v7276_v49  ;;  %v3182_v39 = vrot.slane %v3169_v7, 4  ;;  %v9504_v0 = vsel %vm12378_vm0, %v3169_v7, %v3184_v15  ;;  %v4904_v7 = vrot.slane %v12714_v59, 4 }
 0x538   :  { %12710 = vst [vmem:[#allocation280_spill] sm:$0xff] %v9504_v0  ;;  %v4891_v20 = vsel %vm12378_vm0, %v4890_v18, %v9247_v27  ;;  %v4926_v15 = vrot.slane %v4889_v14, 4  ;;  %v4952_v46 = vrot.slane %v4901_v11, 4  ;;  %v9721_v17 = vperm.slane %v1805_v3, %v7276_v49 }
 0x539   :  { %12709 = vst [vmem:[#allocation279_spill] sm:$0xff] %v9500_v30  ;;  %v9510_v5 = vsel %vm12378_vm0, %v9500_v30, %v3176_v37  ;;  %v9515_v62 = vsel %vm12378_vm0, %v3182_v39, %v3145_v36  ;;  %v4929_v37 = vsel %vm12378_vm0, %v4889_v14, %v4928_v21  ;;  %v9525_v22 = vperm.slane %v4891_v20, %v7130_v63  ;;  %v12738_v30 = vld [vmem:[#allocation88_spill] sm:$0xff] }
 0x53a   :  { %12711 = vst [vmem:[#allocation281_spill] sm:$0xff] %v9510_v5  ;;  %v4927_v36 = vsel %vm12378_vm0, %v4926_v15, %v4877_v45  ;;  %v4937_v4 = vperm.slane %v4929_v37, %v7276_v49  ;;  %v4925_v14 = vperm.slane %v9228_v26, %v7276_v49 }
 0x53b   :  { %12712 = vst [vmem:[#allocation282_spill] sm:$0xff] %v9515_v62  ;;  %v9534_v23 = vperm.slane %v4927_v36, %v7276_v49  ;;  %v4940_v21 = vrot.slane %v9525_v22, 4  ;;  %v12736_v62 = vld [vmem:[#allocation89_spill] sm:$0xff] }
 0x53c   :  { %1334 = vperm.xlu2 %6785, %v12713_v29   ;;  %12715 = vst [vmem:[#allocation59_spill] sm:$0xff] %v9525_v22  ;;  %v4976_v37 = vrot.slane %v4937_v4, 4  ;;  %v1780_v44 = vrot.slane %v12736_v62, 4  ;;  %v2116_v62 = vrot.slane %v8819_v12, 4 }
 0x53d   :  { %12716 = vst [vmem:[#allocation51_spill] sm:$0xff] %v9534_v23 }
 0x53e   :  { %1328 = vperm.xlu1 %6784, %v12713_v29   ;;  %v1781_v41 = vsel %vm12378_vm0, %v12738_v30, %v1780_v44  ;;  %v12741_v30 = vld [vmem:[#allocation64_spill] sm:$0xff] }
 0x53f   :  { %v9701_v13 = vperm.slane %v1781_v41, %v7276_v49 }
 0x540   :  { %v1216_v24 = vpop.permute.xlu1 %1215 }
 0x541   :  { %v4902_v16 = vrot.slane %v1216_v24, 4  ;;  %v4905_v39 = vsel %vm12378_vm0, %v1216_v24, %v4904_v7 }
 0x542   :  { %v4913_v27 = vperm.slane %v4905_v39, %v7130_v63 }
 0x543   :  { %v4903_v18 = vsel %vm12378_vm0, %v4902_v16, %v12714_v59  ;;  %v4968_v16 = vrot.slane %v4925_v14, 4 }
 0x544   :  { %v9540_v45 = vperm.slane %v4903_v18, %v7130_v63  ;;  %v4950_v7 = vrot.slane %v4913_v27, 4  ;;  %6787 = vset.pattern.permute.xlu2 %v6907_v1  ;;  %v4953_v20 = vsel %vm12378_vm0, %v4913_v27, %v4952_v46  ;;  %v4972_v46 = vrot.slane %v9534_v23, 4 }
 0x545   :  { %v4961_v15 = vperm.slane %v4953_v20, %v7276_v49 }
 0x546   :  { %12717 = vst [vmem:[#allocation283_spill] sm:$0xff] %v9540_v45  ;;  %6786 = vset.pattern.permute.xlu1 %v6941_v10  ;;  %v4951_v59 = vsel %vm12378_vm0, %v4950_v7, %v4901_v11  ;;  %v4941_v26 = vsel %vm12378_vm0, %v9540_v45, %v4940_v21 }
 0x547   :  { %v9550_v24 = vperm.slane %v4951_v59, %v7276_v49  ;;  %v4949_v36 = vperm.slane %v4941_v26, %v7276_v49  ;;  %v9554_v39 = vsel %vm12378_vm0, %v4961_v15, %v4976_v37  ;;  %v4974_v27 = vrot.slane %v4961_v15, 4  ;;  %v12724_v59 = vld [vmem:[#allocation148_spill] sm:$0xff]  ;;  %v1223_v15 = vpop.permute.xlu2 %1222 }
 0x548   :  { %12719 = vst [vmem:[#allocation285_spill] sm:$0xff] %v9554_v39  ;;  %v2292_v22 = vrot.slane %v1223_v15, 4 }
 0x549   :  { %12718 = vst [vmem:[#allocation284_spill] sm:$0xff] %v9550_v24  ;;  %v4966_v18 = vrot.slane %v4949_v36, 4  ;;  %v9558_v20 = vsel %vm12378_vm0, %v4949_v36, %v4968_v16  ;;  %v9562_v11 = vsel %vm12378_vm0, %v9550_v24, %v4972_v46  ;;  %v9565_v21 = vsel %vm12378_vm0, %v4974_v27, %v4937_v4  ;;  %v12726_v46 = vld [vmem:[#allocation28_spill] sm:$0xff] }
 0x54a   :  { %12720 = vst [vmem:[#allocation286_spill] sm:$0xff] %v9558_v20 }
 0x54b   :  { %12721 = vst [vmem:[#allocation287_spill] sm:$0xff] %v9562_v11  ;;  %v9568_v7 = vsel %vm12378_vm0, %v4966_v18, %v4925_v14 }
 0x54c   :  { %12722 = vst [vmem:[#allocation288_spill] sm:$0xff] %v9565_v21  ;;  %1347 = vperm.xlu2 %6787, %v12724_v59   ;;  %v12727_v21 = vld [vmem:[#allocation60_spill] sm:$0xff] }
 0x54d   :  { %12723 = vst [vmem:[#allocation289_spill] sm:$0xff] %v9568_v7  ;;  %v4978_v58 = vrot.slane %v12727_v21, 4 }
 0x54e   :  { %1340 = vperm.xlu1 %6786, %v12713_v29   ;;  %v12725_v29 = vld [vmem:[#allocation11_spill] sm:$0xff] }
 0x54f   :  { %v9575_v37 = vpop.permute.xlu2 %1240 }
 0x550   :  { %v9582_v14 = vpop.permute.xlu1 %1234  ;;  %v4980_v27 = vrot.slane %v9575_v37, 4  ;;  %v4979_v41 = vsel %vm12378_vm0, %v4978_v58, %v9575_v37 }
 0x551   :  { %v4084_v38 = vrot.slane %v9582_v14, 4  ;;  %v9731_v58 = vperm.slane %v4979_v41, %v7130_v63 }
 0x552   :  { %v4981_v11 = vsel %vm12378_vm0, %v12727_v21, %v4980_v27 }
 0x553   :  { %v9601_v20 = vperm.slane %v4981_v11, %v7130_v63 }
 0x554   :  { %6789 = vset.pattern.permute.xlu2 %v6941_v10 }
 0x555   :  { %12728 = vst [vmem:[#allocation148_spill] sm:$0xff] %v9601_v20  ;;  %v5040_v24 = vrot.slane %v9601_v20, 4 }
 0x556   :  { %6788 = vset.pattern.permute.xlu1 %v6911_v2 }
 0x557   :  { %v9579_v4 = vpop.permute.xlu2 %1253 }
 0x55c   :  { %1365 = vperm.xlu2 %6789, %v12724_v59  }
 0x55e   :  { %1359 = vperm.xlu1 %6788, %v12724_v59  }
 0x55f   :  { %v1273_v26 = vpop.permute.xlu2 %1272 }
 0x560   :  { %v1248_v36 = vpop.permute.xlu1 %1247  ;;  %v2293_v45 = vsel %vm12378_vm0, %v1273_v26, %v2292_v22 }
 0x561   :  { %v9622_v31 = vperm.slane %v2293_v45, %v7130_v63  ;;  %v2304_v20 = vrot.slane %v1248_v36, 4 }
 0x563   :  { %12730 = vst [vmem:[#allocation28_spill] sm:$0xff] %v9622_v31  ;;  %v2352_v6 = vrot.slane %v9622_v31, 4  ;;  %v9716_v31 = vpop.permute.xlu0 %1228 }
 0x564   :  { %6791 = vset.pattern.permute.xlu2 %v6935_v8 }
 0x566   :  { %6790 = vset.pattern.permute.xlu1 %v6907_v1 }
 0x567   :  { %v9587_v16 = vpop.permute.xlu2 %1284 }
 0x568   :  { %v4085_v32 = vsel %vm12378_vm0, %v9587_v16, %v4084_v38 }
 0x569   :  { %v4093_v38 = vperm.slane %v4085_v32, %v7130_v63 }
 0x56c   :  { %1378 = vperm.xlu2 %6791, %v12725_v29  }
 0x56e   :  { %1372 = vperm.xlu1 %6790, %v12725_v29  }
 0x570   :  { %v9594_v59 = vpop.permute.xlu1 %1265 }
 0x571   :  { %v4992_v39 = vrot.slane %v9594_v59, 4 }
 0x574   :  { %6793 = vset.pattern.permute.xlu2 %v6907_v1 }
 0x576   :  { %6792 = vset.pattern.permute.xlu1 %v6941_v10  ;;  %v9592_v18 = vpop.permute.xlu2 %1303 }
 0x57c   :  { %1397 = vperm.xlu2 %6793, %v12726_v46  }
 0x57e   :  { %1390 = vperm.xlu1 %6792, %v12725_v29  }
 0x580   :  { %v9610_v29 = vpop.permute.xlu1 %1278 }
 0x584   :  { %6795 = vset.pattern.permute.xlu2 %v6911_v2 }
 0x586   :  { %v9604_v7 = vpop.permute.xlu2 %1315  ;;  %6794 = vset.pattern.permute.xlu1 %v6935_v8 }
 0x587   :  { %v4993_v23 = vsel %vm12378_vm0, %v9604_v7, %v4992_v39  ;;  %v2290_v39 = vrot.slane %v1273_v26, 4  ;;  %v4990_v32 = vrot.slane %v9604_v7, 4 }
 0x588   :  { %v9613_v27 = vperm.slane %v4993_v23, %v7130_v63 }
 0x589   :  { %v2291_v22 = vsel %vm12378_vm0, %v2290_v39, %v1223_v15 }
 0x58a   :  { %12729 = vst [vmem:[#allocation11_spill] sm:$0xff] %v9613_v27  ;;  %v9617_v11 = vsel %vm12378_vm0, %v9613_v27, %v5040_v24 }
 0x58c   :  { %1409 = vperm.xlu2 %6795, %v12726_v46  }
 0x58e   :  { %1403 = vperm.xlu1 %6794, %v12726_v46  }
 0x590   :  { %v1298_v33 = vpop.permute.xlu1 %1297 }
 0x591   :  { %v2302_v60 = vrot.slane %v1298_v33, 4  ;;  %v2305_v23 = vsel %vm12378_vm0, %v1298_v33, %v2304_v20  ;;  %v9641_v33 = vperm.slane %v2291_v22, %v7130_v63  ;;  %v12732_v22 = vld [vmem:[#allocation31_spill] sm:$0xff] }
 0x592   :  { %v9628_v24 = vperm.slane %v2305_v23, %v7130_v63 }
 0x593   :  { %v2303_v27 = vsel %vm12378_vm0, %v2302_v60, %v1248_v36  ;;  %v9648_v60 = vld [vmem:[%s12079_s0 + $0x38] sm:$0xff]  ;;  %v4082_v36 = vrot.slane %v9587_v16, 4  ;;  %s6865_s0 = smov 6  }
 0x594   :  { %v9633_v45 = vperm.slane %v2303_v27, %v7130_v63  ;;  %v9637_v26 = vsel %vm12378_vm0, %v9628_v24, %v2352_v6  ;;  %6797 = vset.pattern.permute.xlu2 %v6935_v8  ;;  %v1417_v15 = vperm.slane %v9648_v60, 0 }
 0x595   :  { %v4083_v46 = vsel %vm12378_vm0, %v4082_v36, %v9582_v14  ;;  %v12740_v14 = vld [vmem:[#allocation34_spill] sm:$0xff] }
 0x596   :  { %v2338_v20 = vrot.slane %v9633_v45, 4  ;;  %6796 = vset.pattern.permute.xlu1 %v6907_v1  ;;  %v9659_v27 = vperm.slane %v4083_v46, %v7130_v63  ;;  %v1335_v46 = vpop.permute.xlu2 %1334  ;;  %v4106_v35 = vrot.slane %v12740_v14, 4 }
 0x597   :  { %v4108_v43 = vrot.slane %v1335_v46, 4 }
 0x598   :  { %v9653_v6 = vsel %vm12378_vm0, %v2338_v20, %v9641_v33  ;;  %12731 = vst [vmem:[#allocation60_spill] sm:$0xff] %v9659_v27  ;;  %v4132_v47 = vrot.slane %v9659_v27, 4  ;;  %v4107_v37 = vsel %vm12378_vm0, %v4106_v35, %v1335_v46 }
 0x599   :  { %v4109_v41 = vsel %vm12378_vm0, %v12740_v14, %v4108_v43  ;;  %v9747_v35 = vperm.slane %v4107_v37, %v7130_v63 }
 0x59a   :  { %v4117_v43 = vperm.slane %v4109_v41, %v7130_v63 }
 0x59b   :  { %12745 = vst [vmem:[#allocation89_spill] sm:$0xff] %v9747_v35 }
 0x59c   :  { %1428 = vperm.xlu2 %6797, %v1417_v15  }
 0x59e   :  { %1422 = vperm.xlu1 %6796, %v1417_v15  }
 0x5a0   :  { %v1310_v39 = vpop.permute.xlu1 %1309 }
 0x5a1   :  { %v4094_v23 = vrot.slane %v1310_v39, 4 }
 0x5a3   :  { %v4095_v42 = vsel %vm12378_vm0, %v4094_v23, %v12732_v22  ;;  %v12734_v23 = vld [vmem:[#allocation63_spill] sm:$0xff] }
 0x5a4   :  { %v9665_v20 = vperm.slane %v4095_v42, %v7130_v63  ;;  %6799 = vset.pattern.permute.xlu2 %v6941_v10  ;;  %12743 = vst [vmem:[#allocation63_spill] sm:$0xff] %v9731_v58 }
 0x5a6   :  { %12733 = vst [vmem:[#allocation31_spill] sm:$0xff] %v9665_v20  ;;  %6798 = vset.pattern.permute.xlu1 %v6911_v2  ;;  %v9671_v36 = vsel %vm12378_vm0, %v9665_v20, %v4132_v47  ;;  %v1348_v27 = vpop.permute.xlu2 %1347  ;;  %v12735_v47 = vld [vmem:[#allocation13_spill] sm:$0xff] }
 0x5a7   :  { %v2328_v21 = vrot.slane %v1348_v27, 4 }
 0x5ac   :  { %1440 = vperm.xlu2 %6799, %v1417_v15  }
 0x5ae   :  { %1434 = vperm.xlu1 %6798, %v1417_v15  }
 0x5b0   :  { %v9678_v42 = vpop.permute.xlu1 %1328 }
 0x5b4   :  { %6801 = vset.pattern.permute.xlu2 %v6911_v2 }
 0x5b6   :  { %6800 = vset.pattern.permute.xlu1 %v6935_v8  ;;  %v9680_v0 = vpop.permute.xlu2 %1365 }
 0x5bc   :  { %1459 = vperm.xlu2 %6801, %v12734_v23  }
 0x5be   :  { %1453 = vperm.xlu1 %6800, %v12734_v23  }
 0x5c0   :  { %v9684_v15 = vpop.permute.xlu1 %1340 }
 0x5c4   :  { %6803 = vset.pattern.permute.xlu2 %v6907_v1 }
 0x5c6   :  { %6802 = vset.pattern.permute.xlu1 %v6941_v10  ;;  %v9686_v20 = vpop.permute.xlu2 %1378 }
 0x5cc   :  { %1472 = vperm.xlu2 %6803, %v12735_v47  }
 0x5ce   :  { %1465 = vperm.xlu1 %6802, %v12734_v23   ;;  %v4096_v23 = vrot.slane %v12732_v22, 4  ;;  %v12742_v22 = vld [vmem:[#allocation93_spill] sm:$0xff] }
 0x5cf   :  { %v2316_v57 = vrot.slane %v12742_v22, 4 }
 0x5d0   :  { %v9692_v5 = vpop.permute.xlu1 %1359  ;;  %v4097_v44 = vsel %vm12378_vm0, %v1310_v39, %v4096_v23 }
 0x5d1   :  { %v4105_v23 = vperm.slane %v4097_v44, %v7130_v63 }
 0x5d3   :  { %v4142_v46 = vrot.slane %v4105_v23, 4 }
 0x5d4   :  { %6805 = vset.pattern.permute.xlu2 %v6941_v10 }
 0x5d6   :  { %v1398_v51 = vpop.permute.xlu2 %1397  ;;  %6804 = vset.pattern.permute.xlu1 %v6911_v2 }
 0x5d7   :  { %v2326_v48 = vrot.slane %v1398_v51, 4  ;;  %v2329_v16 = vsel %vm12378_vm0, %v1398_v51, %v2328_v21  ;;  %v4120_v51 = vrot.slane %v9692_v5, 4 }
 0x5d9   :  { %v2327_v12 = vsel %vm12378_vm0, %v2326_v48, %v1348_v27  ;;  %v9728_v48 = vsel %vm12378_vm0, %v8804_v53, %v2116_v62  ;;  %v2361_v27 = vperm.slane %v9637_v26, %v7276_v49  ;;  %v2340_v53 = vrot.slane %v9641_v33, 4 }
 0x5da   :  { %v4144_v62 = vrot.slane %v4093_v38, 4  ;;  %v9753_v26 = vperm.slane %v2329_v16, %v7130_v63 }
 0x5db   :  { %v2341_v37 = vsel %vm12378_vm0, %v9633_v45, %v2340_v53  ;;  %v4141_v45 = vperm.slane %v9671_v36, %v7276_v49 }
 0x5dc   :  { %1490 = vperm.xlu2 %6805, %v12735_v47  }
 0x5de   :  { %1484 = vperm.xlu1 %6804, %v12735_v47   ;;  %v2333_v47 = vperm.slane %v2327_v12, %v7130_v63  ;;  %v4991_v12 = vsel %vm12378_vm0, %v4990_v32, %v9594_v59  ;;  %v4143_v32 = vsel %vm12378_vm0, %v4142_v46, %v4093_v38 }
 0x5e0   :  { %v1373_v3 = vpop.permute.xlu1 %1372  ;;  %v2362_v33 = vrot.slane %v2333_v47, 4 }
 0x5e1   :  { %v2314_v39 = vrot.slane %v1373_v3, 4  ;;  %v2317_v44 = vsel %vm12378_vm0, %v1373_v3, %v2316_v57  ;;  %v2400_v3 = vrot.slane %v2361_v27, 4 }
 0x5e2   :  { %v9744_v7 = vperm.slane %v2317_v44, %v7130_v63 }
 0x5e3   :  { %v2315_v57 = vsel %vm12378_vm0, %v2314_v39, %v12742_v22  ;;  %v4145_v22 = vsel %vm12378_vm0, %v4105_v23, %v4144_v62  ;;  %v4156_v23 = vrot.slane %v9747_v35, 4  ;;  %v9813_v35 = vperm.slane %v4991_v12, %v7130_v63 }
 0x5e4   :  { %12744 = vst [vmem:[#allocation13_spill] sm:$0xff] %v9744_v7  ;;  %v2321_v21 = vperm.slane %v2315_v57, %v7130_v63  ;;  %v2376_v14 = vrot.slane %v9744_v7, 4  ;;  %6807 = vset.pattern.permute.xlu2 %v6935_v8  ;;  %v4153_v38 = vperm.slane %v4145_v22, %v7276_v49  ;;  %v12748_v22 = vld [vmem:[#allocation12_spill] sm:$0xff]  ;;  %v5028_v12 = vrot.slane %v9731_v58, 4 }
 0x5e5   :  { %12750 = vst [vmem:[#allocation34_spill] sm:$0xff] %v9813_v35 }
 0x5e6   :  { %v2364_v16 = vrot.slane %v2321_v21, 4  ;;  %v1410_v39 = vpop.permute.xlu2 %1409  ;;  %6806 = vset.pattern.permute.xlu1 %v6907_v1  ;;  %v9766_v44 = vsel %vm12378_vm0, %v2362_v33, %v2321_v21  ;;  %v2377_v57 = vsel %vm12378_vm0, %v9753_v26, %v2376_v14  ;;  %v4168_v33 = vrot.slane %v4117_v43, 4 }
 0x5e7   :  { %v4118_v7 = vrot.slane %v1410_v39, 4  ;;  %v4121_v59 = vsel %vm12378_vm0, %v1410_v39, %v4120_v51  ;;  %v2385_v41 = vperm.slane %v2377_v57, %v7276_v49  ;;  %v4184_v39 = vrot.slane %v4141_v45, 4 }
 0x5e8   :  { %v4129_v53 = vperm.slane %v4121_v59, %v7130_v63  ;;  %v2365_v62 = vsel %vm12378_vm0, %v2333_v47, %v2364_v16  ;;  %v9791_v47 = vperm.slane %v4143_v32, %v7276_v49  ;;  %v9794_v16 = vperm.slane %v2341_v37, %v7276_v49 }
 0x5e9   :  { %v4119_v21 = vsel %vm12378_vm0, %v4118_v7, %v9692_v5  ;;  %v9781_v14 = vperm.slane %v2365_v62, %v7276_v49  ;;  %v9788_v51 = vsel %vm12378_vm0, %v2385_v41, %v2400_v3  ;;  %v2398_v7 = vrot.slane %v2385_v41, 4 }
 0x5ea   :  { %v9785_v46 = vperm.slane %v4119_v21, %v7130_v63  ;;  %v4166_v36 = vrot.slane %v4129_v53, 4  ;;  %12747 = vst [vmem:[#allocation88_spill] sm:$0xff] %v9791_v47  ;;  %v5016_v57 = vrot.slane %v9680_v0, 4  ;;  %v4169_v62 = vsel %vm12378_vm0, %v4129_v53, %v4168_v33 }
 0x5eb   :  { %v2390_v5 = vrot.slane %v9781_v14, 4  ;;  %v9806_v37 = vsel %vm12378_vm0, %v2398_v7, %v2361_v27  ;;  %v4188_v53 = vrot.slane %v9791_v47, 4  ;;  %v2140_v27 = vrot.slane %v9068_v50, 4 }
 0x5ec   :  { %12746 = vst [vmem:[#allocation109_spill] sm:$0xff] %v9785_v46  ;;  %1503 = vperm.xlu2 %6807, %v12748_v22   ;;  %v4167_v59 = vsel %vm12378_vm0, %v4166_v36, %v4117_v43  ;;  %v4157_v3 = vsel %vm12378_vm0, %v9785_v46, %v4156_v23  ;;  %v4177_v43 = vperm.slane %v4169_v62, %v7276_v49  ;;  %v4192_v23 = vrot.slane %v4153_v38, 4 }
 0x5ed   :  { %v2391_v32 = vsel %vm12378_vm0, %v2390_v5, %v9794_v16  ;;  %v9809_v41 = vperm.slane %v4167_v59, %v7276_v49  ;;  %v4165_v21 = vperm.slane %v4157_v3, %v7276_v49  ;;  %v5004_v33 = vrot.slane %v9684_v15, 4 }
 0x5ee   :  { %1497 = vperm.xlu1 %6806, %v12748_v22   ;;  %5254 = vrot.lane.b32.xlu0 %v2391_v32, %s6864_s10  ;;  %v9826_v59 = vsel %vm12378_vm0, %v4177_v43, %v4192_v23  ;;  %v4190_v62 = vrot.slane %v4177_v43, 4  ;;  %v3186_v32 = vrot.slane %v9610_v29, 4  ;;  %v5017_v50 = vsel %vm12378_vm0, %v12741_v30, %v5016_v57 }
 0x5ef   :  { %12749 = vst [vmem:[#allocation105_spill] sm:$0xff] %v9809_v41  ;;  %v4182_v36 = vrot.slane %v4165_v21, 4  ;;  %v9822_v5 = vsel %vm12378_vm0, %v4165_v21, %v4184_v39  ;;  %v9830_v3 = vsel %vm12378_vm0, %v9809_v41, %v4188_v53  ;;  %v5029_v43 = vsel %vm12378_vm0, %v9813_v35, %v5028_v12 }
 0x5f0   :  { %12751 = vst [vmem:[#allocation64_spill] sm:$0xff] %v9822_v5  ;;  %v1391_v7 = vpop.permute.xlu1 %1390  ;;  %v9843_v23 = vsel %vm12378_vm0, %v4190_v62, %v4153_v38  ;;  %v12757_v53 = vrot.slane %v12741_v30, 4  ;;  %v2141_v38 = vsel %vm12378_vm0, %v9055_v52, %v2140_v27  ;;  %v9864_v30 = vperm.slane %v5017_v50, %v7130_v63 }
 0x5f1   :  { %12752 = vst [vmem:[#allocation93_spill] sm:$0xff] %v9826_v59  ;;  %v5002_v47 = vrot.slane %v1391_v7, 4  ;;  %v5005_v39 = vsel %vm12378_vm0, %v1391_v7, %v5004_v33  ;;  %v9840_v58 = vsel %vm12378_vm0, %v4182_v36, %v4141_v45  ;;  %v12758_v7 = vrot.slane %v9701_v13, 4 }
 0x5f2   :  { %12753 = vst [vmem:[#allocation12_spill] sm:$0xff] %v9830_v3  ;;  %v9837_v21 = vperm.slane %v5005_v39, %v7130_v63  ;;  %v5015_v57 = vsel %vm12378_vm0, %v12757_v53, %v9680_v0  ;;  %v12759_v36 = vrot.slane %v9716_v31, 4  ;;  %v3187_v52 = vsel %vm12378_vm0, %v3186_v32, %v9716_v31 }
 0x5f3   :  { %12755 = vst [vmem:[#allocation291_spill] sm:$0xff] %v9840_v58  ;;  %v5003_v33 = vsel %vm12378_vm0, %v5002_v47, %v9684_v15  ;;  %v1833_v45 = vsel %vm12378_vm0, %v9721_v17, %v12758_v7  ;;  %v3198_v47 = vrot.slane %v9592_v18, 4  ;;  %v9876_v27 = vperm.slane %v9728_v48, %v7276_v49 }
 0x5f4   :  { %12754 = vst [vmem:[#allocation290_spill] sm:$0xff] %v9837_v21  ;;  %v3189_v12 = vsel %vm12378_vm0, %v9610_v29, %v12759_v36  ;;  %v9867_v0 = vperm.slane %v5003_v33, %v7130_v63  ;;  %v5064_v15 = vrot.slane %v9837_v21, 4  ;;  %6810 = vset.pattern.permute.xlu2 %v6907_v1  ;;  %v9879_v29 = vperm.slane %v5029_v43, %v7276_v49  ;;  %v1354_v21 = vpop.permute.xlu0 %1353 }
 0x5f5   :  { %12756 = vst [vmem:[#allocation292_spill] sm:$0xff] %v9843_v23  ;;  %v9882_v62 = vperm.slane %v5015_v57, %v7130_v63  ;;  %v5049_v31 = vperm.slane %v9617_v11, %v7276_v49  ;;  %v9892_v32 = vperm.slane %v3189_v12, %v7130_v63  ;;  %v3212_v39 = vrot.slane %v9678_v42, 4 }
 0x5f6   :  { %12760 = vst [vmem:[#allocation293_spill] sm:$0xff] %v9864_v30  ;;  %v5052_v50 = vrot.slane %v9867_v0, 4  ;;  %6809 = vset.pattern.permute.xlu1 %v6941_v10  ;;  %5276 = vrot.lane.b32.xlu0 %v1833_v45, %s6865_s0  ;;  %v5065_v48 = vsel %vm12378_vm0, %v9864_v30, %v5064_v15  ;;  %v9896_v43 = vperm.slane %v2141_v38, %v7276_v49  ;;  %v3200_v53 = vrot.slane %v9579_v4, 4 }
 0x5f7   :  { %12761 = vst [vmem:[#allocation294_spill] sm:$0xff] %v9867_v0  ;;  %v3193_v57 = vperm.slane %v3187_v52, %v7130_v63  ;;  %v5073_v11 = vperm.slane %v5065_v48, %v7276_v49  ;;  %v3199_v7 = vsel %vm12378_vm0, %v3198_v47, %v9579_v4  ;;  %v3210_v45 = vrot.slane %v9686_v20, 4  ;;  %v12767_v0 = vld [vmem:[#allocation30_spill] sm:$0xff] }
 0x5f8   :  { %12762 = vst [vmem:[#allocation295_spill] sm:$0xff] %v9879_v29  ;;  %v5053_v33 = vsel %vm12378_vm0, %v9882_v62, %v5052_v50  ;;  %v5080_v38 = vrot.slane %v9879_v29, 4  ;;  %v3201_v12 = vsel %vm12378_vm0, %v9592_v18, %v3200_v53  ;;  %v2168_v15 = vrot.slane %v9876_v27, 4 }
 0x5f9   :  { %12763 = vst [vmem:[#allocation296_spill] sm:$0xff] %v9882_v62  ;;  %v9907_v36 = vperm.slane %v5053_v33, %v7276_v49  ;;  %v5088_v52 = vrot.slane %v5049_v31, 4  ;;  %v3248_v50 = vrot.slane %v9892_v32, 4  ;;  %v3213_v48 = vsel %vm12378_vm0, %v9686_v20, %v3212_v39 }
 0x5fa   :  { %12764 = vst [vmem:[#allocation297_spill] sm:$0xff] %v9892_v32  ;;  %v5086_v47 = vrot.slane %v5073_v11, 4  ;;  %v3224_v33 = vrot.slane %v1354_v21, 4  ;;  %v3205_v30 = vperm.slane %v3199_v7, %v7130_v63  ;;  %v3236_v29 = vrot.slane %v3193_v57, 4  ;;  %v12798_v32 = vld [vmem:[#allocation78_spill] sm:$0xff] }
 0x5fb   :  { %12765 = vst [vmem:[#allocation298_spill] sm:$0xff] %v9907_v36  ;;  %v9918_v4 = vsel %vm12378_vm0, %v9907_v36, %v5080_v38  ;;  %v9923_v18 = vsel %vm12378_vm0, %v5073_v11, %v5088_v52  ;;  %v9926_v53 = vperm.slane %v3201_v12, %v7130_v63  ;;  %v3211_v20 = vsel %vm12378_vm0, %v3210_v45, %v9678_v42 }
 0x5fc   :  { %12766 = vst [vmem:[#allocation299_spill] sm:$0xff] %v9918_v4  ;;  %1522 = vperm.xlu2 %6810, %v12767_v0   ;;  %v2169_v39 = vsel %vm12378_vm0, %v9896_v43, %v2168_v15  ;;  %v9933_v38 = vsel %vm12378_vm0, %v5086_v47, %v5049_v31  ;;  %v9936_v7 = vperm.slane %v3213_v48, %v7130_v63  ;;  %v3234_v12 = vrot.slane %v3205_v30, 4 }
 0x5fd   :  { %12768 = vst [vmem:[#allocation30_spill] sm:$0xff] %v9923_v18  ;;  %v3249_v11 = vsel %vm12378_vm0, %v9926_v53, %v3248_v50  ;;  %v3217_v52 = vperm.slane %v3211_v20, %v7130_v63  ;;  %v3237_v45 = vsel %vm12378_vm0, %v3205_v30, %v3236_v29 }
 0x5fe   :  { %12769 = vst [vmem:[#allocation300_spill] sm:$0xff] %v9926_v53  ;;  %1515 = vperm.xlu1 %6809, %v12748_v22   ;;  %5282 = vrot.lane.b32.xlu0 %v2169_v39, %s6865_s0  ;;  %v3272_v47 = vrot.slane %v9936_v7, 4  ;;  %v3235_v22 = vsel %vm12378_vm0, %v3234_v12, %v3193_v57  ;;  %v9951_v39 = vperm.slane %v3249_v11, %v7276_v49 }
 0x5ff   :  { %12770 = vst [vmem:[#allocation301_spill] sm:$0xff] %v9933_v38  ;;  %v3245_v20 = vperm.slane %v3237_v45, %v7276_v49  ;;  %v3260_v18 = vrot.slane %v3217_v52, 4 }
 0x600   :  { %12771 = vst [vmem:[#allocation302_spill] sm:$0xff] %v9936_v7  ;;  %v1404_v42 = vpop.permute.xlu1 %1403  ;;  %v3296_v12 = vrot.slane %v9951_v39, 4  ;;  %v1678_v7 = vrot.slane %v12798_v32, 4 }
 0x601   :  { %v3222_v15 = vrot.slane %v1404_v42, 4  ;;  %v3225_v31 = vsel %vm12378_vm0, %v1404_v42, %v3224_v33  ;;  %12773 = vst [vmem:[#allocation304_spill] sm:$0xff] %v9951_v39  ;;  %v9960_v33 = vperm.slane %v3235_v22, %v7276_v49  ;;  %v3288_v45 = vrot.slane %v3245_v20, 4 }
 0x602   :  { %v9947_v48 = vperm.slane %v3225_v31, %v7130_v63 }
 0x603   :  { %v3223_v50 = vsel %vm12378_vm0, %v3222_v15, %v1354_v21 }
 0x604   :  { %12772 = vst [vmem:[#allocation303_spill] sm:$0xff] %v9947_v48  ;;  %v3229_v30 = vperm.slane %v3223_v50, %v7130_v63  ;;  %v3273_v29 = vsel %vm12378_vm0, %v9947_v48, %v3272_v47  ;;  %6812 = vset.pattern.permute.xlu2 %v6911_v2  ;;  %v3284_v50 = vrot.slane %v9960_v33, 4 }
 0x605   :  { %v9963_v57 = vperm.slane %v3273_v29, %v7276_v49 }
 0x606   :  { %v3258_v11 = vrot.slane %v3229_v30, 4  ;;  %6811 = vset.pattern.permute.xlu1 %v6935_v8  ;;  %v3261_v21 = vsel %vm12378_vm0, %v3229_v30, %v3260_v18 }
 0x607   :  { %12774 = vst [vmem:[#allocation305_spill] sm:$0xff] %v9963_v57  ;;  %v3269_v42 = vperm.slane %v3261_v21, %v7276_v49  ;;  %v9972_v31 = vsel %vm12378_vm0, %v9963_v57, %v3296_v12 }
 0x608   :  { %v3259_v15 = vsel %vm12378_vm0, %v3258_v11, %v3217_v52  ;;  %12775 = vst [vmem:[#allocation306_spill] sm:$0xff] %v9972_v31  ;;  %v1542_v52 = vperm.slane %v9648_v60, 5  ;;  %v9993_v11 = vpop.permute.xlu2 %1428 }
 0x609   :  { %v9975_v47 = vperm.slane %v3259_v15, %v7276_v49  ;;  %v9978_v22 = vsel %vm12378_vm0, %v3269_v42, %v3288_v45  ;;  %v3286_v18 = vrot.slane %v3269_v42, 4  ;;  %v12779_v42 = vld [vmem:[#allocation69_spill] sm:$0xff]  ;;  %v10012_v15 = vpop.permute.xlu0 %1478 }
 0x60a   :  { %12776 = vst [vmem:[#allocation307_spill] sm:$0xff] %v9978_v22 }
 0x60b   :  { %v9983_v30 = vsel %vm12378_vm0, %v9975_v47, %v3284_v50  ;;  %v9986_v29 = vsel %vm12378_vm0, %v3286_v18, %v3245_v20  ;;  %v3298_v18 = vrot.slane %v10012_v15, 4 }
 0x60c   :  { %12777 = vst [vmem:[#allocation308_spill] sm:$0xff] %v9983_v30  ;;  %1534 = vperm.xlu2 %6812, %v12767_v0  }
 0x60d   :  { %12778 = vst [vmem:[#allocation309_spill] sm:$0xff] %v9986_v29 }
 0x60e   :  { %1528 = vperm.xlu1 %6811, %v12767_v0  }
 0x610   :  { %v9996_v21 = vpop.permute.xlu2 %1440  ;;  %v9999_v20 = vpop.permute.xlu1 %1422 }
 0x611   :  { %v1604_v53 = vpop.permute.xlu0 %1603 }
 0x612   :  { %v3334_v29 = vrot.slane %v1604_v53, 4 }
 0x614   :  { %6815 = vset.pattern.permute.xlu2 %v6935_v8 }
 0x616   :  { %6814 = vset.pattern.permute.xlu1 %v6907_v1 }
 0x618   :  { %v10001_v0 = vpop.permute.xlu2 %1459 }
 0x619   :  { %v4208_v23 = vrot.slane %v10001_v0, 4 }
 0x61c   :  { %1553 = vperm.xlu2 %6815, %v1542_v52  }
 0x61e   :  { %1547 = vperm.xlu1 %6814, %v1542_v52  }
 0x620   :  { %v10003_v12 = vpop.permute.xlu1 %1434 }
 0x621   :  { %v4196_v3 = vrot.slane %v10003_v12, 4 }
 0x624   :  { %6817 = vset.pattern.permute.xlu2 %v6941_v10 }
 0x626   :  { %6816 = vset.pattern.permute.xlu1 %v6911_v2  ;;  %v10006_v60 = vpop.permute.xlu2 %1472 }
 0x62c   :  { %1565 = vperm.xlu2 %6817, %v1542_v52  }
 0x62e   :  { %1559 = vperm.xlu1 %6816, %v1542_v52   ;;  %v3299_v52 = vsel %vm12378_vm0, %v3298_v18, %v9993_v11 }
 0x62f   :  { %v10022_v38 = vperm.slane %v3299_v52, %v7130_v63 }
 0x630   :  { %v10010_v45 = vpop.permute.xlu1 %1453 }
 0x631   :  { %12780 = vst [vmem:[#allocation69_spill] sm:$0xff] %v10022_v38  ;;  %v3348_v35 = vrot.slane %v10022_v38, 4 }
 0x634   :  { %6820 = vset.pattern.permute.xlu2 %v6911_v2 }
 0x636   :  { %6819 = vset.pattern.permute.xlu1 %v6935_v8  ;;  %v10014_v50 = vpop.permute.xlu2 %1490 }
 0x63c   :  { %1584 = vperm.xlu2 %6820, %v12779_v42  }
 0x63e   :  { %1578 = vperm.xlu1 %6819, %v12779_v42  }
 0x640   :  { %v10027_v4 = vpop.permute.xlu1 %1465 }
 0x644   :  { %6822 = vset.pattern.permute.xlu2 %v6907_v1  ;;  %v12781_v1 = vld [vmem:[#allocation149_spill] sm:$0xff] }
 0x646   :  { %v10024_v8 = vpop.permute.xlu2 %1503  ;;  %6821 = vset.pattern.permute.xlu1 %v6941_v10 }
 0x647   :  { %v3310_v36 = vrot.slane %v10024_v8, 4 }
 0x649   :  { %v3311_v62 = vsel %vm12378_vm0, %v3310_v36, %v10010_v45  ;;  %v12782_v36 = vld [vmem:[#allocation35_spill] sm:$0xff] }
 0x64a   :  { %v10034_v18 = vperm.slane %v3311_v62, %v7130_v63  ;;  %v4209_v5 = vsel %vm12378_vm0, %v12782_v36, %v4208_v23 }
 0x64c   :  { %1597 = vperm.xlu2 %6822, %v12781_v1   ;;  %v10039_v52 = vsel %vm12378_vm0, %v10034_v18, %v3348_v35  ;;  %v10054_v35 = vperm.slane %v4209_v5, %v7130_v63  ;;  %v12787_v5 = vld [vmem:[#allocation113_spill] sm:$0xff] }
 0x64e   :  { %1590 = vperm.xlu1 %6821, %v12779_v42   ;;  %12784 = vst [vmem:[#allocation35_spill] sm:$0xff] %v10054_v35 }
 0x650   :  { %v10044_v59 = vpop.permute.xlu1 %1484 }
 0x651   :  { %v4197_v62 = vsel %vm12378_vm0, %v10044_v59, %v4196_v3  ;;  %v12785_v3 = vld [vmem:[#allocation90_spill] sm:$0xff] }
 0x652   :  { %v10051_v58 = vperm.slane %v4197_v62, %v7130_v63  ;;  %v10066_v23 = vperm.slane %v12785_v3, %v7276_v49  ;;  %v10071_v62 = vperm.slane %v12787_v5, %v7276_v49  ;;  %v12790_v3 = vld [vmem:[#allocation84_spill] sm:$0xff]  ;;  %v10089_v5 = vperm.slane %v8454_v54, %v7276_v49 }
 0x653   :  { %v10105_v54 = vperm.slane %v9653_v6, %v7276_v49  ;;  %v2166_v6 = vrot.slane %v9896_v43, 4  ;;  %v2402_v43 = vrot.slane %v10006_v60, 4 }
 0x654   :  { %12783 = vst [vmem:[#allocation149_spill] sm:$0xff] %v10051_v58  ;;  %v4256_v41 = vrot.slane %v10051_v58, 4  ;;  %6824 = vset.pattern.permute.xlu2 %v6941_v10  ;;  %v1828_v10 = vrot.slane %v10066_v23, 4 }
 0x655   :  { %12786 = vst [vmem:[#allocation90_spill] sm:$0xff] %v10066_v23 }
 0x656   :  { %6823 = vset.pattern.permute.xlu1 %v6911_v2  ;;  %v10061_v42 = vsel %vm12378_vm0, %v10054_v35, %v4256_v41  ;;  %12788 = vst [vmem:[#allocation113_spill] sm:$0xff] %v10071_v62  ;;  %v1829_v2 = vsel %vm12378_vm0, %v10071_v62, %v1828_v10  ;;  %v10079_v41 = vperm.slane %v8827_v19, %v7276_v49  ;;  %v3312_v62 = vrot.slane %v10010_v45, 4 }
 0x657   :  { %12792 = vst [vmem:[#allocation311_spill] sm:$0xff] %v10089_v5  ;;  %v10094_v10 = vperm.slane %v8708_v28, %v7276_v49  ;;  %v10109_v28 = vperm.slane %v9766_v44, %v7276_v49  ;;  %v2167_v44 = vsel %vm12378_vm0, %v2166_v6, %v9876_v27  ;;  %v2403_v35 = vsel %vm12378_vm0, %v2402_v43, %v9999_v20 }
 0x658   :  { %12789 = vst [vmem:[#allocation310_spill] sm:$0xff] %v10079_v41  ;;  %v2164_v58 = vrot.slane %v10079_v41, 4  ;;  %v3313_v45 = vsel %vm12378_vm0, %v10024_v8, %v3312_v62 }
 0x659   :  { %12793 = vst [vmem:[#allocation312_spill] sm:$0xff] %v10094_v10  ;;  %v3321_v57 = vperm.slane %v3313_v45, %v7130_v63 }
 0x65a   :  { %12794 = vst [vmem:[#allocation313_spill] sm:$0xff] %v10105_v54 }
 0x65b   :  { %12795 = vst [vmem:[#allocation314_spill] sm:$0xff] %v10109_v28 }
 0x65c   :  { %1615 = vperm.xlu2 %6824, %v12781_v1  }
 0x65e   :  { %1609 = vperm.xlu1 %6823, %v12781_v1   ;;  %v10085_v1 = vperm.slane %v9079_v56, %v7276_v49 }
 0x660   :  { %12791 = vst [vmem:[#allocation84_spill] sm:$0xff] %v10085_v1  ;;  %v2165_v19 = vsel %vm12378_vm0, %v10085_v1, %v2164_v58  ;;  %v1498_v41 = vpop.permute.xlu1 %1497 }
 0x664   :  { %5212 = vrot.lane.b32.xlu2 %v1829_v2, %s6863_s5  ;;  %v2052_v2 = vrot.slane %v10089_v5, 4  ;;  %v12796_v5 = vld [vmem:[#allocation94_spill] sm:$0xff] }
 0x666   :  { %5210 = vrot.lane.b32.xlu1 %v12790_v3, %s6863_s5  ;;  %v2053_v56 = vsel %vm12378_vm0, %v10094_v10, %v2052_v2  ;;  %v2388_v3 = vrot.slane %v10105_v54, 4 }
 0x668   :  { %v2389_v58 = vsel %vm12378_vm0, %v10109_v28, %v2388_v3  ;;  %v2416_v28 = vrot.slane %v12796_v5, 4 }
 0x66c   :  { %5218 = vrot.lane.b32.xlu2 %v2165_v19, %s6863_s5  ;;  %v1830_v19 = vrot.slane %v9721_v17, 4 }
 0x66e   :  { %5216 = vrot.lane.b32.xlu1 %v2053_v56, %s6863_s5  ;;  %v1831_v2 = vsel %vm12378_vm0, %v1830_v19, %v9701_v13  ;;  %v1523_v56 = vpop.permute.xlu2 %1522  ;;  %v2404_v13 = vrot.slane %v9999_v20, 4 }
 0x66f   :  { %v2428_v23 = vrot.slane %v1523_v56, 4 }
 0x670   :  { %v10125_v3 = vpop.permute.xlu1 %1515  ;;  %v2405_v27 = vsel %vm12378_vm0, %v10006_v60, %v2404_v13 }
 0x671   :  { %v10144_v10 = vperm.slane %v2405_v27, %v7130_v63 }
 0x673   :  { %v2464_v13 = vrot.slane %v10144_v10, 4 }
 0x676   :  { %5222 = vrot.lane.b32.xlu1 %v2389_v58, %s6863_s5  ;;  %v10122_v54 = vpop.permute.xlu2 %1534 }
 0x67e   :  { %5244 = vrot.lane.b32.xlu1 %v1831_v2, %s6864_s10  ;;  %v10127_v58 = vpop.permute.xlu2 %1553  ;;  %v2414_v2 = vrot.slane %v1498_v41, 4 }
 0x680   :  { %v10129_v17 = vpop.permute.xlu1 %1528  ;;  %v2415_v6 = vsel %vm12378_vm0, %v2414_v2, %v12796_v5  ;;  %v2409_v5 = vperm.slane %v2403_v35, %v7130_v63  ;;  %v3300_v2 = vrot.slane %v9993_v11, 4 }
 0x681   :  { %v2421_v46 = vperm.slane %v2415_v6, %v7130_v63 }
 0x682   :  { %v2452_v35 = vrot.slane %v2409_v5, 4 }
 0x683   :  { %v2450_v27 = vrot.slane %v2421_v46, 4 }
 0x684   :  { %v2453_v62 = vsel %vm12378_vm0, %v2421_v46, %v2452_v35  ;;  %v3358_v46 = vrot.slane %v3321_v57, 4 }
 0x685   :  { %v2451_v45 = vsel %vm12378_vm0, %v2450_v27, %v2409_v5  ;;  %v2461_v35 = vperm.slane %v2453_v62, %v7276_v49  ;;  %v12800_v27 = vld [vmem:[#allocation77_spill] sm:$0xff]  ;;  %v12801_v62 = vld [vmem:[#allocation80_spill] sm:$0xff] }
 0x686   :  { %5250 = vrot.lane.b32.xlu1 %v2167_v44, %s6864_s10  ;;  %v10132_v19 = vpop.permute.xlu2 %1565  ;;  %v2417_v44 = vsel %vm12378_vm0, %v1498_v41, %v2416_v28  ;;  %v12797_v41 = vld [vmem:[#allocation95_spill] sm:$0xff]  ;;  %v10192_v32 = vperm.slane %v2451_v45, %v7276_v49 }
 0x687   :  { %v10151_v60 = vperm.slane %v2417_v44, %v7130_v63  ;;  %v2426_v28 = vrot.slane %v12797_v41, 4  ;;  %v2429_v20 = vsel %vm12378_vm0, %v12797_v41, %v2428_v23  ;;  %v3301_v23 = vsel %vm12378_vm0, %v10012_v15, %v3300_v2 }
 0x688   :  { %v10165_v39 = vperm.slane %v2429_v20, %v7130_v63  ;;  %12799 = vst [vmem:[#allocation94_spill] sm:$0xff] %v10192_v32  ;;  %v2504_v22 = vrot.slane %v2461_v35, 4 }
 0x689   :  { %v2427_v43 = vsel %vm12378_vm0, %v2426_v28, %v1523_v56  ;;  %v2465_v44 = vsel %vm12378_vm0, %v10151_v60, %v2464_v13  ;;  %v3336_v28 = vrot.slane %v10127_v58, 4 }
 0x68a   :  { %v2433_v11 = vperm.slane %v2427_v43, %v7130_v63  ;;  %v10175_v56 = vperm.slane %v2465_v44, %v7276_v49  ;;  %v2488_v15 = vrot.slane %v10165_v39, 4  ;;  %v3309_v43 = vperm.slane %v3301_v23, %v7130_v63 }
 0x68b   :  { %v3337_v23 = vsel %vm12378_vm0, %v1604_v53, %v3336_v28  ;;  %v3324_v53 = vrot.slane %v10129_v17, 4 }
 0x68c   :  { %v2476_v48 = vrot.slane %v2433_v11, 4  ;;  %v3345_v28 = vperm.slane %v3337_v23, %v7130_v63 }
 0x690   :  { %v1548_v1 = vpop.permute.xlu1 %1547 }
 0x691   :  { %v2440_v6 = vrot.slane %v1548_v1, 4 }
 0x696   :  { %v10147_v31 = vpop.permute.xlu2 %1584 }
 0x6a0   :  { %v10171_v8 = vpop.permute.xlu1 %1559 }
 0x6a6   :  { %v1598_v41 = vpop.permute.xlu2 %1597 }
 0x6a7   :  { %v2438_v13 = vrot.slane %v1598_v41, 4  ;;  %v2441_v20 = vsel %vm12378_vm0, %v1598_v41, %v2440_v6  ;;  %v1679_v41 = vsel %vm12378_vm0, %v1678_v7, %v12800_v27  ;;  %v2500_v27 = vrot.slane %v10192_v32, 4 }
 0x6a8   :  { %v10183_v2 = vperm.slane %v2441_v20, %v7130_v63 }
 0x6a9   :  { %v2439_v44 = vsel %vm12378_vm0, %v2438_v13, %v1548_v1  ;;  %v2512_v1 = vrot.slane %v10175_v56, 4  ;;  %v1702_v13 = vrot.slane %v12801_v62, 4  ;;  %v3359_v62 = vsel %vm12378_vm0, %v3358_v46, %v3309_v43 }
 0x6aa   :  { %v2445_v6 = vperm.slane %v2439_v44, %v7130_v63  ;;  %v2489_v5 = vsel %vm12378_vm0, %v10183_v2, %v2488_v15  ;;  %v3360_v15 = vrot.slane %v3309_v43, 4 }
 0x6ab   :  { %v10198_v20 = vperm.slane %v2489_v5, %v7276_v49 }
 0x6ac   :  { %v2474_v44 = vrot.slane %v2445_v6, 4  ;;  %v2477_v30 = vsel %vm12378_vm0, %v2445_v6, %v2476_v48  ;;  %v3361_v38 = vsel %vm12378_vm0, %v3321_v57, %v3360_v15  ;;  %v12803_v15 = vld [vmem:[#allocation79_spill] sm:$0xff] }
 0x6ad   :  { %v2485_v45 = vperm.slane %v2477_v30, %v7276_v49  ;;  %v10206_v7 = vsel %vm12378_vm0, %v10198_v20, %v2512_v1  ;;  %v5102_v1 = vrot.slane %v10125_v3, 4 }
 0x6ae   :  { %v2475_v5 = vsel %vm12378_vm0, %v2474_v44, %v2433_v11  ;;  %v1946_v11 = vrot.slane %v8181_v9, 4  ;;  %v10222_v44 = vperm.slane %v1679_v41, %v7276_v49  ;;  %v1703_v9 = vsel %vm12378_vm0, %v1702_v13, %v12803_v15  ;;  %v12804_v13 = vld [vmem:[#allocation151_spill] sm:$0xff] }
 0x6af   :  { %v2505_v48 = vsel %vm12378_vm0, %v2485_v45, %v2504_v22  ;;  %v2502_v6 = vrot.slane %v2485_v45, 4  ;;  %v10215_v30 = vperm.slane %v2475_v5, %v7276_v49  ;;  %v3382_v5 = vrot.slane %v3345_v28, 4 }
 0x6b0   :  { %5288 = vrot.lane.b32.xlu0 %v2505_v48, %s6865_s0  ;;  %v1579_v23 = vpop.permute.xlu1 %1578  ;;  %v10234_v41 = vperm.slane %v3359_v62, %v7276_v49  ;;  %v3369_v48 = vperm.slane %v3361_v38, %v7276_v49  ;;  %v1947_v62 = vsel %vm12378_vm0, %v1946_v11, %v12804_v13  ;;  %v3357_v38 = vperm.slane %v10039_v52, %v7276_v49  ;;  %v12808_v13 = vld [vmem:[#allocation160_spill] sm:$0xff] }
 0x6b1   :  { %12802 = vst [vmem:[#allocation95_spill] sm:$0xff] %v10215_v30  ;;  %v3322_v43 = vrot.slane %v1579_v23, 4  ;;  %v3325_v46 = vsel %vm12378_vm0, %v1579_v23, %v3324_v53  ;;  %v2503_v22 = vsel %vm12378_vm0, %v2502_v6, %v2461_v35  ;;  %v2501_v45 = vsel %vm12378_vm0, %v10215_v30, %v2500_v27  ;;  %v12813_v30 = vld [vmem:[#allocation15_spill] sm:$0xff] }
 0x6b2   :  { %v3333_v57 = vperm.slane %v3325_v46, %v7130_v63  ;;  %5256 = vrot.lane.b32.xlu1 %v2503_v22, %s6864_s10  ;;  %5224 = vrot.lane.b32.xlu2 %v2501_v45, %s6863_s5  ;;  %v5090_v53 = vrot.slane %v10014_v50, 4  ;;  %v3335_v35 = vsel %vm12378_vm0, %v3334_v29, %v10127_v58  ;;  %v5092_v22 = vrot.slane %v9996_v21, 4  ;;  %s6887_s5 = smov 50  }
 0x6b3   :  { %v3323_v27 = vsel %vm12378_vm0, %v3322_v43, %v10129_v17  ;;  %v5103_v45 = vsel %vm12378_vm0, %v5102_v1, %v10027_v4  ;;  %v10257_v58 = vperm.slane %v3335_v35, %v7130_v63  ;;  %v3404_v11 = vrot.slane %v10234_v41, 4 }
 0x6b4   :  { %v10243_v6 = vperm.slane %v3323_v27, %v7130_v63  ;;  %v3383_v23 = vsel %vm12378_vm0, %v3382_v5, %v3333_v57  ;;  %v3384_v46 = vrot.slane %v3333_v57, 4  ;;  %v5091_v57 = vsel %vm12378_vm0, %v5090_v53, %v9996_v21 }
 0x6b5   :  { %v10252_v29 = vperm.slane %v3383_v23, %v7276_v49  ;;  %v5093_v1 = vsel %vm12378_vm0, %v10014_v50, %v5092_v22  ;;  %v5104_v15 = vrot.slane %v10027_v4, 4  ;;  %v3408_v27 = vrot.slane %v3369_v48, 4 }
 0x6b6   :  { %v3372_v17 = vrot.slane %v10243_v6, 4  ;;  %v1616_v43 = vpop.permute.xlu2 %1615  ;;  %v3385_v5 = vsel %vm12378_vm0, %v3345_v28, %v3384_v46  ;;  %v5109_v52 = vperm.slane %v5103_v45, %v7130_v63  ;;  %v1709_v4 = vperm.slane %v1703_v9, %v7276_v49  ;;  %v12807_v46 = vld [vmem:[#allocation156_spill] sm:$0xff] }
 0x6b7   :  { %v3393_v28 = vperm.slane %v3385_v5, %v7276_v49  ;;  %v10274_v23 = vsel %vm12378_vm0, %v10252_v29, %v3404_v11  ;;  %v5105_v21 = vsel %vm12378_vm0, %v10125_v3, %v5104_v15  ;;  %v5126_v50 = vrot.slane %v1616_v43, 4 }
 0x6b8   :  { %5310 = vrot.lane.b32.xlu0 %v1947_v62, %s6866_s13  ;;  %v3373_v35 = vsel %vm12378_vm0, %v10257_v58, %v3372_v17  ;;  %12805 = vst [vmem:[#allocation78_spill] sm:$0xff] %v10274_v23  ;;  %v10280_v53 = vperm.slane %v5093_v1, %v7130_v63  ;;  %v3400_v22 = vrot.slane %v3357_v38, 4  ;;  %v5097_v3 = vperm.slane %v5091_v57, %v7130_v63 }
 0x6b9   :  { %v3381_v62 = vperm.slane %v3373_v35, %v7276_v49  ;;  %v10288_v45 = vsel %vm12378_vm0, %v3393_v28, %v3408_v27  ;;  %v2282_v17 = vrot.slane %v9310_v34, 4  ;;  %v1724_v9 = vrot.slane %v10222_v44, 4  ;;  %v12812_v35 = vld [vmem:[#allocation72_spill] sm:$0xff] }
 0x6ba   :  { %12806 = vst [vmem:[#allocation77_spill] sm:$0xff] %v10280_v53  ;;  %5278 = vrot.lane.b32.xlu1 %v12807_v46, %s6865_s0  ;;  %5246 = vrot.lane.b32.xlu2 %v12808_v13, %s6864_s10  ;;  %v3406_v5 = vrot.slane %v3393_v28, 4  ;;  %v10294_v11 = vperm.slane %v5105_v21, %v7130_v63  ;;  %v5138_v1 = vrot.slane %v5109_v52, 4  ;;  %v5116_v13 = vrot.slane %v12812_v35, 4 }
 0x6bb   :  { %12809 = vst [vmem:[#allocation80_spill] sm:$0xff] %v10288_v45  ;;  %v3398_v15 = vrot.slane %v3381_v62, 4  ;;  %v10297_v46 = vsel %vm12378_vm0, %v3381_v62, %v3400_v22  ;;  %v5127_v27 = vsel %vm12378_vm0, %v5126_v50, %v10132_v19  ;;  %v5152_v34 = vrot.slane %v10280_v53, 4  ;;  %v12814_v62 = vld [vmem:[#allocation208_spill] sm:$0xff] }
 0x6bc   :  { %12810 = vst [vmem:[#allocation79_spill] sm:$0xff] %v10294_v11  ;;  %v10303_v57 = vsel %vm12378_vm0, %v3406_v5, %v3369_v48  ;;  %v1725_v28 = vsel %vm12378_vm0, %v1709_v4, %v1724_v9  ;;  %v1722_v32 = vrot.slane %v1709_v4, 4  ;;  %v2014_v23 = vrot.slane %v12813_v30, 4 }
 0x6bd   :  { %12811 = vst [vmem:[#allocation151_spill] sm:$0xff] %v10297_v46  ;;  %v10308_v21 = vsel %vm12378_vm0, %v3398_v15, %v3357_v38  ;;  %v2038_v22 = vrot.slane %v12814_v62, 4  ;;  %v5128_v45 = vrot.slane %v10132_v19, 4  ;;  %v2283_v50 = vsel %vm12378_vm0, %v2282_v17, %v9293_v40  ;;  %v12815_v62 = vld [vmem:[#allocation6_spill] sm:$0xff] }
 0x6be   :  { %v5140_v46 = vrot.slane %v5097_v3, 4  ;;  %v5133_v48 = vperm.slane %v5127_v27, %v7130_v63  ;;  %v5139_v4 = vsel %vm12378_vm0, %v5138_v1, %v5097_v3  ;;  %v5153_v38 = vsel %vm12378_vm0, %v10294_v11, %v5152_v34 }
 0x6bf   :  { %v4194_v30 = vrot.slane %v10044_v59, 4  ;;  %v5129_v9 = vsel %vm12378_vm0, %v1616_v43, %v5128_v45  ;;  %v2015_v40 = vsel %vm12378_vm0, %v2014_v23, %v12815_v62  ;;  %v12817_v43 = vld [vmem:[#allocation205_spill] sm:$0xff]  ;;  %v10338_v1 = vperm.slane %v5139_v4, %v7276_v49 }
 0x6c0   :  { %5316 = vrot.lane.b32.xlu0 %v2283_v50, %s6866_s13  ;;  %v1591_v5 = vpop.permute.xlu1 %1590  ;;  %v5141_v3 = vsel %vm12378_vm0, %v5109_v52, %v5140_v46  ;;  %v2039_v45 = vsel %vm12378_vm0, %v2038_v22, %v12817_v43  ;;  %v10341_v23 = vperm.slane %v5153_v38, %v7276_v49  ;;  %v2021_v27 = vperm.slane %v2015_v40, %v7276_v49  ;;  %v12824_v43 = vld [vmem:[#allocation85_spill] sm:$0xff] }
 0x6c1   :  { %v5114_v15 = vrot.slane %v1591_v5, 4  ;;  %v5117_v19 = vsel %vm12378_vm0, %v1591_v5, %v5116_v13  ;;  %12818 = vst [vmem:[#allocation160_spill] sm:$0xff] %v10338_v1  ;;  %v10344_v13 = vperm.slane %v5129_v9, %v7130_v63  ;;  %v4195_v46 = vsel %vm12378_vm0, %v4194_v30, %v10003_v12 }
 0x6c2   :  { %v10326_v17 = vperm.slane %v5117_v19, %v7130_v63  ;;  %5284 = vrot.lane.b32.xlu1 %v9355_v61, %s6865_s0  ;;  %5252 = vrot.lane.b32.xlu2 %v9367_v55, %s6864_s10  ;;  %12819 = vst [vmem:[#allocation72_spill] sm:$0xff] %v10341_v23  ;;  %v5162_v61 = vrot.slane %v5133_v48, 4  ;;  %v5149_v34 = vperm.slane %v5141_v3, %v7276_v49  ;;  %v2350_v38 = vrot.slane %v9628_v24, 4  ;;  %s6892_s10 = smov 60  }
 0x6c3   :  { %v5115_v59 = vsel %vm12378_vm0, %v5114_v15, %v12812_v35  ;;  %12820 = vst [vmem:[#allocation15_spill] sm:$0xff] %v10344_v13  ;;  %v1723_v35 = vsel %vm12378_vm0, %v1722_v32, %v10222_v44  ;;  %v2045_v50 = vperm.slane %v2039_v45, %v7276_v49  ;;  %v5188_v12 = vrot.slane %v10338_v1, 4 }
 0x6c4   :  { %12816 = vst [vmem:[#allocation156_spill] sm:$0xff] %v10326_v17  ;;  %v5121_v55 = vperm.slane %v5115_v59, %v7130_v63  ;;  %v5176_v52 = vrot.slane %v10326_v17, 4  ;;  %v10367_v44 = vperm.slane %v4195_v46, %v7130_v63  ;;  %v4220_v30 = vrot.slane %v10122_v54, 4  ;;  %v12886_v17 = vld [vmem:[#allocation277_spill] sm:$0xff] }
 0x6c5   :  { %v5200_v24 = vrot.slane %v10341_v23, 4  ;;  %v4218_v19 = vrot.slane %v10147_v31, 4  ;;  %v5192_v40 = vrot.slane %v5149_v34, 4  ;;  %v4206_v59 = vrot.slane %v12782_v36, 4 }
 0x6c6   :  { %v5164_v22 = vrot.slane %v5121_v55, 4  ;;  %v5163_v5 = vsel %vm12378_vm0, %v5162_v61, %v5121_v55  ;;  %v5177_v4 = vsel %vm12378_vm0, %v10344_v13, %v5176_v52  ;;  %v2374_v45 = vrot.slane %v9753_v26, 4 }
 0x6c7   :  { %v10360_v9 = vperm.slane %v5163_v5, %v7276_v49  ;;  %v10364_v32 = vperm.slane %v5177_v4, %v7276_v49  ;;  %v4221_v61 = vsel %vm12378_vm0, %v10147_v31, %v4220_v30  ;;  %v4207_v36 = vsel %vm12378_vm0, %v4206_v59, %v10001_v0 }
 0x6c8   :  { %5338 = vrot.lane.b32.xlu0 %v1725_v28, %s6867_s14  ;;  %v5165_v15 = vsel %vm12378_vm0, %v5133_v48, %v5164_v22  ;;  %v2060_v28 = vrot.slane %v2021_v27, 4  ;;  %v2058_v46 = vrot.slane %v2045_v50, 4  ;;  %v12827_v22 = vld [vmem:[#allocation28_spill] sm:$0xff]  ;;  %v4244_v4 = vrot.slane %v10367_v44, 4 }
 0x6c9   :  { %12821 = vst [vmem:[#allocation208_spill] sm:$0xff] %v10360_v9  ;;  %v5173_v62 = vperm.slane %v5165_v15, %v7276_v49  ;;  %v10377_v3 = vsel %vm12378_vm0, %v10360_v9, %v5188_v12  ;;  %v10385_v48 = vsel %vm12378_vm0, %v10364_v32, %v5200_v24  ;;  %v2351_v5 = vsel %vm12378_vm0, %v2350_v38, %v12827_v22  ;;  %v12828_v12 = vld [vmem:[#allocation13_spill] sm:$0xff] }
 0x6ca   :  { %12822 = vst [vmem:[#allocation6_spill] sm:$0xff] %v10364_v32  ;;  %5306 = vrot.lane.b32.xlu1 %v1723_v35, %s6866_s13  ;;  %5274 = vrot.lane.b32.xlu2 %v12824_v43, %s6865_s0  ;;  %v2056_v35 = vrot.slane %v9407_v25, 4  ;;  %v4219_v26 = vsel %vm12378_vm0, %v4218_v19, %v10122_v54  ;;  %v2375_v31 = vsel %vm12378_vm0, %v2374_v45, %v12828_v12  ;;  %v4232_v25 = vrot.slane %v10171_v8, 4  ;;  %v12830_v24 = vld [vmem:[#allocation81_spill] sm:$0xff] }
 0x6cb   :  { %12823 = vst [vmem:[#allocation205_spill] sm:$0xff] %v10377_v3  ;;  %v10391_v55 = vsel %vm12378_vm0, %v5173_v62, %v5192_v40  ;;  %v5190_v52 = vrot.slane %v5173_v62, 4  ;;  %v10407_v15 = vperm.slane %v4221_v61, %v7130_v63  ;;  %v10410_v0 = vperm.slane %v4207_v36, %v7130_v63  ;;  %v12914_v9 = vld [vmem:[#allocation145_spill] sm:$0xff] }
 0x6cc   :  { %12825 = vst [vmem:[#allocation85_spill] sm:$0xff] %v10385_v48  ;;  %v2061_v38 = vsel %vm12378_vm0, %v2045_v50, %v2060_v28  ;;  %v2057_v62 = vsel %vm12378_vm0, %v12830_v24, %v2056_v35  ;;  %v10417_v54 = vperm.slane %v4219_v26, %v7130_v63  ;;  %v2059_v19 = vsel %vm12378_vm0, %v2058_v46, %v2021_v27  ;;  %v12831_v27 = vld [vmem:[#allocation103_spill] sm:$0xff]  ;;  %v12832_v46 = vld [vmem:[#allocation108_spill] sm:$0xff] }
 0x6cd   :  { %12826 = vst [vmem:[#allocation315_spill] sm:$0xff] %v10391_v55  ;;  %v10404_v30 = vsel %vm12378_vm0, %v5190_v52, %v5149_v34  ;;  %v2357_v40 = vperm.slane %v2351_v5, %v7276_v49  ;;  %v2381_v59 = vperm.slane %v2375_v31, %v7276_v49  ;;  %v4245_v50 = vsel %vm12378_vm0, %v10410_v0, %v4244_v4 }
 0x6ce   :  { %12829 = vst [vmem:[#allocation28_spill] sm:$0xff] %v10404_v30  ;;  %v4265_v28 = vperm.slane %v10061_v42, %v7276_v49  ;;  %v4280_v61 = vrot.slane %v10407_v15, 4  ;;  %v1790_v36 = vrot.slane %v12831_v27, 4  ;;  %v1814_v35 = vrot.slane %v12832_v46, 4 }
 0x6cf   :  { %v4268_v5 = vrot.slane %v10417_v54, 4  ;;  %v10445_v26 = vperm.slane %v4245_v50, %v7276_v49  ;;  %v2396_v12 = vrot.slane %v2357_v40, 4  ;;  %v2394_v31 = vrot.slane %v2381_v59, 4 }
 0x6d0   :  { %5344 = vrot.lane.b32.xlu0 %v2061_v38, %s6867_s14  ;;  %v1610_v34 = vpop.permute.xlu1 %1609  ;;  %v4304_v38 = vrot.slane %v4265_v28, 4  ;;  %v2392_v24 = vrot.slane %v9794_v16, 4  ;;  %v3146_v13 = vrot.slane %v12886_v17, 4 }
 0x6d1   :  { %v4230_v43 = vrot.slane %v1610_v34, 4  ;;  %v4233_v45 = vsel %vm12378_vm0, %v1610_v34, %v4232_v25  ;;  %v4296_v27 = vrot.slane %v10445_v26, 4  ;;  %v2395_v46 = vsel %vm12378_vm0, %v2394_v31, %v2357_v40 }
 0x6d2   :  { %v10430_v52 = vperm.slane %v4233_v45, %v7130_v63  ;;  %5312 = vrot.lane.b32.xlu1 %v2059_v19, %s6866_s13  ;;  %5280 = vrot.lane.b32.xlu2 %v2057_v62, %s6865_s0  ;;  %v12833_v62 = vld [vmem:[#allocation107_spill] sm:$0xff]  ;;  %v2397_v19 = vsel %vm12378_vm0, %v2381_v59, %v2396_v12 }
 0x6d3   :  { %v4231_v22 = vsel %vm12378_vm0, %v4230_v43, %v10171_v8  ;;  %v1815_v8 = vsel %vm12378_vm0, %v1814_v35, %v12833_v62  ;;  %v2393_v35 = vsel %vm12378_vm0, %v9781_v14, %v2392_v24  ;;  %v12839_v12 = vld [vmem:[#allocation115_spill] sm:$0xff]  ;;  %v12841_v24 = vld [vmem:[#allocation241_spill] sm:$0xff] }
 0x6d4   :  { %v10440_v42 = vperm.slane %v4231_v22, %v7130_v63  ;;  %v4281_v4 = vsel %vm12378_vm0, %v10430_v52, %v4280_v61  ;;  %v12835_v61 = vld [vmem:[#allocation101_spill] sm:$0xff]  ;;  %v1821_v59 = vperm.slane %v1815_v8, %v7276_v49  ;;  %v12836_v22 = vld [vmem:[#allocation242_spill] sm:$0xff]  ;;  %v1838_v40 = vrot.slane %v12839_v12, 4  ;;  %v12842_v8 = vld [vmem:[#allocation111_spill] sm:$0xff] }
 0x6d5   :  { %v4289_v25 = vperm.slane %v4281_v4, %v7276_v49  ;;  %v1791_v16 = vsel %vm12378_vm0, %v1790_v36, %v12835_v61  ;;  %v12843_v61 = vld [vmem:[#allocation235_spill] sm:$0xff] }
 0x6d6   :  { %v4269_v34 = vsel %vm12378_vm0, %v10440_v42, %v4268_v5  ;;  %v2150_v5 = vrot.slane %v12836_v22, 4  ;;  %v1797_v31 = vperm.slane %v1791_v16, %v7276_v49  ;;  %v1834_v14 = vrot.slane %v1821_v59, 4  ;;  %v12844_v22 = vld [vmem:[#allocation45_spill] sm:$0xff] }
 0x6d7   :  { %v10455_v43 = vperm.slane %v4269_v34, %v7276_v49  ;;  %v4302_v45 = vrot.slane %v4289_v25, 4  ;;  %v10458_v50 = vsel %vm12378_vm0, %v4289_v25, %v4304_v38  ;;  %v12840_v25 = vld [vmem:[#allocation240_spill] sm:$0xff]  ;;  %v1839_v34 = vsel %vm12378_vm0, %v1838_v40, %v12842_v8 }
 0x6d8   :  { %12834 = vst [vmem:[#allocation13_spill] sm:$0xff] %v10458_v50  ;;  %5350 = vrot.lane.b32.xlu0 %v2397_v19, %s6867_s14  ;;  %v2126_v38 = vrot.slane %v12840_v25, 4  ;;  %v2151_v62 = vsel %vm12378_vm0, %v2150_v5, %v12841_v24  ;;  %v1836_v19 = vrot.slane %v1797_v31, 4  ;;  %v2174_v5 = vrot.slane %v12844_v22, 4  ;;  %v10529_v22 = vpop.permute.xlu2 %5212 }
 0x6d9   :  { %v10473_v4 = vsel %vm12378_vm0, %v10455_v43, %v4296_v27  ;;  %v10476_v36 = vsel %vm12378_vm0, %v4302_v45, %v4265_v28  ;;  %v1835_v45 = vsel %vm12378_vm0, %v1834_v14, %v1797_v31  ;;  %v2157_v16 = vperm.slane %v2151_v62, %v7276_v49  ;;  %v12845_v31 = vld [vmem:[#allocation243_spill] sm:$0xff] }
 0x6da   :  { %5318 = vrot.lane.b32.xlu1 %v2395_v46, %s6866_s13  ;;  %5286 = vrot.lane.b32.xlu2 %v2393_v35, %s6865_s0  ;;  %12837 = vst [vmem:[#allocation81_spill] sm:$0xff] %v10473_v4  ;;  %v2127_v27 = vsel %vm12378_vm0, %v2126_v38, %v12843_v61  ;;  %v1837_v28 = vsel %vm12378_vm0, %v1821_v59, %v1836_v19  ;;  %v10491_v46 = vpop.permute.xlu0 %5214  ;;  %v2486_v35 = vrot.slane %v10183_v2, 4  ;;  %v2462_v40 = vrot.slane %v10151_v60, 4  ;;  %v12918_v4 = vld [vmem:[#allocation222_spill] sm:$0xff] }
 0x6db   :  { %12838 = vst [vmem:[#allocation103_spill] sm:$0xff] %v10476_v36  ;;  %v2133_v12 = vperm.slane %v2127_v27, %v7276_v49  ;;  %v2170_v25 = vrot.slane %v2157_v16, 4  ;;  %v2175_v14 = vsel %vm12378_vm0, %v2174_v5, %v12845_v31  ;;  %v12849_v5 = vld [vmem:[#allocation157_spill] sm:$0xff]  ;;  %v12913_v36 = vld [vmem:[#allocation139_spill] sm:$0xff] }
 0x6dc   :  { %v2487_v59 = vsel %vm12378_vm0, %v2486_v35, %v10165_v39  ;;  %v2463_v2 = vsel %vm12378_vm0, %v2462_v40, %v10144_v10  ;;  %v2510_v39 = vrot.slane %v10198_v20, 4  ;;  %v10524_v20 = vpop.permute.xlu1 %5210  ;;  %v12851_v40 = vld [vmem:[#allocation99_spill] sm:$0xff] }
 0x6dd   :  { %v2172_v38 = vrot.slane %v2133_v12, 4  ;;  %v2171_v62 = vsel %vm12378_vm0, %v2170_v25, %v2133_v12  ;;  %v2493_v8 = vperm.slane %v2487_v59, %v7276_v49  ;;  %v12850_v12 = vld [vmem:[#allocation158_spill] sm:$0xff]  ;;  %v2562_v25 = vrot.slane %v12851_v40, 4 }
 0x6de   :  { %v2511_v10 = vsel %vm12378_vm0, %v2510_v39, %v10175_v56  ;;  %v12848_v56 = vld [vmem:[#allocation61_spill] sm:$0xff]  ;;  %v12857_v39 = vld [vmem:[#allocation26_spill] sm:$0xff] }
 0x6df   :  { %v2173_v24 = vsel %vm12378_vm0, %v2157_v16, %v2172_v38  ;;  %v2506_v19 = vrot.slane %v2493_v8, 4  ;;  %v12847_v16 = vld [vmem:[#allocation154_spill] sm:$0xff]  ;;  %v2586_v35 = vrot.slane %v12848_v56, 4  ;;  %v12860_v56 = vld [vmem:[#allocation83_spill] sm:$0xff] }
 0x6e0   :  { %5372 = vrot.lane.b32.xlu0 %v1839_v34, %s6868_s15  ;;  %v2469_v34 = vperm.slane %v2463_v2, %v7276_v49  ;;  %v12855_v2 = vld [vmem:[#allocation261_spill] sm:$0xff] }
 0x6e2   :  { %5340 = vrot.lane.b32.xlu1 %v1837_v28, %s6867_s14  ;;  %5308 = vrot.lane.b32.xlu2 %v1835_v45, %s6866_s13  ;;  %v10509_v60 = vpop.permute.xlu0 %5220  ;;  %v2508_v61 = vrot.slane %v2469_v34, 4  ;;  %v2507_v28 = vsel %vm12378_vm0, %v2506_v19, %v2469_v34  ;;  %v12858_v34 = vld [vmem:[#allocation259_spill] sm:$0xff] }
 0x6e4   :  { %v2509_v27 = vsel %vm12378_vm0, %v2493_v8, %v2508_v61  ;;  %v10538_v31 = vpop.permute.xlu1 %5216 }
 0x6e5   :  { %12853 = vst [vmem:[#allocation101_spill] sm:$0xff] %v10538_v31  ;;  %v12935_v31 = vld [vmem:[#allocation39_spill] sm:$0xff] }
 0x6e8   :  { %5378 = vrot.lane.b32.xlu0 %v2175_v14, %s6868_s15  ;;  %v12854_v14 = vld [vmem:[#allocation57_spill] sm:$0xff] }
 0x6e9   :  { %v2587_v38 = vsel %vm12378_vm0, %v2586_v35, %v12854_v14  ;;  %v12861_v35 = vld [vmem:[#allocation86_spill] sm:$0xff] }
 0x6ea   :  { %5346 = vrot.lane.b32.xlu1 %v2173_v24, %s6867_s14  ;;  %5314 = vrot.lane.b32.xlu2 %v2171_v62, %s6866_s13  ;;  %v10522_v45 = vpop.permute.xlu0 %5242  ;;  %v12856_v24 = vld [vmem:[#allocation97_spill] sm:$0xff]  ;;  %v10547_v8 = vperm.slane %v2587_v38, %v7276_v49 }
 0x6eb   :  { %12846 = vst [vmem:[#allocation108_spill] sm:$0xff] %v10522_v45  ;;  %v2563_v62 = vsel %vm12378_vm0, %v2562_v25, %v12856_v24  ;;  %v12863_v25 = vld [vmem:[#allocation192_spill] sm:$0xff] }
 0x6ec   :  { %v10554_v19 = vperm.slane %v2563_v62, %v7276_v49  ;;  %v2610_v61 = vrot.slane %v10547_v8, 4 }
 0x6f0   :  { %5384 = vrot.lane.b32.xlu0 %v2511_v10, %s6868_s15  ;;  %v10556_v10 = vpop.permute.xlu2 %5218 }
 0x6f1   :  { %12859 = vst [vmem:[#allocation242_spill] sm:$0xff] %v10556_v10  ;;  %v13070_v10 = vld [vmem:[#allocation90_spill] sm:$0xff] }
 0x6f2   :  { %5352 = vrot.lane.b32.xlu1 %v2509_v27, %s6867_s14  ;;  %5320 = vrot.lane.b32.xlu2 %v2507_v28, %s6866_s13  ;;  %v10536_v59 = vpop.permute.xlu0 %5248  ;;  %v2611_v28 = vsel %vm12378_vm0, %v2610_v61, %v10554_v19  ;;  %v3282_v61 = vrot.slane %v9975_v47, 4  ;;  %v12871_v47 = vld [vmem:[#allocation20_spill] sm:$0xff] }
 0x6f3   :  { %12852 = vst [vmem:[#allocation107_spill] sm:$0xff] %v10536_v59  ;;  %v3010_v48 = vrot.slane %v12871_v47, 4 }
 0x6f8   :  { %5406 = vrot.lane.b32.xlu0 %v12847_v16, %s6869_s16  ;;  %v10563_v16 = vpop.permute.xlu1 %5222 }
 0x6fa   :  { %5374 = vrot.lane.b32.xlu1 %v12849_v5, %s6868_s15  ;;  %5342 = vrot.lane.b32.xlu2 %v12850_v12, %s6867_s14  ;;  %v10559_v27 = vpop.permute.xlu0 %5254  ;;  %v12862_v5 = vld [vmem:[#allocation195_spill] sm:$0xff] }
 0x6fb   :  { %v2946_v12 = vrot.slane %v12862_v5, 4  ;;  %v12869_v5 = vld [vmem:[#allocation130_spill] sm:$0xff] }
 0x6fd   :  { %v2947_v14 = vsel %vm12378_vm0, %v2946_v12, %v12863_v25  ;;  %v12870_v25 = vld [vmem:[#allocation137_spill] sm:$0xff] }
 0x700   :  { %5412 = vrot.lane.b32.xlu0 %v12855_v2, %s6869_s16  ;;  %v12865_v2 = vld [vmem:[#allocation138_spill] sm:$0xff]  ;;  %v10579_v62 = vpop.permute.xlu1 %5244 }
 0x701   :  { %v2698_v24 = vrot.slane %v12865_v2, 4  ;;  %v3283_v2 = vsel %vm12378_vm0, %v3282_v61, %v9960_v33 }
 0x702   :  { %5380 = vrot.lane.b32.xlu1 %v12857_v39, %s6868_s15  ;;  %5348 = vrot.lane.b32.xlu2 %v12858_v34, %s6867_s14  ;;  %v10575_v38 = vpop.permute.xlu0 %5276  ;;  %v12866_v39 = vld [vmem:[#allocation210_spill] sm:$0xff]  ;;  %v12867_v34 = vld [vmem:[#allocation211_spill] sm:$0xff] }
 0x703   :  { %12864 = vst [vmem:[#allocation115_spill] sm:$0xff] %v10575_v38 }
 0x708   :  { %5434 = vrot.lane.b32.xlu0 %v2611_v28, %s6870_s17  ;;  %v12868_v28 = vld [vmem:[#allocation136_spill] sm:$0xff] }
 0x70a   :  { %5402 = vrot.lane.b32.xlu1 %v12860_v56, %s6869_s16  ;;  %5370 = vrot.lane.b32.xlu2 %v12861_v35, %s6868_s15  ;;  %v2674_v56 = vrot.slane %v12868_v28, 4  ;;  %v12872_v28 = vld [vmem:[#allocation221_spill] sm:$0xff]  ;;  %v10600_v32 = vpop.permute.xlu0 %5282 }
 0x70b   :  { %v3034_v23 = vrot.slane %v12872_v28, 4  ;;  %12873 = vst [vmem:[#allocation240_spill] sm:$0xff] %v10600_v32  ;;  %v3346_v28 = vrot.slane %v10034_v18, 4 }
 0x70c   :  { %v10571_v40 = vpop.permute.xlu2 %5224  ;;  %v2675_v12 = vsel %vm12378_vm0, %v2674_v56, %v12869_v5  ;;  %v12875_v5 = vld [vmem:[#allocation8_spill] sm:$0xff] }
 0x710   :  { %5440 = vrot.lane.b32.xlu0 %v2947_v14, %s6870_s17  ;;  %v2699_v14 = vsel %vm12378_vm0, %v2698_v24, %v12870_v25  ;;  %v10606_v24 = vpop.permute.xlu1 %5250  ;;  %v12876_v25 = vld [vmem:[#allocation220_spill] sm:$0xff] }
 0x711   :  { %12874 = vst [vmem:[#allocation241_spill] sm:$0xff] %v10606_v24 }
 0x712   :  { %5408 = vrot.lane.b32.xlu1 %v12866_v39, %s6869_s16  ;;  %5376 = vrot.lane.b32.xlu2 %v12867_v34, %s6868_s15  ;;  %v2681_v39 = vperm.slane %v2675_v12, %v7276_v49  ;;  %v2705_v34 = vperm.slane %v2699_v14, %v7276_v49  ;;  %v3011_v12 = vsel %vm12378_vm0, %v3010_v48, %v12875_v5  ;;  %v12877_v48 = vld [vmem:[#allocation119_spill] sm:$0xff]  ;;  %v12879_v5 = vld [vmem:[#allocation69_spill] sm:$0xff] }
 0x713   :  { %v3035_v14 = vsel %vm12378_vm0, %v3034_v23, %v12876_v25  ;;  %v3370_v23 = vrot.slane %v10257_v58, 4 }
 0x714   :  { %v10587_v35 = vpop.permute.xlu2 %5246  ;;  %v2724_v61 = vrot.slane %v2681_v39, 4  ;;  %v2722_v56 = vrot.slane %v2705_v34, 4  ;;  %v3041_v47 = vperm.slane %v3035_v14, %v7276_v49 }
 0x715   :  { %v3371_v18 = vsel %vm12378_vm0, %v3370_v23, %v10243_v6  ;;  %v12882_v6 = vld [vmem:[#allocation164_spill] sm:$0xff] }
 0x716   :  { %v2810_v23 = vrot.slane %v12882_v6, 4 }
 0x718   :  { %5446 = vrot.lane.b32.xlu0 %v3283_v2, %s6870_s17  ;;  %v2725_v2 = vsel %vm12378_vm0, %v2705_v34, %v2724_v61 }
 0x71a   :  { %5414 = vrot.lane.b32.xlu1 %v9788_v51, %s6869_s16  ;;  %5382 = vrot.lane.b32.xlu2 %v9806_v37, %s6868_s15  ;;  %v2723_v51 = vsel %vm12378_vm0, %v2722_v56, %v2681_v39  ;;  %v3017_v37 = vperm.slane %v3011_v12, %v7276_v49  ;;  %v3058_v56 = vrot.slane %v3041_v47, 4  ;;  %v3347_v12 = vsel %vm12378_vm0, %v3346_v28, %v12879_v5  ;;  %v12881_v28 = vld [vmem:[#allocation153_spill] sm:$0xff]  ;;  %s6569_s15 = sshll.u32 %s12080_s1, 4  ;;  %s6570_s15 = int_to_ptr.hbm [resolvable:$true] %s6569_s15 }
 0x71b   :  { %v3353_v58 = vperm.slane %v3347_v12, %v7276_v49  ;;  %v2786_v5 = vrot.slane %v12881_v28, 4  ;;  %v12884_v12 = vld [vmem:[#allocation162_spill] sm:$0xff] }
 0x71c   :  { %v10608_v33 = vpop.permute.xlu2 %5252  ;;  %v3060_v39 = vrot.slane %v3017_v37, 4  ;;  %v3059_v14 = vsel %vm12378_vm0, %v3058_v56, %v3017_v37 }
 0x71d   :  { %v3396_v37 = vrot.slane %v3353_v58, 4 }
 0x71e   :  { %v3061_v25 = vsel %vm12378_vm0, %v3041_v47, %v3060_v39 }
 0x720   :  { %5468 = vrot.lane.b32.xlu0 %v2725_v2, %s6871_s18  ;;  %v3377_v2 = vperm.slane %v3371_v18, %v7276_v49  ;;  %v2811_v18 = vsel %vm12378_vm0, %v2810_v23, %v12884_v12  ;;  %v12887_v23 = vld [vmem:[#allocation165_spill] sm:$0xff] }
 0x721   :  { %v2817_v6 = vperm.slane %v2811_v18, %v7276_v49 }
 0x722   :  { %v10620_v53 = vpop.permute.xlu0 %5288  ;;  %5436 = vrot.lane.b32.xlu1 %v2723_v51, %s6870_s17  ;;  %5404 = vrot.lane.b32.xlu2 %v12877_v48, %s6869_s16  ;;  %v12880_v48 = vld [vmem:[#allocation245_spill] sm:$0xff]  ;;  %v3394_v56 = vrot.slane %v3377_v2, 4 }
 0x724   :  { %v10626_v34 = vpop.permute.xlu2 %5274  ;;  %v10628_v61 = vpop.permute.xlu1 %5256  ;;  %v3395_v28 = vsel %vm12378_vm0, %v3394_v56, %v3353_v58  ;;  %v2834_v58 = vrot.slane %v2817_v6, 4  ;;  %v12888_v56 = vld [vmem:[#allocation274_spill] sm:$0xff] }
 0x725   :  { %12878 = vst [vmem:[#allocation111_spill] sm:$0xff] %v10626_v34  ;;  %v3122_v18 = vrot.slane %v12888_v56, 4  ;;  %v13001_v34 = vld [vmem:[#allocation19_spill] sm:$0xff] }
 0x728   :  { %5474 = vrot.lane.b32.xlu0 %v3061_v25, %s6871_s18  ;;  %v3397_v25 = vsel %vm12378_vm0, %v3377_v2, %v3396_v37  ;;  %v2838_v2 = vrot.slane %v12887_v23, 4 }
 0x72a   :  { %v10639_v51 = vpop.permute.xlu0 %5310  ;;  %5442 = vrot.lane.b32.xlu1 %v3059_v14, %s6870_s17  ;;  %5410 = vrot.lane.b32.xlu2 %v12880_v48, %s6869_s16  ;;  %v12885_v14 = vld [vmem:[#allocation150_spill] sm:$0xff] }
 0x72b   :  { %v2787_v48 = vsel %vm12378_vm0, %v2786_v5, %v12885_v14  ;;  %v12890_v14 = vld [vmem:[#allocation163_spill] sm:$0xff] }
 0x72c   :  { %v10646_v47 = vpop.permute.xlu2 %5280  ;;  %v10648_v39 = vpop.permute.xlu1 %5278  ;;  %v2793_v37 = vperm.slane %v2787_v48, %v7276_v49  ;;  %v2839_v30 = vsel %vm12378_vm0, %v2838_v2, %v12890_v14 }
 0x72d   :  { %12883 = vst [vmem:[#allocation235_spill] sm:$0xff] %v10646_v47 }
 0x72e   :  { %v2835_v23 = vsel %vm12378_vm0, %v2834_v58, %v2793_v37 }
 0x730   :  { %5480 = vrot.lane.b32.xlu0 %v3397_v25, %s6871_s18  ;;  %v12889_v25 = vld [vmem:[#allocation275_spill] sm:$0xff] }
 0x731   :  { %v3147_v17 = vsel %vm12378_vm0, %v3146_v13, %v12889_v25  ;;  %v12893_v13 = vld [vmem:[#allocation279_spill] sm:$0xff] }
 0x732   :  { %v10659_v11 = vpop.permute.xlu0 %5316  ;;  %5416 = vrot.lane.b32.xlu2 %v10206_v7, %s6869_s16  ;;  %5448 = vrot.lane.b32.xlu1 %v3395_v28, %s6870_s17  ;;  %v2836_v7 = vrot.slane %v2793_v37, 4  ;;  %v12891_v28 = vld [vmem:[#allocation268_spill] sm:$0xff]  ;;  %v3153_v55 = vperm.slane %v3147_v17, %v7276_v49  ;;  %v3174_v2 = vrot.slane %v12893_v13, 4  ;;  %v12896_v37 = vld [vmem:[#allocation278_spill] sm:$0xff]  ;;  %s6895_s16 = smov [#allocation2]  }
 0x733   :  { %v3123_v48 = vsel %vm12378_vm0, %v3122_v18, %v12891_v28  ;;  %v12900_v13 = vld [vmem:[#allocation102_spill] sm:$0xff] }
 0x734   :  { %v10666_v12 = vpop.permute.xlu2 %5286  ;;  %v10668_v5 = vpop.permute.xlu1 %5284  ;;  %v2837_v3 = vsel %vm12378_vm0, %v2817_v6, %v2836_v7  ;;  %v3129_v25 = vperm.slane %v3123_v48, %v7276_v49  ;;  %v3170_v18 = vrot.slane %v3153_v55, 4  ;;  %v3175_v6 = vsel %vm12378_vm0, %v3174_v2, %v12896_v37 }
 0x736   :  { %v3172_v58 = vrot.slane %v3129_v25, 4  ;;  %v3171_v17 = vsel %vm12378_vm0, %v3170_v18, %v3129_v25  ;;  %v12901_v25 = vld [vmem:[#allocation100_spill] sm:$0xff] }
 0x738   :  { %5502 = vrot.lane.b32.xlu0 %v2839_v30, %s6872_s19  ;;  %v3173_v7 = vsel %vm12378_vm0, %v3153_v55, %v3172_v58  ;;  %v12904_v58 = vld [vmem:[#allocation198_spill] sm:$0xff] }
 0x73a   :  { %v10681_v56 = vpop.permute.xlu0 %5338  ;;  %5438 = vrot.lane.b32.xlu2 %v2835_v23, %s6870_s17  ;;  %5470 = vrot.lane.b32.xlu1 %v2837_v3, %s6871_s18  ;;  %v2612_v23 = vrot.slane %v10554_v19, 4  ;;  %v12902_v19 = vld [vmem:[#allocation201_spill] sm:$0xff] }
 0x73b   :  { %12892 = vst [vmem:[#allocation45_spill] sm:$0xff] %v10681_v56 }
 0x73c   :  { %v10687_v30 = vpop.permute.xlu2 %5308  ;;  %v10689_v14 = vpop.permute.xlu1 %5306  ;;  %v2613_v2 = vsel %vm12378_vm0, %v10547_v8, %v2612_v23  ;;  %v12905_v8 = vld [vmem:[#allocation203_spill] sm:$0xff] }
 0x73d   :  { %12894 = vst [vmem:[#allocation243_spill] sm:$0xff] %v10687_v30  ;;  %v12907_v23 = vld [vmem:[#allocation307_spill] sm:$0xff] }
 0x73e   :  { %12895 = vst [vmem:[#allocation154_spill] sm:$0xff] %v10689_v14 }
 0x740   :  { %5508 = vrot.lane.b32.xlu0 %v3175_v6, %s6872_s19 }
 0x742   :  { %v10696_v3 = vpop.permute.xlu0 %5344  ;;  %5444 = vrot.lane.b32.xlu2 %v3171_v17, %s6870_s17  ;;  %5476 = vrot.lane.b32.xlu1 %v3173_v7, %s6871_s18  ;;  %s6567_s17 = sshll.u32 %s6895_s16, 4  ;;  %s6568_s17 = int_to_ptr.vmem [resolvable:$true] %s6567_s17 }
 0x743   :  { %12897 = vst [vmem:[#allocation61_spill] sm:$0xff] %v10696_v3 }
 0x744   :  { %v10700_v28 = vpop.permute.xlu2 %5314  ;;  %v10702_v48 = vpop.permute.xlu1 %5312 }
 0x745   :  { %12898 = vst [vmem:[#allocation157_spill] sm:$0xff] %v10700_v28 }
 0x746   :  { %12899 = vst [vmem:[#allocation158_spill] sm:$0xff] %v10702_v48  ;;  %v12922_v48 = vld [vmem:[#allocation161_spill] sm:$0xff] }
 0x747   :  { %v2822_v28 = vrot.slane %v12922_v48, 4 }
 0x748   :  { %5530 = vrot.lane.b32.xlu0 %v12900_v13, %s6873_s20 }
 0x74a   :  { %v10709_v55 = vpop.permute.xlu0 %5350  ;;  %5466 = vrot.lane.b32.xlu2 %v2613_v2, %s6871_s18  ;;  %5498 = vrot.lane.b32.xlu1 %v12901_v25, %s6872_s19  ;;  %v12909_v2 = vld [vmem:[#allocation308_spill] sm:$0xff]  ;;  %v12910_v25 = vld [vmem:[#allocation309_spill] sm:$0xff] }
 0x74c   :  { %v10714_v18 = vpop.permute.xlu2 %5320  ;;  %v10716_v37 = vpop.permute.xlu1 %5318 }
 0x750   :  { %5536 = vrot.lane.b32.xlu0 %v12902_v19, %s6873_s20  ;;  %v12911_v19 = vld [vmem:[#allocation140_spill] sm:$0xff] }
 0x752   :  { %v10720_v6 = vpop.permute.xlu0 %5372  ;;  %5472 = vrot.lane.b32.xlu2 %v12904_v58, %s6871_s18  ;;  %5504 = vrot.lane.b32.xlu1 %v12905_v8, %s6872_s19  ;;  %v2730_v58 = vrot.slane %v12911_v19, 4 }
 0x753   :  { %12903 = vst [vmem:[#allocation99_spill] sm:$0xff] %v10720_v6 }
 0x754   :  { %v10726_v17 = vpop.permute.xlu2 %5342  ;;  %v10728_v7 = vpop.permute.xlu1 %5340  ;;  %v2731_v1 = vsel %vm12378_vm0, %v2730_v58, %v12913_v36 }
 0x755   :  { %12906 = vst [vmem:[#allocation57_spill] sm:$0xff] %v10728_v7  ;;  %v12936_v7 = vld [vmem:[#allocation58_spill] sm:$0xff] }
 0x758   :  { %5542 = vrot.lane.b32.xlu0 %v12907_v23, %s6873_s20 }
 0x75a   :  { %v10732_v13 = vpop.permute.xlu0 %5378  ;;  %5478 = vrot.lane.b32.xlu2 %v12909_v2, %s6871_s18  ;;  %5510 = vrot.lane.b32.xlu1 %v12910_v25, %s6872_s19  ;;  %v12915_v2 = vld [vmem:[#allocation142_spill] sm:$0xff]  ;;  %v12916_v25 = vld [vmem:[#allocation224_spill] sm:$0xff]  ;;  %s6896_s18 = smov 128  }
 0x75b   :  { %12908 = vst [vmem:[#allocation261_spill] sm:$0xff] %v10732_v13  ;;  %v3066_v19 = vrot.slane %v12916_v25, 4  ;;  %v3402_v25 = vrot.slane %v10252_v29, 4 }
 0x75c   :  { %v10739_v50 = vpop.permute.xlu2 %5348  ;;  %v10741_v8 = vpop.permute.xlu1 %5346 }
 0x75d   :  { %12912 = vst [vmem:[#allocation97_spill] sm:$0xff] %v10741_v8  ;;  %v3067_v36 = vsel %vm12378_vm0, %v3066_v19, %v12918_v4  ;;  %v12924_v4 = vld [vmem:[#allocation38_spill] sm:$0xff] }
 0x760   :  { %5564 = vrot.lane.b32.xlu0 %v2731_v1, %s6874_s21  ;;  %v12919_v1 = vld [vmem:[#allocation146_spill] sm:$0xff] }
 0x761   :  { %v2798_v58 = vrot.slane %v12919_v1, 4 }
 0x762   :  { %v10746_v23 = vpop.permute.xlu0 %5384  ;;  %5500 = vrot.lane.b32.xlu2 %v12914_v9, %s6872_s19  ;;  %5532 = vrot.lane.b32.xlu1 %v12915_v2, %s6873_s20  ;;  %v12920_v9 = vld [vmem:[#allocation230_spill] sm:$0xff]  ;;  %v12921_v2 = vld [vmem:[#allocation24_spill] sm:$0xff] }
 0x763   :  { %v2799_v19 = vsel %vm12378_vm0, %v2798_v58, %v12924_v4  ;;  %v12930_v58 = vld [vmem:[#allocation36_spill] sm:$0xff] }
 0x764   :  { %v10753_v13 = vpop.permute.xlu2 %5370  ;;  %v10755_v3 = vpop.permute.xlu1 %5352  ;;  %v2805_v29 = vperm.slane %v2799_v19, %v7276_v49 }
 0x765   :  { %12917 = vst [vmem:[#allocation26_spill] sm:$0xff] %v10753_v13 }
 0x768   :  { %5570 = vrot.lane.b32.xlu0 %v3067_v36, %s6874_s21  ;;  %v12925_v36 = vld [vmem:[#allocation159_spill] sm:$0xff] }
 0x769   :  { %v2823_v1 = vsel %vm12378_vm0, %v2822_v28, %v12925_v36  ;;  %v12929_v28 = vld [vmem:[#allocation151_spill] sm:$0xff]  ;;  %v12932_v36 = vld [vmem:[#allocation96_spill] sm:$0xff] }
 0x76a   :  { %v10761_v8 = vpop.permute.xlu0 %5406  ;;  %5506 = vrot.lane.b32.xlu2 %v12920_v9, %s6872_s19  ;;  %5538 = vrot.lane.b32.xlu1 %v12921_v2, %s6873_s20  ;;  %v3403_v9 = vsel %vm12378_vm0, %v3402_v25, %v10234_v41  ;;  %v12926_v2 = vld [vmem:[#allocation16_spill] sm:$0xff]  ;;  %v2829_v48 = vperm.slane %v2823_v1, %v7276_v49  ;;  %v2540_v41 = vrot.slane %v12930_v58, 4  ;;  %v12931_v25 = vld [vmem:[#allocation42_spill] sm:$0xff]  ;;  %v2844_v58 = vrot.slane %v2805_v29, 4 }
 0x76b   :  { %v2528_v59 = vrot.slane %v12926_v2, 4  ;;  %v2552_v4 = vrot.slane %v12931_v25, 4  ;;  %v12933_v2 = vld [vmem:[#allocation98_spill] sm:$0xff]  ;;  %v12934_v1 = vld [vmem:[#allocation256_spill] sm:$0xff] }
 0x76c   :  { %v10769_v32 = vpop.permute.xlu2 %5376  ;;  %v10771_v47 = vpop.permute.xlu1 %5374  ;;  %v3134_v24 = vrot.slane %v12934_v1, 4  ;;  %v12939_v1 = vld [vmem:[#allocation23_spill] sm:$0xff]  ;;  %v2845_v38 = vsel %vm12378_vm0, %v2829_v48, %v2844_v58 }
 0x76d   :  { %12923 = vst [vmem:[#allocation259_spill] sm:$0xff] %v10769_v32  ;;  %v12927_v32 = vld [vmem:[#allocation276_spill] sm:$0xff]  ;;  %v2529_v19 = vsel %vm12378_vm0, %v12933_v2, %v2528_v59  ;;  %v12938_v59 = vld [vmem:[#allocation273_spill] sm:$0xff] }
 0x76e   :  { %v3158_v6 = vrot.slane %v12927_v32, 4  ;;  %v2537_v25 = vperm.slane %v2529_v19, %v7130_v63 }
 0x770   :  { %5576 = vrot.lane.b32.xlu0 %v3403_v9, %s6874_s21  ;;  %v2516_v9 = vrot.slane %v12932_v36, 4  ;;  %v12937_v36 = vld [vmem:[#allocation22_spill] sm:$0xff]  ;;  %v3159_v2 = vsel %vm12378_vm0, %v3158_v6, %v12938_v59  ;;  %v2574_v19 = vrot.slane %v2537_v25, 4 }
 0x771   :  { %v3135_v14 = vsel %vm12378_vm0, %v3134_v24, %v12937_v36  ;;  %v3165_v24 = vperm.slane %v3159_v2, %v7276_v49 }
 0x772   :  { %v10784_v13 = vpop.permute.xlu0 %5412  ;;  %5512 = vrot.lane.b32.xlu2 %v10308_v21, %s6872_s19  ;;  %5544 = vrot.lane.b32.xlu1 %v12929_v28, %s6873_s20  ;;  %v2541_v21 = vsel %vm12378_vm0, %v12935_v31, %v2540_v41  ;;  %v2553_v28 = vsel %vm12378_vm0, %v12936_v7, %v2552_v4  ;;  %v2517_v30 = vsel %vm12378_vm0, %v12939_v1, %v2516_v9 }
 0x773   :  { %12928 = vst [vmem:[#allocation83_spill] sm:$0xff] %v10784_v13  ;;  %v2842_v13 = vrot.slane %v2829_v48, 4  ;;  %v2549_v31 = vperm.slane %v2541_v21, %v7130_v63  ;;  %v2561_v41 = vperm.slane %v2553_v28, %v7130_v63  ;;  %v3141_v4 = vperm.slane %v3135_v14, %v7276_v49  ;;  %v12941_v48 = vld [vmem:[#allocation166_spill] sm:$0xff] }
 0x774   :  { %v10796_v32 = vpop.permute.xlu2 %5382  ;;  %v10798_v56 = vpop.permute.xlu1 %5380  ;;  %v2525_v6 = vperm.slane %v2517_v30, %v7130_v63  ;;  %v3178_v14 = vrot.slane %v3165_v24, 4 }
 0x775   :  { %v2843_v7 = vsel %vm12378_vm0, %v2842_v13, %v2805_v29  ;;  %v2600_v9 = vrot.slane %v2549_v31, 4  ;;  %v2598_v21 = vrot.slane %v2561_v41, 4  ;;  %v3180_v13 = vrot.slane %v3141_v4, 4 }
 0x776   :  { %v2576_v58 = vrot.slane %v2525_v6, 4  ;;  %v2575_v63 = vsel %vm12378_vm0, %v2574_v19, %v2525_v6  ;;  %v3179_v1 = vsel %vm12378_vm0, %v3178_v14, %v3141_v4  ;;  %v12947_v4 = vld [vmem:[#allocation193_spill] sm:$0xff] }
 0x777   :  { %v2601_v29 = vsel %vm12378_vm0, %v2561_v41, %v2600_v9  ;;  %v3181_v30 = vsel %vm12378_vm0, %v3165_v24, %v3180_v13  ;;  %v2599_v2 = vsel %vm12378_vm0, %v2598_v21, %v2549_v31  ;;  %v12945_v41 = vld [vmem:[#allocation281_spill] sm:$0xff]  ;;  %v12946_v31 = vld [vmem:[#allocation188_spill] sm:$0xff]  ;;  %v2934_v19 = vrot.slane %v12947_v4, 4  ;;  %v12952_v4 = vld [vmem:[#allocation303_spill] sm:$0xff] }
 0x778   :  { %5598 = vrot.lane.b32.xlu0 %v2845_v38, %s6875_s22  ;;  %v2577_v59 = vsel %vm12378_vm0, %v2537_v25, %v2576_v58  ;;  %v2605_v25 = vperm.slane %v2599_v2, %v7276_v49  ;;  %v2910_v6 = vrot.slane %v12946_v31, 4 }
 0x779   :  { %v10845_v24 = vperm.slane %v2577_v59, %v7276_v49  ;;  %v12951_v59 = vld [vmem:[#allocation7_spill] sm:$0xff] }
 0x77a   :  { %v10819_v36 = vpop.permute.xlu0 %5434  ;;  %5534 = vrot.lane.b32.xlu2 %v12941_v48, %s6873_s20  ;;  %5566 = vrot.lane.b32.xlu1 %v2843_v7, %s6874_s21  ;;  %v10836_v7 = vperm.slane %v2601_v29, %v7276_v49  ;;  %v2581_v48 = vperm.slane %v2575_v63, %v7276_v49  ;;  %v12950_v29 = vld [vmem:[#allocation190_spill] sm:$0xff]  ;;  %v2911_v2 = vsel %vm12378_vm0, %v2910_v6, %v12951_v59  ;;  %v12958_v59 = vld [vmem:[#allocation43_spill] sm:$0xff] }
 0x77b   :  { %12940 = vst [vmem:[#allocation86_spill] sm:$0xff] %v10819_v36  ;;  %v2935_v58 = vsel %vm12378_vm0, %v2934_v19, %v12950_v29  ;;  %v12954_v19 = vld [vmem:[#allocation197_spill] sm:$0xff]  ;;  %v2917_v29 = vperm.slane %v2911_v2, %v7276_v49 }
 0x77c   :  { %v10824_v28 = vpop.permute.xlu2 %5404  ;;  %v10826_v38 = vpop.permute.xlu1 %5402  ;;  %v2622_v13 = vrot.slane %v10836_v7, 4  ;;  %v2620_v14 = vrot.slane %v2581_v48, 4  ;;  %v2941_v31 = vperm.slane %v2935_v58, %v7276_v49  ;;  %v12957_v58 = vld [vmem:[#allocation302_spill] sm:$0xff] }
 0x77d   :  { %12942 = vst [vmem:[#allocation195_spill] sm:$0xff] %v10824_v28 }
 0x77e   :  { %12943 = vst [vmem:[#allocation192_spill] sm:$0xff] %v10826_v38  ;;  %v2623_v63 = vsel %vm12378_vm0, %v2622_v13, %v10845_v24  ;;  %v2958_v13 = vrot.slane %v12954_v19, 4 }
 0x780   :  { %5604 = vrot.lane.b32.xlu0 %v3181_v30, %s6875_s22  ;;  %v2618_v30 = vrot.slane %v2605_v25, 4 }
 0x782   :  { %v10839_v36 = vpop.permute.xlu0 %5440  ;;  %5540 = vrot.lane.b32.xlu2 %v12945_v41, %s6873_s20  ;;  %5572 = vrot.lane.b32.xlu1 %v3179_v1, %s6874_s21  ;;  %v2619_v1 = vsel %vm12378_vm0, %v2618_v30, %v2581_v48  ;;  %v2621_v41 = vsel %vm12378_vm0, %v2605_v25, %v2620_v14  ;;  %v2954_v48 = vrot.slane %v2941_v31, 4  ;;  %v12956_v25 = vld [vmem:[#allocation300_spill] sm:$0xff] }
 0x783   :  { %12944 = vst [vmem:[#allocation138_spill] sm:$0xff] %v10839_v36  ;;  %v3270_v36 = vrot.slane %v12952_v4, 4  ;;  %v3246_v14 = vrot.slane %v12956_v25, 4  ;;  %v2959_v4 = vsel %vm12378_vm0, %v2958_v13, %v12958_v59 }
 0x784   :  { %v10850_v9 = vpop.permute.xlu2 %5410  ;;  %v10852_v21 = vpop.permute.xlu1 %5408  ;;  %v2955_v2 = vsel %vm12378_vm0, %v2954_v48, %v2917_v29 }
 0x785   :  { %12948 = vst [vmem:[#allocation210_spill] sm:$0xff] %v10850_v9  ;;  %v3271_v30 = vsel %vm12378_vm0, %v3270_v36, %v12957_v58  ;;  %v12961_v36 = vld [vmem:[#allocation305_spill] sm:$0xff] }
 0x786   :  { %12949 = vst [vmem:[#allocation211_spill] sm:$0xff] %v10852_v21  ;;  %v3277_v38 = vperm.slane %v3271_v30, %v7276_v49  ;;  %v3294_v13 = vrot.slane %v12961_v36, 4 }
 0x788   :  { %5626 = vrot.lane.b32.xlu0 %v2623_v63, %s6876_s23 }
 0x78a   :  { %v10866_v21 = vpop.permute.xlu0 %5446  ;;  %5562 = vrot.lane.b32.xlu2 %v2619_v1, %s6874_s21  ;;  %5594 = vrot.lane.b32.xlu1 %v2621_v41, %s6875_s22  ;;  %v2956_v1 = vrot.slane %v2917_v29, 4  ;;  %v12959_v41 = vld [vmem:[#allocation297_spill] sm:$0xff]  ;;  %v12963_v29 = vld [vmem:[#allocation304_spill] sm:$0xff] }
 0x78b   :  { %12953 = vst [vmem:[#allocation136_spill] sm:$0xff] %v10866_v21  ;;  %v3247_v19 = vsel %vm12378_vm0, %v3246_v14, %v12959_v41  ;;  %v3290_v14 = vrot.slane %v3277_v38, 4 }
 0x78c   :  { %v10872_v63 = vpop.permute.xlu2 %5416  ;;  %v10874_v6 = vpop.permute.xlu1 %5414  ;;  %v2957_v9 = vsel %vm12378_vm0, %v2941_v31, %v2956_v1  ;;  %v3253_v25 = vperm.slane %v3247_v19, %v7276_v49  ;;  %v3295_v31 = vsel %vm12378_vm0, %v3294_v13, %v12963_v29  ;;  %v12967_v19 = vld [vmem:[#allocation141_spill] sm:$0xff]  ;;  %v12972_v29 = vld [vmem:[#allocation227_spill] sm:$0xff] }
 0x78d   :  { %12955 = vst [vmem:[#allocation130_spill] sm:$0xff] %v10874_v6 }
 0x78e   :  { %v3292_v48 = vrot.slane %v3253_v25, 4  ;;  %v3291_v30 = vsel %vm12378_vm0, %v3290_v14, %v3253_v25  ;;  %v12971_v14 = vld [vmem:[#allocation225_spill] sm:$0xff] }
 0x790   :  { %5632 = vrot.lane.b32.xlu0 %v2959_v4, %s6876_s23  ;;  %v3293_v4 = vsel %vm12378_vm0, %v3277_v38, %v3292_v48  ;;  %v12969_v38 = vld [vmem:[#allocation144_spill] sm:$0xff] }
 0x791   :  { %v12973_v48 = vld [vmem:[#allocation228_spill] sm:$0xff] }
 0x792   :  { %v10887_v28 = vpop.permute.xlu0 %5468  ;;  %5568 = vrot.lane.b32.xlu2 %v2955_v2, %s6874_s21  ;;  %5600 = vrot.lane.b32.xlu1 %v2957_v9, %s6875_s22  ;;  %v12968_v2 = vld [vmem:[#allocation143_spill] sm:$0xff] }
 0x793   :  { %12960 = vst [vmem:[#allocation137_spill] sm:$0xff] %v10887_v28 }
 0x794   :  { %v10893_v58 = vpop.permute.xlu2 %5438  ;;  %v10895_v59 = vpop.permute.xlu1 %5436 }
 0x795   :  { %12962 = vst [vmem:[#allocation20_spill] sm:$0xff] %v10895_v59 }
 0x798   :  { %5638 = vrot.lane.b32.xlu0 %v3295_v31, %s6876_s23 }
 0x79a   :  { %v10902_v9 = vpop.permute.xlu0 %5474  ;;  %5574 = vrot.lane.b32.xlu2 %v3291_v30, %s6874_s21  ;;  %5606 = vrot.lane.b32.xlu1 %v3293_v4, %s6875_s22 }
 0x79b   :  { %12964 = vst [vmem:[#allocation221_spill] sm:$0xff] %v10902_v9 }
 0x79c   :  { %v10906_v1 = vpop.permute.xlu2 %5444  ;;  %v10908_v41 = vpop.permute.xlu1 %5442 }
 0x79d   :  { %12965 = vst [vmem:[#allocation8_spill] sm:$0xff] %v10906_v1 }
 0x79e   :  { %12966 = vst [vmem:[#allocation220_spill] sm:$0xff] %v10908_v41 }
 0x7a0   :  { %5660 = vrot.lane.b32.xlu0 %v12967_v19, %s6877_s24  ;;  %v12975_v19 = vld [vmem:[#allocation80_spill] sm:$0xff] }
 0x7a2   :  { %5596 = vrot.lane.b32.xlu2 %v12968_v2, %s6875_s22  ;;  %v10914_v36 = vpop.permute.xlu0 %5480  ;;  %5628 = vrot.lane.b32.xlu1 %v12969_v38, %s6876_s23  ;;  %v12976_v2 = vld [vmem:[#allocation78_spill] sm:$0xff] }
 0x7a4   :  { %v10918_v13 = vpop.permute.xlu2 %5466  ;;  %v10920_v25 = vpop.permute.xlu1 %5448 }
 0x7a5   :  { %12970 = vst [vmem:[#allocation119_spill] sm:$0xff] %v10918_v13 }
 0x7a8   :  { %5666 = vrot.lane.b32.xlu0 %v12971_v14, %s6877_s24  ;;  %v12978_v14 = vld [vmem:[#allocation183_spill] sm:$0xff] }
 0x7aa   :  { %5602 = vrot.lane.b32.xlu2 %v12972_v29, %s6875_s22  ;;  %v10926_v31 = vpop.permute.xlu0 %5502  ;;  %5634 = vrot.lane.b32.xlu1 %v12973_v48, %s6876_s23  ;;  %v3730_v29 = vrot.slane %v12978_v14, 4  ;;  %v12986_v14 = vld [vmem:[#allocation266_spill] sm:$0xff] }
 0x7ab   :  { %v4066_v59 = vrot.slane %v12986_v14, 4 }
 0x7ac   :  { %v10930_v30 = vpop.permute.xlu2 %5472  ;;  %v10932_v4 = vpop.permute.xlu1 %5470 }
 0x7ad   :  { %12974 = vst [vmem:[#allocation69_spill] sm:$0xff] %v10930_v30  ;;  %v12981_v30 = vld [vmem:[#allocation180_spill] sm:$0xff] }
 0x7ae   :  { %v3731_v41 = vsel %vm12378_vm0, %v3730_v29, %v12981_v30  ;;  %v12990_v29 = vld [vmem:[#allocation32_spill] sm:$0xff] }
 0x7b0   :  { %5672 = vrot.lane.b32.xlu0 %v12975_v19, %s6877_s24  ;;  %v12982_v19 = vld [vmem:[#allocation33_spill] sm:$0xff] }
 0x7b1   :  { %v3458_v28 = vrot.slane %v12982_v19, 4  ;;  %v12991_v19 = vld [vmem:[#allocation48_spill] sm:$0xff] }
 0x7b2   :  { %5608 = vrot.lane.b32.xlu2 %v12976_v2, %s6875_s22  ;;  %v10938_v38 = vpop.permute.xlu0 %5508  ;;  %5640 = vrot.lane.b32.xlu1 %v10303_v57, %s6876_s23  ;;  %v12983_v2 = vld [vmem:[#allocation41_spill] sm:$0xff]  ;;  %v12985_v57 = vld [vmem:[#allocation167_spill] sm:$0xff] }
 0x7b3   :  { %12977 = vst [vmem:[#allocation245_spill] sm:$0xff] %v10938_v38  ;;  %v12987_v38 = vld [vmem:[#allocation50_spill] sm:$0xff] }
 0x7b4   :  { %v10943_v9 = vpop.permute.xlu2 %5478  ;;  %v10945_v48 = vpop.permute.xlu1 %5476 }
 0x7b5   :  { %12979 = vst [vmem:[#allocation153_spill] sm:$0xff] %v10943_v9 }
 0x7b6   :  { %12980 = vst [vmem:[#allocation164_spill] sm:$0xff] %v10945_v48  ;;  %v3482_v48 = vrot.slane %v12987_v38, 4  ;;  %v12993_v38 = vld [vmem:[#allocation213_spill] sm:$0xff] }
 0x7b7   :  { %v3818_v1 = vrot.slane %v12993_v38, 4 }
 0x7b8   :  { %5694 = vrot.lane.b32.xlu0 %v3731_v41, %s6878_s25  ;;  %v3459_v41 = vsel %vm12378_vm0, %v3458_v28, %v12990_v29  ;;  %v3483_v21 = vsel %vm12378_vm0, %v3482_v48, %v12991_v19  ;;  %v12996_v28 = vld [vmem:[#allocation280_spill] sm:$0xff]  ;;  %v12997_v48 = vld [vmem:[#allocation187_spill] sm:$0xff] }
 0x7b9   :  { %v3489_v14 = vperm.slane %v3483_v21, %v7276_v49  ;;  %v3794_v29 = vrot.slane %v12997_v48, 4 }
 0x7ba   :  { %5630 = vrot.lane.b32.xlu2 %v12983_v2, %s6876_s23  ;;  %v10953_v13 = vpop.permute.xlu0 %5530  ;;  %5662 = vrot.lane.b32.xlu1 %v12985_v57, %s6877_s24  ;;  %v12992_v2 = vld [vmem:[#allocation263_spill] sm:$0xff]  ;;  %v3465_v57 = vperm.slane %v3459_v41, %v7276_v49  ;;  %v2624_v41 = vrot.slane %v10845_v24, 4 }
 0x7bb   :  { %12984 = vst [vmem:[#allocation162_spill] sm:$0xff] %v10953_v13  ;;  %v4067_v13 = vsel %vm12378_vm0, %v4066_v59, %v12992_v2  ;;  %v3506_v21 = vrot.slane %v3489_v14, 4  ;;  %v13000_v2 = vld [vmem:[#allocation17_spill] sm:$0xff] }
 0x7bc   :  { %v10959_v9 = vpop.permute.xlu2 %5500  ;;  %v10961_v30 = vpop.permute.xlu1 %5498  ;;  %v3795_v38 = vsel %vm12378_vm0, %v3794_v29, %v13000_v2  ;;  %v13003_v29 = vld [vmem:[#allocation109_spill] sm:$0xff] }
 0x7bd   :  { %12988 = vst [vmem:[#allocation150_spill] sm:$0xff] %v10959_v9  ;;  %v12994_v9 = vld [vmem:[#allocation282_spill] sm:$0xff]  ;;  %v3507_v48 = vsel %vm12378_vm0, %v3506_v21, %v3465_v57  ;;  %v4154_v2 = vrot.slane %v13003_v29, 4 }
 0x7be   :  { %12989 = vst [vmem:[#allocation277_spill] sm:$0xff] %v10961_v30 }
 0x7c0   :  { %5700 = vrot.lane.b32.xlu0 %v4067_v13, %s6878_s25  ;;  %v3508_v13 = vrot.slane %v3465_v57, 4 }
 0x7c2   :  { %5636 = vrot.lane.b32.xlu2 %v12994_v9, %s6876_s23  ;;  %v10975_v30 = vpop.permute.xlu0 %5536  ;;  %5668 = vrot.lane.b32.xlu1 %v12996_v28, %s6877_s24  ;;  %v3819_v9 = vsel %vm12378_vm0, %v3818_v1, %v13001_v34  ;;  %v2625_v28 = vsel %vm12378_vm0, %v10836_v7, %v2624_v41  ;;  %v13007_v41 = vld [vmem:[#allocation89_spill] sm:$0xff] }
 0x7c3   :  { %12995 = vst [vmem:[#allocation165_spill] sm:$0xff] %v10975_v30  ;;  %v3509_v30 = vsel %vm12378_vm0, %v3489_v14, %v3508_v13  ;;  %v3825_v24 = vperm.slane %v3819_v9, %v7276_v49  ;;  %v13006_v14 = vld [vmem:[#allocation60_spill] sm:$0xff] }
 0x7c4   :  { %v10980_v19 = vpop.permute.xlu2 %5506  ;;  %v10982_v59 = vpop.permute.xlu1 %5504 }
 0x7c5   :  { %12998 = vst [vmem:[#allocation274_spill] sm:$0xff] %v10980_v19  ;;  %v13002_v19 = vld [vmem:[#allocation31_spill] sm:$0xff]  ;;  %v3842_v57 = vrot.slane %v3825_v24, 4 }
 0x7c6   :  { %12999 = vst [vmem:[#allocation275_spill] sm:$0xff] %v10982_v59  ;;  %v3801_v59 = vperm.slane %v3795_v38, %v7276_v49  ;;  %v4130_v6 = vrot.slane %v13002_v19, 4  ;;  %v4155_v19 = vsel %vm12378_vm0, %v4154_v2, %v13007_v41 }
 0x7c8   :  { %5722 = vrot.lane.b32.xlu0 %v3509_v30, %s6879_s26  ;;  %v3844_v7 = vrot.slane %v3801_v59, 4  ;;  %v4131_v13 = vsel %vm12378_vm0, %v4130_v6, %v13006_v14  ;;  %v3843_v38 = vsel %vm12378_vm0, %v3842_v57, %v3801_v59  ;;  %v13011_v6 = vld [vmem:[#allocation106_spill] sm:$0xff]  ;;  %v13014_v14 = vld [vmem:[#allocation112_spill] sm:$0xff] }
 0x7c9   :  { %v4137_v9 = vperm.slane %v4131_v13, %v7276_v49  ;;  %v3570_v2 = vrot.slane %v13011_v6, 4 }
 0x7ca   :  { %5658 = vrot.lane.b32.xlu2 %v2625_v28, %s6877_s24  ;;  %v10999_v34 = vpop.permute.xlu0 %5542  ;;  %5690 = vrot.lane.b32.xlu1 %v3507_v48, %s6878_s25  ;;  %v3845_v21 = vsel %vm12378_vm0, %v3825_v24, %v3844_v7  ;;  %v4161_v28 = vperm.slane %v4155_v19, %v7276_v49  ;;  %v13008_v48 = vld [vmem:[#allocation117_spill] sm:$0xff] }
 0x7cb   :  { %13004 = vst [vmem:[#allocation163_spill] sm:$0xff] %v10999_v34  ;;  %v3594_v29 = vrot.slane %v13008_v48, 4  ;;  %v13009_v34 = vld [vmem:[#allocation202_spill] sm:$0xff]  ;;  %v4180_v59 = vrot.slane %v4137_v9, 4 }
 0x7cc   :  { %v11002_v1 = vpop.permute.xlu2 %5512  ;;  %v11004_v30 = vpop.permute.xlu1 %5510  ;;  %v4178_v57 = vrot.slane %v4161_v28, 4  ;;  %v13016_v48 = vld [vmem:[#allocation306_spill] sm:$0xff] }
 0x7cd   :  { %13005 = vst [vmem:[#allocation268_spill] sm:$0xff] %v11004_v30  ;;  %v3595_v13 = vsel %vm12378_vm0, %v3594_v29, %v13014_v14  ;;  %v4181_v41 = vsel %vm12378_vm0, %v4161_v28, %v4180_v59  ;;  %v13019_v59 = vld [vmem:[#allocation226_spill] sm:$0xff] }
 0x7ce   :  { %v3906_v14 = vrot.slane %v13019_v59, 4 }
 0x7d0   :  { %5728 = vrot.lane.b32.xlu0 %v3845_v21, %s6879_s26  ;;  %v4179_v21 = vsel %vm12378_vm0, %v4178_v57, %v4137_v9 }
 0x7d2   :  { %5664 = vrot.lane.b32.xlu2 %v13009_v34, %s6877_s24  ;;  %v11018_v30 = vpop.permute.xlu0 %5564  ;;  %5696 = vrot.lane.b32.xlu1 %v3843_v38, %s6878_s25  ;;  %v13015_v34 = vld [vmem:[#allocation104_spill] sm:$0xff]  ;;  %v3601_v38 = vperm.slane %v3595_v13, %v7276_v49 }
 0x7d3   :  { %13010 = vst [vmem:[#allocation279_spill] sm:$0xff] %v11018_v30  ;;  %v3571_v19 = vsel %vm12378_vm0, %v3570_v2, %v13015_v34  ;;  %v13018_v30 = vld [vmem:[#allocation120_spill] sm:$0xff] }
 0x7d4   :  { %v11022_v24 = vpop.permute.xlu2 %5534  ;;  %v11024_v7 = vpop.permute.xlu1 %5532  ;;  %v3622_v29 = vrot.slane %v13018_v30, 4  ;;  %v3577_v28 = vperm.slane %v3571_v19, %v7276_v49  ;;  %v3618_v57 = vrot.slane %v3601_v38, 4  ;;  %v13023_v13 = vld [vmem:[#allocation232_spill] sm:$0xff]  ;;  %v13025_v30 = vld [vmem:[#allocation223_spill] sm:$0xff] }
 0x7d5   :  { %13012 = vst [vmem:[#allocation278_spill] sm:$0xff] %v11022_v24  ;;  %v3907_v19 = vsel %vm12378_vm0, %v3906_v14, %v13025_v30  ;;  %v13067_v24 = vld [vmem:[#allocation46_spill] sm:$0xff] }
 0x7d6   :  { %13013 = vst [vmem:[#allocation102_spill] sm:$0xff] %v11024_v7  ;;  %v3619_v59 = vsel %vm12378_vm0, %v3618_v57, %v3577_v28  ;;  %v13028_v57 = vld [vmem:[#allocation233_spill] sm:$0xff] }
 0x7d8   :  { %5734 = vrot.lane.b32.xlu0 %v4181_v41, %s6879_s26  ;;  %v13020_v41 = vld [vmem:[#allocation234_spill] sm:$0xff] }
 0x7d9   :  { %v3930_v7 = vrot.slane %v13020_v41, 4 }
 0x7da   :  { %5670 = vrot.lane.b32.xlu2 %v13016_v48, %s6877_s24  ;;  %v11036_v6 = vpop.permute.xlu0 %5570  ;;  %5702 = vrot.lane.b32.xlu1 %v4179_v21, %s6878_s25  ;;  %v13024_v48 = vld [vmem:[#allocation116_spill] sm:$0xff]  ;;  %v3620_v21 = vrot.slane %v3577_v28, 4 }
 0x7db   :  { %13017 = vst [vmem:[#allocation100_spill] sm:$0xff] %v11036_v6  ;;  %v3931_v34 = vsel %vm12378_vm0, %v3930_v7, %v13023_v13  ;;  %v3623_v6 = vsel %vm12378_vm0, %v3622_v29, %v13024_v48  ;;  %v13026_v29 = vld [vmem:[#allocation236_spill] sm:$0xff] }
 0x7dc   :  { %v11043_v2 = vpop.permute.xlu2 %5540  ;;  %v11045_v9 = vpop.permute.xlu1 %5538  ;;  %v3621_v41 = vsel %vm12378_vm0, %v3601_v38, %v3620_v21  ;;  %v3958_v13 = vrot.slane %v13026_v29, 4  ;;  %v4242_v38 = vrot.slane %v10410_v0, 4 }
 0x7dd   :  { %13021 = vst [vmem:[#allocation201_spill] sm:$0xff] %v11043_v2  ;;  %v4266_v2 = vrot.slane %v10440_v42, 4 }
 0x7de   :  { %13022 = vst [vmem:[#allocation198_spill] sm:$0xff] %v11045_v9  ;;  %v3937_v9 = vperm.slane %v3931_v34, %v7276_v49  ;;  %v3959_v34 = vsel %vm12378_vm0, %v3958_v13, %v13028_v57  ;;  %v4243_v30 = vsel %vm12378_vm0, %v4242_v38, %v10367_v44 }
 0x7df   :  { %v4267_v42 = vsel %vm12378_vm0, %v4266_v2, %v10417_v54  ;;  %v4294_v54 = vrot.slane %v10455_v43, 4  ;;  %v4249_v2 = vperm.slane %v4243_v30, %v7276_v49  ;;  %v13038_v30 = vld [vmem:[#allocation186_spill] sm:$0xff] }
 0x7e0   :  { %5756 = vrot.lane.b32.xlu0 %v3623_v6, %s6880_s27  ;;  %v3913_v6 = vperm.slane %v3907_v19, %v7276_v49  ;;  %v3954_v28 = vrot.slane %v3937_v9, 4 }
 0x7e2   :  { %5692 = vrot.lane.b32.xlu2 %v3619_v59, %s6878_s25  ;;  %v11059_v7 = vpop.permute.xlu0 %5576  ;;  %5724 = vrot.lane.b32.xlu1 %v3621_v41, %s6879_s26  ;;  %v3956_v21 = vrot.slane %v3913_v6, 4  ;;  %v3955_v19 = vsel %vm12378_vm0, %v3954_v28, %v3913_v6  ;;  %v4273_v41 = vperm.slane %v4267_v42, %v7276_v49  ;;  %v4292_v6 = vrot.slane %v4249_v2, 4 }
 0x7e4   :  { %v11064_v48 = vpop.permute.xlu2 %5562  ;;  %v11066_v14 = vpop.permute.xlu1 %5544  ;;  %v3957_v59 = vsel %vm12378_vm0, %v3937_v9, %v3956_v21  ;;  %v4290_v44 = vrot.slane %v4273_v41, 4  ;;  %v4295_v9 = vsel %vm12378_vm0, %v4294_v54, %v10445_v26  ;;  %v4293_v28 = vsel %vm12378_vm0, %v4273_v41, %v4292_v6  ;;  %v13035_v26 = vld [vmem:[#allocation184_spill] sm:$0xff]  ;;  %v13037_v21 = vld [vmem:[#allocation185_spill] sm:$0xff]  ;;  %v13041_v41 = vld [vmem:[#allocation271_spill] sm:$0xff] }
 0x7e5   :  { %13027 = vst [vmem:[#allocation203_spill] sm:$0xff] %v11064_v48  ;;  %v13042_v54 = vld [vmem:[#allocation92_spill] sm:$0xff]  ;;  %v13045_v6 = vld [vmem:[#allocation269_spill] sm:$0xff]  ;;  %v13060_v48 = vld [vmem:[#allocation170_spill] sm:$0xff] }
 0x7e6   :  { %v4291_v38 = vsel %vm12378_vm0, %v4290_v44, %v4249_v2  ;;  %v3582_v2 = vrot.slane %v13042_v54, 4  ;;  %v13051_v54 = vld [vmem:[#allocation47_spill] sm:$0xff] }
 0x7e8   :  { %5762 = vrot.lane.b32.xlu0 %v3959_v34, %s6880_s27 }
 0x7ea   :  { %5698 = vrot.lane.b32.xlu2 %v3955_v19, %s6878_s25  ;;  %v11080_v0 = vpop.permute.xlu0 %5598  ;;  %5730 = vrot.lane.b32.xlu1 %v3957_v59, %s6879_s26 }
 0x7eb   :  { %13029 = vst [vmem:[#allocation307_spill] sm:$0xff] %v11080_v0  ;;  %v13064_v0 = vld [vmem:[#allocation231_spill] sm:$0xff] }
 0x7ec   :  { %v11085_v29 = vpop.permute.xlu2 %5568  ;;  %v11087_v13 = vpop.permute.xlu1 %5566 }
 0x7ed   :  { %13030 = vst [vmem:[#allocation308_spill] sm:$0xff] %v11085_v29 }
 0x7ee   :  { %13031 = vst [vmem:[#allocation309_spill] sm:$0xff] %v11087_v13 }
 0x7f0   :  { %5768 = vrot.lane.b32.xlu0 %v4295_v9, %s6880_s27  ;;  %v13044_v9 = vld [vmem:[#allocation272_spill] sm:$0xff] }
 0x7f2   :  { %v11094_v42 = vpop.permute.xlu0 %5604  ;;  %5736 = vrot.lane.b32.xlu1 %v4293_v28, %s6879_s26  ;;  %5704 = vrot.lane.b32.xlu2 %v4291_v38, %s6878_s25  ;;  %v13046_v28 = vld [vmem:[#allocation114_spill] sm:$0xff] }
 0x7f3   :  { %13032 = vst [vmem:[#allocation140_spill] sm:$0xff] %v11094_v42  ;;  %v3606_v38 = vrot.slane %v13046_v28, 4  ;;  %v13062_v42 = vld [vmem:[#allocation113_spill] sm:$0xff] }
 0x7f4   :  { %v11098_v43 = vpop.permute.xlu2 %5574  ;;  %v11100_v57 = vpop.permute.xlu1 %5572 }
 0x7f5   :  { %13033 = vst [vmem:[#allocation139_spill] sm:$0xff] %v11098_v43  ;;  %v13063_v43 = vld [vmem:[#allocation178_spill] sm:$0xff] }
 0x7f6   :  { %13034 = vst [vmem:[#allocation145_spill] sm:$0xff] %v11100_v57 }
 0x7f8   :  { %5790 = vrot.lane.b32.xlu0 %v13035_v26, %s6881_s28  ;;  %v13047_v26 = vld [vmem:[#allocation49_spill] sm:$0xff] }
 0x7fa   :  { %v11104_v34 = vpop.permute.xlu0 %5626  ;;  %5758 = vrot.lane.b32.xlu1 %v13037_v21, %s6880_s27  ;;  %5726 = vrot.lane.b32.xlu2 %v13038_v30, %s6879_s26  ;;  %v3514_v21 = vrot.slane %v13047_v26, 4 }
 0x7fb   :  { %13036 = vst [vmem:[#allocation142_spill] sm:$0xff] %v11104_v34  ;;  %v13050_v34 = vld [vmem:[#allocation91_spill] sm:$0xff] }
 0x7fc   :  { %v11110_v19 = vpop.permute.xlu2 %5596  ;;  %v11112_v59 = vpop.permute.xlu1 %5594 }
 0x7fd   :  { %13039 = vst [vmem:[#allocation224_spill] sm:$0xff] %v11110_v19 }
 0x7fe   :  { %13040 = vst [vmem:[#allocation222_spill] sm:$0xff] %v11112_v59  ;;  %v13052_v59 = vld [vmem:[#allocation110_spill] sm:$0xff] }
 0x800   :  { %5796 = vrot.lane.b32.xlu0 %v13041_v41, %s6881_s28  ;;  %v3583_v41 = vsel %vm12378_vm0, %v3582_v2, %v13050_v34  ;;  %v13056_v34 = vld [vmem:[#allocation56_spill] sm:$0xff] }
 0x801   :  { %v3589_v26 = vperm.slane %v3583_v41, %v7276_v49 }
 0x802   :  { %v11117_v44 = vpop.permute.xlu0 %5632  ;;  %5764 = vrot.lane.b32.xlu1 %v13044_v9, %s6880_s27  ;;  %5732 = vrot.lane.b32.xlu2 %v13045_v6, %s6879_s26  ;;  %v3607_v9 = vsel %vm12378_vm0, %v3606_v38, %v13052_v59  ;;  %v13053_v6 = vld [vmem:[#allocation175_spill] sm:$0xff] }
 0x803   :  { %13043 = vst [vmem:[#allocation146_spill] sm:$0xff] %v11117_v44  ;;  %v3515_v44 = vsel %vm12378_vm0, %v3514_v21, %v13051_v54  ;;  %v3694_v28 = vrot.slane %v13053_v6, 4  ;;  %v3613_v2 = vperm.slane %v3607_v9, %v7276_v49  ;;  %v13057_v21 = vld [vmem:[#allocation21_spill] sm:$0xff]  ;;  %v13058_v59 = vld [vmem:[#allocation95_spill] sm:$0xff]  ;;  %v3628_v57 = vrot.slane %v3589_v26, 4 }
 0x804   :  { %v11125_v30 = vpop.permute.xlu2 %5602  ;;  %v11127_v29 = vpop.permute.xlu1 %5600  ;;  %v3918_v54 = vrot.slane %v13057_v21, 4  ;;  %v2498_v38 = vrot.slane %v13058_v59, 4  ;;  %v3942_v9 = vrot.slane %v13064_v0, 4 }
 0x805   :  { %13048 = vst [vmem:[#allocation230_spill] sm:$0xff] %v11125_v30  ;;  %v13059_v30 = vld [vmem:[#allocation214_spill] sm:$0xff]  ;;  %v3695_v6 = vsel %vm12378_vm0, %v3694_v28, %v13060_v48  ;;  %v3626_v13 = vrot.slane %v3613_v2, 4  ;;  %v13066_v48 = vld [vmem:[#allocation212_spill] sm:$0xff] }
 0x806   :  { %13049 = vst [vmem:[#allocation24_spill] sm:$0xff] %v11127_v29  ;;  %v13055_v29 = vld [vmem:[#allocation54_spill] sm:$0xff]  ;;  %v11158_v21 = vperm.slane %v3695_v6, %v7276_v49 }
 0x808   :  { %5818 = vrot.lane.b32.xlu0 %v3515_v44, %s6882_s29  ;;  %v3850_v44 = vrot.slane %v13059_v30, 4  ;;  %v13065_v30 = vld [vmem:[#allocation94_spill] sm:$0xff] }
 0x809   :  { %v2499_v59 = vsel %vm12378_vm0, %v2498_v38, %v13065_v30  ;;  %v13071_v30 = vld [vmem:[#allocation181_spill] sm:$0xff] }
 0x80a   :  { %v11138_v19 = vpop.permute.xlu0 %5638  ;;  %5786 = vrot.lane.b32.xlu1 %v13055_v29, %s6881_s28  ;;  %5754 = vrot.lane.b32.xlu2 %v13056_v34, %s6880_s27  ;;  %v1826_v29 = vrot.slane %v13062_v42, 4  ;;  %v3718_v34 = vrot.slane %v13063_v43, 4  ;;  %v3851_v28 = vsel %vm12378_vm0, %v3850_v44, %v13066_v48  ;;  %v13068_v42 = vld [vmem:[#allocation155_spill] sm:$0xff]  ;;  %v6202_v0 = vsel %vm6194_vm1, %v2499_v59, %v10571_v40  ;;  %v13069_v43 = vld [vmem:[#allocation229_spill] sm:$0xff]  ;;  %v13074_v40 = vld [vmem:[#allocation216_spill] sm:$0xff] }
 0x80b   :  { %13054 = vst [vmem:[#allocation161_spill] sm:$0xff] %v11138_v19  ;;  %v1938_v45 = vrot.slane %v13068_v42, 4  ;;  %v3943_v6 = vsel %vm12378_vm0, %v3942_v9, %v13069_v43  ;;  %v6211_v44 = vsel %vm6203_vm2, %v6202_v0, %v10628_v61  ;;  %v13073_v48 = vld [vmem:[#allocation219_spill] sm:$0xff]  ;;  %v11186_v59 = vsel %vm12378_vm0, %v3613_v2, %v3628_v57  ;;  %v13076_v61 = vld [vmem:[#allocation105_spill] sm:$0xff]  ;;  %v13077_v43 = vld [vmem:[#allocation152_spill] sm:$0xff] }
 0x80c   :  { %v11150_v41 = vpop.permute.xlu2 %5608  ;;  %v11152_v19 = vpop.permute.xlu1 %5606  ;;  %v11174_v38 = vsel %vm12378_vm0, %v1826_v29, %v13070_v10  ;;  %v13075_v10 = vld [vmem:[#allocation177_spill] sm:$0xff]  ;;  %v11193_v42 = vsel %vm12378_vm0, %v3626_v13, %v3589_v26  ;;  %v3949_v0 = vperm.slane %v3943_v6, %v7276_v49  ;;  %v6220_v57 = vsel %vm6212_vm3, %v6211_v44, %v10620_v53  ;;  %v13079_v13 = vld [vmem:[#allocation179_spill] sm:$0xff]  ;;  %v13080_v6 = vld [vmem:[#allocation312_spill] sm:$0xff] }
 0x80d   :  { %13061 = vst [vmem:[#allocation38_spill] sm:$0xff] %v11152_v19  ;;  %v3919_v19 = vsel %vm12378_vm0, %v3918_v54, %v13067_v24  ;;  %v3742_v24 = vrot.slane %v13071_v30, 4  ;;  %v3719_v29 = vsel %vm12378_vm0, %v3718_v34, %v13075_v10  ;;  %v1939_v30 = vsel %vm12378_vm0, %v1938_v45, %v13077_v43  ;;  %v13083_v34 = vld [vmem:[#allocation88_spill] sm:$0xff] }
 0x80e   :  { %v3925_v9 = vperm.slane %v3919_v19, %v7276_v49  ;;  %v11212_v45 = vperm.slane %v3719_v29, %v7276_v49  ;;  %v6197_v53 = vsel %vm6194_vm1, %v1939_v30, %v10491_v46  ;;  %v2050_v44 = vrot.slane %v13080_v6, 4  ;;  %v13088_v6 = vld [vmem:[#allocation64_spill] sm:$0xff] }
 0x80f   :  { %v11209_v26 = vsel %vm12378_vm0, %v3742_v24, %v13079_v13  ;;  %v3962_v13 = vrot.slane %v3949_v0, 4  ;;  %v4278_v29 = vrot.slane %v10430_v52, 4  ;;  %v6206_v46 = vsel %vm6203_vm2, %v6197_v53, %v10587_v35  ;;  %v13087_v53 = vld [vmem:[#allocation291_spill] sm:$0xff] }
 0x810   :  { %5824 = vrot.lane.b32.xlu0 %v3851_v28, %s6882_s29  ;;  %v4186_v28 = vrot.slane %v13076_v61, 4  ;;  %v3964_v10 = vrot.slane %v3925_v9, 4  ;;  %v13081_v61 = vld [vmem:[#allocation35_spill] sm:$0xff] }
 0x811   :  { %v4254_v43 = vrot.slane %v13081_v61, 4  ;;  %v13089_v61 = vld [vmem:[#allocation311_spill] sm:$0xff] }
 0x812   :  { %v11179_v54 = vpop.permute.xlu0 %5660  ;;  %5760 = vrot.lane.b32.xlu2 %v13073_v48, %s6880_s27  ;;  %5792 = vrot.lane.b32.xlu1 %v13074_v40, %s6881_s28  ;;  %v6229_v48 = vsel %vm6221_vm4, %v6220_v57, %v10714_v18  ;;  %v13082_v18 = vld [vmem:[#allocation84_spill] sm:$0xff]  ;;  %v4187_v24 = vsel %vm12378_vm0, %v4186_v28, %v13083_v34  ;;  %v13086_v34 = vld [vmem:[#allocation25_spill] sm:$0xff] }
 0x813   :  { %13072 = vst [vmem:[#allocation159_spill] sm:$0xff] %v11179_v54  ;;  %v6238_v40 = vsel %vm6230_vm5, %v6229_v48, %v10755_v3  ;;  %v2162_v57 = vrot.slane %v13082_v18, 4  ;;  %v13084_v54 = vld [vmem:[#allocation314_spill] sm:$0xff]  ;;  %v13085_v3 = vld [vmem:[#allocation149_spill] sm:$0xff]  ;;  %v6215_v48 = vsel %vm6212_vm3, %v6206_v46, %v10648_v39  ;;  %v2274_v52 = vrot.slane %v13086_v34, 4 }
 0x814   :  { %v11200_v2 = vpop.permute.xlu2 %5630  ;;  %v11202_v19 = vpop.permute.xlu1 %5628  ;;  %v4255_v30 = vsel %vm12378_vm0, %v4254_v43, %v13085_v3  ;;  %v6247_v28 = vsel %vm6239_vm6, %v6238_v40, %v10746_v23  ;;  %v3738_v39 = vrot.slane %v11212_v45, 4  ;;  %v11246_v43 = vsel %vm12378_vm0, %v2050_v44, %v13089_v61  ;;  %v13090_v18 = vld [vmem:[#allocation313_spill] sm:$0xff]  ;;  %v13095_v61 = vld [vmem:[#allocation242_spill] sm:$0xff] }
 0x815   :  { %13078 = vst [vmem:[#allocation16_spill] sm:$0xff] %v11202_v19  ;;  %v2386_v19 = vrot.slane %v13084_v54, 4  ;;  %v6256_v54 = vsel %vm6248_vm7, %v6247_v28, %v10872_v63  ;;  %v11251_v63 = vsel %vm12378_vm0, %v3949_v0, %v3964_v10  ;;  %v11254_v40 = vsel %vm12378_vm0, %v3962_v13, %v3925_v9  ;;  %v13091_v0 = vld [vmem:[#allocation310_spill] sm:$0xff] }
 0x816   :  { %v6265_v23 = vsel %vm6257_vm8, %v6256_v54, %v10920_v25  ;;  %v6224_v46 = vsel %vm6221_vm4, %v6215_v48, %v10639_v51  ;;  %v4261_v44 = vperm.slane %v4255_v30, %v7276_v49  ;;  %v4279_v25 = vsel %vm12378_vm0, %v4278_v29, %v10407_v15  ;;  %v13092_v51 = vld [vmem:[#allocation10_spill] sm:$0xff] }
 0x817   :  { %v2163_v10 = vsel %vm12378_vm0, %v2162_v57, %v13091_v0  ;;  %v2275_v13 = vsel %vm12378_vm0, %v2274_v52, %v13092_v51  ;;  %v6274_v15 = vsel %vm6266_vm9, %v6265_v23, %v10914_v36  ;;  %v6196_v36 = vsel %vm6194_vm1, %v11174_v38, %v10529_v22  ;;  %v13096_v23 = vld [vmem:[#allocation108_spill] sm:$0xff]  ;;  %v13100_v0 = vld [vmem:[#allocation115_spill] sm:$0xff] }
 0x818   :  { %5830 = vrot.lane.b32.xlu0 %v4187_v24, %s6882_s29  ;;  %v2387_v24 = vsel %vm12378_vm0, %v2386_v19, %v13090_v18  ;;  %v6233_v19 = vsel %vm6230_vm5, %v6224_v46, %v10726_v17  ;;  %v6200_v57 = vsel %vm6194_vm1, %v2275_v13, %v10509_v60  ;;  %v4285_v17 = vperm.slane %v4279_v25, %v7276_v49  ;;  %v13097_v18 = vld [vmem:[#allocation130_spill] sm:$0xff]  ;;  %v13099_v25 = vld [vmem:[#allocation111_spill] sm:$0xff] }
 0x819   :  { %v6201_v9 = vsel %vm6194_vm1, %v2387_v24, %v10563_v16  ;;  %v6242_v48 = vsel %vm6239_vm6, %v6233_v19, %v10771_v47  ;;  %v6283_v16 = vsel %vm6275_vm10, %v6274_v15, %v11002_v1  ;;  %v6209_v29 = vsel %vm6203_vm2, %v6200_v57, %v10608_v33  ;;  %v13098_v46 = vld [vmem:[#allocation278_spill] sm:$0xff]  ;;  %v13102_v51 = vld [vmem:[#allocation243_spill] sm:$0xff] }
 0x81a   :  { %v11237_v35 = vpop.permute.xlu0 %5666  ;;  %5766 = vrot.lane.b32.xlu2 %v13087_v53, %s6880_s27  ;;  %5798 = vrot.lane.b32.xlu1 %v13088_v6, %s6881_s28  ;;  %v6210_v30 = vsel %vm6203_vm2, %v6201_v9, %v10559_v27  ;;  %v6292_v47 = vsel %vm6284_vm11, %v6283_v16, %v11066_v14  ;;  %v4300_v60 = vrot.slane %v4261_v44, 4  ;;  %v6218_v33 = vsel %vm6212_vm3, %v6209_v29, %v10668_v5  ;;  %v13093_v14 = vld [vmem:[#allocation87_spill] sm:$0xff]  ;;  %v13101_v9 = vld [vmem:[#allocation309_spill] sm:$0xff] }
 0x81b   :  { %v6219_v1 = vsel %vm6212_vm3, %v6210_v30, %v10666_v12  ;;  %v6251_v27 = vsel %vm6248_vm7, %v6242_v48, %v10761_v8  ;;  %v6195_v34 = vsel %vm6194_vm1, %v13093_v14, %v10524_v20  ;;  %v13094_v12 = vld [vmem:[#allocation122_spill] sm:$0xff]  ;;  %v6301_v20 = vsel %vm6293_vm12, %v6292_v47, %v11059_v7  ;;  %v13104_v57 = vld [vmem:[#allocation83_spill] sm:$0xff]  ;;  %v13105_v30 = vld [vmem:[#allocation265_spill] sm:$0xff] }
 0x81c   :  { %v11260_v3 = vpop.permute.xlu2 %5636  ;;  %v11262_v28 = vpop.permute.xlu1 %5634  ;;  %v6260_v52 = vsel %vm6257_vm8, %v6251_v27, %v10893_v58  ;;  %v4298_v8 = vrot.slane %v4285_v17, 4  ;;  %v6227_v58 = vsel %vm6221_vm4, %v6218_v33, %v10659_v11  ;;  %v6310_v38 = vsel %vm6302_vm13, %v6301_v20, %v11150_v41  ;;  %v13103_v48 = vld [vmem:[#allocation154_spill] sm:$0xff]  ;;  %v13107_v33 = vld [vmem:[#allocation8_spill] sm:$0xff]  ;;  %v13109_v14 = vld [vmem:[#allocation237_spill] sm:$0xff] }
 0x81d   :  { %v6269_v5 = vsel %vm6266_vm9, %v6260_v52, %v10932_v4  ;;  %v6236_v4 = vsel %vm6230_vm5, %v6227_v58, %v10739_v50  ;;  %v6199_v50 = vsel %vm6194_vm1, %v2163_v10, %v13095_v61  ;;  %v4301_v10 = vsel %vm12378_vm0, %v4285_v17, %v4300_v60  ;;  %v13108_v17 = vld [vmem:[#allocation136_spill] sm:$0xff] }
 0x81e   :  { %v6245_v11 = vsel %vm6239_vm6, %v6236_v4, %v10798_v56  ;;  %v6278_v41 = vsel %vm6275_vm10, %v6269_v5, %v10926_v31  ;;  %v4299_v29 = vsel %vm12378_vm0, %v4298_v8, %v4261_v44  ;;  %v4054_v47 = vrot.slane %v13105_v30, 4  ;;  %v13113_v5 = vld [vmem:[#allocation101_spill] sm:$0xff]  ;;  %v13115_v58 = vld [vmem:[#allocation268_spill] sm:$0xff] }
 0x81f   :  { %v6254_v16 = vsel %vm6248_vm7, %v6245_v11, %v13104_v57  ;;  %vm6329_vm0 = vcmask 261120   ;;  %v6198_v20 = vsel %vm6194_vm1, %v11246_v43, %v13113_v5  ;;  %v13114_v8 = vld [vmem:[#allocation45_spill] sm:$0xff]  ;;  %v13136_v5 = vld [vmem:[#allocation119_spill] sm:$0xff]  ;;  %vm13140_vm1 = vcmask 1047556  }
 0x820   :  { %5852 = vrot.lane.b32.xlu0 %v11186_v59, %s6883_s30  ;;  %v6228_v59 = vsel %vm6221_vm4, %v6219_v1, %v10716_v37  ;;  %v6205_v37 = vsel %vm6203_vm2, %v6196_v36, %v10579_v62  ;;  %v13106_v36 = vld [vmem:[#allocation57_spill] sm:$0xff] }
 0x821   :  { %v6237_v7 = vsel %vm6230_vm5, %v6228_v59, %v10709_v55  ;;  %v6204_v55 = vsel %vm6203_vm2, %v6195_v34, %v13096_v23  ;;  %v6214_v31 = vsel %vm6212_vm3, %v6205_v37, %v13100_v0  ;;  %v13110_v34 = vld [vmem:[#allocation153_spill] sm:$0xff]  ;;  %v13111_v59 = vld [vmem:[#allocation164_spill] sm:$0xff]  ;;  %v13119_v23 = vld [vmem:[#allocation195_spill] sm:$0xff] }
 0x822   :  { %v5673_v22 = vpop.permute.xlu0 %5672  ;;  %5788 = vrot.lane.b32.xlu2 %v13094_v12, %s6881_s28  ;;  %5820 = vrot.lane.b32.xlu1 %v11193_v42, %s6882_s29  ;;  %v6246_v62 = vsel %vm6239_vm6, %v6237_v7, %v10796_v32  ;;  %v6287_v32 = vsel %vm6284_vm11, %v6278_v41, %v13098_v46  ;;  %v6213_v56 = vsel %vm6212_vm3, %v6204_v55, %v13099_v25  ;;  %v13116_v7 = vld [vmem:[#allocation241_spill] sm:$0xff]  ;;  %v13118_v41 = vld [vmem:[#allocation99_spill] sm:$0xff] }
 0x823   :  { %v6255_v24 = vsel %vm6248_vm7, %v6246_v62, %v13097_v18  ;;  %v6296_v19 = vsel %vm6293_vm12, %v6287_v32, %v13101_v9  ;;  %v6223_v13 = vsel %vm6221_vm4, %v6214_v31, %v13102_v51  ;;  %v6222_v15 = vsel %vm6221_vm4, %v6213_v56, %v13103_v48  ;;  %v13117_v62 = vld [vmem:[#allocation26_spill] sm:$0xff]  ;;  %v13120_v18 = vld [vmem:[#allocation192_spill] sm:$0xff]  ;;  %v13124_v31 = vld [vmem:[#allocation201_spill] sm:$0xff] }
 0x824   :  { %v11322_v54 = vpop.permute.xlu2 %5658  ;;  %v5641_v42 = vpop.permute.xlu1 %5640  ;;  %v6232_v1 = vsel %vm6230_vm5, %v6223_v13, %v13106_v36  ;;  %v6264_v60 = vsel %vm6257_vm8, %v6255_v24, %v13108_v17  ;;  %v6231_v37 = vsel %vm6230_vm5, %v6222_v15, %v13114_v8  ;;  %v13121_v24 = vld [vmem:[#allocation245_spill] sm:$0xff]  ;;  %v13123_v56 = vld [vmem:[#allocation20_spill] sm:$0xff]  ;;  %v13126_v13 = vld [vmem:[#allocation235_spill] sm:$0xff] }
 0x825   :  { %v6319_v53 = vsel %vm6311_vm14, %v6310_v38, %v5641_v42  ;;  %v6273_v44 = vsel %vm6266_vm9, %v6264_v60, %v13110_v34  ;;  %v6240_v11 = vsel %vm6239_vm6, %v6231_v37, %v13117_v62  ;;  %v6241_v43 = vsel %vm6239_vm6, %v6232_v1, %v13118_v41  ;;  %v13127_v15 = vld [vmem:[#allocation240_spill] sm:$0xff]  ;;  %v13129_v36 = vld [vmem:[#allocation145_spill] sm:$0xff]  ;;  %v13131_v17 = vld [vmem:[#allocation158_spill] sm:$0xff] }
 0x826   :  { %v11336_v6 = vsel %vm6320_vm15, %v6319_v53, %v5673_v22  ;;  %v13112_v22 = vld [vmem:[#allocation307_spill] sm:$0xff]  ;;  %v6208_v53 = vsel %vm6203_vm2, %v6199_v50, %v13116_v7  ;;  %v6250_v55 = vsel %vm6248_vm7, %v6241_v43, %v13119_v23  ;;  %v13133_v34 = vld [vmem:[#allocation38_spill] sm:$0xff]  ;;  %v13144_v43 = vld [vmem:[#allocation61_spill] sm:$0xff] }
 0x827   :  { %v6305_v12 = vsel %vm6302_vm13, %v6296_v19, %v13112_v22  ;;  %v13122_v50 = vld [vmem:[#allocation107_spill] sm:$0xff]  ;;  %v6259_v0 = vsel %vm6257_vm8, %v6250_v55, %v13123_v56  ;;  %v6217_v57 = vsel %vm6212_vm3, %v6208_v53, %v13127_v15  ;;  %v13135_v22 = vld [vmem:[#allocation97_spill] sm:$0xff]  ;;  %v13145_v23 = vld [vmem:[#allocation102_spill] sm:$0xff] }
 0x828   :  { %5858 = vrot.lane.b32.xlu0 %v11251_v63, %s6883_s30  ;;  %v6263_v63 = vsel %vm6257_vm8, %v6254_v16, %v13107_v33  ;;  %v6314_v38 = vsel %vm6311_vm14, %v6305_v12, %v11200_v2  ;;  %v6249_v2 = vsel %vm6248_vm7, %v6240_v11, %v13120_v18  ;;  %v6207_v25 = vsel %vm6203_vm2, %v6198_v20, %v13122_v50  ;;  %v13125_v19 = vld [vmem:[#allocation163_spill] sm:$0xff]  ;;  %v13130_v33 = vld [vmem:[#allocation157_spill] sm:$0xff]  ;;  %v13143_v11 = vld [vmem:[#allocation140_spill] sm:$0xff] }
 0x829   :  { %v6272_v52 = vsel %vm6266_vm9, %v6263_v63, %v13111_v59  ;;  %v6216_v48 = vsel %vm6212_vm3, %v6207_v25, %v13126_v13  ;;  %v13128_v16 = vld [vmem:[#allocation139_spill] sm:$0xff]  ;;  %v6226_v63 = vsel %vm6221_vm4, %v6217_v57, %v13130_v33  ;;  %v13134_v59 = vld [vmem:[#allocation82_spill] sm:$0xff]  ;;  %v13137_v20 = vld [vmem:[#allocation137_spill] sm:$0xff] }
 0x82a   :  { %v5695_v27 = vpop.permute.xlu0 %5694  ;;  %5794 = vrot.lane.b32.xlu2 %v13109_v14, %s6881_s28  ;;  %5826 = vrot.lane.b32.xlu1 %v11254_v40, %s6882_s29  ;;  %v6282_v40 = vsel %vm6275_vm10, %v6273_v44, %v13115_v58  ;;  %v6281_v46 = vsel %vm6275_vm10, %v6272_v52, %v13121_v24  ;;  %v6225_v60 = vsel %vm6221_vm4, %v6216_v48, %v13131_v17  ;;  %v4030_v52 = vrot.slane %v13134_v59, 4  ;;  %v13138_v58 = vld [vmem:[#allocation81_spill] sm:$0xff]  ;;  %v13151_v13 = vld [vmem:[#allocation162_spill] sm:$0xff]  ;;  %v13152_v57 = vld [vmem:[#allocation220_spill] sm:$0xff] }
 0x82b   :  { %v6290_v9 = vsel %vm6284_vm11, %v6281_v46, %v13124_v31  ;;  %v6291_v51 = vsel %vm6284_vm11, %v6282_v40, %v13125_v19  ;;  %v6235_v12 = vsel %vm6230_vm5, %v6226_v63, %v13135_v22  ;;  %v6268_v8 = vsel %vm6266_vm9, %v6259_v0, %v13137_v20  ;;  %v13139_v40 = vld [vmem:[#allocation262_spill] sm:$0xff]  ;;  %v13142_v53 = vld [vmem:[#allocation277_spill] sm:$0xff]  ;;  %v13147_v46 = vld [vmem:[#allocation259_spill] sm:$0xff] }
 0x82c   :  { %v11388_v42 = vpop.permute.xlu2 %5664  ;;  %v5663_v4 = vpop.permute.xlu1 %5662  ;;  %v6300_v30 = vsel %vm6293_vm12, %v6291_v51, %v13128_v16  ;;  %v6299_v1 = vsel %vm6293_vm12, %v6290_v9, %v13129_v36  ;;  %v13148_v25 = vld [vmem:[#allocation261_spill] sm:$0xff]  ;;  %v13149_v9 = vld [vmem:[#allocation210_spill] sm:$0xff]  ;;  %v13155_v63 = vld [vmem:[#allocation260_spill] sm:$0xff] }
 0x82d   :  { %v6323_v61 = vsel %vm6320_vm15, %v6314_v38, %v5663_v4  ;;  %v6309_v44 = vsel %vm6302_vm13, %v6300_v30, %v13133_v34  ;;  %v4055_v38 = vsel %vm13140_vm1, %v4054_v47, %v13139_v40  ;;  %v13141_v4 = vld [vmem:[#allocation150_spill] sm:$0xff]  ;;  %v6308_v41 = vsel %vm6302_vm13, %v6299_v1, %v13143_v11  ;;  %v13146_v47 = vld [vmem:[#allocation161_spill] sm:$0xff]  ;;  %v13153_v30 = vld [vmem:[#allocation203_spill] sm:$0xff] }
 0x82e   :  { %v11404_v32 = vsel %vm6329_vm0, %v6323_v61, %v5695_v27  ;;  %v13132_v27 = vld [vmem:[#allocation86_spill] sm:$0xff]  ;;  %v6277_v7 = vsel %vm6275_vm10, %v6268_v8, %v13141_v4  ;;  %v6234_v61 = vsel %vm6230_vm5, %v6225_v60, %v13144_v43  ;;  %v6244_v56 = vsel %vm6239_vm6, %v6235_v12, %v13148_v25  ;;  %v13154_v1 = vld [vmem:[#allocation279_spill] sm:$0xff]  ;;  %vm13156_vm2 = vmmov %vm13140_vm1 }
 0x82f   :  { %v6258_v14 = vsel %vm6257_vm8, %v6249_v2, %v13132_v27  ;;  %v6286_v55 = vsel %vm6284_vm11, %v6277_v7, %v13145_v23  ;;  %v6318_v2 = vsel %vm6311_vm14, %v6309_v44, %v13146_v47  ;;  %v6243_v50 = vsel %vm6239_vm6, %v6234_v61, %v13147_v46  ;;  %v13157_v60 = vld [vmem:[#allocation224_spill] sm:$0xff]  ;;  %vm13160_vm3 = vmmov %vm13140_vm1  ;;  %v13161_v22 = vld [vmem:[#allocation138_spill] sm:$0xff] }
 0x830   :  { %5864 = vrot.lane.b32.xlu0 %v4301_v10, %s6883_s30  ;;  %v6267_v10 = vsel %vm6266_vm9, %v6258_v14, %v13136_v5  ;;  %v6253_v19 = vsel %vm6248_vm7, %v6244_v56, %v13149_v9  ;;  %v6295_v33 = vsel %vm6293_vm12, %v6286_v55, %v13154_v1  ;;  %v4031_v17 = vsel %vm13156_vm2, %v4030_v52, %v13155_v63  ;;  %v13158_v14 = vld [vmem:[#allocation222_spill] sm:$0xff]  ;;  %v13162_v5 = vld [vmem:[#allocation16_spill] sm:$0xff]  ;;  %vm13163_vm4 = vmmov %vm13140_vm1 }
 0x831   :  { %v6276_v62 = vsel %vm6275_vm10, %v6267_v10, %v13142_v53  ;;  %v6262_v16 = vsel %vm6257_vm8, %v6253_v19, %v13152_v57  ;;  %v6304_v27 = vsel %vm6302_vm13, %v6295_v33, %v13157_v60  ;;  %v13159_v44 = vrot.slane %v11158_v21, 4  ;;  %v13164_v8 = vld [vmem:[#allocation69_spill] sm:$0xff]  ;;  %v13166_v4 = vld [vmem:[#allocation267_spill] sm:$0xff]  ;;  %v13173_v56 = vld [vmem:[#allocation308_spill] sm:$0xff] }
 0x832   :  { %v5701_v37 = vpop.permute.xlu0 %5700  ;;  %5800 = vrot.lane.b32.xlu2 %v13138_v58, %s6881_s28  ;;  %5832 = vrot.lane.b32.xlu1 %v4299_v29, %s6882_s29  ;;  %v6317_v29 = vsel %vm6311_vm14, %v6308_v41, %v11260_v3  ;;  %v13150_v3 = vld [vmem:[#allocation211_spill] sm:$0xff]  ;;  %v6285_v48 = vsel %vm6284_vm11, %v6276_v62, %v13151_v13  ;;  %v6313_v52 = vsel %vm6311_vm14, %v6304_v27, %v13162_v5  ;;  %v4078_v7 = vrot.slane %v13166_v4, 4  ;;  %v13169_v62 = vld [vmem:[#allocation142_spill] sm:$0xff]  ;;  %v13172_v46 = vld [vmem:[#allocation165_spill] sm:$0xff] }
 0x833   :  { %v6252_v51 = vsel %vm6248_vm7, %v6243_v50, %v13150_v3  ;;  %v6294_v36 = vsel %vm6293_vm12, %v6285_v48, %v13153_v30  ;;  %v3741_v59 = vsel %vm13160_vm3, %v11212_v45, %v13159_v44  ;;  %v3739_v10 = vsel %vm13163_vm4, %v3738_v39, %v11158_v21  ;;  %v13167_v45 = vld [vmem:[#allocation274_spill] sm:$0xff]  ;;  %v13168_v39 = vld [vmem:[#allocation275_spill] sm:$0xff]  ;;  %v13174_v9 = vld [vmem:[#allocation100_spill] sm:$0xff] }
 0x834   :  { %v5671_v18 = vpop.permute.xlu2 %5670  ;;  %v5669_v24 = vpop.permute.xlu1 %5668  ;;  %v6303_v34 = vsel %vm6302_vm13, %v6294_v36, %v13158_v14  ;;  %v6261_v12 = vsel %vm6257_vm8, %v6252_v51, %v13161_v22  ;;  %v4061_v20 = vperm.slane %v4055_v38, %v7276_v49  ;;  %v4037_v53 = vperm.slane %v4031_v17, %v7276_v49  ;;  %v13170_v41 = vld [vmem:[#allocation198_spill] sm:$0xff]  ;;  %v13171_v55 = vld [vmem:[#allocation159_spill] sm:$0xff]  ;;  %v13175_v19 = vld [vmem:[#allocation264_spill] sm:$0xff] }
 0x835   :  { %v11462_v0 = vsel %vm6320_vm15, %v6318_v2, %v5671_v18  ;;  %v6326_v31 = vsel %vm6320_vm15, %v6317_v29, %v5669_v24  ;;  %v6312_v11 = vsel %vm6311_vm14, %v6303_v34, %v13169_v62  ;;  %vm6338_vm5 = vcmask 277504   ;;  %vm13176_vm6 = vmmov %vm13140_vm1  ;;  %v13177_v13 = vld [vmem:[#allocation230_spill] sm:$0xff]  ;;  %v13178_v57 = vld [vmem:[#allocation24_spill] sm:$0xff] }
 0x836   :  { %v11472_v15 = vsel %vm6329_vm0, %v6326_v31, %v5701_v37  ;;  %v13165_v37 = vld [vmem:[#allocation221_spill] sm:$0xff]  ;;  %v6321_v61 = vsel %vm6320_vm15, %v6312_v11, %v11322_v54  ;;  %v6322_v29 = vsel %vm6320_vm15, %v6313_v52, %v13171_v55  ;;  %v4074_v24 = vrot.slane %v4061_v20, 4  ;;  %vm13179_vm7 = vmmov %vm13140_vm1  ;;  %v13181_v63 = vld [vmem:[#allocation146_spill] sm:$0xff] }
 0x837   :  { %v6271_v58 = vsel %vm6266_vm9, %v6262_v16, %v13165_v37  ;;  %v4079_v3 = vsel %vm13176_vm6, %v4078_v7, %v13175_v19  ;;  %v4076_v51 = vrot.slane %v4037_v53, 4  ;;  %vm13180_vm8 = vmmov %vm13140_vm1  ;;  %v13182_v22 = vld [vmem:[#allocation53_spill] sm:$0xff]  ;;  %v13183_v5 = vld [vmem:[#allocation52_spill] sm:$0xff] }
 0x838   :  { %5886 = vrot.lane.b32.xlu0 %v11209_v26, %s6884_s2  ;;  %v6270_v26 = vsel %vm6266_vm9, %v6261_v12, %v13164_v8  ;;  %v6280_v21 = vsel %vm6275_vm10, %v6271_v58, %v13167_v45  ;;  %v4075_v36 = vsel %vm13179_vm7, %v4074_v24, %v4037_v53  ;;  %v13186_v58 = vld [vmem:[#allocation217_spill] sm:$0xff]  ;;  %vm6347_vm9 = vcmask 293888   ;;  %v13192_v55 = vld [vmem:[#allocation126_spill] sm:$0xff]  ;;  %v13196_v24 = vld [vmem:[#allocation252_spill] sm:$0xff] }
 0x839   :  { %v6279_v38 = vsel %vm6275_vm10, %v6270_v26, %v13168_v39  ;;  %v6289_v43 = vsel %vm6284_vm11, %v6280_v21, %v13170_v41  ;;  %v4077_v1 = vsel %vm13180_vm8, %v4061_v20, %v4076_v51  ;;  %v13185_v26 = vld [vmem:[#allocation215_spill] sm:$0xff]  ;;  %v13188_v45 = vld [vmem:[#allocation93_spill] sm:$0xff]  ;;  %v13189_v39 = vld [vmem:[#allocation12_spill] sm:$0xff] }
 0x83a   :  { %v5723_v40 = vpop.permute.xlu0 %5722  ;;  %5822 = vrot.lane.b32.xlu2 %v3739_v10, %s6882_s29  ;;  %5854 = vrot.lane.b32.xlu1 %v3741_v59, %s6883_s30  ;;  %v6288_v50 = vsel %vm6284_vm11, %v6279_v38, %v13172_v46  ;;  %v6298_v54 = vsel %vm6293_vm12, %v6289_v43, %v13174_v9  ;;  %v13190_v38 = vld [vmem:[#allocation292_spill] sm:$0xff]  ;;  %v13191_v62 = vld [vmem:[#allocation129_spill] sm:$0xff]  ;;  %vm13193_vm10 = vmmov %vm13140_vm1 }
 0x83b   :  { %v6297_v31 = vsel %vm6293_vm12, %v6288_v50, %v13173_v56  ;;  %v6307_v48 = vsel %vm6302_vm13, %v6298_v54, %v13177_v13  ;;  %v4514_v11 = vrot.slane %v13191_v62, 4  ;;  %v13197_v54 = vld [vmem:[#allocation249_spill] sm:$0xff]  ;;  %vm13198_vm11 = vmmov %vm13140_vm1  ;;  %vm6356_vm12 = vcmask 310272  }
 0x83c   :  { %v5693_v23 = vpop.permute.xlu2 %5692  ;;  %v5691_v18 = vpop.permute.xlu1 %5690  ;;  %v6306_v16 = vsel %vm6302_vm13, %v6297_v31, %v13178_v57  ;;  %v6316_v30 = vsel %vm6311_vm14, %v6307_v48, %v11262_v28  ;;  %v13200_v48 = vld [vmem:[#allocation239_spill] sm:$0xff]  ;;  %v13201_v57 = vld [vmem:[#allocation238_spill] sm:$0xff]  ;;  %vm13205_vm13 = vmmov %vm13140_vm1 }
 0x83d   :  { %v6331_v47 = vsel %vm6329_vm0, %v6322_v29, %v5693_v23  ;;  %v6330_v2 = vsel %vm6329_vm0, %v6321_v61, %v5691_v18  ;;  %v6315_v17 = vsel %vm6311_vm14, %v6306_v16, %v13181_v63  ;;  %v6325_v14 = vsel %vm6320_vm15, %v6316_v30, %v11237_v35  ;;  %v13203_v30 = vld [vmem:[#allocation169_spill] sm:$0xff]  ;;  %vm13207_vm14 = vmmov %vm13140_vm1 }
 0x83e   :  { %v6339_v25 = vsel %vm6338_vm5, %v6330_v2, %v5723_v40  ;;  %v6324_v60 = vsel %vm6320_vm15, %v6315_v17, %v11388_v42  ;;  %v13184_v42 = vld [vmem:[#allocation55_spill] sm:$0xff]  ;;  %v13187_v40 = vld [vmem:[#allocation218_spill] sm:$0xff]  ;;  %v4515_v29 = vsel %vm13193_vm10, %v4514_v11, %v13192_v55  ;;  %vm13209_vm15 = vmmov %vm13140_vm1 }
 0x83f   :  { %v13195_v2 = vld [vmem:[#allocation123_spill] sm:$0xff]  ;;  %vm13216_vm2 = vmmov %vm13140_vm1  ;;  %v13220_v55 = vld [vmem:[#allocation182_spill] sm:$0xff] }
 0x840   :  { %5892 = vrot.lane.b32.xlu0 %v4079_v3, %s6884_s2  ;;  %v13199_v3 = vld [vmem:[#allocation147_spill] sm:$0xff]  ;;  %vm13217_vm3 = vmmov %vm13140_vm1 }
 0x841   :  { %v4578_v51 = vrot.slane %v13199_v3, 4  ;;  %vm13218_vm4 = vmmov %vm13140_vm1 }
 0x842   :  { %v5729_v33 = vpop.permute.xlu0 %5728  ;;  %5828 = vrot.lane.b32.xlu2 %v4075_v36, %s6882_s29  ;;  %5860 = vrot.lane.b32.xlu1 %v4077_v1, %s6883_s30  ;;  %v4602_v36 = vrot.slane %v13203_v30, 4  ;;  %vm13223_vm6 = vmmov %vm13140_vm1  ;;  %v13230_v30 = vld [vmem:[#allocation73_spill] sm:$0xff] }
 0x843   :  { %vm13224_vm7 = vmmov %vm13140_vm1 }
 0x844   :  { %v5699_v27 = vpop.permute.xlu2 %5698  ;;  %v5697_v28 = vpop.permute.xlu1 %5696  ;;  %vm13226_vm8 = vmmov %vm13140_vm1 }
 0x845   :  { %v6334_v34 = vsel %vm6329_vm0, %v6325_v14, %v5699_v27  ;;  %v6333_v44 = vsel %vm6329_vm0, %v6324_v60, %v5697_v28  ;;  %v13204_v60 = vld [vmem:[#allocation5_spill] sm:$0xff]  ;;  %v13206_v14 = vld [vmem:[#allocation14_spill] sm:$0xff]  ;;  %vm13233_vm10 = vmmov %vm13140_vm1 }
 0x846   :  { %v6342_v59 = vsel %vm6338_vm5, %v6333_v44, %v5729_v33  ;;  %v4579_v27 = vsel %vm13205_vm13, %v4578_v51, %v13204_v60  ;;  %v4603_v28 = vsel %vm13207_vm14, %v4602_v36, %v13206_v14  ;;  %v13208_v44 = vld [vmem:[#allocation160_spill] sm:$0xff]  ;;  %v13225_v51 = vld [vmem:[#allocation62_spill] sm:$0xff]  ;;  %v4406_v36 = vrot.slane %v13230_v30, 4  ;;  %vm13237_vm13 = vmmov %vm13140_vm1 }
 0x847   :  { %vm13238_vm14 = vmmov %vm13140_vm1 }
 0x848   :  { %5914 = vrot.lane.b32.xlu0 %v13182_v22, %s6885_s3 }
 0x84a   :  { %v5735_v12 = vpop.permute.xlu0 %5734  ;;  %5850 = vrot.lane.b32.xlu2 %v13183_v5, %s6883_s30  ;;  %5882 = vrot.lane.b32.xlu1 %v13184_v42, %s6884_s2  ;;  %v13210_v5 = vld [vmem:[#allocation283_spill] sm:$0xff] }
 0x84b   :  { %v4938_v42 = vrot.slane %v13210_v5, 4  ;;  %v13234_v5 = vld [vmem:[#allocation70_spill] sm:$0xff] }
 0x84c   :  { %v5705_v52 = vpop.permute.xlu2 %5704  ;;  %v5703_v35 = vpop.permute.xlu1 %5702 }
 0x84d   :  { %v6337_v10 = vsel %vm6329_vm0, %v11336_v6, %v5705_v52  ;;  %v6336_v20 = vsel %vm6329_vm0, %v11462_v0, %v5703_v35  ;;  %v13211_v35 = vld [vmem:[#allocation103_spill] sm:$0xff] }
 0x84e   :  { %v6345_v8 = vsel %vm6338_vm5, %v6336_v20, %v5735_v12  ;;  %v4585_v12 = vperm.slane %v4579_v27, %v7276_v49  ;;  %v13213_v20 = vld [vmem:[#allocation258_spill] sm:$0xff] }
 0x850   :  { %5920 = vrot.lane.b32.xlu0 %v13185_v26, %s6885_s3  ;;  %v4914_v26 = vrot.slane %v13213_v20, 4 }
 0x852   :  { %v5757_v37 = vpop.permute.xlu0 %5756  ;;  %5856 = vrot.lane.b32.xlu2 %v13186_v58, %s6883_s30  ;;  %5888 = vrot.lane.b32.xlu1 %v13187_v40, %s6884_s2 }
 0x854   :  { %v5727_v4 = vpop.permute.xlu2 %5726  ;;  %v5725_v7 = vpop.permute.xlu1 %5724 }
 0x855   :  { %v6341_v6 = vsel %vm6338_vm5, %v11404_v32, %v5727_v4  ;;  %v6340_v0 = vsel %vm6338_vm5, %v6331_v47, %v5725_v7  ;;  %v13194_v47 = vld [vmem:[#allocation125_spill] sm:$0xff]  ;;  %v4628_v7 = vrot.slane %v4585_v12, 4 }
 0x856   :  { %v11573_v53 = vsel %vm6347_vm9, %v6340_v0, %v5757_v37  ;;  %v13214_v0 = vld [vmem:[#allocation257_spill] sm:$0xff] }
 0x858   :  { %5926 = vrot.lane.b32.xlu0 %v13188_v45, %s6885_s3  ;;  %v4915_v45 = vsel %vm13140_vm1, %v4914_v26, %v13214_v0  ;;  %v13242_v0 = vld [vmem:[#allocation296_spill] sm:$0xff] }
 0x859   :  { %v4921_v11 = vperm.slane %v4915_v45, %v7276_v49  ;;  %v5050_v45 = vrot.slane %v13242_v0, 4 }
 0x85a   :  { %v5763_v21 = vpop.permute.xlu0 %5762  ;;  %5862 = vrot.lane.b32.xlu2 %v13189_v39, %s6883_s30  ;;  %5894 = vrot.lane.b32.xlu1 %v13190_v38, %s6884_s2 }
 0x85c   :  { %v5733_v41 = vpop.permute.xlu2 %5732  ;;  %v5731_v43 = vpop.permute.xlu1 %5730 }
 0x85d   :  { %v6344_v32 = vsel %vm6338_vm5, %v11472_v15, %v5733_v41  ;;  %v6343_v61 = vsel %vm6338_vm5, %v6334_v34, %v5731_v43  ;;  %v4850_v15 = vrot.slane %v13196_v24, 4  ;;  %v13219_v43 = vld [vmem:[#allocation71_spill] sm:$0xff]  ;;  %v4964_v24 = vrot.slane %v4921_v11, 4 }
 0x85e   :  { %v11586_v23 = vsel %vm6347_vm9, %v6343_v61, %v5763_v21  ;;  %v13215_v21 = vld [vmem:[#allocation59_spill] sm:$0xff] }
 0x85f   :  { %v4851_v19 = vsel %vm13198_vm11, %v4850_v15, %v13197_v54  ;;  %v4939_v39 = vsel %vm13216_vm2, %v4938_v42, %v13215_v21  ;;  %vm13235_vm11 = vmmov %vm13140_vm1 }
 0x860   :  { %5948 = vrot.lane.b32.xlu0 %v4515_v29, %s6886_s4  ;;  %v4945_v41 = vperm.slane %v4939_v39, %v7276_v49  ;;  %v4407_v42 = vsel %vm13235_vm11, %v4406_v36, %v13234_v5  ;;  %vm13245_vm2 = vmmov %vm13140_vm1  ;;  %vm6392_vm11 = vcmask 375808  }
 0x862   :  { %v5769_v18 = vpop.permute.xlu0 %5768  ;;  %5884 = vrot.lane.b32.xlu2 %v13194_v47, %s6884_s2  ;;  %5916 = vrot.lane.b32.xlu1 %v13195_v2, %s6885_s3  ;;  %v4962_v15 = vrot.slane %v4945_v41, 4  ;;  %v4965_v3 = vsel %vm13224_vm7, %v4945_v41, %v4964_v24  ;;  %v13243_v41 = vld [vmem:[#allocation294_spill] sm:$0xff]  ;;  %vm13252_vm7 = vmmov %vm13140_vm1 }
 0x864   :  { %v5755_v46 = vpop.permute.xlu2 %5754  ;;  %v5737_v50 = vpop.permute.xlu1 %5736 }
 0x865   :  { %v6348_v56 = vsel %vm6347_vm9, %v6339_v25, %v5755_v46  ;;  %v6346_v31 = vsel %vm6338_vm5, %v6337_v10, %v5737_v50  ;;  %v13202_v25 = vld [vmem:[#allocation208_spill] sm:$0xff]  ;;  %v13212_v10 = vld [vmem:[#allocation13_spill] sm:$0xff]  ;;  %vm6365_vm5 = vcmask 326656  }
 0x866   :  { %v11599_v9 = vsel %vm6347_vm9, %v6346_v31, %v5769_v18  ;;  %v5186_v16 = vrot.slane %v13202_v25, 4  ;;  %v13221_v46 = vld [vmem:[#allocation65_spill] sm:$0xff]  ;;  %v13222_v31 = vld [vmem:[#allocation67_spill] sm:$0xff] }
 0x867   :  { %v4354_v50 = vrot.slane %v13221_v46, 4  ;;  %v13250_v46 = vld [vmem:[#allocation298_spill] sm:$0xff] }
 0x868   :  { %5954 = vrot.lane.b32.xlu0 %v4851_v19, %s6886_s4  ;;  %v5187_v22 = vsel %vm13209_vm15, %v5186_v16, %v13208_v44  ;;  %v13229_v16 = vld [vmem:[#allocation270_spill] sm:$0xff]  ;;  %vm13239_vm15 = vmmov %vm13140_vm1 }
 0x86a   :  { %v5791_v13 = vpop.permute.xlu0 %5790  ;;  %5890 = vrot.lane.b32.xlu2 %v13200_v48, %s6884_s2  ;;  %5922 = vrot.lane.b32.xlu1 %v13201_v57, %s6885_s3  ;;  %v13228_v48 = vld [vmem:[#allocation200_spill] sm:$0xff] }
 0x86b   :  { %v4714_v57 = vrot.slane %v13228_v48, 4  ;;  %v13251_v48 = vld [vmem:[#allocation295_spill] sm:$0xff] }
 0x86c   :  { %v5761_v1 = vpop.permute.xlu2 %5760  ;;  %v5759_v33 = vpop.permute.xlu1 %5758 }
 0x86d   :  { %v6351_v63 = vsel %vm6347_vm9, %v6342_v59, %v5761_v1  ;;  %v6350_v17 = vsel %vm6347_vm9, %v6341_v6, %v5759_v33  ;;  %v4609_v59 = vperm.slane %v4603_v28, %v7276_v49  ;;  %v13231_v33 = vld [vmem:[#allocation189_spill] sm:$0xff] }
 0x86e   :  { %v11618_v34 = vsel %vm6356_vm12, %v6350_v17, %v5791_v13  ;;  %v4690_v17 = vrot.slane %v13231_v33, 4 }
 0x86f   :  { %v4626_v6 = vrot.slane %v4609_v59, 4  ;;  %v4629_v62 = vsel %vm13217_vm3, %v4609_v59, %v4628_v7  ;;  %v13241_v7 = vld [vmem:[#allocation34_spill] sm:$0xff]  ;;  %vm13247_vm3 = vmmov %vm13140_vm1 }
 0x870   :  { %5960 = vrot.lane.b32.xlu0 %v5187_v22, %s6886_s4  ;;  %v13232_v22 = vld [vmem:[#allocation194_spill] sm:$0xff] }
 0x872   :  { %v5797_v52 = vpop.permute.xlu0 %5796  ;;  %5896 = vrot.lane.b32.xlu2 %v13211_v35, %s6884_s2  ;;  %5928 = vrot.lane.b32.xlu1 %v13212_v10, %s6885_s3  ;;  %v13236_v35 = vld [vmem:[#allocation18_spill] sm:$0xff] }
 0x873   :  { %v4691_v10 = vsel %vm13237_vm13, %v4690_v17, %v13236_v35  ;;  %v13259_v35 = vld [vmem:[#allocation254_spill] sm:$0xff]  ;;  %vm13273_vm13 = vmmov %vm13140_vm1 }
 0x874   :  { %v5767_v37 = vpop.permute.xlu2 %5766  ;;  %v5765_v58 = vpop.permute.xlu1 %5764 }
 0x875   :  { %v11632_v40 = vsel %vm6347_vm9, %v6345_v8, %v5767_v37  ;;  %v6353_v4 = vsel %vm6347_vm9, %v6344_v32, %v5765_v58  ;;  %v4627_v8 = vsel %vm13218_vm4, %v4626_v6, %v4585_v12  ;;  %v4378_v32 = vrot.slane %v13219_v43, 4  ;;  %vm13227_vm9 = vmmov %vm13140_vm1  ;;  %v13240_v37 = vld [vmem:[#allocation204_spill] sm:$0xff] }
 0x876   :  { %v11640_v38 = vsel %vm6356_vm12, %v6353_v4, %v5797_v52  ;;  %v4963_v13 = vsel %vm13227_vm9, %v4962_v15, %v4921_v11  ;;  %v4715_v12 = vsel %vm13233_vm10, %v4714_v57, %v13232_v22  ;;  %v4742_v58 = vrot.slane %v13240_v37, 4  ;;  %vm13248_vm4 = vmmov %vm13140_vm1  ;;  %v13261_v37 = vld [vmem:[#allocation315_spill] sm:$0xff] }
 0x877   :  { %v4379_v54 = vsel %vm13223_vm6, %v4378_v32, %v13222_v31  ;;  %v4721_v20 = vperm.slane %v4715_v12, %v7276_v49  ;;  %v4697_v4 = vperm.slane %v4691_v10, %v7276_v49  ;;  %v5026_v6 = vrot.slane %v13241_v7, 4  ;;  %vm13249_vm6 = vmmov %vm13140_vm1  ;;  %v13260_v10 = vld [vmem:[#allocation255_spill] sm:$0xff]  ;;  %v13263_v7 = vld [vmem:[#allocation28_spill] sm:$0xff] }
 0x878   :  { %5982 = vrot.lane.b32.xlu0 %v4629_v62, %s6887_s5  ;;  %v5051_v43 = vsel %vm13140_vm1, %v5050_v45, %v13243_v41  ;;  %vm13254_vm9 = vmmov %vm13140_vm1  ;;  %vm6383_vm10 = vcmask 359424   ;;  %v13267_v41 = vld [vmem:[#allocation68_spill] sm:$0xff] }
 0x879   :  { %v4738_v11 = vrot.slane %v4721_v20, 4 }
 0x87a   :  { %v5819_v61 = vpop.permute.xlu0 %5818  ;;  %5918 = vrot.lane.b32.xlu2 %v13220_v55, %s6885_s3  ;;  %5950 = vrot.lane.b32.xlu1 %v4627_v8, %s6886_s4 }
 0x87c   :  { %v5789_v29 = vpop.permute.xlu2 %5788  ;;  %v5787_v18 = vpop.permute.xlu1 %5786 }
 0x87d   :  { %v11653_v47 = vsel %vm6356_vm12, %v11573_v53, %v5789_v29  ;;  %v6357_v2 = vsel %vm6356_vm12, %v6348_v56, %v5787_v18  ;;  %v4355_v53 = vsel %vm13226_vm8, %v4354_v50, %v13225_v51  ;;  %v4385_v56 = vperm.slane %v4379_v54, %v7276_v49  ;;  %v13246_v18 = vld [vmem:[#allocation63_spill] sm:$0xff]  ;;  %vm13253_vm8 = vmmov %vm13140_vm1 }
 0x87e   :  { %v11660_v19 = vsel %vm6365_vm5, %v6357_v2, %v5819_v61  ;;  %v4361_v1 = vperm.slane %v4355_v53, %v7276_v49  ;;  %v13244_v61 = vld [vmem:[#allocation199_spill] sm:$0xff]  ;;  %v4740_v29 = vrot.slane %v4697_v4, 4  ;;  %v5027_v2 = vsel %vm13247_vm3, %v5026_v6, %v13246_v18  ;;  %v13264_v6 = vld [vmem:[#allocation168_spill] sm:$0xff]  ;;  %vm13285_vm3 = vmmov %vm13140_vm1 }
 0x87f   :  { %v4402_v44 = vrot.slane %v4385_v56, 4  ;;  %v4743_v55 = vsel %vm13245_vm2, %v4742_v58, %v13244_v61  ;;  %v5078_v50 = vrot.slane %v13250_v46, 4  ;;  %v5033_v31 = vperm.slane %v5027_v2, %v7276_v49  ;;  %v13271_v2 = vld [vmem:[#allocation29_spill] sm:$0xff]  ;;  %vm13284_vm2 = vmmov %vm13140_vm1 }
 0x880   :  { %5988 = vrot.lane.b32.xlu0 %v4965_v3, %s6887_s5  ;;  %v4404_v52 = vrot.slane %v4361_v1, 4  ;;  %v4741_v24 = vsel %vm13249_vm6, %v4721_v20, %v4740_v29  ;;  %v4634_v0 = vrot.slane %v13264_v6, 4  ;;  %v13269_v29 = vld [vmem:[#allocation173_spill] sm:$0xff]  ;;  %vm13291_vm6 = vmmov %vm13140_vm1 }
 0x881   :  { %v5079_v57 = vsel %vm13252_vm7, %v5078_v50, %v13251_v48  ;;  %v13272_v50 = vld [vmem:[#allocation27_spill] sm:$0xff]  ;;  %vm13294_vm7 = vmmov %vm13140_vm1 }
 0x882   :  { %v5825_v25 = vpop.permute.xlu0 %5824  ;;  %5924 = vrot.lane.b32.xlu2 %v13229_v16, %s6885_s3  ;;  %5956 = vrot.lane.b32.xlu1 %v4963_v13, %s6886_s4 }
 0x884   :  { %v5795_v60 = vpop.permute.xlu2 %5794  ;;  %v5793_v27 = vpop.permute.xlu1 %5792 }
 0x885   :  { %v6361_v14 = vsel %vm6356_vm12, %v11586_v23, %v5795_v60  ;;  %v6360_v28 = vsel %vm6356_vm12, %v6351_v63, %v5793_v27  ;;  %v4403_v23 = vsel %vm13238_vm14, %v4402_v44, %v4361_v1  ;;  %v4405_v63 = vsel %vm13239_vm15, %v4385_v56, %v4404_v52  ;;  %v13255_v60 = vld [vmem:[#allocation133_spill] sm:$0xff]  ;;  %v13257_v44 = vld [vmem:[#allocation135_spill] sm:$0xff]  ;;  %vm13275_vm14 = vmmov %vm13140_vm1 }
 0x886   :  { %v11681_v59 = vsel %vm6365_vm5, %v6360_v28, %v5825_v25  ;;  %v5076_v25 = vrot.slane %v5033_v31, 4  ;;  %v13256_v28 = vld [vmem:[#allocation132_spill] sm:$0xff]  ;;  %vm13277_vm15 = vmmov %vm13140_vm1 }
 0x888   :  { %6010 = vrot.lane.b32.xlu0 %v4407_v42, %s6888_s6  ;;  %v13258_v42 = vld [vmem:[#allocation253_spill] sm:$0xff] }
 0x88a   :  { %v5831_v26 = vpop.permute.xlu0 %5830  ;;  %5946 = vrot.lane.b32.xlu2 %v4403_v23, %s6886_s4  ;;  %5978 = vrot.lane.b32.xlu1 %v4405_v63, %s6887_s5 }
 0x88c   :  { %v5801_v21 = vpop.permute.xlu2 %5800  ;;  %v5799_v39 = vpop.permute.xlu1 %5798 }
 0x88d   :  { %v6364_v62 = vsel %vm6356_vm12, %v11599_v9, %v5801_v21  ;;  %v6363_v8 = vsel %vm6356_vm12, %v11632_v40, %v5799_v39  ;;  %v4739_v9 = vsel %vm13248_vm4, %v4738_v11, %v4697_v4  ;;  %v5057_v40 = vperm.slane %v5051_v43, %v7276_v49  ;;  %v13262_v4 = vld [vmem:[#allocation205_spill] sm:$0xff]  ;;  %vm13286_vm4 = vmmov %vm13140_vm1 }
 0x88e   :  { %v6372_v32 = vsel %vm6365_vm5, %v6363_v8, %v5831_v26  ;;  %vm6374_vm12 = vcmask 343040   ;;  %v13265_v8 = vld [vmem:[#allocation37_spill] sm:$0xff]  ;;  %v4390_v43 = vrot.slane %v13267_v41, 4 }
 0x88f   :  { %v5074_v13 = vrot.slane %v5057_v40, 4  ;;  %v5077_v30 = vsel %vm13254_vm9, %v5057_v40, %v5076_v25  ;;  %vm6401_vm9 = vcmask 392192  }
 0x890   :  { %6016 = vrot.lane.b32.xlu0 %v4743_v55, %s6888_s6  ;;  %v13268_v55 = vld [vmem:[#allocation176_spill] sm:$0xff] }
 0x891   :  { %v5075_v16 = vsel %vm13253_vm8, %v5074_v13, %v5033_v31  ;;  %vm13295_vm8 = vmmov %vm13140_vm1 }
 0x892   :  { %v5853_v15 = vpop.permute.xlu0 %5852  ;;  %5952 = vrot.lane.b32.xlu2 %v4739_v9, %s6886_s4  ;;  %5984 = vrot.lane.b32.xlu1 %v4741_v24, %s6887_s5  ;;  %v4366_v9 = vrot.slane %v13271_v2, 4 }
 0x894   :  { %v5823_v54 = vpop.permute.xlu2 %5822  ;;  %v5821_v3 = vpop.permute.xlu1 %5820  ;;  %v4367_v31 = vsel %vm13273_vm13, %v4366_v9, %v13272_v50  ;;  %v13298_v9 = vld [vmem:[#allocation127_spill] sm:$0xff]  ;;  %vm13303_vm13 = vmmov %vm13140_vm1 }
 0x895   :  { %v6368_v51 = vsel %vm6365_vm5, %v11618_v34, %v5823_v54  ;;  %v6367_v53 = vsel %vm6365_vm5, %v11653_v47, %v5821_v3  ;;  %v13274_v54 = vld [vmem:[#allocation66_spill] sm:$0xff]  ;;  %v4373_v48 = vperm.slane %v4367_v31, %v7276_v49 }
 0x896   :  { %v6376_v56 = vsel %vm6374_vm12, %v6367_v53, %v5853_v15  ;;  %v4391_v3 = vsel %vm13275_vm14, %v4390_v43, %v13274_v54  ;;  %v13276_v53 = vld [vmem:[#allocation51_spill] sm:$0xff]  ;;  %vm13304_vm14 = vmmov %vm13140_vm1 }
 0x898   :  { %6022 = vrot.lane.b32.xlu0 %v5079_v57, %s6888_s6  ;;  %v13278_v57 = vld [vmem:[#allocation40_spill] sm:$0xff] }
 0x899   :  { %v4702_v25 = vrot.slane %v13278_v57, 4  ;;  %v13302_v57 = vld [vmem:[#allocation118_spill] sm:$0xff] }
 0x89a   :  { %v5859_v36 = vpop.permute.xlu0 %5858  ;;  %5958 = vrot.lane.b32.xlu2 %v5075_v16, %s6886_s4  ;;  %5990 = vrot.lane.b32.xlu1 %v5077_v30, %s6887_s5  ;;  %v13279_v16 = vld [vmem:[#allocation196_spill] sm:$0xff] }
 0x89b   :  { %v4726_v30 = vrot.slane %v13279_v16, 4 }
 0x89c   :  { %v5829_v34 = vpop.permute.xlu2 %5828  ;;  %v5827_v47 = vpop.permute.xlu1 %5826 }
 0x89d   :  { %v6371_v1 = vsel %vm6365_vm5, %v11640_v38, %v5829_v34  ;;  %v6370_v33 = vsel %vm6365_vm5, %v6361_v14, %v5827_v47  ;;  %v13280_v34 = vld [vmem:[#allocation289_spill] sm:$0xff]  ;;  %v13281_v47 = vld [vmem:[#allocation286_spill] sm:$0xff] }
 0x89e   :  { %v6379_v17 = vsel %vm6374_vm12, %v6370_v33, %v5859_v36 }
 0x8a0   :  { %6044 = vrot.lane.b32.xlu0 %v13255_v60, %s6889_s7 }
 0x8a2   :  { %v5865_v27 = vpop.permute.xlu0 %5864  ;;  %5980 = vrot.lane.b32.xlu2 %v13256_v28, %s6887_s5  ;;  %6012 = vrot.lane.b32.xlu1 %v13257_v44, %s6888_s6  ;;  %v4412_v28 = vrot.slane %v4373_v48, 4 }
 0x8a4   :  { %v5851_v22 = vpop.permute.xlu2 %5850  ;;  %v5833_v12 = vpop.permute.xlu1 %5832 }
 0x8a5   :  { %v6375_v38 = vsel %vm6374_vm12, %v11660_v19, %v5851_v22  ;;  %v6373_v14 = vsel %vm6365_vm5, %v6364_v62, %v5833_v12  ;;  %vm13266_vm5 = vmmov %vm13140_vm1  ;;  %v13282_v22 = vld [vmem:[#allocation44_spill] sm:$0xff] }
 0x8a6   :  { %v11742_v5 = vsel %vm6374_vm12, %v6373_v14, %v5865_v27  ;;  %v4635_v11 = vsel %vm13266_vm5, %v4634_v0, %v13265_v8  ;;  %v4703_v12 = vsel %vm13140_vm1, %v4702_v25, %v13282_v22  ;;  %vm13301_vm5 = vmmov %vm13140_vm1 }
 0x8a8   :  { %6050 = vrot.lane.b32.xlu0 %v13258_v42, %s6889_s7 }
 0x8aa   :  { %v5887_v52 = vpop.permute.xlu0 %5886  ;;  %5986 = vrot.lane.b32.xlu2 %v13259_v35, %s6887_s5  ;;  %6018 = vrot.lane.b32.xlu1 %v13260_v10, %s6888_s6  ;;  %v4709_v35 = vperm.slane %v4703_v12, %v7276_v49 }
 0x8ac   :  { %v5857_v23 = vpop.permute.xlu2 %5856  ;;  %v5855_v63 = vpop.permute.xlu1 %5854 }
 0x8ad   :  { %v6378_v19 = vsel %vm6374_vm12, %v11681_v59, %v5857_v23  ;;  %v6377_v20 = vsel %vm6374_vm12, %v6368_v51, %v5855_v63  ;;  %v13287_v23 = vld [vmem:[#allocation11_spill] sm:$0xff] }
 0x8ae   :  { %v11754_v26 = vsel %vm6383_vm10, %v6377_v20, %v5887_v52  ;;  %v5038_v63 = vrot.slane %v13287_v23, 4  ;;  %v13288_v20 = vld [vmem:[#allocation75_spill] sm:$0xff] }
 0x8b0   :  { %6056 = vrot.lane.b32.xlu0 %v13261_v37, %s6889_s7  ;;  %v13289_v37 = vld [vmem:[#allocation293_spill] sm:$0xff] }
 0x8b2   :  { %v5893_v58 = vpop.permute.xlu0 %5892  ;;  %5992 = vrot.lane.b32.xlu2 %v13262_v4, %s6887_s5  ;;  %6024 = vrot.lane.b32.xlu1 %v13263_v7, %s6888_s6 }
 0x8b4   :  { %v5863_v45 = vpop.permute.xlu2 %5862  ;;  %v5861_v21 = vpop.permute.xlu1 %5860 }
 0x8b5   :  { %v6381_v59 = vsel %vm6374_vm12, %v6372_v32, %v5863_v45  ;;  %v6380_v39 = vsel %vm6374_vm12, %v6371_v1, %v5861_v21  ;;  %v13270_v32 = vld [vmem:[#allocation284_spill] sm:$0xff]  ;;  %v4748_v45 = vrot.slane %v4709_v35, 4  ;;  %vm13293_vm12 = vmmov %vm13140_vm1 }
 0x8b6   :  { %v11766_v62 = vsel %vm6383_vm10, %v6380_v39, %v5893_v58  ;;  %v4970_v18 = vrot.slane %v13270_v32, 4  ;;  %v5062_v58 = vrot.slane %v13289_v37, 4  ;;  %v13290_v39 = vld [vmem:[#allocation148_spill] sm:$0xff]  ;;  %v13296_v32 = vld [vmem:[#allocation206_spill] sm:$0xff] }
 0x8b7   :  { %v5039_v8 = vsel %vm13291_vm6, %v5038_v63, %v13290_v39  ;;  %v13318_v39 = vld [vmem:[#allocation15_spill] sm:$0xff]  ;;  %vm13320_vm6 = vmmov %vm13140_vm1 }
 0x8b8   :  { %6078 = vrot.lane.b32.xlu0 %v4635_v11, %s6890_s8  ;;  %v4971_v13 = vsel %vm13277_vm15, %v4970_v18, %v13276_v53  ;;  %v13292_v11 = vld [vmem:[#allocation290_spill] sm:$0xff]  ;;  %v13297_v18 = vld [vmem:[#allocation121_spill] sm:$0xff]  ;;  %v13299_v53 = vld [vmem:[#allocation124_spill] sm:$0xff] }
 0x8b9   :  { %v5063_v41 = vsel %vm13293_vm12, %v5062_v58, %v13292_v11  ;;  %v4478_v2 = vrot.slane %v13297_v18, 4  ;;  %vm13310_vm15 = vmmov %vm13140_vm1  ;;  %v13321_v18 = vld [vmem:[#allocation248_spill] sm:$0xff] }
 0x8ba   :  { %v5915_v61 = vpop.permute.xlu0 %5914  ;;  %6014 = vrot.lane.b32.xlu2 %v13268_v55, %s6888_s6  ;;  %6046 = vrot.lane.b32.xlu1 %v13269_v29, %s6889_s7  ;;  %v5045_v55 = vperm.slane %v5039_v8, %v7276_v49  ;;  %v5174_v8 = vrot.slane %v13318_v39, 4  ;;  %vm13322_vm12 = vmmov %vm13140_vm1 }
 0x8bb   :  { %v4479_v25 = vsel %vm13303_vm13, %v4478_v2, %v13302_v57  ;;  %vm13330_vm13 = vmmov %vm13140_vm1 }
 0x8bc   :  { %v5885_v24 = vpop.permute.xlu2 %5884  ;;  %v5883_v40 = vpop.permute.xlu1 %5882  ;;  %v5084_v54 = vrot.slane %v5045_v55, 4 }
 0x8bd   :  { %v6385_v15 = vsel %vm6383_vm10, %v6376_v56, %v5885_v24  ;;  %v6384_v46 = vsel %vm6383_vm10, %v6375_v38, %v5883_v40  ;;  %v4397_v56 = vperm.slane %v4391_v3, %v7276_v49  ;;  %v13283_v38 = vld [vmem:[#allocation191_spill] sm:$0xff]  ;;  %v4502_v24 = vrot.slane %v13298_v9, 4 }
 0x8be   :  { %v11785_v51 = vsel %vm6392_vm11, %v6384_v46, %v5915_v61  ;;  %v4727_v14 = vsel %vm13284_vm2, %v4726_v30, %v13283_v38  ;;  %v13308_v38 = vld [vmem:[#allocation9_spill] sm:$0xff]  ;;  %vm13313_vm2 = vmmov %vm13140_vm1 }
 0x8bf   :  { %v4410_v44 = vrot.slane %v4397_v56, 4  ;;  %v4413_v52 = vsel %vm13285_vm3, %v4397_v56, %v4412_v28  ;;  %v4733_v10 = vperm.slane %v4727_v14, %v7276_v49  ;;  %v4814_v14 = vrot.slane %v13308_v38, 4  ;;  %vm13314_vm3 = vmmov %vm13140_vm1  ;;  %v13334_v38 = vld [vmem:[#allocation174_spill] sm:$0xff] }
 0x8c0   :  { %6084 = vrot.lane.b32.xlu0 %v4971_v13, %s6890_s8 }
 0x8c1   :  { %v4746_v21 = vrot.slane %v4733_v10, 4  ;;  %v4749_v61 = vsel %vm13294_vm7, %v4733_v10, %v4748_v45  ;;  %v13311_v10 = vld [vmem:[#allocation128_spill] sm:$0xff]  ;;  %v13317_v45 = vld [vmem:[#allocation79_spill] sm:$0xff]  ;;  %vm13324_vm7 = vmmov %vm13140_vm1 }
 0x8c2   :  { %v5921_v36 = vpop.permute.xlu0 %5920  ;;  %6020 = vrot.lane.b32.xlu2 %v13280_v34, %s6888_s6  ;;  %6052 = vrot.lane.b32.xlu1 %v13281_v47, %s6889_s7  ;;  %v13306_v34 = vld [vmem:[#allocation299_spill] sm:$0xff] }
 0x8c3   :  { %v13307_v47 = vld [vmem:[#allocation131_spill] sm:$0xff] }
 0x8c4   :  { %v5891_v1 = vpop.permute.xlu2 %5890  ;;  %v5889_v33 = vpop.permute.xlu1 %5888 }
 0x8c5   :  { %v6388_v60 = vsel %vm6383_vm10, %v6379_v17, %v5891_v1  ;;  %v6387_v27 = vsel %vm6383_vm10, %v6378_v19, %v5889_v33  ;;  %v4411_v17 = vsel %vm13286_vm4, %v4410_v44, %v4373_v48  ;;  %v4526_v1 = vrot.slane %v13307_v47, 4  ;;  %vm13315_vm4 = vmmov %vm13140_vm1 }
 0x8c6   :  { %v11805_v42 = vsel %vm6392_vm11, %v6387_v27, %v5921_v36  ;;  %v4485_v33 = vperm.slane %v4479_v25, %v7276_v49 }
 0x8c7   :  { %v4527_v23 = vsel %vm13140_vm1, %v4526_v1, %v13311_v10  ;;  %v13335_v10 = vld [vmem:[#allocation285_spill] sm:$0xff] }
 0x8c8   :  { %6106 = vrot.lane.b32.xlu0 %v4413_v52, %s6891_s9  ;;  %v13309_v52 = vld [vmem:[#allocation246_spill] sm:$0xff]  ;;  %v4524_v63 = vrot.slane %v4485_v33, 4 }
 0x8ca   :  { %v5927_v19 = vpop.permute.xlu0 %5926  ;;  %6042 = vrot.lane.b32.xlu2 %v13288_v20, %s6889_s7  ;;  %6074 = vrot.lane.b32.xlu1 %v4411_v17, %s6890_s8 }
 0x8cc   :  { %v5897_v4 = vpop.permute.xlu2 %5896  ;;  %v5895_v7 = vpop.permute.xlu1 %5894 }
 0x8cd   :  { %v11819_v6 = vsel %vm6383_vm10, %v11742_v5, %v5897_v4  ;;  %v6390_v0 = vsel %vm6383_vm10, %v6381_v59, %v5895_v7  ;;  %v4747_v5 = vsel %vm13295_vm8, %v4746_v21, %v4709_v35  ;;  %v5069_v59 = vperm.slane %v5063_v41, %v7276_v49  ;;  %vm13300_vm10 = vmmov %vm13140_vm1  ;;  %v13316_v4 = vld [vmem:[#allocation250_spill] sm:$0xff] }
 0x8ce   :  { %v11827_v43 = vsel %vm6392_vm11, %v6390_v0, %v5927_v19  ;;  %v4503_v13 = vsel %vm13300_vm10, %v4502_v24, %v13299_v53  ;;  %v13312_v19 = vld [vmem:[#allocation244_spill] sm:$0xff]  ;;  %v4862_v7 = vrot.slane %v13316_v4, 4  ;;  %v5150_v21 = vrot.slane %v13317_v45, 4  ;;  %v13323_v24 = vld [vmem:[#allocation77_spill] sm:$0xff]  ;;  %vm13325_vm8 = vmmov %vm13140_vm1 }
 0x8cf   :  { %v5082_v3 = vrot.slane %v5069_v59, 4  ;;  %v5085_v56 = vsel %vm13301_vm5, %v5069_v59, %v5084_v54  ;;  %v4509_v16 = vperm.slane %v4503_v13, %v7276_v49  ;;  %v13319_v59 = vld [vmem:[#allocation156_spill] sm:$0xff]  ;;  %vm13326_vm10 = vmmov %vm13140_vm1  ;;  %v13327_v54 = vld [vmem:[#allocation6_spill] sm:$0xff] }
 0x8d0   :  { %6112 = vrot.lane.b32.xlu0 %v4749_v61, %s6891_s9  ;;  %v4863_v2 = vsel %vm13322_vm12, %v4862_v7, %v13321_v18  ;;  %vm13329_vm5 = vmmov %vm13140_vm1  ;;  %v13338_v4 = vld [vmem:[#allocation76_spill] sm:$0xff]  ;;  %v13339_v7 = vld [vmem:[#allocation74_spill] sm:$0xff]  ;;  %vm6537_vm12 = vcmask 523264  }
 0x8d1   :  { %v4522_v12 = vrot.slane %v4509_v16, 4  ;;  %v4525_v20 = vsel %vm13315_vm4, %v4509_v16, %v4524_v63  ;;  %v13336_v63 = vld [vmem:[#allocation287_spill] sm:$0xff]  ;;  %v13342_v18 = vld [vmem:[#allocation301_spill] sm:$0xff]  ;;  %vm6455_vm4 = vcmask 490496  }
 0x8d2   :  { %v5949_v29 = vpop.permute.xlu0 %5948  ;;  %6048 = vrot.lane.b32.xlu2 %v13296_v32, %s6889_s7  ;;  %6080 = vrot.lane.b32.xlu1 %v4747_v5, %s6890_s8 }
 0x8d4   :  { %v5919_v40 = vpop.permute.xlu2 %5918  ;;  %v5917_v46 = vpop.permute.xlu1 %5916 }
 0x8d5   :  { %v11841_v50 = vsel %vm6392_vm11, %v11754_v26, %v5919_v40  ;;  %v6394_v31 = vsel %vm6392_vm11, %v6385_v15, %v5917_v46  ;;  %v5083_v26 = vsel %vm13304_vm14, %v5082_v3, %v5045_v55  ;;  %v13305_v15 = vld [vmem:[#allocation247_spill] sm:$0xff]  ;;  %v5151_v40 = vsel %vm13324_vm7, %v5150_v21, %v13323_v24  ;;  %vm13331_vm14 = vmmov %vm13140_vm1 }
 0x8d6   :  { %v11847_v48 = vsel %vm6401_vm9, %v6394_v31, %v5949_v29  ;;  %v4838_v30 = vrot.slane %v13305_v15, 4  ;;  %v5175_v29 = vsel %vm13320_vm6, %v5174_v8, %v13319_v59  ;;  %v5198_v3 = vrot.slane %v13327_v54, 4  ;;  %v13328_v15 = vld [vmem:[#allocation72_spill] sm:$0xff] }
 0x8d7   :  { %v5157_v53 = vperm.slane %v5151_v40, %v7276_v49  ;;  %vm6437_vm1 = vcmask 457728   ;;  %vm6546_vm6 = vcmask 785408  }
 0x8d8   :  { %6118 = vrot.lane.b32.xlu0 %v5085_v56, %s6891_s9  ;;  %v4839_v17 = vsel %vm13310_vm15, %v4838_v30, %v13309_v52  ;;  %v5199_v30 = vsel %vm13329_vm5, %v5198_v3, %v13328_v15  ;;  %vm6419_vm15 = vcmask 424960  }
 0x8d9   :  { %v4845_v37 = vperm.slane %v4839_v17, %v7276_v49 }
 0x8da   :  { %v5955_v36 = vpop.permute.xlu0 %5954  ;;  %6054 = vrot.lane.b32.xlu2 %v13306_v34, %s6889_s7  ;;  %6086 = vrot.lane.b32.xlu1 %v5083_v26, %s6890_s8 }
 0x8db   :  { %v4858_v55 = vrot.slane %v4845_v37, 4 }
 0x8dc   :  { %v5925_v27 = vpop.permute.xlu2 %5924  ;;  %v5923_v28 = vpop.permute.xlu1 %5922 }
 0x8dd   :  { %v6398_v44 = vsel %vm6392_vm11, %v11766_v62, %v5925_v27  ;;  %v6397_v22 = vsel %vm6392_vm11, %v6388_v60, %v5923_v28  ;;  %v4815_v62 = vsel %vm13313_vm2, %v4814_v14, %v13312_v19  ;;  %v4523_v60 = vsel %vm13314_vm3, %v4522_v12, %v4485_v33  ;;  %v13332_v28 = vld [vmem:[#allocation172_spill] sm:$0xff]  ;;  %v13333_v12 = vld [vmem:[#allocation171_spill] sm:$0xff] }
 0x8de   :  { %v11868_v35 = vsel %vm6401_vm9, %v6397_v22, %v5955_v36  ;;  %v4821_v0 = vperm.slane %v4815_v62, %v7276_v49  ;;  %v5196_v36 = vrot.slane %v5157_v53, 4  ;;  %v13337_v19 = vld [vmem:[#allocation288_spill] sm:$0xff]  ;;  %vm6446_vm2 = vcmask 474112  }
 0x8df   :  { %vm6464_vm3 = vcmask 506880  }
 0x8e0   :  { %6140 = vrot.lane.b32.xlu0 %v4527_v23, %s6892_s10  ;;  %v4860_v9 = vrot.slane %v4821_v0, 4 }
 0x8e2   :  { %v5961_v58 = vpop.permute.xlu0 %5960  ;;  %6076 = vrot.lane.b32.xlu2 %v4523_v60, %s6890_s8  ;;  %6108 = vrot.lane.b32.xlu1 %v4525_v20, %s6891_s9  ;;  %v4861_v46 = vsel %vm13326_vm10, %v4845_v37, %v4860_v9 }
 0x8e4   :  { %v5947_v11 = vpop.permute.xlu2 %5946  ;;  %v5929_v41 = vpop.permute.xlu1 %5928 }
 0x8e5   :  { %v6402_v61 = vsel %vm6401_vm9, %v11785_v51, %v5947_v11  ;;  %v6400_v5 = vsel %vm6392_vm11, %v11819_v6, %v5929_v41  ;;  %v4859_v51 = vsel %vm13325_vm8, %v4858_v55, %v4821_v0  ;;  %v5181_v6 = vperm.slane %v5175_v29, %v7276_v49  ;;  %v13340_v11 = vld [vmem:[#allocation209_spill] sm:$0xff]  ;;  %v13341_v41 = vld [vmem:[#allocation207_spill] sm:$0xff] }
 0x8e6   :  { %v6409_v32 = vsel %vm6401_vm9, %v6400_v5, %v5961_v58  ;;  %vm6410_vm11 = vcmask 408576  }
 0x8e7   :  { %v5194_v26 = vrot.slane %v5181_v6, 4  ;;  %v5197_v34 = vsel %vm13331_vm14, %v5181_v6, %v5196_v36  ;;  %v13346_v36 = vld [vmem:[#allocation85_spill] sm:$0xff] }
 0x8e8   :  { %6146 = vrot.lane.b32.xlu0 %v4863_v2, %s6892_s10  ;;  %v13343_v2 = vld [vmem:[#allocation30_spill] sm:$0xff] }
 0x8e9   :  { %v5195_v49 = vsel %vm13330_vm13, %v5194_v26, %v5157_v53 }
 0x8ea   :  { %v5983_v31 = vpop.permute.xlu0 %5982  ;;  %6082 = vrot.lane.b32.xlu2 %v4859_v51, %s6890_s8  ;;  %6114 = vrot.lane.b32.xlu1 %v4861_v46, %s6891_s9 }
 0x8ec   :  { %v5953_v13 = vpop.permute.xlu2 %5952  ;;  %v5951_v56 = vpop.permute.xlu1 %5950 }
 0x8ed   :  { %v6405_v57 = vsel %vm6401_vm9, %v11805_v42, %v5953_v13  ;;  %v6404_v25 = vsel %vm6401_vm9, %v11841_v50, %v5951_v56 }
 0x8ee   :  { %v6413_v16 = vsel %vm6410_vm11, %v6404_v25, %v5983_v31  ;;  %v13344_v31 = vld [vmem:[#allocation134_spill] sm:$0xff]  ;;  %v13345_v25 = vld [vmem:[#allocation251_spill] sm:$0xff] }
 0x8f0   :  { %6152 = vrot.lane.b32.xlu0 %v5199_v30, %s6892_s10 }
 0x8f2   :  { %v5989_v47 = vpop.permute.xlu0 %5988  ;;  %6088 = vrot.lane.b32.xlu2 %v5195_v49, %s6890_s8  ;;  %6120 = vrot.lane.b32.xlu1 %v5197_v34, %s6891_s9 }
 0x8f4   :  { %v5959_v42 = vpop.permute.xlu2 %5958  ;;  %v5957_v50 = vpop.permute.xlu1 %5956 }
 0x8f5   :  { %v6408_v1 = vsel %vm6401_vm9, %v11827_v43, %v5959_v42  ;;  %v6407_v33 = vsel %vm6401_vm9, %v6398_v44, %v5957_v50  ;;  %vm6428_vm9 = vcmask 441344  }
 0x8f6   :  { %v6416_v27 = vsel %vm6410_vm11, %v6407_v33, %v5989_v47 }
 0x8f8   :  { %6174 = vrot.lane.b32.xlu0 %v13332_v28, %s6893_s11 }
 0x8fa   :  { %v6011_v22 = vpop.permute.xlu0 %6010  ;;  %6110 = vrot.lane.b32.xlu2 %v13333_v12, %s6891_s9  ;;  %6142 = vrot.lane.b32.xlu1 %v13334_v38, %s6892_s10 }
 0x8fc   :  { %v5981_v14 = vpop.permute.xlu2 %5980  ;;  %v5979_v52 = vpop.permute.xlu1 %5978 }
 0x8fd   :  { %v6412_v43 = vsel %vm6410_vm11, %v11847_v48, %v5981_v14  ;;  %v6411_v44 = vsel %vm6410_vm11, %v6402_v61, %v5979_v52 }
 0x8fe   :  { %v6420_v17 = vsel %vm6419_vm15, %v6411_v44, %v6011_v22 }
 0x900   :  { %6180 = vrot.lane.b32.xlu0 %v13335_v10, %s6893_s11 }
 0x902   :  { %v6017_v23 = vpop.permute.xlu0 %6016  ;;  %6116 = vrot.lane.b32.xlu2 %v13336_v63, %s6891_s9  ;;  %6148 = vrot.lane.b32.xlu1 %v13337_v19, %s6892_s10 }
 0x904   :  { %v5987_v62 = vpop.permute.xlu2 %5986  ;;  %v5985_v60 = vpop.permute.xlu1 %5984 }
 0x905   :  { %v6415_v20 = vsel %vm6410_vm11, %v11868_v35, %v5987_v62  ;;  %v6414_v48 = vsel %vm6410_vm11, %v6405_v57, %v5985_v60 }
 0x906   :  { %v6423_v37 = vsel %vm6419_vm15, %v6414_v48, %v6017_v23 }
 0x90a   :  { %v6023_v58 = vpop.permute.xlu0 %6022  ;;  %6138 = vrot.lane.b32.xlu2 %v13338_v4, %s6892_s10  ;;  %6170 = vrot.lane.b32.xlu1 %v13339_v7, %s6893_s11 }
 0x90c   :  { %v5993_v0 = vpop.permute.xlu2 %5992  ;;  %v5991_v45 = vpop.permute.xlu1 %5990 }
 0x90d   :  { %v6418_v21 = vsel %vm6410_vm11, %v6409_v32, %v5993_v0  ;;  %v6417_v39 = vsel %vm6410_vm11, %v6408_v1, %v5991_v45 }
 0x90e   :  { %v6426_v8 = vsel %vm6419_vm15, %v6417_v39, %v6023_v58 }
 0x912   :  { %v6045_v35 = vpop.permute.xlu0 %6044  ;;  %6144 = vrot.lane.b32.xlu2 %v13340_v11, %s6892_s10  ;;  %6176 = vrot.lane.b32.xlu1 %v13341_v41, %s6893_s11 }
 0x914   :  { %v6015_v61 = vpop.permute.xlu2 %6014  ;;  %v6013_v5 = vpop.permute.xlu1 %6012 }
 0x915   :  { %v6422_v55 = vsel %vm6419_vm15, %v6413_v16, %v6015_v61  ;;  %v6421_v59 = vsel %vm6419_vm15, %v6412_v43, %v6013_v5 }
 0x916   :  { %v11953_v29 = vsel %vm6428_vm9, %v6421_v59, %v6045_v35 }
 0x91a   :  { %v6051_v32 = vpop.permute.xlu0 %6050  ;;  %6150 = vrot.lane.b32.xlu2 %v13342_v18, %s6892_s10  ;;  %6182 = vrot.lane.b32.xlu1 %v13343_v2, %s6893_s11 }
 0x91c   :  { %v6021_v9 = vpop.permute.xlu2 %6020  ;;  %v6019_v24 = vpop.permute.xlu1 %6018 }
 0x91d   :  { %v6425_v40 = vsel %vm6419_vm15, %v6416_v27, %v6021_v9  ;;  %v6424_v51 = vsel %vm6419_vm15, %v6415_v20, %v6019_v24 }
 0x91e   :  { %v11962_v46 = vsel %vm6428_vm9, %v6424_v51, %v6051_v32 }
 0x922   :  { %v6057_v6 = vpop.permute.xlu0 %6056  ;;  %6172 = vrot.lane.b32.xlu2 %v13344_v31, %s6893_s11 }
 0x924   :  { %v6043_v54 = vpop.permute.xlu2 %6042  ;;  %v6025_v3 = vpop.permute.xlu1 %6024 }
 0x925   :  { %v6429_v53 = vsel %vm6428_vm9, %v6420_v17, %v6043_v54  ;;  %v6427_v13 = vsel %vm6419_vm15, %v6418_v21, %v6025_v3 }
 0x926   :  { %v11969_v56 = vsel %vm6428_vm9, %v6427_v13, %v6057_v6 }
 0x92a   :  { %v6079_v57 = vpop.permute.xlu0 %6078  ;;  %6178 = vrot.lane.b32.xlu2 %v13345_v25, %s6893_s11 }
 0x92c   :  { %v6049_v26 = vpop.permute.xlu2 %6048  ;;  %v6047_v16 = vpop.permute.xlu1 %6046 }
 0x92d   :  { %v6432_v15 = vsel %vm6428_vm9, %v6423_v37, %v6049_v26  ;;  %v6431_v62 = vsel %vm6428_vm9, %v6422_v55, %v6047_v16 }
 0x92e   :  { %v6440_v60 = vsel %vm6437_vm1, %v6431_v62, %v6079_v57 }
 0x932   :  { %v6085_v30 = vpop.permute.xlu0 %6084  ;;  %6184 = vrot.lane.b32.xlu2 %v13346_v36, %s6893_s11 }
 0x934   :  { %v6055_v49 = vpop.permute.xlu2 %6054  ;;  %v6053_v34 = vpop.permute.xlu1 %6052 }
 0x935   :  { %v11977_v47 = vsel %vm6428_vm9, %v6426_v8, %v6055_v49  ;;  %v6434_v0 = vsel %vm6428_vm9, %v6425_v40, %v6053_v34 }
 0x936   :  { %v6443_v45 = vsel %vm6437_vm1, %v6434_v0, %v6085_v30 }
 0x93a   :  { %v6107_v42 = vpop.permute.xlu0 %6106 }
 0x93c   :  { %v6077_v50 = vpop.permute.xlu2 %6076  ;;  %v6075_v1 = vpop.permute.xlu1 %6074 }
 0x93d   :  { %v6439_v61 = vsel %vm6437_vm1, %v11953_v29, %v6077_v50  ;;  %v6438_v5 = vsel %vm6437_vm1, %v6429_v53, %v6075_v1 }
 0x93e   :  { %v6447_v59 = vsel %vm6446_vm2, %v6438_v5, %v6107_v42 }
 0x942   :  { %v6113_v33 = vpop.permute.xlu0 %6112 }
 0x944   :  { %v6083_v27 = vpop.permute.xlu2 %6082  ;;  %v6081_v28 = vpop.permute.xlu1 %6080 }
 0x945   :  { %v6442_v29 = vsel %vm6437_vm1, %v11962_v46, %v6083_v27  ;;  %v6441_v51 = vsel %vm6437_vm1, %v6432_v15, %v6081_v28 }
 0x946   :  { %v6450_v31 = vsel %vm6446_vm2, %v6441_v51, %v6113_v33 }
 0x94a   :  { %v11979_v22 = vpop.permute.xlu0 %6118 }
 0x94c   :  { %v6089_v12 = vpop.permute.xlu2 %6088  ;;  %v6087_v38 = vpop.permute.xlu1 %6086 }
 0x94d   :  { %v6445_v46 = vsel %vm6437_vm1, %v11969_v56, %v6089_v12  ;;  %v6444_v26 = vsel %vm6437_vm1, %v11977_v47, %v6087_v38 }
 0x94e   :  { %v6453_v15 = vsel %vm6446_vm2, %v6444_v26, %v11979_v22 }
 0x952   :  { %v6141_v14 = vpop.permute.xlu0 %6140 }
 0x954   :  { %v6111_v52 = vpop.permute.xlu2 %6110  ;;  %v6109_v43 = vpop.permute.xlu1 %6108 }
 0x955   :  { %v6449_v48 = vsel %vm6446_vm2, %v6440_v60, %v6111_v52  ;;  %v6448_v55 = vsel %vm6446_vm2, %v6439_v61, %v6109_v43 }
 0x956   :  { %v6457_v2 = vsel %vm6455_vm4, %v6448_v55, %v6141_v14 }
 0x95a   :  { %v6147_v44 = vpop.permute.xlu0 %6146 }
 0x95c   :  { %v6117_v17 = vpop.permute.xlu2 %6116  ;;  %v6115_v10 = vpop.permute.xlu1 %6114 }
 0x95d   :  { %v6452_v21 = vsel %vm6446_vm2, %v6443_v45, %v6117_v17  ;;  %v6451_v6 = vsel %vm6446_vm2, %v6442_v29, %v6115_v10 }
 0x95e   :  { %v6460_v53 = vsel %vm6455_vm4, %v6451_v6, %v6147_v44 }
 0x962   :  { %v6153_v23 = vpop.permute.xlu0 %6152 }
 0x964   :  { %v6139_v63 = vpop.permute.xlu2 %6138  ;;  %v6121_v19 = vpop.permute.xlu1 %6120 }
 0x965   :  { %v6456_v32 = vsel %vm6455_vm4, %v6447_v59, %v6139_v63  ;;  %v6454_v16 = vsel %vm6446_vm2, %v6445_v46, %v6121_v19 }
 0x966   :  { %v6463_v49 = vsel %vm6455_vm4, %v6454_v16, %v6153_v23 }
 0x96a   :  { %v6175_v20 = vpop.permute.xlu0 %6174 }
 0x96c   :  { %v6145_v37 = vpop.permute.xlu2 %6144  ;;  %v6143_v58 = vpop.permute.xlu1 %6142 }
 0x96d   :  { %v6458_v4 = vsel %vm6455_vm4, %v6449_v48, %v6143_v58  ;;  %v6459_v54 = vsel %vm6455_vm4, %v6450_v31, %v6145_v37 }
 0x96e   :  { %v11986_v7 = vsel %vm6464_vm3, %v6458_v4, %v6175_v20 }
 0x96f   :  { %6485 = vrot.lane.b32.xlu2 %v11986_v7, %s6878_s25 }
 0x972   :  { %v6181_v35 = vpop.permute.xlu0 %6180 }
 0x974   :  { %v6151_v39 = vpop.permute.xlu2 %6150  ;;  %v6149_v8 = vpop.permute.xlu1 %6148 }
 0x975   :  { %v6461_v11 = vsel %vm6455_vm4, %v6452_v21, %v6149_v8  ;;  %v6462_v30 = vsel %vm6455_vm4, %v6453_v15, %v6151_v39 }
 0x976   :  { %v11995_v41 = vsel %vm6464_vm3, %v6461_v11, %v6181_v35 }
 0x977   :  { %6491 = vrot.lane.b32.xlu2 %v11995_v41, %s6878_s25 }
 0x97c   :  { %v6173_v18 = vpop.permute.xlu2 %6172  ;;  %v6171_v9 = vpop.permute.xlu1 %6170 }
 0x97d   :  { %v12007_v24 = vsel %vm6464_vm3, %v6457_v2, %v6173_v18  ;;  %v6465_v40 = vsel %vm6464_vm3, %v6456_v32, %v6171_v9 }
 0x97e   :  { %6483 = vrot.lane.b32.xlu1 %v12007_v24, %s6878_s25  ;;  %6481 = vrot.lane.b32.xlu0 %v6465_v40, %s6878_s25 }
 0x97f   :  { %6505 = vrot.lane.b32.xlu2 %v6465_v40, %s6894_s12 }
 0x984   :  { %v6179_v3 = vpop.permute.xlu2 %6178  ;;  %v6177_v13 = vpop.permute.xlu1 %6176 }
 0x985   :  { %v6469_v57 = vsel %vm6464_vm3, %v6460_v53, %v6179_v3  ;;  %v6468_v25 = vsel %vm6464_vm3, %v6459_v54, %v6177_v13 }
 0x986   :  { %6489 = vrot.lane.b32.xlu1 %v6469_v57, %s6878_s25  ;;  %6487 = vrot.lane.b32.xlu0 %v6468_v25, %s6878_s25 }
 0x987   :  { %6511 = vrot.lane.b32.xlu2 %v6468_v25, %s6894_s12 }
 0x98c   :  { %v6185_v36 = vpop.permute.xlu2 %6184  ;;  %v6183_v34 = vpop.permute.xlu1 %6182 }
 0x98d   :  { %v6472_v42 = vsel %vm6464_vm3, %v6463_v49, %v6185_v36  ;;  %v6471_v50 = vsel %vm6464_vm3, %v6462_v30, %v6183_v34 }
 0x98e   :  { %6495 = vrot.lane.b32.xlu1 %v6472_v42, %s6878_s25  ;;  %6493 = vrot.lane.b32.xlu0 %v6471_v50, %s6878_s25 }
 0x98f   :  { %6517 = vrot.lane.b32.xlu2 %v6471_v50, %s6894_s12 }
 0x996   :  { %6509 = vrot.lane.b32.xlu1 %v11986_v7, %s6894_s12  ;;  %6507 = vrot.lane.b32.xlu0 %v12007_v24, %s6894_s12 }
 0x99e   :  { %6515 = vrot.lane.b32.xlu1 %v11995_v41, %s6894_s12  ;;  %6513 = vrot.lane.b32.xlu0 %v6469_v57, %s6894_s12 }
 0x9a6   :  { %6519 = vrot.lane.b32.xlu0 %v6472_v42, %s6894_s12 }
 0x9c9   :  { %v6486_v56 = vpop.permute.xlu2 %6485 }
 0x9ca   :  { %v6531_v20 = vsel %vm6329_vm0, %v11986_v7, %v6486_v56 }
 0x9cb   :  { %v6540_v37 = vsel %vm6537_vm12, %v6531_v20, %v6486_v56 }
 0x9d1   :  { %v6492_v47 = vpop.permute.xlu2 %6491 }
 0x9d2   :  { %v6534_v39 = vsel %vm6329_vm0, %v11995_v41, %v6492_v47 }
 0x9d3   :  { %v6543_v8 = vsel %vm6537_vm12, %v6534_v39, %v6492_v47 }
 0x9d9   :  { %v6506_v1 = vpop.permute.xlu2 %6505 }
 0x9e1   :  { %v6512_v38 = vpop.permute.xlu2 %6511 }
 0x9e9   :  { %v6518_v19 = vpop.permute.xlu2 %6517 }
 0x9f0   :  { %v6482_v33 = vpop.permute.xlu0 %6481  ;;  %v6484_v27 = vpop.permute.xlu1 %6483 }
 0x9f1   :  { %v6529_v28 = vsel %vm6329_vm0, %v6465_v40, %v6482_v33  ;;  %v6530_v48 = vsel %vm6329_vm0, %v12007_v24, %v6484_v27 }
 0x9f2   :  { %v6538_v22 = vsel %vm6537_vm12, %v6529_v28, %v6482_v33  ;;  %v6539_v58 = vsel %vm6537_vm12, %v6530_v48, %v6484_v27 }
 0x9f3   :  { %v6547_v12 = vsel %vm6546_vm6, %v6538_v22, %v6506_v1 }
 0x9f4   :  { %6555 = vst [vmem:[#allocation2] sm:$0xff] %v6547_v12 }
 0x9f8   :  { %v6488_v14 = vpop.permute.xlu0 %6487  ;;  %v6490_v52 = vpop.permute.xlu1 %6489 }
 0x9f9   :  { %v6532_v43 = vsel %vm6329_vm0, %v6468_v25, %v6488_v14  ;;  %v6533_v7 = vsel %vm6329_vm0, %v6469_v57, %v6490_v52 }
 0x9fa   :  { %v6541_v44 = vsel %vm6537_vm12, %v6532_v43, %v6488_v14  ;;  %v6542_v35 = vsel %vm6537_vm12, %v6533_v7, %v6490_v52 }
 0x9fb   :  { %v6550_v17 = vsel %vm6546_vm6, %v6541_v44, %v6512_v38 }
 0x9fc   :  { %6558 = vst [vmem:[#allocation2 + $0x18] sm:$0xff] %v6550_v17 }
 0xa00   :  { %v6494_v10 = vpop.permute.xlu0 %6493  ;;  %v6496_v23 = vpop.permute.xlu1 %6495 }
 0xa01   :  { %v6535_v63 = vsel %vm6329_vm0, %v6471_v50, %v6494_v10  ;;  %v6536_v41 = vsel %vm6329_vm0, %v6472_v42, %v6496_v23 }
 0xa02   :  { %v6544_v62 = vsel %vm6537_vm12, %v6535_v63, %v6494_v10  ;;  %v6545_v59 = vsel %vm6537_vm12, %v6536_v41, %v6496_v23 }
 0xa03   :  { %v6553_v60 = vsel %vm6546_vm6, %v6544_v62, %v6518_v19 }
 0xa04   :  { %6561 = vst [vmem:[#allocation2 + $0x30] sm:$0xff] %v6553_v60 }
 0xa08   :  { %v6508_v4 = vpop.permute.xlu0 %6507  ;;  %v6510_v0 = vpop.permute.xlu1 %6509 }
 0xa09   :  { %v6548_v45 = vsel %vm6546_vm6, %v6539_v58, %v6508_v4  ;;  %v6549_v21 = vsel %vm6546_vm6, %v6540_v37, %v6510_v0 }
 0xa0a   :  { %6556 = vst [vmem:[#allocation2 + $0x8] sm:$0xff] %v6548_v45 }
 0xa0b   :  { %6557 = vst [vmem:[#allocation2 + $0x10] sm:$0xff] %v6549_v21 }
 0xa10   :  { %v6514_v11 = vpop.permute.xlu0 %6513  ;;  %v6516_v61 = vpop.permute.xlu1 %6515 }
 0xa11   :  { %v6551_v5 = vsel %vm6546_vm6, %v6542_v35, %v6514_v11  ;;  %v6552_v55 = vsel %vm6546_vm6, %v6543_v8, %v6516_v61 }
 0xa12   :  { %6559 = vst [vmem:[#allocation2 + $0x20] sm:$0xff] %v6551_v5 }
 0xa13   :  { %6560 = vst [vmem:[#allocation2 + $0x28] sm:$0xff] %v6552_v55 }
 0xa18   :  { %v6520_v32 = vpop.permute.xlu0 %6519 }
 0xa19   :  { %v6554_v18 = vsel %vm6546_vm6, %v6545_v59, %v6520_v32 }
 0xa1a   :  { %6562 = vst [vmem:[#allocation2 + $0x38] sm:$0xff] %v6554_v18 }
 0xa1b   :  { %6575 = dma.vmem_to_hbm [thread:$0]  %s6568_s17, 1024, %s6570_s15, [#allocation3], %s6896_s18, %s6896_s18, %s6866_s13  }
 0xa1c   :  { %6859 = dma.done.wait [#allocation3], 1024  }
 0xa1d   :  { %6860 = vsyncadd [#allocation3], 4294966272 }
 0xa1e   :  { %6580 = vsyncpa [#allocation3], 1 }

</bundles_post_ra>
